<compile_context>
chip_gen: v7x
topology: tpu7x:2x2x1
jax: 0.10.0
libtpu: 0.0.40
codegen_flags: <defaults>
</compile_context>

<pallas_src>
import functools

import jax
import jax.numpy as jnp
from jax import lax
from jax.experimental import pallas as pl
from jax.experimental.pallas import tpu as pltpu

NEG_SLOPE = 0.2
VMEM_LIMIT = 32 * 1024 * 1024   # far above the ~5 MiB peak we need; safe on v5e/v6e/v7x


def _has_256_mxu():
    # TN=256 only helps chips with a 256x256 MXU (v6e / v7x).
    try:
        kind = jax.devices()[0].device_kind.lower()
        return ("v6" in kind) or ("v7" in kind)
    except Exception:
        return False


_MXU_256 = _has_256_mxu()


# ----------------------------- Pallas kernel ------------------------------- #
def _conv_mm_kernel(p_ref, w_ref, shift_ref, o_ref, *, apply_act):
    # p: (TM, K) bf16, w: (K, TN) bf16 (BN scale pre-folded), shift: (1, TN) f32.
    # K is full-extent -> one MXU dot per grid step, no accumulator scratch.
    y = jnp.dot(p_ref[...], w_ref[...], preferred_element_type=jnp.float32)
    y = y + shift_ref[...]
    if apply_act:
        y = jnp.where(y >= 0.0, y, NEG_SLOPE * y)
    o_ref[...] = y.astype(o_ref.dtype)


def _pick_tiles(M, N):
    """Choose (TM, TN) so blocks are legal, unpadded, and the grid has >=2 steps."""
    if N % 128 != 0:
        TN = N                       # full-extent (e.g. 64 or 1); masked stores are tiny here
    elif _MXU_256:
        TN = 256 if (N % 256 == 0 and N >= 512) else min(N, 128)
    else:
        TN = 128                     # 128x128 MXU: wider N tiles buy nothing
    n_n = N // TN
    if n_n >= 2 or M % 32 != 0:
        TM = M                       # full-extent M block (M may be e.g. 30)
    else:
        TM = M // 2                  # give the parallel axis a second step (16-aligned)
    return TM, TN


def pallas_conv_matmul(patches, w_scaled, shift, apply_act, out_dtype):
    """(M, K) @ (K, N) + shift (+ LeakyReLU) -> (M, N) in `out_dtype`.

    `patches` / `w_scaled` are bf16; accumulation is f32 on the MXU.
    """
    M, K = patches.shape
    _, N = w_scaled.shape
    TM, TN = _pick_tiles(M, N)
    n_m = M // TM
    n_n = N // TN

    return pl.pallas_call(
        functools.partial(_conv_mm_kernel, apply_act=apply_act),
        out_shape=jax.ShapeDtypeStruct((M, N), out_dtype),
        grid_spec=pltpu.PrefetchScalarGridSpec(
            num_scalar_prefetch=0,
            grid=(n_n, n_m),                       # weight block constant over inner M loop
            in_specs=[
                pl.BlockSpec((TM, K), lambda j, i: (i, 0)),
                pl.BlockSpec((K, TN), lambda j, i: (0, j)),
                pl.BlockSpec((1, TN), lambda j, i: (0, j)),
            ],
            out_specs=pl.BlockSpec((TM, TN), lambda j, i: (i, j)),
        ),
        compiler_params=pltpu.CompilerParams(
            dimension_semantics=("parallel", "parallel"),
            vmem_limit_bytes=VMEM_LIMIT),
    )(patches, w_scaled, shift)


# ------------------------------ host glue ---------------------------------- #
def im2col_nhwc(x, kh, kw, sh, sw, ph, pw):
    """NHWC im2col; patch K is ordered (kh, kw, cin) with channels lane-dense."""
    B, H, W, C = x.shape
    xp = jnp.pad(x, ((0, 0), (ph, ph), (pw, pw), (0, 0)))
    Ho = (H + 2 * ph - kh) // sh + 1
    Wo = (W + 2 * pw - kw) // sw + 1
    cols = []
    for i in range(kh):
        for j in range(kw):
            cols.append(xp[:, i:i + sh * Ho:sh, j:j + sw * Wo:sw, :])
    p = jnp.concatenate(cols, axis=-1)                 # (B, Ho, Wo, KH*KW*C)
    return p.reshape(B * Ho * Wo, kh * kw * C), Ho, Wo


def conv_layer(x, weight, bias, stride, padding, bn=None, act=False,
               out_dtype=jnp.bfloat16):
    # x: NHWC activations (bf16); weight: (Cout, Cin, KH, KW) PyTorch layout.
    Cout, Cin, KH, KW = weight.shape
    sh, sw = stride
    ph, pw = padding
    xb = x if x.dtype == jnp.bfloat16 else x.astype(jnp.bfloat16)
    patches, Ho, Wo = im2col_nhwc(xb, KH, KW, sh, sw, ph, pw)

    # (KH, KW, Cin, Cout) -> (K, N), matching the (kh, kw, cin) patch order.
    w_mat = jnp.transpose(weight, (2, 3, 1, 0)).reshape(KH * KW * Cin, Cout)

    if bn is not None:
        gamma, beta, mean, var, eps = bn
        inv_std = gamma / jnp.sqrt(var + eps)
        w_mat = w_mat * inv_std[None, :]               # fold BN scale into weight
        shift = beta - mean * inv_std + bias * inv_std
    else:
        shift = bias

    out = pallas_conv_matmul(patches, w_mat.astype(jnp.bfloat16),
                             shift.astype(jnp.float32).reshape(1, Cout),
                             act, out_dtype)
    B = x.shape[0]
    return out.reshape(B, Ho, Wo, Cout)                # stay NHWC between layers


def init_params(key, dim=64):
    def conv_p(k, cout, cin, ksz=4):
        k1, k2 = jax.random.split(k)
        w = 0.05 * jax.random.normal(k1, (cout, cin, ksz, ksz), jnp.float32)
        b = 0.05 * jax.random.normal(k2, (cout,), jnp.float32)
        return w, b

    def bn_p(k, c):
        k1, k2 = jax.random.split(k)
        gamma = 1.0 + 0.1 * jax.random.normal(k1, (c,), jnp.float32)
        beta = 0.1 * jax.random.normal(k2, (c,), jnp.float32)
        mean = jnp.zeros((c,), jnp.float32)
        var = jnp.ones((c,), jnp.float32)
        return (gamma, beta, mean, var, 1e-5)

    ks = jax.random.split(key, 8)
    return {
        "c1": conv_p(ks[0], dim, 3),
        "c2": conv_p(ks[1], dim * 2, dim),     "bn2": bn_p(ks[2], dim * 2),
        "c3": conv_p(ks[3], dim * 4, dim * 2), "bn3": bn_p(ks[4], dim * 4),
        "c4": conv_p(ks[5], dim * 8, dim * 4), "bn4": bn_p(ks[6], dim * 8),
        "c5": conv_p(ks[7], 1, dim * 8),
    }


def discriminator_forward(params, x):
    h = jnp.transpose(x, (0, 2, 3, 1)).astype(jnp.bfloat16)            # NCHW -> NHWC
    h = conv_layer(h, *params["c1"], (2, 2), (1, 1), bn=None,          act=True)
    h = conv_layer(h, *params["c2"], (2, 2), (1, 1), bn=params["bn2"], act=True)
    h = conv_layer(h, *params["c3"], (2, 2), (1, 1), bn=params["bn3"], act=True)
    h = conv_layer(h, *params["c4"], (1, 1), (1, 2), bn=params["bn4"], act=True)
    h = conv_layer(h, *params["c5"], (1, 1), (2, 1), bn=None,          act=False,
                   out_dtype=jnp.float32)
    return jnp.transpose(h, (0, 3, 1, 2))                              # NHWC -> NCHW


# ---------------------------- pure-JAX reference ---------------------------- #
def ref_forward(params, x):
    def conv(h, w, b, stride, padding):
        y = lax.conv_general_dilated(
            h, w, window_strides=stride,
            padding=[(padding[0], padding[0]), (padding[1], padding[1])],
            dimension_numbers=("NCHW", "OIHW", "NCHW"),
            precision=lax.Precision.HIGHEST)
        return y + b[None, :, None, None]

    def bn(h, p):
        gamma, beta, mean, var, eps = p
        return (gamma[None, :, None, None] *
                (h - mean[None, :, None, None]) /
                jnp.sqrt(var[None, :, None, None] + eps) +
                beta[None, :, None, None])

    def lrelu(h):
        return jnp.where(h >= 0, h, NEG_SLOPE * h)

    h = lrelu(conv(x, *params["c1"], (2, 2), (1, 1)))
    h = lrelu(bn(conv(h, *params["c2"], (2, 2), (1, 1)), params["bn2"]))
    h = lrelu(bn(conv(h, *params["c3"], (2, 2), (1, 1)), params["bn3"]))
    h = lrelu(bn(conv(h, *params["c4"], (1, 1), (1, 2)), params["bn4"]))
    h = conv(h, *params["c5"], (1, 1), (2, 1))
    return h


if __name__ == "__main__":
    key = jax.random.PRNGKey(0)
    kx, kp = jax.random.split(key)
    dim = 64
    x = jax.random.normal(kx, (2, 3, 32, 32), jnp.float32)   # NCHW like PyTorch
    params = init_params(kp, dim)

    fwd = jax.jit(discriminator_forward)
    out = jax.block_until_ready(fwd(params, x))
    ref = ref_forward(params, x)

    assert out.shape == ref.shape == (2, 1, 4, 4), (out.shape, ref.shape)
    rel_err = float(jnp.max(jnp.abs(out - ref)) / (jnp.max(jnp.abs(ref)) + 1e-6))
    assert rel_err < 5e-2, f"mismatch vs reference, rel_err={rel_err}"
    print("KERNEL_OK")
</pallas_src>

<mosaic_0001>
module attributes {stable_mosaic.version = 11 : i64} {
  func.func @_conv_mm_kernel(%arg0: i32, %arg1: i32, %arg2: memref<256x48xbf16, #tpu.memory_space<vmem>>, %arg3: memref<48x64xbf16, #tpu.memory_space<vmem>>, %arg4: memref<1x64xf32, #tpu.memory_space<vmem>>, %arg5: memref<256x64xbf16, #tpu.memory_space<vmem>>) attributes {dimension_semantics = [#tpu.dimension_semantics<parallel>, #tpu.dimension_semantics<parallel>], iteration_bounds = array<i64: 1, 2>, scalar_prefetch = 0 : i64, scratch_operands = 0 : i64, tpu.core_type = #tpu.core_type<tc>, window_params = [{transform_indices = @transform_0, window_bounds = array<i64: 256, 48>}, {transform_indices = @transform_1, window_bounds = array<i64: 48, 64>}, {transform_indices = @transform_2, window_bounds = array<i64: 1, 64>}, {transform_indices = @transform_3, window_bounds = array<i64: 256, 64>}]} {
    %c0 = arith.constant 0 : index
    %c0_0 = arith.constant 0 : index
    %0 = vector.load %arg2[%c0, %c0_0] : memref<256x48xbf16, #tpu.memory_space<vmem>>, vector<256x48xbf16>
    %c0_1 = arith.constant 0 : index
    %c0_2 = arith.constant 0 : index
    %1 = vector.load %arg3[%c0_1, %c0_2] : memref<48x64xbf16, #tpu.memory_space<vmem>>, vector<48x64xbf16>
    %cst = arith.constant dense<0.000000e+00> : vector<256x64xf32>
    %2 = tpu.matmul %0, %1, %cst {dimension_numbers = #tpu.dot_dimension_numbers<[1], [0], [0], [1], [0, 0, 1, 1], [], []>} : vector<256x48xbf16>, vector<48x64xbf16>, vector<256x64xf32> -> vector<256x64xf32>
    %c0_3 = arith.constant 0 : index
    %c0_4 = arith.constant 0 : index
    %3 = vector.load %arg4[%c0_3, %c0_4] : memref<1x64xf32, #tpu.memory_space<vmem>>, vector<1x64xf32>
    %4 = vector.broadcast %3 : vector<1x64xf32> to vector<256x64xf32>
    %5 = arith.addf %2, %4 : vector<256x64xf32>
    %cst_5 = arith.constant 0.000000e+00 : f32
    %6 = vector.broadcast %cst_5 : f32 to vector<256x64xf32>
    %7 = arith.cmpf oge, %5, %6 : vector<256x64xf32>
    %cst_6 = arith.constant 2.000000e-01 : f32
    %8 = vector.broadcast %cst_6 : f32 to vector<256x64xf32>
    %9 = arith.mulf %8, %5 : vector<256x64xf32>
    %10 = arith.select %7, %5, %9 : vector<256x64xi1>, vector<256x64xf32>
    %11 = arith.truncf %10 : vector<256x64xf32> to vector<256x64xbf16>
    %c0_7 = arith.constant 0 : index
    %c0_8 = arith.constant 0 : index
    %12 = vector.load %arg5[%c0_7, %c0_8] : memref<256x64xbf16, #tpu.memory_space<vmem>>, vector<256x64xbf16>
    tpu.vector_store %arg5[%c0_7, %c0_8], %11 {strides = array<i32>} : memref<256x64xbf16, #tpu.memory_space<vmem>>, vector<256x64xbf16>,
    return
  }
  func.func @transform_0(%arg0: i32, %arg1: i32) -> (i32, i32) {
    %c0_i32 = arith.constant 0 : i32
    %c0_i32_0 = arith.constant 0 : i32
    return %arg1, %c0_i32 : i32, i32
  }
  func.func @transform_1(%arg0: i32, %arg1: i32) -> (i32, i32) {
    %c0_i32 = arith.constant 0 : i32
    %c0_i32_0 = arith.constant 0 : i32
    return %c0_i32, %arg0 : i32, i32
  }
  func.func @transform_2(%arg0: i32, %arg1: i32) -> (i32, i32) {
    %c0_i32 = arith.constant 0 : i32
    %c0_i32_0 = arith.constant 0 : i32
    return %c0_i32, %arg0 : i32, i32
  }
  func.func @transform_3(%arg0: i32, %arg1: i32) -> (i32, i32) {
    %c0_i32 = arith.constant 0 : i32
    return %arg1, %arg0 : i32, i32
  }
}

module attributes {stable_mosaic.version = 11 : i64} {
  func.func @_conv_mm_kernel(%arg0: i32, %arg1: i32, %arg2: memref<64x1024xbf16, #tpu.memory_space<vmem>>, %arg3: memref<1024x128xbf16, #tpu.memory_space<vmem>>, %arg4: memref<1x128xf32, #tpu.memory_space<vmem>>, %arg5: memref<64x128xbf16, #tpu.memory_space<vmem>>) attributes {dimension_semantics = [#tpu.dimension_semantics<parallel>, #tpu.dimension_semantics<parallel>], iteration_bounds = array<i64: 1, 2>, scalar_prefetch = 0 : i64, scratch_operands = 0 : i64, tpu.core_type = #tpu.core_type<tc>, window_params = [{transform_indices = @transform_0, window_bounds = array<i64: 64, 1024>}, {transform_indices = @transform_1, window_bounds = array<i64: 1024, 128>}, {transform_indices = @transform_2, window_bounds = array<i64: 1, 128>}, {transform_indices = @transform_3, window_bounds = array<i64: 64, 128>}]} {
    %c0 = arith.constant 0 : index
    %c0_0 = arith.constant 0 : index
    %0 = vector.load %arg2[%c0, %c0_0] : memref<64x1024xbf16, #tpu.memory_space<vmem>>, vector<64x1024xbf16>
    %c0_1 = arith.constant 0 : index
    %c0_2 = arith.constant 0 : index
    %1 = vector.load %arg3[%c0_1, %c0_2] : memref<1024x128xbf16, #tpu.memory_space<vmem>>, vector<1024x128xbf16>
    %cst = arith.constant dense<0.000000e+00> : vector<64x128xf32>
    %2 = tpu.matmul %0, %1, %cst {dimension_numbers = #tpu.dot_dimension_numbers<[1], [0], [0], [1], [0, 0, 1, 1], [], []>} : vector<64x1024xbf16>, vector<1024x128xbf16>, vector<64x128xf32> -> vector<64x128xf32>
    %c0_3 = arith.constant 0 : index
    %c0_4 = arith.constant 0 : index
    %3 = vector.load %arg4[%c0_3, %c0_4] : memref<1x128xf32, #tpu.memory_space<vmem>>, vector<1x128xf32>
    %4 = vector.broadcast %3 : vector<1x128xf32> to vector<64x128xf32>
    %5 = arith.addf %2, %4 : vector<64x128xf32>
    %cst_5 = arith.constant 0.000000e+00 : f32
    %6 = vector.broadcast %cst_5 : f32 to vector<64x128xf32>
    %7 = arith.cmpf oge, %5, %6 : vector<64x128xf32>
    %cst_6 = arith.constant 2.000000e-01 : f32
    %8 = vector.broadcast %cst_6 : f32 to vector<64x128xf32>
    %9 = arith.mulf %8, %5 : vector<64x128xf32>
    %10 = arith.select %7, %5, %9 : vector<64x128xi1>, vector<64x128xf32>
    %11 = arith.truncf %10 : vector<64x128xf32> to vector<64x128xbf16>
    %c0_7 = arith.constant 0 : index
    %c0_8 = arith.constant 0 : index
    %12 = vector.load %arg5[%c0_7, %c0_8] : memref<64x128xbf16, #tpu.memory_space<vmem>>, vector<64x128xbf16>
    tpu.vector_store %arg5[%c0_7, %c0_8], %11 {strides = array<i32>} : memref<64x128xbf16, #tpu.memory_space<vmem>>, vector<64x128xbf16>,
    return
  }
  func.func @transform_0(%arg0: i32, %arg1: i32) -> (i32, i32) {
    %c0_i32 = arith.constant 0 : i32
    %c0_i32_0 = arith.constant 0 : i32
    return %arg1, %c0_i32 : i32, i32
  }
  func.func @transform_1(%arg0: i32, %arg1: i32) -> (i32, i32) {
    %c0_i32 = arith.constant 0 : i32
    %c0_i32_0 = arith.constant 0 : i32
    return %c0_i32, %arg0 : i32, i32
  }
  func.func @transform_2(%arg0: i32, %arg1: i32) -> (i32, i32) {
    %c0_i32 = arith.constant 0 : i32
    %c0_i32_0 = arith.constant 0 : i32
    return %c0_i32, %arg0 : i32, i32
  }
  func.func @transform_3(%arg0: i32, %arg1: i32) -> (i32, i32) {
    %c0_i32 = arith.constant 0 : i32
    return %arg1, %arg0 : i32, i32
  }
}

module attributes {stable_mosaic.version = 11 : i64} {
  func.func @_conv_mm_kernel(%arg0: i32, %arg1: i32, %arg2: memref<32x2048xbf16, #tpu.memory_space<vmem>>, %arg3: memref<2048x128xbf16, #tpu.memory_space<vmem>>, %arg4: memref<1x128xf32, #tpu.memory_space<vmem>>, %arg5: memref<32x128xbf16, #tpu.memory_space<vmem>>) attributes {dimension_semantics = [#tpu.dimension_semantics<parallel>, #tpu.dimension_semantics<parallel>], iteration_bounds = array<i64: 2, 1>, scalar_prefetch = 0 : i64, scratch_operands = 0 : i64, tpu.core_type = #tpu.core_type<tc>, window_params = [{transform_indices = @transform_0, window_bounds = array<i64: 32, 2048>}, {transform_indices = @transform_1, window_bounds = array<i64: 2048, 128>}, {transform_indices = @transform_2, window_bounds = array<i64: 1, 128>}, {transform_indices = @transform_3, window_bounds = array<i64: 32, 128>}]} {
    %c0 = arith.constant 0 : index
    %c0_0 = arith.constant 0 : index
    %0 = vector.load %arg2[%c0, %c0_0] : memref<32x2048xbf16, #tpu.memory_space<vmem>>, vector<32x2048xbf16>
    %c0_1 = arith.constant 0 : index
    %c0_2 = arith.constant 0 : index
    %1 = vector.load %arg3[%c0_1, %c0_2] : memref<2048x128xbf16, #tpu.memory_space<vmem>>, vector<2048x128xbf16>
    %cst = arith.constant dense<0.000000e+00> : vector<32x128xf32>
    %2 = tpu.matmul %0, %1, %cst {dimension_numbers = #tpu.dot_dimension_numbers<[1], [0], [0], [1], [0, 0, 1, 1], [], []>} : vector<32x2048xbf16>, vector<2048x128xbf16>, vector<32x128xf32> -> vector<32x128xf32>
    %c0_3 = arith.constant 0 : index
    %c0_4 = arith.constant 0 : index
    %3 = vector.load %arg4[%c0_3, %c0_4] : memref<1x128xf32, #tpu.memory_space<vmem>>, vector<1x128xf32>
    %4 = vector.broadcast %3 : vector<1x128xf32> to vector<32x128xf32>
    %5 = arith.addf %2, %4 : vector<32x128xf32>
    %cst_5 = arith.constant 0.000000e+00 : f32
    %6 = vector.broadcast %cst_5 : f32 to vector<32x128xf32>
    %7 = arith.cmpf oge, %5, %6 : vector<32x128xf32>
    %cst_6 = arith.constant 2.000000e-01 : f32
    %8 = vector.broadcast %cst_6 : f32 to vector<32x128xf32>
    %9 = arith.mulf %8, %5 : vector<32x128xf32>
    %10 = arith.select %7, %5, %9 : vector<32x128xi1>, vector<32x128xf32>
    %11 = arith.truncf %10 : vector<32x128xf32> to vector<32x128xbf16>
    %c0_7 = arith.constant 0 : index
    %c0_8 = arith.constant 0 : index
    %12 = vector.load %arg5[%c0_7, %c0_8] : memref<32x128xbf16, #tpu.memory_space<vmem>>, vector<32x128xbf16>
    tpu.vector_store %arg5[%c0_7, %c0_8], %11 {strides = array<i32>} : memref<32x128xbf16, #tpu.memory_space<vmem>>, vector<32x128xbf16>,
    return
  }
  func.func @transform_0(%arg0: i32, %arg1: i32) -> (i32, i32) {
    %c0_i32 = arith.constant 0 : i32
    %c0_i32_0 = arith.constant 0 : i32
    return %arg1, %c0_i32 : i32, i32
  }
  func.func @transform_1(%arg0: i32, %arg1: i32) -> (i32, i32) {
    %c0_i32 = arith.constant 0 : i32
    %c0_i32_0 = arith.constant 0 : i32
    return %c0_i32, %arg0 : i32, i32
  }
  func.func @transform_2(%arg0: i32, %arg1: i32) -> (i32, i32) {
    %c0_i32 = arith.constant 0 : i32
    %c0_i32_0 = arith.constant 0 : i32
    return %c0_i32, %arg0 : i32, i32
  }
  func.func @transform_3(%arg0: i32, %arg1: i32) -> (i32, i32) {
    %c0_i32 = arith.constant 0 : i32
    return %arg1, %arg0 : i32, i32
  }
}

module attributes {stable_mosaic.version = 11 : i64} {
  func.func @_conv_mm_kernel(%arg0: i32, %arg1: i32, %arg2: memref<30x4096xbf16, #tpu.memory_space<vmem>>, %arg3: memref<4096x128xbf16, #tpu.memory_space<vmem>>, %arg4: memref<1x128xf32, #tpu.memory_space<vmem>>, %arg5: memref<30x128xbf16, #tpu.memory_space<vmem>>) attributes {dimension_semantics = [#tpu.dimension_semantics<parallel>, #tpu.dimension_semantics<parallel>], iteration_bounds = array<i64: 4, 1>, scalar_prefetch = 0 : i64, scratch_operands = 0 : i64, tpu.core_type = #tpu.core_type<tc>, window_params = [{transform_indices = @transform_0, window_bounds = array<i64: 30, 4096>}, {transform_indices = @transform_1, window_bounds = array<i64: 4096, 128>}, {transform_indices = @transform_2, window_bounds = array<i64: 1, 128>}, {transform_indices = @transform_3, window_bounds = array<i64: 30, 128>}]} {
    %c0 = arith.constant 0 : index
    %c0_0 = arith.constant 0 : index
    %0 = vector.load %arg2[%c0, %c0_0] : memref<30x4096xbf16, #tpu.memory_space<vmem>>, vector<30x4096xbf16>
    %c0_1 = arith.constant 0 : index
    %c0_2 = arith.constant 0 : index
    %1 = vector.load %arg3[%c0_1, %c0_2] : memref<4096x128xbf16, #tpu.memory_space<vmem>>, vector<4096x128xbf16>
    %cst = arith.constant dense<0.000000e+00> : vector<30x128xf32>
    %2 = tpu.matmul %0, %1, %cst {dimension_numbers = #tpu.dot_dimension_numbers<[1], [0], [0], [1], [0, 0, 1, 1], [], []>} : vector<30x4096xbf16>, vector<4096x128xbf16>, vector<30x128xf32> -> vector<30x128xf32>
    %c0_3 = arith.constant 0 : index
    %c0_4 = arith.constant 0 : index
    %3 = vector.load %arg4[%c0_3, %c0_4] : memref<1x128xf32, #tpu.memory_space<vmem>>, vector<1x128xf32>
    %4 = vector.broadcast %3 : vector<1x128xf32> to vector<30x128xf32>
    %5 = arith.addf %2, %4 : vector<30x128xf32>
    %cst_5 = arith.constant 0.000000e+00 : f32
    %6 = vector.broadcast %cst_5 : f32 to vector<30x128xf32>
    %7 = arith.cmpf oge, %5, %6 : vector<30x128xf32>
    %cst_6 = arith.constant 2.000000e-01 : f32
    %8 = vector.broadcast %cst_6 : f32 to vector<30x128xf32>
    %9 = arith.mulf %8, %5 : vector<30x128xf32>
    %10 = arith.select %7, %5, %9 : vector<30x128xi1>, vector<30x128xf32>
    %11 = arith.truncf %10 : vector<30x128xf32> to vector<30x128xbf16>
    %c0_7 = arith.constant 0 : index
    %c0_8 = arith.constant 0 : index
    %12 = vector.load %arg5[%c0_7, %c0_8] : memref<30x128xbf16, #tpu.memory_space<vmem>>, vector<30x128xbf16>
    tpu.vector_store %arg5[%c0_7, %c0_8], %11 {strides = array<i32>} : memref<30x128xbf16, #tpu.memory_space<vmem>>, vector<30x128xbf16>,
    return
  }
  func.func @transform_0(%arg0: i32, %arg1: i32) -> (i32, i32) {
    %c0_i32 = arith.constant 0 : i32
    %c0_i32_0 = arith.constant 0 : i32
    return %arg1, %c0_i32 : i32, i32
  }
  func.func @transform_1(%arg0: i32, %arg1: i32) -> (i32, i32) {
    %c0_i32 = arith.constant 0 : i32
    %c0_i32_0 = arith.constant 0 : i32
    return %c0_i32, %arg0 : i32, i32
  }
  func.func @transform_2(%arg0: i32, %arg1: i32) -> (i32, i32) {
    %c0_i32 = arith.constant 0 : i32
    %c0_i32_0 = arith.constant 0 : i32
    return %c0_i32, %arg0 : i32, i32
  }
  func.func @transform_3(%arg0: i32, %arg1: i32) -> (i32, i32) {
    %c0_i32 = arith.constant 0 : i32
    return %arg1, %arg0 : i32, i32
  }
}

module attributes {stable_mosaic.version = 11 : i64} {
  func.func @_conv_mm_kernel(%arg0: i32, %arg1: i32, %arg2: memref<16x8192xbf16, #tpu.memory_space<vmem>>, %arg3: memref<8192x1xbf16, #tpu.memory_space<vmem>>, %arg4: memref<1x1xf32, #tpu.memory_space<vmem>>, %arg5: memref<16x1xf32, #tpu.memory_space<vmem>>) attributes {dimension_semantics = [#tpu.dimension_semantics<parallel>, #tpu.dimension_semantics<parallel>], iteration_bounds = array<i64: 1, 2>, scalar_prefetch = 0 : i64, scratch_operands = 0 : i64, tpu.core_type = #tpu.core_type<tc>, window_params = [{transform_indices = @transform_0, window_bounds = array<i64: 16, 8192>}, {transform_indices = @transform_1, window_bounds = array<i64: 8192, 1>}, {transform_indices = @transform_2, window_bounds = array<i64: 1, 1>}, {transform_indices = @transform_3, window_bounds = array<i64: 16, 1>}]} {
    %c0 = arith.constant 0 : index
    %c0_0 = arith.constant 0 : index
    %0 = vector.load %arg2[%c0, %c0_0] : memref<16x8192xbf16, #tpu.memory_space<vmem>>, vector<16x8192xbf16>
    %c0_1 = arith.constant 0 : index
    %c0_2 = arith.constant 0 : index
    %1 = vector.load %arg3[%c0_1, %c0_2] : memref<8192x1xbf16, #tpu.memory_space<vmem>>, vector<8192x1xbf16>
    %cst = arith.constant dense<0.000000e+00> : vector<16x1xf32>
    %2 = tpu.matmul %0, %1, %cst {dimension_numbers = #tpu.dot_dimension_numbers<[1], [0], [0], [1], [0, 0, 1, 1], [], []>} : vector<16x8192xbf16>, vector<8192x1xbf16>, vector<16x1xf32> -> vector<16x1xf32>
    %c0_3 = arith.constant 0 : index
    %c0_4 = arith.constant 0 : index
    %3 = vector.load %arg4[%c0_3, %c0_4] : memref<1x1xf32, #tpu.memory_space<vmem>>, vector<1x1xf32>
    %4 = vector.broadcast %3 : vector<1x1xf32> to vector<16x1xf32>
    %5 = arith.addf %2, %4 : vector<16x1xf32>
    %c0_5 = arith.constant 0 : index
    %c0_6 = arith.constant 0 : index
    %6 = vector.load %arg5[%c0_5, %c0_6] : memref<16x1xf32, #tpu.memory_space<vmem>>, vector<16x1xf32>
    tpu.vector_store %arg5[%c0_5, %c0_6], %5 {strides = array<i32>} : memref<16x1xf32, #tpu.memory_space<vmem>>, vector<16x1xf32>,
    return
  }
  func.func @transform_0(%arg0: i32, %arg1: i32) -> (i32, i32) {
    %c0_i32 = arith.constant 0 : i32
    %c0_i32_0 = arith.constant 0 : i32
    return %arg1, %c0_i32 : i32, i32
  }
  func.func @transform_1(%arg0: i32, %arg1: i32) -> (i32, i32) {
    %c0_i32 = arith.constant 0 : i32
    %c0_i32_0 = arith.constant 0 : i32
    return %c0_i32, %arg0 : i32, i32
  }
  func.func @transform_2(%arg0: i32, %arg1: i32) -> (i32, i32) {
    %c0_i32 = arith.constant 0 : i32
    %c0_i32_0 = arith.constant 0 : i32
    return %c0_i32, %arg0 : i32, i32
  }
  func.func @transform_3(%arg0: i32, %arg1: i32) -> (i32, i32) {
    %c0_i32 = arith.constant 0 : i32
    return %arg1, %arg0 : i32, i32
  }
}

</mosaic_0001>

<bundles_post_ra>
// kernel: discriminator_forward.5
= control target key start
LH: loop header
LB: loop body
LE: loop exit
PB: predicated region body
PF: predicated region fallthrough
CT: control target
= control target key end

     0   :  { %s1201_s12 = smov 0   ;;  %s1203_s13 = smov 0   ;;  %s1388_s0 = inlined_call_operand.vmem [shape: bf16[512,48], index: 0, kind: input, shape index: {}]   ;;  %s1389_s1 = inlined_call_operand.vmem [shape: bf16[48,64], index: 1, kind: input, shape index: {}]   ;;  %s1390_s2 = inlined_call_operand.vmem [shape: f32[1,64], index: 2, kind: input, shape index: {}]   ;;  %s1391_s3 = inlined_call_operand.vmem [shape: bf16[512,64], index: 3, kind: output, shape index: {}]  }
   0x1   :  { %s1205_s14 = smov 0  }
   0x2 LB: > { %s22_s15 = sadd.s32 1, %s1175_s13  ;;  %p944_p0 = scmp.ge.s32.totalorder %s1179_s14, 1  ;;  %s1179_s14 = sphi %s1205_s14, %s13_s14   ;;  %s1175_s13 = sphi %s1203_s13, %s1393_s13   ;;  %s1171_s12 = sphi %s1201_s12, %s1392_s12  }
   0x3   : > { %p23_p1 = scmp.ge.s32.totalorder %s22_s15, 2  ;;  %p169_p2 = scmp.lt.s32.totalorder %s1179_s14, 3 }
   0x5   : > { %s1395_s15 = smov (%p23_p1, %s22_s15), 0  ;;  %p170_p3 = pnand %p944_p0, %p169_p2 }
   0x6   : > { %v1138_v0 = vld [vmem:[%s1389_s1] sm:$0xff] (!%p170_p3)   ;;  %s945_s18 = sshll.u32 (!%p170_p3), %s1171_s12, 5  ;;  %v1139_v1 = vld [vmem:[%s1389_s1 + $0x8] sm:$0xff] (!%p170_p3)   ;;  %v1140_v2 = vld [vmem:[%s1389_s1 + $0x10] sm:$0xff] (!%p170_p3)   ;;  %vm369_vm0 = vcmask (!%p170_p3), 392192   ;;  %vm803_vm1 = vcmask (!%p170_p3), 519168  }
   0x7   : > { %173 = sbr.rel (%p170_p3) target bundleno = 279 (0x117), region = 32  ;;  %p204_p4 = scmp.lt.s32.totalorder (!%p170_p3), %s945_s18, 63  ;;  %1070 = vmatprep.subr.bf16.mxu0 (!%p170_p3), %v1138_v0  ;;  %1108 = vmatprep.subr.bf16.mxu1 (!%p170_p3), %v1138_v0  ;;  %v1273_v19 = vld [vmem:[%s1390_s2] ss:$0 sm:$0xff] (!%p170_p3) }
   0x8   : > { %1071 = vmatpush3.bf16.msra.mxu0 (!%p170_p3), %v1138_v0  ;;  %1111 = vmatpush3.bf16.msra.mxu1 (!%p170_p3), %v1138_v0 }
   0x9   : > { %1072 = vmatprep.subr.bf16.mxu0 (!%p170_p3), %v1139_v1  ;;  %1109 = vmatprep.subr.bf16.mxu1 (!%p170_p3), %v1139_v1 }
   0xc   : > { %1073 = vmatpush3.bf16.msra.mxu0 (!%p170_p3), %v1139_v1  ;;  %1112 = vmatpush3.bf16.msra.mxu1 (!%p170_p3), %v1139_v1 }
   0xd   : > { %1074 = vmatprep.subr.bf16.mxu0 (!%p170_p3), %v1140_v2  ;;  %1110 = vmatprep.subr.bf16.mxu1 (!%p170_p3), %v1140_v2 }
   0xe   : > { %s1397_s18 = smov (!%p204_p4, %s945_s18), 63 }
   0xf   : > { %s946_s23 = sshll.u32 %s1397_s18, 2 }
  0x10   : > { %s1236_s26 = scalar_lea.vmem %s1388_s0, %s946_s23  ;;  %1075 = vmatpush3.bf16.msra.mxu0 %v1140_v2  ;;  %1113 = vmatpush3.bf16.msra.mxu1 %v1140_v2  ;;  %s1284_s4 = scalar_lea.vmem %s1391_s3, %s946_s23 }
  0x11   : > { %v1141_v3 = vld [vmem:[%s1236_s26] sm:$0xff]   ;;  %v1143_v5 = vld [vmem:[%s1236_s26 + $0x8] sm:$0xff]   ;;  %v1145_v7 = vld [vmem:[%s1236_s26 + $0x10] sm:$0xff]  }
  0x12   : > { %v1142_v4 = vld [vmem:[%s1236_s26 + $0x40] sm:$0xff]   ;;  %1076 = vmatprep.mubr.msk.bf16.mxu0 %vm369_vm0, %v1141_v3  ;;  %v1144_v6 = vld [vmem:[%s1236_s26 + $0x48] sm:$0xff]   ;;  %v1146_v8 = vld [vmem:[%s1236_s26 + $0x50] sm:$0xff]  }
  0x13   : > { %1092 = vmatprep.mubr.msk.bf16.mxu1 %vm369_vm0, %v1142_v4  ;;  %1077 = vmatmul.mubr.msk.bf16.vlgmr.msra.gmra.mrb[0].mxu0 %vm369_vm0, %v1143_v5  ;;  %v1147_v9 = vld [vmem:[%s1236_s26 + $0x18] sm:$0xff]   ;;  %v1149_v11 = vld [vmem:[%s1236_s26 + $0x20] sm:$0xff]   ;;  %v1151_v13 = vld [vmem:[%s1236_s26 + $0x28] sm:$0xff]  }
  0x14   : > { %1093 = vmatmul.mubr.msk.bf16.vlgmr.msra.gmra.mrb[0].mxu1 %vm369_vm0, %v1144_v6  ;;  %1080 = vmatprep.mubr.msk.bf16.mxu0 %vm369_vm0, %v1145_v7  ;;  %v1148_v10 = vld [vmem:[%s1236_s26 + $0x58] sm:$0xff]   ;;  %v1150_v12 = vld [vmem:[%s1236_s26 + $0x60] sm:$0xff]   ;;  %v1152_v14 = vld [vmem:[%s1236_s26 + $0x68] sm:$0xff]  }
  0x15   : > { %1096 = vmatprep.mubr.msk.bf16.mxu1 %vm369_vm0, %v1146_v8  ;;  %v1153_v15 = vld [vmem:[%s1236_s26 + $0x30] sm:$0xff]   ;;  %v1155_v17 = vld [vmem:[%s1236_s26 + $0x38] sm:$0xff]  }
  0x16   : > { %v1154_v16 = vld [vmem:[%s1236_s26 + $0x70] sm:$0xff]   ;;  %v1156_v18 = vld [vmem:[%s1236_s26 + $0x78] sm:$0xff]  }
  0x1b   : > { %1081 = vmatmul.mubr.msk.bf16.gmra.mrb[4].mxu0 %vm369_vm0, %v1147_v9 }
  0x1c   : > { %1097 = vmatmul.mubr.msk.bf16.gmra.mrb[4].mxu1 %vm369_vm0, %v1148_v10  ;;  %1084 = vmatprep.mubr.msk.bf16.mxu0 %vm369_vm0, %v1149_v11 }
  0x1d   : > { %1100 = vmatprep.mubr.msk.bf16.mxu1 %vm369_vm0, %v1150_v12 }
  0x23   : > { %1085 = vmatmul.mubr.msk.bf16.gmra.mrb[8].mxu0 %vm369_vm0, %v1151_v13 }
  0x24   : > { %1101 = vmatmul.mubr.msk.bf16.gmra.mrb[8].mxu1 %vm369_vm0, %v1152_v14  ;;  %1088 = vmatprep.mubr.msk.bf16.mxu0 %vm369_vm0, %v1153_v15 }
  0x25   : > { %1104 = vmatprep.mubr.msk.bf16.mxu1 %vm369_vm0, %v1154_v16 }
  0x2b   : > { %1089 = vmatmul.mubr.msk.bf16.gmra.mrb[12].mxu0 %vm369_vm0, %v1155_v17 }
  0x2c   : > { %1105 = vmatmul.mubr.msk.bf16.gmra.mrb[12].mxu1 %vm369_vm0, %v1156_v18 }
  0xe6   : > { %v1078_v20 = vpop.f32.mrb[0].mxu0 }
  0xe7   : > { %v1094_v21 = vpop.f32.mrb[0].mxu1  ;;  %v461_v22 = vadd.f32 %v1078_v20, %v1273_v19  ;;  %v452_v24 = vpop.f32.mrb[1].mxu0 }
  0xe8   : > { %v525_v23 = vadd.f32 %v1094_v21, %v1273_v19  ;;  %v516_v25 = vpop.f32.mrb[1].mxu1  ;;  %v453_v26 = vadd.f32 %v1273_v19, %v452_v24  ;;  %v1079_v28 = vpop.f32.mrb[2].mxu0 }
  0xe9   : > { %v517_v27 = vadd.f32 %v1273_v19, %v516_v25  ;;  %v1095_v29 = vpop.f32.mrb[2].mxu1  ;;  %vm581_vm2 = vcmp.ge.f32.partialorder %v461_v22, 0.0  ;;  %v613_v30 = vmul.f32 0.2, %v461_v22  ;;  %v464_v36 = vadd.f32 %v1079_v28, %v1273_v19  ;;  %v455_v38 = vpop.f32.mrb[3].mxu0 }
  0xea   : > { %vm597_vm3 = vcmp.ge.f32.partialorder %v525_v23, 0.0  ;;  %v629_v31 = vmul.f32 0.2, %v525_v23  ;;  %vm579_vm4 = vcmp.ge.f32.partialorder %v453_v26, 0.0  ;;  %v611_v32 = vmul.f32 0.2, %v453_v26 }
  0xeb   : > { %vm595_vm5 = vcmp.ge.f32.partialorder %v517_v27, 0.0  ;;  %v627_v33 = vmul.f32 0.2, %v517_v27  ;;  %v645_v34 = vsel %vm581_vm2, %v461_v22, %v613_v30  ;;  %v528_v37 = vadd.f32 %v1095_v29, %v1273_v19  ;;  %v519_v39 = vpop.f32.mrb[3].mxu1 }
  0xec   : > { %v661_v35 = vsel %vm597_vm3, %v525_v23, %v629_v31  ;;  %v1021_v40 = vpack.c.bf16 %v645_v34, %v645_v34  ;;  %v643_v42 = vsel %vm579_vm4, %v453_v26, %v611_v32  ;;  %vm582_vm6 = vcmp.ge.f32.partialorder %v464_v36, 0.0 }
  0xed   : > { %v1037_v41 = vpack.c.bf16 %v661_v35, %v661_v35  ;;  %v659_v43 = vsel %vm595_vm5, %v517_v27, %v627_v33  ;;  %v1019_v44 = vpack.c.bf16 %v643_v42, %v643_v42  ;;  %v614_v46 = vmul.f32 0.2, %v464_v36 }
  0xee   : > { %v1035_v45 = vpack.c.bf16 %v659_v43, %v659_v43  ;;  %806 = vst.msk [vmem:[%s1284_s4 + $0x8] sm:$0xf] %vm803_vm1, %v1021_v40  ;;  %vm598_vm7 = vcmp.ge.f32.partialorder %v528_v37, 0.0  ;;  %v630_v47 = vmul.f32 0.2, %v528_v37  ;;  %v456_v48 = vadd.f32 %v1273_v19, %v455_v38  ;;  %v1082_v50 = vpop.f32.mrb[4].mxu0 }
  0xef   : > { %822 = vst.msk [vmem:[%s1284_s4 + $0x48] sm:$0xf] %vm803_vm1, %v1037_v41  ;;  %v520_v49 = vadd.f32 %v1273_v19, %v519_v39  ;;  %v1098_v51 = vpop.f32.mrb[4].mxu1  ;;  %804 = vst.msk [vmem:[%s1284_s4] sm:$0xf] %vm803_vm1, %v1019_v44  ;;  %v646_v52 = vsel %vm582_vm6, %v464_v36, %v614_v46  ;;  %v477_v53 = vadd.f32 %v1082_v50, %v1273_v19  ;;  %v468_v55 = vpop.f32.mrb[5].mxu0 }
  0xf0   : > { %820 = vst.msk [vmem:[%s1284_s4 + $0x40] sm:$0xf] %vm803_vm1, %v1035_v45  ;;  %v541_v54 = vadd.f32 %v1098_v51, %v1273_v19  ;;  %v532_v56 = vpop.f32.mrb[5].mxu1  ;;  %v1022_v57 = vpack.c.bf16 %v646_v52, %v646_v52  ;;  %v662_v58 = vsel %vm598_vm7, %v528_v37, %v630_v47  ;;  %vm580_vm8 = vcmp.ge.f32.partialorder %v456_v48, 0.0  ;;  %v1083_v60 = vpop.f32.mrb[6].mxu0 }
  0xf1   : > { %v612_v59 = vmul.f32 0.2, %v456_v48  ;;  %v1099_v61 = vpop.f32.mrb[6].mxu1  ;;  %v1038_v62 = vpack.c.bf16 %v662_v58, %v662_v58  ;;  %vm596_vm9 = vcmp.ge.f32.partialorder %v520_v49, 0.0  ;;  %v628_v63 = vmul.f32 0.2, %v520_v49 }
  0xf2   : > { %vm585_vm10 = vcmp.ge.f32.partialorder %v477_v53, 0.0  ;;  %v471_v0 = vpop.f32.mrb[7].mxu0  ;;  %v535_v1 = vpop.f32.mrb[7].mxu1  ;;  %807 = vst.msk [vmem:[%s1284_s4 + $0xc] sm:$0xf] %vm803_vm1, %v1022_v57  ;;  %vm601_vm11 = vcmp.ge.f32.partialorder %v541_v54, 0.0  ;;  %v469_v7 = vadd.f32 %v1273_v19, %v468_v55  ;;  %v533_v8 = vadd.f32 %v1273_v19, %v532_v56 }
  0xf3   : > { %v644_v2 = vsel %vm580_vm8, %v456_v48, %v612_v59  ;;  %v617_v3 = vmul.f32 0.2, %v477_v53  ;;  %v633_v4 = vmul.f32 0.2, %v541_v54  ;;  %823 = vst.msk [vmem:[%s1284_s4 + $0x4c] sm:$0xf] %vm803_vm1, %v1038_v62  ;;  %v660_v6 = vsel %vm596_vm9, %v520_v49, %v628_v63 }
  0xf4   : > { %v1020_v5 = vpack.c.bf16 %v644_v2, %v644_v2  ;;  %v1036_v9 = vpack.c.bf16 %v660_v6, %v660_v6  ;;  %v480_v12 = vadd.f32 %v1083_v60, %v1273_v19  ;;  %vm583_vm12 = vcmp.ge.f32.partialorder %v469_v7, 0.0 }
  0xf5   : > { %v649_v10 = vsel %vm585_vm10, %v477_v53, %v617_v3  ;;  %v665_v11 = vsel %vm601_vm11, %v541_v54, %v633_v4  ;;  %v615_v15 = vmul.f32 0.2, %v469_v7  ;;  %vm599_vm13 = vcmp.ge.f32.partialorder %v533_v8, 0.0 }
  0xf6   : > { %805 = vst.msk [vmem:[%s1284_s4 + $0x4] sm:$0xf] %vm803_vm1, %v1020_v5  ;;  %v1025_v13 = vpack.c.bf16 %v649_v10, %v649_v10  ;;  %v1041_v14 = vpack.c.bf16 %v665_v11, %v665_v11  ;;  %821 = vst.msk [vmem:[%s1284_s4 + $0x44] sm:$0xf] %vm803_vm1, %v1036_v9  ;;  %v631_v16 = vmul.f32 0.2, %v533_v8  ;;  %v544_v20 = vadd.f32 %v1099_v61, %v1273_v19 }
  0xf7   : > { %vm586_vm14 = vcmp.ge.f32.partialorder %v480_v12, 0.0  ;;  %v618_v17 = vmul.f32 0.2, %v480_v12  ;;  %v647_v18 = vsel %vm583_vm12, %v469_v7, %v615_v15  ;;  %v472_v21 = vadd.f32 %v1273_v19, %v471_v0  ;;  %v1086_v23 = vpop.f32.mrb[8].mxu0  ;;  %v1102_v24 = vpop.f32.mrb[8].mxu1 }
  0xf8   : > { %810 = vst.msk [vmem:[%s1284_s4 + $0x18] sm:$0xf] %vm803_vm1, %v1025_v13  ;;  %826 = vst.msk [vmem:[%s1284_s4 + $0x58] sm:$0xf] %vm803_vm1, %v1041_v14  ;;  %v536_v22 = vadd.f32 %v1273_v19, %v535_v1  ;;  %v1023_v25 = vpack.c.bf16 %v647_v18, %v647_v18  ;;  %v663_v26 = vsel %vm599_vm13, %v533_v8, %v631_v16  ;;  %v484_v29 = vpop.f32.mrb[9].mxu0  ;;  %v548_v30 = vpop.f32.mrb[9].mxu1 }
  0xf9   : > { %v650_v27 = vsel %vm586_vm14, %v480_v12, %v618_v17  ;;  %v493_v28 = vadd.f32 %v1086_v23, %v1273_v19  ;;  %v1039_v31 = vpack.c.bf16 %v663_v26, %v663_v26  ;;  %vm602_vm15 = vcmp.ge.f32.partialorder %v544_v20, 0.0  ;;  %v1087_v34 = vpop.f32.mrb[10].mxu0  ;;  %v1103_v35 = vpop.f32.mrb[10].mxu1 }
  0xfa   : > { %v1026_v32 = vpack.c.bf16 %v650_v27, %v650_v27  ;;  %v634_v33 = vmul.f32 0.2, %v544_v20  ;;  %808 = vst.msk [vmem:[%s1284_s4 + $0x10] sm:$0xf] %vm803_vm1, %v1023_v25  ;;  %vm584_vm0 = vcmp.ge.f32.partialorder %v472_v21, 0.0  ;;  %vm600_vm2 = vcmp.ge.f32.partialorder %v536_v22, 0.0 }
  0xfb   : > { %v616_v36 = vmul.f32 0.2, %v472_v21  ;;  %v632_v37 = vmul.f32 0.2, %v536_v22  ;;  %824 = vst.msk [vmem:[%s1284_s4 + $0x50] sm:$0xf] %vm803_vm1, %v1039_v31  ;;  %v557_v40 = vadd.f32 %v1102_v24, %v1273_v19  ;;  %v485_v46 = vadd.f32 %v1273_v19, %v484_v29 }
  0xfc   : > { %811 = vst.msk [vmem:[%s1284_s4 + $0x1c] sm:$0xf] %vm803_vm1, %v1026_v32  ;;  %v666_v38 = vsel %vm602_vm15, %v544_v20, %v634_v33  ;;  %vm589_vm3 = vcmp.ge.f32.partialorder %v493_v28, 0.0  ;;  %v621_v39 = vmul.f32 0.2, %v493_v28  ;;  %v487_v41 = vpop.f32.mrb[11].mxu0  ;;  %v549_v54 = vadd.f32 %v1273_v19, %v548_v30 }
  0xfd   : > { %v551_v42 = vpop.f32.mrb[11].mxu1  ;;  %v1042_v43 = vpack.c.bf16 %v666_v38, %v666_v38  ;;  %v648_v44 = vsel %vm584_vm0, %v472_v21, %v616_v36  ;;  %v664_v45 = vsel %vm600_vm2, %v536_v22, %v632_v37  ;;  %vm605_vm4 = vcmp.ge.f32.partialorder %v557_v40, 0.0 }
  0xfe   : > { %v1024_v47 = vpack.c.bf16 %v648_v44, %v648_v44  ;;  %v1040_v48 = vpack.c.bf16 %v664_v45, %v664_v45  ;;  %v653_v49 = vsel %vm589_vm3, %v493_v28, %v621_v39  ;;  %v637_v51 = vmul.f32 0.2, %v557_v40  ;;  %v1090_v53 = vpop.f32.mrb[12].mxu0 }
  0xff   : > { %827 = vst.msk [vmem:[%s1284_s4 + $0x5c] sm:$0xf] %vm803_vm1, %v1042_v43  ;;  %v1029_v50 = vpack.c.bf16 %v653_v49, %v653_v49  ;;  %vm587_vm5 = vcmp.ge.f32.partialorder %v485_v46, 0.0  ;;  %v619_v52 = vmul.f32 0.2, %v485_v46  ;;  %v496_v55 = vadd.f32 %v1087_v34, %v1273_v19  ;;  %v1106_v58 = vpop.f32.mrb[12].mxu1 }
 0x100   : > { %809 = vst.msk [vmem:[%s1284_s4 + $0x14] sm:$0xf] %vm803_vm1, %v1024_v47  ;;  %825 = vst.msk [vmem:[%s1284_s4 + $0x54] sm:$0xf] %vm803_vm1, %v1040_v48  ;;  %v560_v56 = vadd.f32 %v1103_v35, %v1273_v19  ;;  %v488_v57 = vadd.f32 %v1273_v19, %v487_v41  ;;  %v500_v59 = vpop.f32.mrb[13].mxu0  ;;  %v669_v60 = vsel %vm605_vm4, %v557_v40, %v637_v51  ;;  %v564_v0 = vpop.f32.mrb[13].mxu1 }
 0x101   : > { %814 = vst.msk [vmem:[%s1284_s4 + $0x28] sm:$0xf] %vm803_vm1, %v1029_v50  ;;  %v651_v61 = vsel %vm587_vm5, %v485_v46, %v619_v52  ;;  %v552_v62 = vadd.f32 %v1273_v19, %v551_v42  ;;  %v509_v63 = vadd.f32 %v1090_v53, %v1273_v19  ;;  %v1091_v1 = vpop.f32.mrb[14].mxu0  ;;  %v1045_v2 = vpack.c.bf16 %v669_v60, %v669_v60  ;;  %v1107_v5 = vpop.f32.mrb[14].mxu1 }
 0x102   : > { %v1027_v3 = vpack.c.bf16 %v651_v61, %v651_v61  ;;  %vm603_vm6 = vcmp.ge.f32.partialorder %v549_v54, 0.0  ;;  %v635_v4 = vmul.f32 0.2, %v549_v54  ;;  %v503_v6 = vpop.f32.mrb[15].mxu0  ;;  %vm590_vm7 = vcmp.ge.f32.partialorder %v496_v55, 0.0  ;;  %v567_v11 = vpop.f32.mrb[15].mxu1 }
 0x103   : > { %v622_v7 = vmul.f32 0.2, %v496_v55  ;;  %vm606_vm8 = vcmp.ge.f32.partialorder %v560_v56, 0.0  ;;  %v638_v8 = vmul.f32 0.2, %v560_v56  ;;  %vm588_vm9 = vcmp.ge.f32.partialorder %v488_v57, 0.0 }
 0x104   : > { %830 = vst.msk [vmem:[%s1284_s4 + $0x68] sm:$0xf] %vm803_vm1, %v1045_v2  ;;  %812 = vst.msk [vmem:[%s1284_s4 + $0x20] sm:$0xf] %vm803_vm1, %v1027_v3  ;;  %v667_v9 = vsel %vm603_vm6, %v549_v54, %v635_v4  ;;  %v620_v10 = vmul.f32 0.2, %v488_v57  ;;  %v573_v23 = vadd.f32 %v1106_v58, %v1273_v19  ;;  %v501_v25 = vadd.f32 %v1273_v19, %v500_v59 }
 0x105   : > { %vm604_vm10 = vcmp.ge.f32.partialorder %v552_v62, 0.0  ;;  %v1043_v12 = vpack.c.bf16 %v667_v9, %v667_v9  ;;  %v654_v13 = vsel %vm590_vm7, %v496_v55, %v622_v7  ;;  %v670_v14 = vsel %vm606_vm8, %v560_v56, %v638_v8 }
 0x106   : > { %v636_v15 = vmul.f32 0.2, %v552_v62  ;;  %v1030_v16 = vpack.c.bf16 %v654_v13, %v654_v13  ;;  %v1046_v17 = vpack.c.bf16 %v670_v14, %v670_v14  ;;  %v652_v18 = vsel %vm588_vm9, %v488_v57, %v620_v10 }
 0x107   : > { %vm593_vm11 = vcmp.ge.f32.partialorder %v509_v63, 0.0  ;;  %828 = vst.msk [vmem:[%s1284_s4 + $0x60] sm:$0xf] %vm803_vm1, %v1043_v12  ;;  %v1028_v20 = vpack.c.bf16 %v652_v18, %v652_v18  ;;  %v625_v22 = vmul.f32 0.2, %v509_v63  ;;  %v565_v26 = vadd.f32 %v1273_v19, %v564_v0 }
 0x108   : > { %v668_v21 = vsel %vm604_vm10, %v552_v62, %v636_v15  ;;  %815 = vst.msk [vmem:[%s1284_s4 + $0x2c] sm:$0xf] %vm803_vm1, %v1030_v16  ;;  %831 = vst.msk [vmem:[%s1284_s4 + $0x6c] sm:$0xf] %vm803_vm1, %v1046_v17  ;;  %v512_v27 = vadd.f32 %v1091_v1, %v1273_v19  ;;  %vm609_vm12 = vcmp.ge.f32.partialorder %v573_v23, 0.0  ;;  %v576_v30 = vadd.f32 %v1107_v5, %v1273_v19 }
 0x109   : > { %v1044_v24 = vpack.c.bf16 %v668_v21, %v668_v21  ;;  %813 = vst.msk [vmem:[%s1284_s4 + $0x24] sm:$0xf] %vm803_vm1, %v1028_v20  ;;  %v657_v28 = vsel %vm593_vm11, %v509_v63, %v625_v22  ;;  %v641_v29 = vmul.f32 0.2, %v573_v23  ;;  %vm591_vm13 = vcmp.ge.f32.partialorder %v501_v25, 0.0 }
 0x10a   : > { %v1033_v31 = vpack.c.bf16 %v657_v28, %v657_v28  ;;  %v623_v32 = vmul.f32 0.2, %v501_v25  ;;  %vm607_vm14 = vcmp.ge.f32.partialorder %v565_v26, 0.0  ;;  %v639_v34 = vmul.f32 0.2, %v565_v26 }
 0x10b   : > { %829 = vst.msk [vmem:[%s1284_s4 + $0x64] sm:$0xf] %vm803_vm1, %v1044_v24  ;;  %v673_v33 = vsel %vm609_vm12, %v573_v23, %v641_v29  ;;  %vm594_vm15 = vcmp.ge.f32.partialorder %v512_v27, 0.0  ;;  %v626_v35 = vmul.f32 0.2, %v512_v27  ;;  %vm610_vm0 = vcmp.ge.f32.partialorder %v576_v30, 0.0 }
 0x10c   : > { %818 = vst.msk [vmem:[%s1284_s4 + $0x38] sm:$0xf] %vm803_vm1, %v1033_v31  ;;  %v1049_v36 = vpack.c.bf16 %v673_v33, %v673_v33  ;;  %v655_v37 = vsel %vm591_vm13, %v501_v25, %v623_v32  ;;  %v642_v38 = vmul.f32 0.2, %v576_v30  ;;  %v671_v40 = vsel %vm607_vm14, %v565_v26, %v639_v34 }
 0x10d   : > { %v1031_v39 = vpack.c.bf16 %v655_v37, %v655_v37  ;;  %v658_v41 = vsel %vm594_vm15, %v512_v27, %v626_v35  ;;  %v504_v42 = vadd.f32 %v1273_v19, %v503_v6  ;;  %v1047_v43 = vpack.c.bf16 %v671_v40, %v671_v40 }
 0x10e   : > { %834 = vst.msk [vmem:[%s1284_s4 + $0x78] sm:$0xf] %vm803_vm1, %v1049_v36  ;;  %v1034_v44 = vpack.c.bf16 %v658_v41, %v658_v41  ;;  %v674_v45 = vsel %vm610_vm0, %v576_v30, %v642_v38  ;;  %v568_v46 = vadd.f32 %v1273_v19, %v567_v11 }
 0x10f   : > { %816 = vst.msk [vmem:[%s1284_s4 + $0x30] sm:$0xf] %vm803_vm1, %v1031_v39  ;;  %v1050_v47 = vpack.c.bf16 %v674_v45, %v674_v45  ;;  %vm592_vm2 = vcmp.ge.f32.partialorder %v504_v42, 0.0  ;;  %v624_v48 = vmul.f32 0.2, %v504_v42 }
 0x110   : > { %832 = vst.msk [vmem:[%s1284_s4 + $0x70] sm:$0xf] %vm803_vm1, %v1047_v43  ;;  %819 = vst.msk [vmem:[%s1284_s4 + $0x3c] sm:$0xf] %vm803_vm1, %v1034_v44  ;;  %vm608_vm3 = vcmp.ge.f32.partialorder %v568_v46, 0.0 }
 0x111   : > { %v640_v49 = vmul.f32 0.2, %v568_v46  ;;  %835 = vst.msk [vmem:[%s1284_s4 + $0x7c] sm:$0xf] %vm803_vm1, %v1050_v47  ;;  %v656_v50 = vsel %vm592_vm2, %v504_v42, %v624_v48 }
 0x112   : > { %v1032_v51 = vpack.c.bf16 %v656_v50, %v656_v50 }
 0x113   : > { %v672_v52 = vsel %vm608_vm3, %v568_v46, %v640_v49 }
 0x114   : > { %v1048_v53 = vpack.c.bf16 %v672_v52, %v672_v52  ;;  %817 = vst.msk [vmem:[%s1284_s4 + $0x34] sm:$0xf] %vm803_vm1, %v1032_v51 }
 0x116   : > { %833 = vst.msk [vmem:[%s1284_s4 + $0x74] sm:$0xf] %vm803_vm1, %v1048_v53 }
 0x117 PF: > { %s13_s14 = sadd.s32 1, %s1179_s14   ;;  %s1392_s12 = smov %s1175_s13 }
 0x118   : > { %p10_p5 = scmp.ge.s32.totalorder %s13_s14, 4   ;;  %s1393_s13 = smov %s1395_s15 }
 0x11a   :  { %12 = sbr.rel (!%p10_p5) target bundleno = 2 (0x2), region = 68 }

// kernel: discriminator_forward.6
= control target key start
LH: loop header
LB: loop body
LE: loop exit
PB: predicated region body
PF: predicated region fallthrough
CT: control target
= control target key end

     0   :  { %s1809_s12 = smov 0   ;;  %s1811_s13 = smov 0   ;;  %s2105_s0 = inlined_call_operand.vmem [shape: bf16[128,1024], index: 0, kind: input, shape index: {}]   ;;  %s2106_s1 = inlined_call_operand.vmem [shape: bf16[1024,128], index: 1, kind: input, shape index: {}]   ;;  %s2107_s2 = inlined_call_operand.vmem [shape: f32[1,128], index: 2, kind: input, shape index: {}]   ;;  %s2108_s3 = inlined_call_operand.vmem [shape: bf16[128,128], index: 3, kind: output, shape index: {}]  }
   0x1   :  { %s1813_s14 = smov 0  }
   0x2 LB: > { %s22_s15 = sadd.s32 1, %s1783_s13  ;;  %p1372_p0 = scmp.ge.s32.totalorder %s1787_s14, 1  ;;  %s1787_s14 = sphi %s1813_s14, %s13_s14   ;;  %s1783_s13 = sphi %s1811_s13, %s2110_s13   ;;  %s1779_s12 = sphi %s1809_s12, %s2109_s12  }
   0x3   : > { %p23_p1 = scmp.ge.s32.totalorder %s22_s15, 2  ;;  %p170_p2 = scmp.lt.s32.totalorder %s1787_s14, 3 }
   0x5   : > { %s2112_s15 = smov (%p23_p1, %s22_s15), 0  ;;  %p171_p3 = pnand %p1372_p0, %p170_p2 }
   0x6   : > { %v1701_v0 = vld [vmem:[%s2106_s1 + $0x40] sm:$0xff] (!%p171_p3)   ;;  %v1705_v4 = vld [vmem:[%s2106_s1 + $0x48] sm:$0xff] (!%p171_p3)   ;;  %v1709_v8 = vld [vmem:[%s2106_s1 + $0x50] sm:$0xff] (!%p171_p3)   ;;  %s1373_s25 = sshll.u32 (!%p171_p3), %s1779_s12, 3 }
   0x7   : > { %174 = sbr.rel (%p171_p3) target bundleno = 323 (0x143), region = 32  ;;  %v1702_v1 = vld [vmem:[%s2106_s1 + $0xc0] sm:$0xff] (!%p171_p3)   ;;  %1517 = vmatprep.subr.bf16.mxu0 (!%p171_p3), %v1701_v0  ;;  %v1706_v5 = vld [vmem:[%s2106_s1 + $0xc8] sm:$0xff] (!%p171_p3)   ;;  %v1710_v9 = vld [vmem:[%s2106_s1 + $0xd0] sm:$0xff] (!%p171_p3)   ;;  %p206_p4 = scmp.lt.s32.totalorder (!%p171_p3), %s1373_s25, 15 }
   0x8   : > { %v1703_v2 = vld [vmem:[%s2106_s1] sm:$0xff] (!%p171_p3)   ;;  %1557 = vmatprep.subr.bf16.mxu1 (!%p171_p3), %v1702_v1  ;;  %v1707_v6 = vld [vmem:[%s2106_s1 + $0x8] sm:$0xff] (!%p171_p3)   ;;  %v1711_v10 = vld [vmem:[%s2106_s1 + $0x10] sm:$0xff] (!%p171_p3)  }
   0x9   : > { %v1704_v3 = vld [vmem:[%s2106_s1 + $0x80] sm:$0xff] (!%p171_p3)   ;;  %1518 = vmatpush3.bf16.msra.mxu0 (!%p171_p3), %v1703_v2  ;;  %v1708_v7 = vld [vmem:[%s2106_s1 + $0x88] sm:$0xff] (!%p171_p3)   ;;  %v1712_v11 = vld [vmem:[%s2106_s1 + $0x90] sm:$0xff] (!%p171_p3)  }
   0xa   : > { %1558 = vmatpush3.bf16.msra.mxu1 (!%p171_p3), %v1704_v3  ;;  %1519 = vmatprep.subr.bf16.mxu0 (!%p171_p3), %v1705_v4  ;;  %v1713_v12 = vld [vmem:[%s2106_s1 + $0x58] sm:$0xff] (!%p171_p3)   ;;  %v1717_v16 = vld [vmem:[%s2106_s1 + $0x60] sm:$0xff] (!%p171_p3)   ;;  %v1721_v20 = vld [vmem:[%s2106_s1 + $0x68] sm:$0xff] (!%p171_p3)  }
   0xb   : > { %1559 = vmatprep.subr.bf16.mxu1 (!%p171_p3), %v1706_v5  ;;  %v1714_v13 = vld [vmem:[%s2106_s1 + $0xd8] sm:$0xff] (!%p171_p3)   ;;  %v1718_v17 = vld [vmem:[%s2106_s1 + $0xe0] sm:$0xff] (!%p171_p3)   ;;  %v1722_v21 = vld [vmem:[%s2106_s1 + $0xe8] sm:$0xff] (!%p171_p3)  }
   0xc   : > { %v1715_v14 = vld [vmem:[%s2106_s1 + $0x18] sm:$0xff] (!%p171_p3)   ;;  %v1719_v18 = vld [vmem:[%s2106_s1 + $0x20] sm:$0xff] (!%p171_p3)   ;;  %v1723_v22 = vld [vmem:[%s2106_s1 + $0x28] sm:$0xff] (!%p171_p3)  }
   0xd   : > { %1520 = vmatpush3.bf16.msra.mxu0 (!%p171_p3), %v1707_v6  ;;  %v1716_v15 = vld [vmem:[%s2106_s1 + $0x98] sm:$0xff] (!%p171_p3)   ;;  %v1720_v19 = vld [vmem:[%s2106_s1 + $0xa0] sm:$0xff] (!%p171_p3)   ;;  %v1724_v23 = vld [vmem:[%s2106_s1 + $0xa8] sm:$0xff] (!%p171_p3)  }
   0xe   : > { %1560 = vmatpush3.bf16.msra.mxu1 %v1708_v7  ;;  %1521 = vmatprep.subr.bf16.mxu0 %v1709_v8  ;;  %s2114_s25 = smov (!%p206_p4, %s1373_s25), 15  ;;  %v1725_v24 = vld [vmem:[%s2106_s1 + $0x70] sm:$0xff]   ;;  %v1729_v28 = vld [vmem:[%s2106_s1 + $0x78] sm:$0xff]   ;;  %v1733_v40 = vld [vmem:[%s2106_s1 + $0x140] sm:$0xff]  }
   0xf   : > { %1561 = vmatprep.subr.bf16.mxu1 %v1710_v9  ;;  %v1726_v25 = vld [vmem:[%s2106_s1 + $0xf0] sm:$0xff]   ;;  %s1485_s24 = sshll.u32 %s2114_s25, 5  ;;  %v1730_v29 = vld [vmem:[%s2106_s1 + $0xf8] sm:$0xff]   ;;  %v1734_v41 = vld [vmem:[%s2106_s1 + $0x1c0] sm:$0xff]  }
  0x10   : > { %v1727_v26 = vld [vmem:[%s2106_s1 + $0x30] sm:$0xff]   ;;  %s1926_s12 = scalar_lea.vmem %s2105_s0, %s1485_s24  ;;  %v1731_v30 = vld [vmem:[%s2106_s1 + $0x38] sm:$0xff]   ;;  %v1735_v42 = vld [vmem:[%s2106_s1 + $0x100] sm:$0xff]  }
  0x11   : > { %1522 = vmatpush3.bf16.msra.mxu0 %v1711_v10  ;;  %v1728_v27 = vld [vmem:[%s2106_s1 + $0xb0] sm:$0xff]   ;;  %v1732_v31 = vld [vmem:[%s2106_s1 + $0xb8] sm:$0xff]   ;;  %v229_v32 = vld [vmem:[%s1926_s12] sm:$0xff] }
  0x12   : > { %1562 = vmatpush3.bf16.msra.mxu1 %v1712_v11  ;;  %1523 = vmatprep.subr.bf16.mxu0 %v1713_v12  ;;  %v233_v33 = vld [vmem:[%s1926_s12 + $0x20] sm:$0xff]  ;;  %v230_v34 = vld [vmem:[%s1926_s12 + $0x8] sm:$0xff]  ;;  %v1741_v56 = vld [vmem:[%s2106_s1 + $0x150] sm:$0xff]  }
  0x13   : > { %1563 = vmatprep.subr.bf16.mxu1 %v1714_v13  ;;  %v1379_v35 = vcombine.low %v229_v32, %v233_v33  ;;  %v1380_v36 = vcombine.high %v229_v32, %v233_v33  ;;  %v234_v37 = vld [vmem:[%s1926_s12 + $0x28] sm:$0xff]  ;;  %v1736_v43 = vld [vmem:[%s2106_s1 + $0x180] sm:$0xff]   ;;  %v1742_v57 = vld [vmem:[%s2106_s1 + $0x1d0] sm:$0xff]  }
  0x14   : > { %v1381_v38 = vcombine.low %v230_v34, %v234_v37  ;;  %v1382_v39 = vcombine.high %v230_v34, %v234_v37  ;;  %v1737_v44 = vld [vmem:[%s2106_s1 + $0x148] sm:$0xff]   ;;  %v237_v48 = vld [vmem:[%s1926_s12 + $0x40] sm:$0xff]  ;;  %v1743_v58 = vld [vmem:[%s2106_s1 + $0x110] sm:$0xff]  }
  0x15   : > { %1524 = vmatpush3.bf16.msra.mxu0 %v1715_v14  ;;  %972 = vmatprep.mubr.bf16.mxu0 %v1380_v36  ;;  %v1738_v45 = vld [vmem:[%s2106_s1 + $0x1c8] sm:$0xff]   ;;  %v241_v49 = vld [vmem:[%s1926_s12 + $0x60] sm:$0xff]  ;;  %v1744_v59 = vld [vmem:[%s2106_s1 + $0x190] sm:$0xff]  }
  0x16   : > { %1564 = vmatpush3.bf16.msra.mxu1 %v1716_v15  ;;  %1525 = vmatprep.subr.bf16.mxu0 %v1717_v16  ;;  %v1739_v46 = vld [vmem:[%s2106_s1 + $0x108] sm:$0xff]   ;;  %v1388_v50 = vcombine.high %v237_v48, %v241_v49  ;;  %v1387_v53 = vcombine.low %v237_v48, %v241_v49  ;;  %v1745_v60 = vld [vmem:[%s2106_s1 + $0x158] sm:$0xff]   ;;  %v245_v0 = vld [vmem:[%s1926_s12 + $0x80] sm:$0xff] }
  0x17   : > { %1565 = vmatprep.subr.bf16.mxu1 %v1718_v17  ;;  %1037 = vmatprep.mubr.bf16.mxu1 %v1382_v39  ;;  %v1740_v47 = vld [vmem:[%s2106_s1 + $0x188] sm:$0xff]   ;;  %v1746_v61 = vld [vmem:[%s2106_s1 + $0x1d8] sm:$0xff]   ;;  %v249_v1 = vld [vmem:[%s1926_s12 + $0xa0] sm:$0xff] }
  0x18   : > { %v238_v51 = vld [vmem:[%s1926_s12 + $0x48] sm:$0xff]  ;;  %v1747_v62 = vld [vmem:[%s2106_s1 + $0x118] sm:$0xff]   ;;  %v1396_v4 = vcombine.high %v245_v0, %v249_v1  ;;  %v1395_v6 = vcombine.low %v245_v0, %v249_v1  ;;  %v1749_v8 = vld [vmem:[%s2106_s1 + $0x160] sm:$0xff]  }
  0x19   : > { %1526 = vmatpush3.bf16.msra.mxu0 %v1719_v18  ;;  %v242_v52 = vld [vmem:[%s1926_s12 + $0x68] sm:$0xff]  ;;  %v1748_v63 = vld [vmem:[%s2106_s1 + $0x198] sm:$0xff]   ;;  %v1750_v9 = vld [vmem:[%s2106_s1 + $0x1e0] sm:$0xff]  }
  0x1a   : > { %1566 = vmatpush3.bf16.msra.mxu1 %v1720_v19  ;;  %1527 = vmatprep.subr.bf16.mxu0 %v1721_v20  ;;  %v1390_v54 = vcombine.high %v238_v51, %v242_v52  ;;  %v1389_v55 = vcombine.low %v238_v51, %v242_v52  ;;  %v246_v2 = vld [vmem:[%s1926_s12 + $0x88] sm:$0xff]  ;;  %v1751_v10 = vld [vmem:[%s2106_s1 + $0x120] sm:$0xff]   ;;  %v231_v32 = vld [vmem:[%s1926_s12 + $0x10] sm:$0xff] }
  0x1b   : > { %1567 = vmatprep.subr.bf16.mxu1 %v1722_v21  ;;  %v250_v3 = vld [vmem:[%s1926_s12 + $0xa8] sm:$0xff]  ;;  %v1752_v11 = vld [vmem:[%s2106_s1 + $0x1a0] sm:$0xff]   ;;  %v235_v33 = vld [vmem:[%s1926_s12 + $0x30] sm:$0xff] }
  0x1c   : > { %v1398_v5 = vcombine.high %v246_v2, %v250_v3  ;;  %v1397_v7 = vcombine.low %v246_v2, %v250_v3  ;;  %v1753_v12 = vld [vmem:[%s2106_s1 + $0x168] sm:$0xff]   ;;  %v253_v16 = vld [vmem:[%s1926_s12 + $0xc0] sm:$0xff]  ;;  %v1383_v34 = vcombine.low %v231_v32, %v235_v33  ;;  %v232_v36 = vld [vmem:[%s1926_s12 + $0x18] sm:$0xff] }
  0x1d   : > { %1528 = vmatpush3.bf16.msra.mxu0 %v1723_v22  ;;  %v1754_v13 = vld [vmem:[%s2106_s1 + $0x1e8] sm:$0xff]   ;;  %v257_v17 = vld [vmem:[%s1926_s12 + $0xe0] sm:$0xff]  ;;  %v236_v37 = vld [vmem:[%s1926_s12 + $0x38] sm:$0xff] }
  0x1e   : > { %1568 = vmatpush3.bf16.msra.mxu1 %v1724_v23  ;;  %1529 = vmatprep.subr.bf16.mxu0 %v1725_v24  ;;  %v1755_v14 = vld [vmem:[%s2106_s1 + $0x128] sm:$0xff]   ;;  %v1404_v19 = vcombine.high %v253_v16, %v257_v17  ;;  %v1403_v21 = vcombine.low %v253_v16, %v257_v17  ;;  %v1757_v24 = vld [vmem:[%s2106_s1 + $0x170] sm:$0xff]   ;;  %v1385_v39 = vcombine.low %v232_v36, %v236_v37  ;;  %v248_v48 = vld [vmem:[%s1926_s12 + $0x98] sm:$0xff] }
  0x1f   : > { %1569 = vmatprep.subr.bf16.mxu1 %v1726_v25  ;;  %v1756_v15 = vld [vmem:[%s2106_s1 + $0x1a8] sm:$0xff]   ;;  %v1758_v25 = vld [vmem:[%s2106_s1 + $0x1f0] sm:$0xff]   ;;  %v252_v49 = vld [vmem:[%s1926_s12 + $0xb8] sm:$0xff] }
  0x20   : > { %v254_v18 = vld [vmem:[%s1926_s12 + $0xc8] sm:$0xff]  ;;  %v1378_v2 = vld [vmem:[%s2107_s2] ss:$0 sm:$0xff] }
  0x21   : > { %1530 = vmatpush3.bf16.msra.mxu0 %v1727_v26  ;;  %v258_v20 = vld [vmem:[%s1926_s12 + $0xe8] sm:$0xff]  ;;  %v1759_v26 = vld [vmem:[%s2106_s1 + $0x130] sm:$0xff]  }
  0x22   : > { %1570 = vmatpush3.bf16.msra.mxu1 %v1728_v27  ;;  %1531 = vmatprep.subr.bf16.mxu0 %v1729_v28  ;;  %v1406_v22 = vcombine.high %v254_v18, %v258_v20  ;;  %v1405_v23 = vcombine.low %v254_v18, %v258_v20  ;;  %v1760_v27 = vld [vmem:[%s2106_s1 + $0x1b0] sm:$0xff]   ;;  %v1761_v28 = vld [vmem:[%s2106_s1 + $0x178] sm:$0xff]  }
  0x23   : > { %1571 = vmatprep.subr.bf16.mxu1 %v1730_v29  ;;  %v1762_v29 = vld [vmem:[%s2106_s1 + $0x1f8] sm:$0xff]  }
  0x25   : > { %1532 = vmatpush3.bf16.msra.mxu0 %v1731_v30  ;;  %v1763_v30 = vld [vmem:[%s2106_s1 + $0x138] sm:$0xff]  }
  0x26   : > { %1572 = vmatpush3.bf16.msra.mxu1 %v1732_v31  ;;  %1597 = vmatprep.subr.bf16.mxu0 %v1733_v40  ;;  %v1764_v31 = vld [vmem:[%s2106_s1 + $0x1b8] sm:$0xff]   ;;  %v1386_v40 = vcombine.high %v232_v36, %v236_v37 }
  0x27   : > { %1637 = vmatprep.subr.bf16.mxu1 %v1734_v41  ;;  %v243_v41 = vld [vmem:[%s1926_s12 + $0x70] sm:$0xff] }
  0x28   : > { %973 = vmatmul.mubr.bf16.vlgmr.msra.gmra.mrb[0].mxu0 %v1379_v35  ;;  %v1384_v35 = vcombine.high %v231_v32, %v235_v33 }
  0x29   : > { %1038 = vmatmul.mubr.bf16.vlgmr.msra.gmra.mrb[0].mxu1 %v1381_v38  ;;  %1598 = vmatpush3.bf16.msra.mxu0 %v1735_v42  ;;  %v239_v38 = vld [vmem:[%s1926_s12 + $0x50] sm:$0xff]  ;;  %v240_v42 = vld [vmem:[%s1926_s12 + $0x58] sm:$0xff] }
  0x2a   : > { %1638 = vmatpush3.bf16.msra.mxu1 %v1736_v43  ;;  %1599 = vmatprep.subr.bf16.mxu0 %v1737_v44  ;;  %v244_v43 = vld [vmem:[%s1926_s12 + $0x78] sm:$0xff]  ;;  %v1392_v44 = vcombine.high %v239_v38, %v243_v41 }
  0x2b   : > { %1639 = vmatprep.subr.bf16.mxu1 %v1738_v45  ;;  %980 = vmatprep.mubr.bf16.mxu0 %v1388_v50  ;;  %v1394_v45 = vcombine.high %v240_v42, %v244_v43  ;;  %v1391_v50 = vcombine.low %v239_v38, %v243_v41  ;;  %v1393_v51 = vcombine.low %v240_v42, %v244_v43 }
  0x2c   : > { %1045 = vmatprep.mubr.bf16.mxu1 %v1390_v54  ;;  %v255_v54 = vld [vmem:[%s1926_s12 + $0xd0] sm:$0xff] }
  0x2d   : > { %1600 = vmatpush3.bf16.msra.mxu0 %v1739_v46  ;;  %v247_v46 = vld [vmem:[%s1926_s12 + $0x90] sm:$0xff] }
  0x2e   : > { %1640 = vmatpush3.bf16.msra.mxu1 %v1740_v47  ;;  %1601 = vmatprep.subr.bf16.mxu0 %v1741_v56  ;;  %v251_v47 = vld [vmem:[%s1926_s12 + $0xb0] sm:$0xff]  ;;  %v256_v56 = vld [vmem:[%s1926_s12 + $0xd8] sm:$0xff] }
  0x2f   : > { %1641 = vmatprep.subr.bf16.mxu1 %v1742_v57  ;;  %v1400_v52 = vcombine.high %v247_v46, %v251_v47  ;;  %v260_v57 = vld [vmem:[%s1926_s12 + $0xf8] sm:$0xff] }
  0x30   : > { %981 = vmatmul.mubr.bf16.gmra.mrb[4].mxu0 %v1387_v53  ;;  %v1402_v53 = vcombine.high %v248_v48, %v252_v49 }
  0x31   : > { %1046 = vmatmul.mubr.bf16.gmra.mrb[4].mxu1 %v1389_v55  ;;  %1602 = vmatpush3.bf16.msra.mxu0 %v1743_v58  ;;  %v259_v55 = vld [vmem:[%s1926_s12 + $0xf0] sm:$0xff]  ;;  %v1399_v58 = vcombine.low %v247_v46, %v251_v47  ;;  %s1377_s12 = sshll.u32 %s2114_s25, 2 }
  0x32   : > { %1642 = vmatpush3.bf16.msra.mxu1 %v1744_v59  ;;  %1603 = vmatprep.subr.bf16.mxu0 %v1745_v60  ;;  %v1401_v59 = vcombine.low %v248_v48, %v252_v49  ;;  %v1408_v60 = vcombine.high %v255_v54, %v259_v55  ;;  %s2084_s17 = scalar_lea.vmem %s2108_s3, %s1377_s12 }
  0x33   : > { %1643 = vmatprep.subr.bf16.mxu1 %v1746_v61  ;;  %988 = vmatprep.mubr.bf16.mxu0 %v1396_v4  ;;  %v1410_v61 = vcombine.high %v256_v56, %v260_v57 }
  0x34   : > { %1053 = vmatprep.mubr.bf16.mxu1 %v1398_v5 }
  0x35   : > { %1604 = vmatpush3.bf16.msra.mxu0 %v1747_v62  ;;  %v1407_v62 = vcombine.low %v255_v54, %v259_v55 }
  0x36   : > { %1644 = vmatpush3.bf16.msra.mxu1 %v1748_v63  ;;  %1605 = vmatprep.subr.bf16.mxu0 %v1749_v8  ;;  %v1409_v63 = vcombine.low %v256_v56, %v260_v57 }
  0x37   : > { %1645 = vmatprep.subr.bf16.mxu1 %v1750_v9 }
  0x38   : > { %989 = vmatmul.mubr.bf16.gmra.mrb[8].mxu0 %v1395_v6 }
  0x39   : > { %1054 = vmatmul.mubr.bf16.gmra.mrb[8].mxu1 %v1397_v7  ;;  %1606 = vmatpush3.bf16.msra.mxu0 %v1751_v10 }
  0x3a   : > { %1646 = vmatpush3.bf16.msra.mxu1 %v1752_v11  ;;  %1607 = vmatprep.subr.bf16.mxu0 %v1753_v12 }
  0x3b   : > { %1647 = vmatprep.subr.bf16.mxu1 %v1754_v13  ;;  %996 = vmatprep.mubr.bf16.mxu0 %v1404_v19 }
  0x3c   : > { %1061 = vmatprep.mubr.bf16.mxu1 %v1406_v22 }
  0x3d   : > { %1608 = vmatpush3.bf16.msra.mxu0 %v1755_v14 }
  0x3e   : > { %1648 = vmatpush3.bf16.msra.mxu1 %v1756_v15  ;;  %1609 = vmatprep.subr.bf16.mxu0 %v1757_v24 }
  0x3f   : > { %1649 = vmatprep.subr.bf16.mxu1 %v1758_v25 }
  0x40   : > { %997 = vmatmul.mubr.bf16.gmra.mrb[12].mxu0 %v1403_v21 }
  0x41   : > { %1062 = vmatmul.mubr.bf16.gmra.mrb[12].mxu1 %v1405_v23  ;;  %1610 = vmatpush3.bf16.msra.mxu0 %v1759_v26 }
  0x42   : > { %1650 = vmatpush3.bf16.msra.mxu1 %v1760_v27  ;;  %1611 = vmatprep.subr.bf16.mxu0 %v1761_v28 }
  0x43   : > { %1651 = vmatprep.subr.bf16.mxu1 %v1762_v29  ;;  %1102 = vmatprep.mubr.bf16.mxu0 %v1384_v35 }
  0x44   : > { %1167 = vmatprep.mubr.bf16.mxu1 %v1386_v40 }
  0x45   : > { %1612 = vmatpush3.bf16.msra.mxu0 %v1763_v30 }
  0x46   : > { %1652 = vmatpush3.bf16.msra.mxu1 %v1764_v31 }
  0x48   : > { %1103 = vmatmul.mubr.bf16.vlgmr.msra.gmra.mrb[16].mxu0 %v1383_v34 }
  0x49   : > { %1168 = vmatmul.mubr.bf16.vlgmr.msra.gmra.mrb[16].mxu1 %v1385_v39  ;;  %1110 = vmatprep.mubr.bf16.mxu0 %v1392_v44 }
  0x4a   : > { %1175 = vmatprep.mubr.bf16.mxu1 %v1394_v45 }
  0x50   : > { %1111 = vmatmul.mubr.bf16.gmra.mrb[20].mxu0 %v1391_v50 }
  0x51   : > { %1176 = vmatmul.mubr.bf16.gmra.mrb[20].mxu1 %v1393_v51  ;;  %1118 = vmatprep.mubr.bf16.mxu0 %v1400_v52 }
  0x52   : > { %1183 = vmatprep.mubr.bf16.mxu1 %v1402_v53 }
  0x58   : > { %1119 = vmatmul.mubr.bf16.gmra.mrb[24].mxu0 %v1399_v58 }
  0x59   : > { %1184 = vmatmul.mubr.bf16.gmra.mrb[24].mxu1 %v1401_v59  ;;  %1126 = vmatprep.mubr.bf16.mxu0 %v1408_v60 }
  0x5a   : > { %1191 = vmatprep.mubr.bf16.mxu1 %v1410_v61 }
  0x60   : > { %1127 = vmatmul.mubr.bf16.gmra.mrb[28].mxu0 %v1407_v62 }
  0x61   : > { %1192 = vmatmul.mubr.bf16.gmra.mrb[28].mxu1 %v1409_v63 }
  0xfb   : > { %v1533_v0 = vpop.f32.mrb[0].mxu0 }
  0xfc   : > { %v1573_v1 = vpop.f32.mrb[0].mxu1  ;;  %v1534_v3 = vpop.f32.mrb[1].mxu0 }
  0xfd   : > { %v1535_v4 = vadd.f32 %v1534_v3, %v1533_v0  ;;  %v1574_v5 = vpop.f32.mrb[1].mxu1  ;;  %v1536_v6 = vpop.f32.mrb[2].mxu0 }
  0xfe   : > { %v1575_v7 = vadd.f32 %v1574_v5, %v1573_v1  ;;  %v1576_v8 = vpop.f32.mrb[2].mxu1  ;;  %v1537_v9 = vpop.f32.mrb[3].mxu0 }
  0xff   : > { %v975_v10 = vadd.f32 %v1535_v4, %v1378_v2  ;;  %v1538_v11 = vadd.f32 %v1537_v9, %v1536_v6  ;;  %v1577_v12 = vpop.f32.mrb[3].mxu1 }
 0x100   : > { %v1578_v13 = vadd.f32 %v1577_v12, %v1576_v8 }
 0x101   : > { %v1040_v14 = vadd.f32 %v1575_v7, %v975_v10  ;;  %v978_v15 = vadd.f32 %v1538_v11, %v1378_v2 }
 0x103   : > { %v2065_v16 = vadd.f32 %v1578_v13, %v978_v15  ;;  %v1539_v17 = vpop.f32.mrb[4].mxu0 }
 0x104   : > { %v1579_v18 = vpop.f32.mrb[4].mxu1  ;;  %v1540_v19 = vpop.f32.mrb[5].mxu0 }
 0x105   : > { %v1541_v20 = vadd.f32 %v1540_v19, %v1539_v17  ;;  %v1580_v21 = vpop.f32.mrb[5].mxu1  ;;  %v1542_v22 = vpop.f32.mrb[6].mxu0 }
 0x106   : > { %v1581_v23 = vadd.f32 %v1580_v21, %v1579_v18  ;;  %v1582_v24 = vpop.f32.mrb[6].mxu1  ;;  %v1543_v25 = vpop.f32.mrb[7].mxu0 }
 0x107   : > { %v983_v26 = vadd.f32 %v1541_v20, %v1378_v2  ;;  %v1544_v27 = vadd.f32 %v1543_v25, %v1542_v22  ;;  %v1583_v28 = vpop.f32.mrb[7].mxu1 }
 0x108   : > { %v1584_v29 = vadd.f32 %v1583_v28, %v1582_v24 }
 0x109   : > { %v2067_v30 = vadd.f32 %v1581_v23, %v983_v26  ;;  %v986_v31 = vadd.f32 %v1544_v27, %v1378_v2 }
 0x10b   : > { %v2069_v32 = vadd.f32 %v1584_v29, %v986_v31  ;;  %v1545_v33 = vpop.f32.mrb[8].mxu0 }
 0x10c   : > { %v1585_v34 = vpop.f32.mrb[8].mxu1  ;;  %v1546_v35 = vpop.f32.mrb[9].mxu0 }
 0x10d   : > { %v1586_v36 = vpop.f32.mrb[9].mxu1  ;;  %v1547_v37 = vadd.f32 %v1546_v35, %v1545_v33  ;;  %v1548_v39 = vpop.f32.mrb[10].mxu0 }
 0x10e   : > { %v1587_v38 = vadd.f32 %v1586_v36, %v1585_v34  ;;  %v1588_v40 = vpop.f32.mrb[10].mxu1  ;;  %v1549_v41 = vpop.f32.mrb[11].mxu0 }
 0x10f   : > { %v1589_v42 = vpop.f32.mrb[11].mxu1  ;;  %v991_v43 = vadd.f32 %v1547_v37, %v1378_v2  ;;  %v1550_v44 = vadd.f32 %v1549_v41, %v1548_v39 }
 0x110   : > { %v1590_v45 = vadd.f32 %v1589_v42, %v1588_v40 }
 0x111   : > { %v2071_v46 = vadd.f32 %v1587_v38, %v991_v43  ;;  %v994_v47 = vadd.f32 %v1550_v44, %v1378_v2 }
 0x113   : > { %v2073_v48 = vadd.f32 %v1590_v45, %v994_v47  ;;  %v1551_v49 = vpop.f32.mrb[12].mxu0 }
 0x114   : > { %v1591_v50 = vpop.f32.mrb[12].mxu1  ;;  %v1552_v51 = vpop.f32.mrb[13].mxu0 }
 0x115   : > { %v1553_v52 = vadd.f32 %v1552_v51, %v1551_v49  ;;  %v1592_v53 = vpop.f32.mrb[13].mxu1  ;;  %v1554_v54 = vpop.f32.mrb[14].mxu0 }
 0x116   : > { %v1593_v55 = vadd.f32 %v1592_v53, %v1591_v50  ;;  %v1594_v56 = vpop.f32.mrb[14].mxu1  ;;  %v1555_v57 = vpop.f32.mrb[15].mxu0 }
 0x117   : > { %v999_v58 = vadd.f32 %v1553_v52, %v1378_v2  ;;  %v1556_v59 = vadd.f32 %v1555_v57, %v1554_v54  ;;  %v1595_v60 = vpop.f32.mrb[15].mxu1 }
 0x118   : > { %v1596_v61 = vadd.f32 %v1595_v60, %v1594_v56 }
 0x119   : > { %v2075_v62 = vadd.f32 %v1593_v55, %v999_v58  ;;  %v1002_v63 = vadd.f32 %v1556_v59, %v1378_v2 }
 0x11b   : > { %v2077_v0 = vadd.f32 %v1596_v61, %v1002_v63  ;;  %v1613_v1 = vpop.f32.mrb[16].mxu0 }
 0x11c   : > { %v1653_v3 = vpop.f32.mrb[16].mxu1  ;;  %v1614_v4 = vpop.f32.mrb[17].mxu0 }
 0x11d   : > { %v1615_v5 = vadd.f32 %v1614_v4, %v1613_v1  ;;  %v1654_v6 = vpop.f32.mrb[17].mxu1  ;;  %v1616_v7 = vpop.f32.mrb[18].mxu0 }
 0x11e   : > { %v1655_v8 = vadd.f32 %v1654_v6, %v1653_v3  ;;  %v1656_v9 = vpop.f32.mrb[18].mxu1  ;;  %v1617_v10 = vpop.f32.mrb[19].mxu0 }
 0x11f   : > { %v1105_v11 = vadd.f32 %v1615_v5, %v1040_v14  ;;  %v1618_v12 = vadd.f32 %v1617_v10, %v1616_v7  ;;  %v1657_v13 = vpop.f32.mrb[19].mxu1 }
 0x120   : > { %v1658_v15 = vadd.f32 %v1657_v13, %v1656_v9 }
 0x121   : > { %v1170_v17 = vadd.f32 %v1655_v8, %v1105_v11  ;;  %v1108_v18 = vadd.f32 %v1618_v12, %v2065_v16 }
 0x123   : > { %v1208_v2 = vmul.f32 0.2, %v1170_v17  ;;  %v1173_v19 = vadd.f32 %v1658_v15, %v1108_v18  ;;  %v1619_v20 = vpop.f32.mrb[20].mxu0  ;;  %vm1200_vm0 = vcmp.ge.f32.partialorder %v1170_v17, 0.0 }
 0x124   : > { %v1659_v21 = vpop.f32.mrb[20].mxu1  ;;  %v1620_v22 = vpop.f32.mrb[21].mxu0 }
 0x125   : > { %vm1201_vm1 = vcmp.ge.f32.partialorder %v1173_v19, 0.0  ;;  %v1209_v23 = vmul.f32 0.2, %v1173_v19  ;;  %v1621_v24 = vadd.f32 %v1620_v22, %v1619_v20  ;;  %v1660_v25 = vpop.f32.mrb[21].mxu1  ;;  %v1622_v26 = vpop.f32.mrb[22].mxu0  ;;  %v1216_v29 = vsel %vm1200_vm0, %v1170_v17, %v1208_v2 }
 0x126   : > { %v1661_v27 = vadd.f32 %v1660_v25, %v1659_v21  ;;  %v1662_v14 = vpop.f32.mrb[22].mxu1  ;;  %v1623_v28 = vpop.f32.mrb[23].mxu0 }
 0x127   : > { %v1217_v16 = vsel %vm1201_vm1, %v1173_v19, %v1209_v23  ;;  %v1113_v31 = vadd.f32 %v1621_v24, %v2067_v30  ;;  %v1624_v33 = vadd.f32 %v1623_v28, %v1622_v26  ;;  %v1663_v34 = vpop.f32.mrb[23].mxu1 }
 0x128   : > { %v1497_v35 = vpack.c.bf16 %v1217_v16, %v1216_v29  ;;  %v1664_v36 = vadd.f32 %v1663_v34, %v1662_v14 }
 0x129   : > { %v1178_v37 = vadd.f32 %v1661_v27, %v1113_v31  ;;  %v1116_v38 = vadd.f32 %v1624_v33, %v2069_v32 }
 0x12a   : > { %1498 = vst [vmem:[%s2084_s17] sm:$0xff] %v1497_v35  }
 0x12b   : > { %v1210_v39 = vmul.f32 0.2, %v1178_v37  ;;  %v1181_v40 = vadd.f32 %v1664_v36, %v1116_v38  ;;  %v1625_v41 = vpop.f32.mrb[24].mxu0  ;;  %vm1202_vm2 = vcmp.ge.f32.partialorder %v1178_v37, 0.0 }
 0x12c   : > { %v1665_v42 = vpop.f32.mrb[24].mxu1  ;;  %v1626_v43 = vpop.f32.mrb[25].mxu0 }
 0x12d   : > { %vm1203_vm3 = vcmp.ge.f32.partialorder %v1181_v40, 0.0  ;;  %v1211_v44 = vmul.f32 0.2, %v1181_v40  ;;  %v1627_v45 = vadd.f32 %v1626_v43, %v1625_v41  ;;  %v1666_v47 = vpop.f32.mrb[25].mxu1  ;;  %v1628_v30 = vpop.f32.mrb[26].mxu0  ;;  %v1218_v52 = vsel %vm1202_vm2, %v1178_v37, %v1210_v39 }
 0x12e   : > { %v1667_v49 = vadd.f32 %v1666_v47, %v1665_v42  ;;  %v1668_v50 = vpop.f32.mrb[26].mxu1  ;;  %v1629_v51 = vpop.f32.mrb[27].mxu0 }
 0x12f   : > { %v1219_v53 = vsel %vm1203_vm3, %v1181_v40, %v1211_v44  ;;  %v1121_v32 = vadd.f32 %v1627_v45, %v2071_v46  ;;  %v1630_v54 = vadd.f32 %v1629_v51, %v1628_v30  ;;  %v1669_v55 = vpop.f32.mrb[27].mxu1 }
 0x130   : > { %v1502_v56 = vpack.c.bf16 %v1219_v53, %v1218_v52  ;;  %v1670_v57 = vadd.f32 %v1669_v55, %v1668_v50 }
 0x131   : > { %v1186_v58 = vadd.f32 %v1667_v49, %v1121_v32  ;;  %v1124_v59 = vadd.f32 %v1630_v54, %v2073_v48 }
 0x132   : > { %1514 = vst [vmem:[%s2084_s17 + $0x8] sm:$0xff] %v1502_v56  }
 0x133   : > { %v1212_v60 = vmul.f32 0.2, %v1186_v58  ;;  %v1189_v61 = vadd.f32 %v1670_v57, %v1124_v59  ;;  %v1631_v63 = vpop.f32.mrb[28].mxu0  ;;  %vm1204_vm4 = vcmp.ge.f32.partialorder %v1186_v58, 0.0 }
 0x134   : > { %v1671_v1 = vpop.f32.mrb[28].mxu1  ;;  %v1632_v3 = vpop.f32.mrb[29].mxu0 }
 0x135   : > { %vm1205_vm5 = vcmp.ge.f32.partialorder %v1189_v61, 0.0  ;;  %v1213_v4 = vmul.f32 0.2, %v1189_v61  ;;  %v1633_v5 = vadd.f32 %v1632_v3, %v1631_v63  ;;  %v1672_v6 = vpop.f32.mrb[29].mxu1  ;;  %v1634_v46 = vpop.f32.mrb[30].mxu0  ;;  %v1220_v10 = vsel %vm1204_vm4, %v1186_v58, %v1212_v60 }
 0x136   : > { %v1673_v7 = vadd.f32 %v1672_v6, %v1671_v1  ;;  %v1674_v8 = vpop.f32.mrb[30].mxu1  ;;  %v1635_v9 = vpop.f32.mrb[31].mxu0 }
 0x137   : > { %v1221_v11 = vsel %vm1205_vm5, %v1189_v61, %v1213_v4  ;;  %v1129_v48 = vadd.f32 %v1633_v5, %v2075_v62  ;;  %v1636_v12 = vadd.f32 %v1635_v9, %v1634_v46  ;;  %v1675_v13 = vpop.f32.mrb[31].mxu1 }
 0x138   : > { %v1507_v15 = vpack.c.bf16 %v1221_v11, %v1220_v10  ;;  %v1676_v17 = vadd.f32 %v1675_v13, %v1674_v8 }
 0x139   : > { %v1194_v18 = vadd.f32 %v1673_v7, %v1129_v48  ;;  %v1132_v2 = vadd.f32 %v1636_v12, %v2077_v0 }
 0x13a   : > { %1515 = vst [vmem:[%s2084_s17 + $0x10] sm:$0xff] %v1507_v15  }
 0x13b   : > { %v1214_v19 = vmul.f32 0.2, %v1194_v18  ;;  %v1197_v20 = vadd.f32 %v1676_v17, %v1132_v2  ;;  %vm1206_vm6 = vcmp.ge.f32.partialorder %v1194_v18, 0.0 }
 0x13d   : > { %vm1207_vm7 = vcmp.ge.f32.partialorder %v1197_v20, 0.0  ;;  %v1215_v21 = vmul.f32 0.2, %v1197_v20  ;;  %v1222_v22 = vsel %vm1206_vm6, %v1194_v18, %v1214_v19 }
 0x13f   : > { %v1223_v23 = vsel %vm1207_vm7, %v1197_v20, %v1215_v21 }
 0x140   : > { %v1512_v24 = vpack.c.bf16 %v1223_v23, %v1222_v22 }
 0x142   : > { %1516 = vst [vmem:[%s2084_s17 + $0x18] sm:$0xff] %v1512_v24  }
 0x143 PF: > { %s13_s14 = sadd.s32 1, %s1787_s14   ;;  %s2109_s12 = smov %s1783_s13 }
 0x144   : > { %p10_p5 = scmp.ge.s32.totalorder %s13_s14, 4   ;;  %s2110_s13 = smov %s2112_s15 }
 0x146   :  { %12 = sbr.rel (!%p10_p5) target bundleno = 2 (0x2), region = 68 }

// kernel: discriminator_forward.7
= control target key start
LH: loop header
LB: loop body
LE: loop exit
PB: predicated region body
PF: predicated region fallthrough
CT: control target
= control target key end

     0   :  { %s3728_s12 = smov 0   ;;  %s3730_s13 = smov 0   ;;  %s4567_s0 = inlined_call_operand.vmem [shape: bf16[32,2048], index: 0, kind: input, shape index: {}]   ;;  %s4568_s1 = inlined_call_operand.vmem [shape: bf16[2048,256], index: 1, kind: input, shape index: {}]   ;;  %s4569_s2 = inlined_call_operand.vmem [shape: f32[1,256], index: 2, kind: input, shape index: {}]   ;;  %s4570_s3 = inlined_call_operand.vmem [shape: bf16[32,256], index: 3, kind: output, shape index: {}]  }
   0x1   :  { %s3732_s14 = smov 0   ;;  %s3734_s15 = smov 0  }
   0x2   :  { %s3736_s16 = smov 0  }
   0x3 LB: > { %s25_s17 = sadd.s32 1, %s3702_s15  ;;  %s3082_s18 = sadd.s32 4294967295, %s3706_s16   ;;  %s3706_s16 = sphi %s3736_s16, %s13_s16   ;;  %s3702_s15 = sphi %s3734_s15, %s4575_s15   ;;  %s3698_s14 = sphi %s3732_s14, %s4574_s14   ;;  %s3694_s13 = sphi %s3730_s13, %s4573_s13   ;;  %s3690_s12 = sphi %s3728_s12, %s4572_s12  }
   0x4   : > { %p27_p0 = scmp.ge.s32.totalorder %s25_s17, 2  ;;  %p65_p1 = scmp.ne.s32.totalorder %s3694_s13, %s3690_s12 }
   0x5   : > { %p66_p2 = scmp.eq.s32.totalorder %s3706_s16, 0  ;;  %p123_p4 = scmp.eq.s32.totalorder %s3082_s18, 1 }
   0x6   : > { %s4577_s17 = smov (%p27_p0, %s25_s17), 0  ;;  %s58_s20 = sadd.s32 1, %s3694_s13 }
   0x7   : > { %p67_p3 = por %p66_p2, %p65_p1  ;;  %s55_s19 = ssub.s32 %s3702_s15, %s4577_s17 }
   0x8   : > { %p56_p5 = scmp.eq.s32.totalorder %s55_s19, 0  ;;  %p3763_p6 = por %p123_p4, %p65_p1 }
   0x9   : > { %p3086_p7 = scmp.ge.s32.totalorder %s3706_s16, 2 }
   0xa   : > { %s3768_s22 = scalar_select %p56_p5, %s3694_s13, %s58_s20  }
   0xb   : > { %155 = sbr.rel (%p3086_p7) target bundleno = 192 (0xc0), region = 20 }
  0x12   : > { %158 = sbr.rel (!%p67_p3) target bundleno = 192 (0xc0), region = 24  ;;  %s160_s23 = sand.u32 (%p67_p3), 1, %s3694_s13  }
  0x13   : > { %s3088_s24 = sshll.u32 (%p67_p3), %s3702_s15, 2  ;;  %s3087_s25 = sshll.u32 (%p67_p3), %s160_s23, 10 }
  0x14   : > { %s3776_s28 = scalar_lea.vmem (%p67_p3), %s4568_s1, %s3088_s24  ;;  %s3780_s29 = scalar_lea.vmem (%p67_p3), [#allocation2], %s3087_s25 }
  0x15   : > { %v180_v0 = vld [vmem:[%s3776_s28] sm:$0xf] (%p67_p3)  ;;  %v182_v1 = vld [vmem:[%s3776_s28 + $0x8] sm:$0xf] (%p67_p3)  ;;  %v184_v2 = vld [vmem:[%s3776_s28 + $0x10] sm:$0xf] (%p67_p3) }
  0x16   : > { %181 = vst [vmem:[%s3780_s29] sm:$0xf] (%p67_p3), %v180_v0  ;;  %183 = vst [vmem:[%s3780_s29 + $0x4] sm:$0xf] (%p67_p3), %v182_v1  ;;  %v186_v3 = vld [vmem:[%s3776_s28 + $0x18] sm:$0xf] (%p67_p3) }
  0x17   : > { %v188_v4 = vld [vmem:[%s3776_s28 + $0x20] sm:$0xf] (%p67_p3)  ;;  %185 = vst [vmem:[%s3780_s29 + $0x8] sm:$0xf] (%p67_p3), %v184_v2  ;;  %187 = vst [vmem:[%s3780_s29 + $0xc] sm:$0xf] (%p67_p3), %v186_v3 }
  0x18   : > { %189 = vst [vmem:[%s3780_s29 + $0x10] sm:$0xf] (%p67_p3), %v188_v4  ;;  %v190_v5 = vld [vmem:[%s3776_s28 + $0x28] sm:$0xf] (%p67_p3)  ;;  %v192_v6 = vld [vmem:[%s3776_s28 + $0x30] sm:$0xf] (%p67_p3) }
  0x19   : > { %v194_v7 = vld [vmem:[%s3776_s28 + $0x38] sm:$0xf]  ;;  %191 = vst [vmem:[%s3780_s29 + $0x14] sm:$0xf] %v190_v5  ;;  %193 = vst [vmem:[%s3780_s29 + $0x18] sm:$0xf] %v192_v6 }
  0x1a   : > { %195 = vst [vmem:[%s3780_s29 + $0x1c] sm:$0xf] %v194_v7  ;;  %v196_v8 = vld [vmem:[%s3776_s28 + $0x40] sm:$0xf]  ;;  %v198_v9 = vld [vmem:[%s3776_s28 + $0x48] sm:$0xf] }
  0x1b   : > { %v200_v10 = vld [vmem:[%s3776_s28 + $0x50] sm:$0xf]  ;;  %197 = vst [vmem:[%s3780_s29 + $0x20] sm:$0xf] %v196_v8  ;;  %199 = vst [vmem:[%s3780_s29 + $0x24] sm:$0xf] %v198_v9 }
  0x1c   : > { %201 = vst [vmem:[%s3780_s29 + $0x28] sm:$0xf] %v200_v10  ;;  %v202_v11 = vld [vmem:[%s3776_s28 + $0x58] sm:$0xf]  ;;  %v204_v12 = vld [vmem:[%s3776_s28 + $0x60] sm:$0xf] }
  0x1d   : > { %v206_v13 = vld [vmem:[%s3776_s28 + $0x68] sm:$0xf]  ;;  %203 = vst [vmem:[%s3780_s29 + $0x2c] sm:$0xf] %v202_v11  ;;  %205 = vst [vmem:[%s3780_s29 + $0x30] sm:$0xf] %v204_v12 }
  0x1e   : > { %207 = vst [vmem:[%s3780_s29 + $0x34] sm:$0xf] %v206_v13  ;;  %v208_v14 = vld [vmem:[%s3776_s28 + $0x70] sm:$0xf]  ;;  %v210_v15 = vld [vmem:[%s3776_s28 + $0x78] sm:$0xf] }
  0x1f   : > { %v212_v16 = vld [vmem:[%s3776_s28 + $0x80] sm:$0xf]  ;;  %209 = vst [vmem:[%s3780_s29 + $0x38] sm:$0xf] %v208_v14  ;;  %211 = vst [vmem:[%s3780_s29 + $0x3c] sm:$0xf] %v210_v15 }
  0x20   : > { %213 = vst [vmem:[%s3780_s29 + $0x40] sm:$0xf] %v212_v16  ;;  %v214_v17 = vld [vmem:[%s3776_s28 + $0x88] sm:$0xf]  ;;  %v216_v18 = vld [vmem:[%s3776_s28 + $0x90] sm:$0xf] }
  0x21   : > { %v218_v19 = vld [vmem:[%s3776_s28 + $0x98] sm:$0xf]  ;;  %215 = vst [vmem:[%s3780_s29 + $0x44] sm:$0xf] %v214_v17  ;;  %217 = vst [vmem:[%s3780_s29 + $0x48] sm:$0xf] %v216_v18 }
  0x22   : > { %219 = vst [vmem:[%s3780_s29 + $0x4c] sm:$0xf] %v218_v19  ;;  %v220_v20 = vld [vmem:[%s3776_s28 + $0xa0] sm:$0xf]  ;;  %v222_v21 = vld [vmem:[%s3776_s28 + $0xa8] sm:$0xf] }
  0x23   : > { %v224_v22 = vld [vmem:[%s3776_s28 + $0xb0] sm:$0xf]  ;;  %221 = vst [vmem:[%s3780_s29 + $0x50] sm:$0xf] %v220_v20  ;;  %223 = vst [vmem:[%s3780_s29 + $0x54] sm:$0xf] %v222_v21 }
  0x24   : > { %225 = vst [vmem:[%s3780_s29 + $0x58] sm:$0xf] %v224_v22  ;;  %v226_v23 = vld [vmem:[%s3776_s28 + $0xb8] sm:$0xf]  ;;  %v228_v24 = vld [vmem:[%s3776_s28 + $0xc0] sm:$0xf] }
  0x25   : > { %v230_v25 = vld [vmem:[%s3776_s28 + $0xc8] sm:$0xf]  ;;  %227 = vst [vmem:[%s3780_s29 + $0x5c] sm:$0xf] %v226_v23  ;;  %229 = vst [vmem:[%s3780_s29 + $0x60] sm:$0xf] %v228_v24 }
  0x26   : > { %231 = vst [vmem:[%s3780_s29 + $0x64] sm:$0xf] %v230_v25  ;;  %v232_v26 = vld [vmem:[%s3776_s28 + $0xd0] sm:$0xf]  ;;  %v234_v27 = vld [vmem:[%s3776_s28 + $0xd8] sm:$0xf] }
  0x27   : > { %v236_v28 = vld [vmem:[%s3776_s28 + $0xe0] sm:$0xf]  ;;  %233 = vst [vmem:[%s3780_s29 + $0x68] sm:$0xf] %v232_v26  ;;  %235 = vst [vmem:[%s3780_s29 + $0x6c] sm:$0xf] %v234_v27 }
  0x28   : > { %237 = vst [vmem:[%s3780_s29 + $0x70] sm:$0xf] %v236_v28  ;;  %v238_v29 = vld [vmem:[%s3776_s28 + $0xe8] sm:$0xf]  ;;  %v240_v30 = vld [vmem:[%s3776_s28 + $0xf0] sm:$0xf] }
  0x29   : > { %v242_v31 = vld [vmem:[%s3776_s28 + $0xf8] sm:$0xf]  ;;  %239 = vst [vmem:[%s3780_s29 + $0x74] sm:$0xf] %v238_v29  ;;  %241 = vst [vmem:[%s3780_s29 + $0x78] sm:$0xf] %v240_v30 }
  0x2a   : > { %243 = vst [vmem:[%s3780_s29 + $0x7c] sm:$0xf] %v242_v31  ;;  %v244_v32 = vld [vmem:[%s3776_s28 + $0x100] sm:$0xf]  ;;  %v246_v33 = vld [vmem:[%s3776_s28 + $0x108] sm:$0xf] }
  0x2b   : > { %v248_v34 = vld [vmem:[%s3776_s28 + $0x110] sm:$0xf]  ;;  %245 = vst [vmem:[%s3780_s29 + $0x80] sm:$0xf] %v244_v32  ;;  %247 = vst [vmem:[%s3780_s29 + $0x84] sm:$0xf] %v246_v33 }
  0x2c   : > { %249 = vst [vmem:[%s3780_s29 + $0x88] sm:$0xf] %v248_v34  ;;  %v250_v35 = vld [vmem:[%s3776_s28 + $0x118] sm:$0xf]  ;;  %v252_v36 = vld [vmem:[%s3776_s28 + $0x120] sm:$0xf] }
  0x2d   : > { %v254_v37 = vld [vmem:[%s3776_s28 + $0x128] sm:$0xf]  ;;  %251 = vst [vmem:[%s3780_s29 + $0x8c] sm:$0xf] %v250_v35  ;;  %253 = vst [vmem:[%s3780_s29 + $0x90] sm:$0xf] %v252_v36 }
  0x2e   : > { %255 = vst [vmem:[%s3780_s29 + $0x94] sm:$0xf] %v254_v37  ;;  %v256_v38 = vld [vmem:[%s3776_s28 + $0x130] sm:$0xf]  ;;  %v258_v39 = vld [vmem:[%s3776_s28 + $0x138] sm:$0xf] }
  0x2f   : > { %v260_v40 = vld [vmem:[%s3776_s28 + $0x140] sm:$0xf]  ;;  %257 = vst [vmem:[%s3780_s29 + $0x98] sm:$0xf] %v256_v38  ;;  %259 = vst [vmem:[%s3780_s29 + $0x9c] sm:$0xf] %v258_v39 }
  0x30   : > { %261 = vst [vmem:[%s3780_s29 + $0xa0] sm:$0xf] %v260_v40  ;;  %v262_v41 = vld [vmem:[%s3776_s28 + $0x148] sm:$0xf]  ;;  %v264_v42 = vld [vmem:[%s3776_s28 + $0x150] sm:$0xf] }
  0x31   : > { %v266_v43 = vld [vmem:[%s3776_s28 + $0x158] sm:$0xf]  ;;  %263 = vst [vmem:[%s3780_s29 + $0xa4] sm:$0xf] %v262_v41  ;;  %265 = vst [vmem:[%s3780_s29 + $0xa8] sm:$0xf] %v264_v42 }
  0x32   : > { %267 = vst [vmem:[%s3780_s29 + $0xac] sm:$0xf] %v266_v43  ;;  %v268_v44 = vld [vmem:[%s3776_s28 + $0x160] sm:$0xf]  ;;  %v270_v45 = vld [vmem:[%s3776_s28 + $0x168] sm:$0xf] }
  0x33   : > { %v272_v46 = vld [vmem:[%s3776_s28 + $0x170] sm:$0xf]  ;;  %269 = vst [vmem:[%s3780_s29 + $0xb0] sm:$0xf] %v268_v44  ;;  %271 = vst [vmem:[%s3780_s29 + $0xb4] sm:$0xf] %v270_v45 }
  0x34   : > { %273 = vst [vmem:[%s3780_s29 + $0xb8] sm:$0xf] %v272_v46  ;;  %v274_v47 = vld [vmem:[%s3776_s28 + $0x178] sm:$0xf]  ;;  %v276_v48 = vld [vmem:[%s3776_s28 + $0x180] sm:$0xf] }
  0x35   : > { %v278_v49 = vld [vmem:[%s3776_s28 + $0x188] sm:$0xf]  ;;  %275 = vst [vmem:[%s3780_s29 + $0xbc] sm:$0xf] %v274_v47  ;;  %277 = vst [vmem:[%s3780_s29 + $0xc0] sm:$0xf] %v276_v48 }
  0x36   : > { %279 = vst [vmem:[%s3780_s29 + $0xc4] sm:$0xf] %v278_v49  ;;  %v280_v50 = vld [vmem:[%s3776_s28 + $0x190] sm:$0xf]  ;;  %v282_v51 = vld [vmem:[%s3776_s28 + $0x198] sm:$0xf] }
  0x37   : > { %v284_v52 = vld [vmem:[%s3776_s28 + $0x1a0] sm:$0xf]  ;;  %281 = vst [vmem:[%s3780_s29 + $0xc8] sm:$0xf] %v280_v50  ;;  %283 = vst [vmem:[%s3780_s29 + $0xcc] sm:$0xf] %v282_v51 }
  0x38   : > { %285 = vst [vmem:[%s3780_s29 + $0xd0] sm:$0xf] %v284_v52  ;;  %v286_v53 = vld [vmem:[%s3776_s28 + $0x1a8] sm:$0xf]  ;;  %v288_v54 = vld [vmem:[%s3776_s28 + $0x1b0] sm:$0xf] }
  0x39   : > { %v290_v55 = vld [vmem:[%s3776_s28 + $0x1b8] sm:$0xf]  ;;  %287 = vst [vmem:[%s3780_s29 + $0xd4] sm:$0xf] %v286_v53  ;;  %289 = vst [vmem:[%s3780_s29 + $0xd8] sm:$0xf] %v288_v54 }
  0x3a   : > { %291 = vst [vmem:[%s3780_s29 + $0xdc] sm:$0xf] %v290_v55  ;;  %v292_v56 = vld [vmem:[%s3776_s28 + $0x1c0] sm:$0xf]  ;;  %v294_v57 = vld [vmem:[%s3776_s28 + $0x1c8] sm:$0xf] }
  0x3b   : > { %v296_v58 = vld [vmem:[%s3776_s28 + $0x1d0] sm:$0xf]  ;;  %293 = vst [vmem:[%s3780_s29 + $0xe0] sm:$0xf] %v292_v56  ;;  %295 = vst [vmem:[%s3780_s29 + $0xe4] sm:$0xf] %v294_v57 }
  0x3c   : > { %297 = vst [vmem:[%s3780_s29 + $0xe8] sm:$0xf] %v296_v58  ;;  %v298_v59 = vld [vmem:[%s3776_s28 + $0x1d8] sm:$0xf]  ;;  %v300_v60 = vld [vmem:[%s3776_s28 + $0x1e0] sm:$0xf] }
  0x3d   : > { %v302_v61 = vld [vmem:[%s3776_s28 + $0x1e8] sm:$0xf]  ;;  %299 = vst [vmem:[%s3780_s29 + $0xec] sm:$0xf] %v298_v59  ;;  %301 = vst [vmem:[%s3780_s29 + $0xf0] sm:$0xf] %v300_v60 }
  0x3e   : > { %303 = vst [vmem:[%s3780_s29 + $0xf4] sm:$0xf] %v302_v61  ;;  %v304_v62 = vld [vmem:[%s3776_s28 + $0x1f0] sm:$0xf]  ;;  %v306_v63 = vld [vmem:[%s3776_s28 + $0x1f8] sm:$0xf] }
  0x3f   : > { %v308_v0 = vld [vmem:[%s3776_s28 + $0x200] sm:$0xf]  ;;  %305 = vst [vmem:[%s3780_s29 + $0xf8] sm:$0xf] %v304_v62  ;;  %307 = vst [vmem:[%s3780_s29 + $0xfc] sm:$0xf] %v306_v63 }
  0x40   : > { %309 = vst [vmem:[%s3780_s29 + $0x100] sm:$0xf] %v308_v0  ;;  %v310_v1 = vld [vmem:[%s3776_s28 + $0x208] sm:$0xf]  ;;  %v312_v2 = vld [vmem:[%s3776_s28 + $0x210] sm:$0xf] }
  0x41   : > { %v314_v3 = vld [vmem:[%s3776_s28 + $0x218] sm:$0xf]  ;;  %311 = vst [vmem:[%s3780_s29 + $0x104] sm:$0xf] %v310_v1  ;;  %313 = vst [vmem:[%s3780_s29 + $0x108] sm:$0xf] %v312_v2 }
  0x42   : > { %315 = vst [vmem:[%s3780_s29 + $0x10c] sm:$0xf] %v314_v3  ;;  %v316_v4 = vld [vmem:[%s3776_s28 + $0x220] sm:$0xf]  ;;  %v318_v5 = vld [vmem:[%s3776_s28 + $0x228] sm:$0xf] }
  0x43   : > { %v320_v6 = vld [vmem:[%s3776_s28 + $0x230] sm:$0xf]  ;;  %317 = vst [vmem:[%s3780_s29 + $0x110] sm:$0xf] %v316_v4  ;;  %319 = vst [vmem:[%s3780_s29 + $0x114] sm:$0xf] %v318_v5 }
  0x44   : > { %321 = vst [vmem:[%s3780_s29 + $0x118] sm:$0xf] %v320_v6  ;;  %v322_v7 = vld [vmem:[%s3776_s28 + $0x238] sm:$0xf]  ;;  %v324_v8 = vld [vmem:[%s3776_s28 + $0x240] sm:$0xf] }
  0x45   : > { %v326_v9 = vld [vmem:[%s3776_s28 + $0x248] sm:$0xf]  ;;  %323 = vst [vmem:[%s3780_s29 + $0x11c] sm:$0xf] %v322_v7  ;;  %325 = vst [vmem:[%s3780_s29 + $0x120] sm:$0xf] %v324_v8 }
  0x46   : > { %327 = vst [vmem:[%s3780_s29 + $0x124] sm:$0xf] %v326_v9  ;;  %v328_v10 = vld [vmem:[%s3776_s28 + $0x250] sm:$0xf]  ;;  %v330_v11 = vld [vmem:[%s3776_s28 + $0x258] sm:$0xf] }
  0x47   : > { %v332_v12 = vld [vmem:[%s3776_s28 + $0x260] sm:$0xf]  ;;  %329 = vst [vmem:[%s3780_s29 + $0x128] sm:$0xf] %v328_v10  ;;  %331 = vst [vmem:[%s3780_s29 + $0x12c] sm:$0xf] %v330_v11 }
  0x48   : > { %333 = vst [vmem:[%s3780_s29 + $0x130] sm:$0xf] %v332_v12  ;;  %v334_v13 = vld [vmem:[%s3776_s28 + $0x268] sm:$0xf]  ;;  %v336_v14 = vld [vmem:[%s3776_s28 + $0x270] sm:$0xf] }
  0x49   : > { %v338_v15 = vld [vmem:[%s3776_s28 + $0x278] sm:$0xf]  ;;  %335 = vst [vmem:[%s3780_s29 + $0x134] sm:$0xf] %v334_v13  ;;  %337 = vst [vmem:[%s3780_s29 + $0x138] sm:$0xf] %v336_v14 }
  0x4a   : > { %339 = vst [vmem:[%s3780_s29 + $0x13c] sm:$0xf] %v338_v15  ;;  %v340_v16 = vld [vmem:[%s3776_s28 + $0x280] sm:$0xf]  ;;  %v342_v17 = vld [vmem:[%s3776_s28 + $0x288] sm:$0xf] }
  0x4b   : > { %v344_v18 = vld [vmem:[%s3776_s28 + $0x290] sm:$0xf]  ;;  %341 = vst [vmem:[%s3780_s29 + $0x140] sm:$0xf] %v340_v16  ;;  %343 = vst [vmem:[%s3780_s29 + $0x144] sm:$0xf] %v342_v17 }
  0x4c   : > { %345 = vst [vmem:[%s3780_s29 + $0x148] sm:$0xf] %v344_v18  ;;  %v346_v19 = vld [vmem:[%s3776_s28 + $0x298] sm:$0xf]  ;;  %v348_v20 = vld [vmem:[%s3776_s28 + $0x2a0] sm:$0xf] }
  0x4d   : > { %v350_v21 = vld [vmem:[%s3776_s28 + $0x2a8] sm:$0xf]  ;;  %347 = vst [vmem:[%s3780_s29 + $0x14c] sm:$0xf] %v346_v19  ;;  %349 = vst [vmem:[%s3780_s29 + $0x150] sm:$0xf] %v348_v20 }
  0x4e   : > { %351 = vst [vmem:[%s3780_s29 + $0x154] sm:$0xf] %v350_v21  ;;  %v352_v22 = vld [vmem:[%s3776_s28 + $0x2b0] sm:$0xf]  ;;  %v354_v23 = vld [vmem:[%s3776_s28 + $0x2b8] sm:$0xf] }
  0x4f   : > { %v356_v24 = vld [vmem:[%s3776_s28 + $0x2c0] sm:$0xf]  ;;  %353 = vst [vmem:[%s3780_s29 + $0x158] sm:$0xf] %v352_v22  ;;  %355 = vst [vmem:[%s3780_s29 + $0x15c] sm:$0xf] %v354_v23 }
  0x50   : > { %357 = vst [vmem:[%s3780_s29 + $0x160] sm:$0xf] %v356_v24  ;;  %v358_v25 = vld [vmem:[%s3776_s28 + $0x2c8] sm:$0xf]  ;;  %v360_v26 = vld [vmem:[%s3776_s28 + $0x2d0] sm:$0xf] }
  0x51   : > { %v362_v27 = vld [vmem:[%s3776_s28 + $0x2d8] sm:$0xf]  ;;  %359 = vst [vmem:[%s3780_s29 + $0x164] sm:$0xf] %v358_v25  ;;  %361 = vst [vmem:[%s3780_s29 + $0x168] sm:$0xf] %v360_v26 }
  0x52   : > { %363 = vst [vmem:[%s3780_s29 + $0x16c] sm:$0xf] %v362_v27  ;;  %v364_v28 = vld [vmem:[%s3776_s28 + $0x2e0] sm:$0xf]  ;;  %v366_v29 = vld [vmem:[%s3776_s28 + $0x2e8] sm:$0xf] }
  0x53   : > { %v368_v30 = vld [vmem:[%s3776_s28 + $0x2f0] sm:$0xf]  ;;  %365 = vst [vmem:[%s3780_s29 + $0x170] sm:$0xf] %v364_v28  ;;  %367 = vst [vmem:[%s3780_s29 + $0x174] sm:$0xf] %v366_v29 }
  0x54   : > { %369 = vst [vmem:[%s3780_s29 + $0x178] sm:$0xf] %v368_v30  ;;  %v370_v31 = vld [vmem:[%s3776_s28 + $0x2f8] sm:$0xf]  ;;  %v372_v32 = vld [vmem:[%s3776_s28 + $0x300] sm:$0xf] }
  0x55   : > { %v374_v33 = vld [vmem:[%s3776_s28 + $0x308] sm:$0xf]  ;;  %371 = vst [vmem:[%s3780_s29 + $0x17c] sm:$0xf] %v370_v31  ;;  %373 = vst [vmem:[%s3780_s29 + $0x180] sm:$0xf] %v372_v32 }
  0x56   : > { %375 = vst [vmem:[%s3780_s29 + $0x184] sm:$0xf] %v374_v33  ;;  %v376_v34 = vld [vmem:[%s3776_s28 + $0x310] sm:$0xf]  ;;  %v378_v35 = vld [vmem:[%s3776_s28 + $0x318] sm:$0xf] }
  0x57   : > { %v380_v36 = vld [vmem:[%s3776_s28 + $0x320] sm:$0xf]  ;;  %377 = vst [vmem:[%s3780_s29 + $0x188] sm:$0xf] %v376_v34  ;;  %379 = vst [vmem:[%s3780_s29 + $0x18c] sm:$0xf] %v378_v35 }
  0x58   : > { %381 = vst [vmem:[%s3780_s29 + $0x190] sm:$0xf] %v380_v36  ;;  %v382_v37 = vld [vmem:[%s3776_s28 + $0x328] sm:$0xf]  ;;  %v384_v38 = vld [vmem:[%s3776_s28 + $0x330] sm:$0xf] }
  0x59   : > { %v386_v39 = vld [vmem:[%s3776_s28 + $0x338] sm:$0xf]  ;;  %383 = vst [vmem:[%s3780_s29 + $0x194] sm:$0xf] %v382_v37  ;;  %385 = vst [vmem:[%s3780_s29 + $0x198] sm:$0xf] %v384_v38 }
  0x5a   : > { %387 = vst [vmem:[%s3780_s29 + $0x19c] sm:$0xf] %v386_v39  ;;  %v388_v40 = vld [vmem:[%s3776_s28 + $0x340] sm:$0xf]  ;;  %v390_v41 = vld [vmem:[%s3776_s28 + $0x348] sm:$0xf] }
  0x5b   : > { %v392_v42 = vld [vmem:[%s3776_s28 + $0x350] sm:$0xf]  ;;  %389 = vst [vmem:[%s3780_s29 + $0x1a0] sm:$0xf] %v388_v40  ;;  %391 = vst [vmem:[%s3780_s29 + $0x1a4] sm:$0xf] %v390_v41 }
  0x5c   : > { %393 = vst [vmem:[%s3780_s29 + $0x1a8] sm:$0xf] %v392_v42  ;;  %v394_v43 = vld [vmem:[%s3776_s28 + $0x358] sm:$0xf]  ;;  %v396_v44 = vld [vmem:[%s3776_s28 + $0x360] sm:$0xf] }
  0x5d   : > { %v398_v45 = vld [vmem:[%s3776_s28 + $0x368] sm:$0xf]  ;;  %395 = vst [vmem:[%s3780_s29 + $0x1ac] sm:$0xf] %v394_v43  ;;  %397 = vst [vmem:[%s3780_s29 + $0x1b0] sm:$0xf] %v396_v44 }
  0x5e   : > { %399 = vst [vmem:[%s3780_s29 + $0x1b4] sm:$0xf] %v398_v45  ;;  %v400_v46 = vld [vmem:[%s3776_s28 + $0x370] sm:$0xf]  ;;  %v402_v47 = vld [vmem:[%s3776_s28 + $0x378] sm:$0xf] }
  0x5f   : > { %v404_v48 = vld [vmem:[%s3776_s28 + $0x380] sm:$0xf]  ;;  %401 = vst [vmem:[%s3780_s29 + $0x1b8] sm:$0xf] %v400_v46  ;;  %403 = vst [vmem:[%s3780_s29 + $0x1bc] sm:$0xf] %v402_v47 }
  0x60   : > { %405 = vst [vmem:[%s3780_s29 + $0x1c0] sm:$0xf] %v404_v48  ;;  %v406_v49 = vld [vmem:[%s3776_s28 + $0x388] sm:$0xf]  ;;  %v408_v50 = vld [vmem:[%s3776_s28 + $0x390] sm:$0xf] }
  0x61   : > { %v410_v51 = vld [vmem:[%s3776_s28 + $0x398] sm:$0xf]  ;;  %407 = vst [vmem:[%s3780_s29 + $0x1c4] sm:$0xf] %v406_v49  ;;  %409 = vst [vmem:[%s3780_s29 + $0x1c8] sm:$0xf] %v408_v50 }
  0x62   : > { %411 = vst [vmem:[%s3780_s29 + $0x1cc] sm:$0xf] %v410_v51  ;;  %v412_v52 = vld [vmem:[%s3776_s28 + $0x3a0] sm:$0xf]  ;;  %v414_v53 = vld [vmem:[%s3776_s28 + $0x3a8] sm:$0xf] }
  0x63   : > { %v416_v54 = vld [vmem:[%s3776_s28 + $0x3b0] sm:$0xf]  ;;  %413 = vst [vmem:[%s3780_s29 + $0x1d0] sm:$0xf] %v412_v52  ;;  %415 = vst [vmem:[%s3780_s29 + $0x1d4] sm:$0xf] %v414_v53 }
  0x64   : > { %417 = vst [vmem:[%s3780_s29 + $0x1d8] sm:$0xf] %v416_v54  ;;  %v418_v55 = vld [vmem:[%s3776_s28 + $0x3b8] sm:$0xf]  ;;  %v420_v56 = vld [vmem:[%s3776_s28 + $0x3c0] sm:$0xf] }
  0x65   : > { %v422_v57 = vld [vmem:[%s3776_s28 + $0x3c8] sm:$0xf]  ;;  %419 = vst [vmem:[%s3780_s29 + $0x1dc] sm:$0xf] %v418_v55  ;;  %421 = vst [vmem:[%s3780_s29 + $0x1e0] sm:$0xf] %v420_v56 }
  0x66   : > { %423 = vst [vmem:[%s3780_s29 + $0x1e4] sm:$0xf] %v422_v57  ;;  %v424_v58 = vld [vmem:[%s3776_s28 + $0x3d0] sm:$0xf]  ;;  %v426_v59 = vld [vmem:[%s3776_s28 + $0x3d8] sm:$0xf] }
  0x67   : > { %v428_v60 = vld [vmem:[%s3776_s28 + $0x3e0] sm:$0xf]  ;;  %425 = vst [vmem:[%s3780_s29 + $0x1e8] sm:$0xf] %v424_v58  ;;  %427 = vst [vmem:[%s3780_s29 + $0x1ec] sm:$0xf] %v426_v59 }
  0x68   : > { %429 = vst [vmem:[%s3780_s29 + $0x1f0] sm:$0xf] %v428_v60  ;;  %v430_v61 = vld [vmem:[%s3776_s28 + $0x3e8] sm:$0xf]  ;;  %v432_v62 = vld [vmem:[%s3776_s28 + $0x3f0] sm:$0xf] }
  0x69   : > { %v434_v63 = vld [vmem:[%s3776_s28 + $0x3f8] sm:$0xf]  ;;  %431 = vst [vmem:[%s3780_s29 + $0x1f4] sm:$0xf] %v430_v61  ;;  %433 = vst [vmem:[%s3780_s29 + $0x1f8] sm:$0xf] %v432_v62 }
  0x6a   : > { %435 = vst [vmem:[%s3780_s29 + $0x1fc] sm:$0xf] %v434_v63  ;;  %v436_v0 = vld [vmem:[%s3776_s28 + $0x400] sm:$0xf]  ;;  %v438_v1 = vld [vmem:[%s3776_s28 + $0x408] sm:$0xf] }
  0x6b   : > { %v440_v2 = vld [vmem:[%s3776_s28 + $0x410] sm:$0xf]  ;;  %437 = vst [vmem:[%s3780_s29 + $0x200] sm:$0xf] %v436_v0  ;;  %439 = vst [vmem:[%s3780_s29 + $0x204] sm:$0xf] %v438_v1 }
  0x6c   : > { %441 = vst [vmem:[%s3780_s29 + $0x208] sm:$0xf] %v440_v2  ;;  %v442_v3 = vld [vmem:[%s3776_s28 + $0x418] sm:$0xf]  ;;  %v444_v4 = vld [vmem:[%s3776_s28 + $0x420] sm:$0xf] }
  0x6d   : > { %v446_v5 = vld [vmem:[%s3776_s28 + $0x428] sm:$0xf]  ;;  %443 = vst [vmem:[%s3780_s29 + $0x20c] sm:$0xf] %v442_v3  ;;  %445 = vst [vmem:[%s3780_s29 + $0x210] sm:$0xf] %v444_v4 }
  0x6e   : > { %447 = vst [vmem:[%s3780_s29 + $0x214] sm:$0xf] %v446_v5  ;;  %v448_v6 = vld [vmem:[%s3776_s28 + $0x430] sm:$0xf]  ;;  %v450_v7 = vld [vmem:[%s3776_s28 + $0x438] sm:$0xf] }
  0x6f   : > { %v452_v8 = vld [vmem:[%s3776_s28 + $0x440] sm:$0xf]  ;;  %449 = vst [vmem:[%s3780_s29 + $0x218] sm:$0xf] %v448_v6  ;;  %451 = vst [vmem:[%s3780_s29 + $0x21c] sm:$0xf] %v450_v7 }
  0x70   : > { %453 = vst [vmem:[%s3780_s29 + $0x220] sm:$0xf] %v452_v8  ;;  %v454_v9 = vld [vmem:[%s3776_s28 + $0x448] sm:$0xf]  ;;  %v456_v10 = vld [vmem:[%s3776_s28 + $0x450] sm:$0xf] }
  0x71   : > { %v458_v11 = vld [vmem:[%s3776_s28 + $0x458] sm:$0xf]  ;;  %455 = vst [vmem:[%s3780_s29 + $0x224] sm:$0xf] %v454_v9  ;;  %457 = vst [vmem:[%s3780_s29 + $0x228] sm:$0xf] %v456_v10 }
  0x72   : > { %459 = vst [vmem:[%s3780_s29 + $0x22c] sm:$0xf] %v458_v11  ;;  %v460_v12 = vld [vmem:[%s3776_s28 + $0x460] sm:$0xf]  ;;  %v462_v13 = vld [vmem:[%s3776_s28 + $0x468] sm:$0xf] }
  0x73   : > { %v464_v14 = vld [vmem:[%s3776_s28 + $0x470] sm:$0xf]  ;;  %461 = vst [vmem:[%s3780_s29 + $0x230] sm:$0xf] %v460_v12  ;;  %463 = vst [vmem:[%s3780_s29 + $0x234] sm:$0xf] %v462_v13 }
  0x74   : > { %465 = vst [vmem:[%s3780_s29 + $0x238] sm:$0xf] %v464_v14  ;;  %v466_v15 = vld [vmem:[%s3776_s28 + $0x478] sm:$0xf]  ;;  %v468_v16 = vld [vmem:[%s3776_s28 + $0x480] sm:$0xf] }
  0x75   : > { %v470_v17 = vld [vmem:[%s3776_s28 + $0x488] sm:$0xf]  ;;  %467 = vst [vmem:[%s3780_s29 + $0x23c] sm:$0xf] %v466_v15  ;;  %469 = vst [vmem:[%s3780_s29 + $0x240] sm:$0xf] %v468_v16 }
  0x76   : > { %471 = vst [vmem:[%s3780_s29 + $0x244] sm:$0xf] %v470_v17  ;;  %v472_v18 = vld [vmem:[%s3776_s28 + $0x490] sm:$0xf]  ;;  %v474_v19 = vld [vmem:[%s3776_s28 + $0x498] sm:$0xf] }
  0x77   : > { %v476_v20 = vld [vmem:[%s3776_s28 + $0x4a0] sm:$0xf]  ;;  %473 = vst [vmem:[%s3780_s29 + $0x248] sm:$0xf] %v472_v18  ;;  %475 = vst [vmem:[%s3780_s29 + $0x24c] sm:$0xf] %v474_v19 }
  0x78   : > { %477 = vst [vmem:[%s3780_s29 + $0x250] sm:$0xf] %v476_v20  ;;  %v478_v21 = vld [vmem:[%s3776_s28 + $0x4a8] sm:$0xf]  ;;  %v480_v22 = vld [vmem:[%s3776_s28 + $0x4b0] sm:$0xf] }
  0x79   : > { %v482_v23 = vld [vmem:[%s3776_s28 + $0x4b8] sm:$0xf]  ;;  %479 = vst [vmem:[%s3780_s29 + $0x254] sm:$0xf] %v478_v21  ;;  %481 = vst [vmem:[%s3780_s29 + $0x258] sm:$0xf] %v480_v22 }
  0x7a   : > { %483 = vst [vmem:[%s3780_s29 + $0x25c] sm:$0xf] %v482_v23  ;;  %v484_v24 = vld [vmem:[%s3776_s28 + $0x4c0] sm:$0xf]  ;;  %v486_v25 = vld [vmem:[%s3776_s28 + $0x4c8] sm:$0xf] }
  0x7b   : > { %v488_v26 = vld [vmem:[%s3776_s28 + $0x4d0] sm:$0xf]  ;;  %485 = vst [vmem:[%s3780_s29 + $0x260] sm:$0xf] %v484_v24  ;;  %487 = vst [vmem:[%s3780_s29 + $0x264] sm:$0xf] %v486_v25 }
  0x7c   : > { %489 = vst [vmem:[%s3780_s29 + $0x268] sm:$0xf] %v488_v26  ;;  %v490_v27 = vld [vmem:[%s3776_s28 + $0x4d8] sm:$0xf]  ;;  %v492_v28 = vld [vmem:[%s3776_s28 + $0x4e0] sm:$0xf] }
  0x7d   : > { %v494_v29 = vld [vmem:[%s3776_s28 + $0x4e8] sm:$0xf]  ;;  %491 = vst [vmem:[%s3780_s29 + $0x26c] sm:$0xf] %v490_v27  ;;  %493 = vst [vmem:[%s3780_s29 + $0x270] sm:$0xf] %v492_v28 }
  0x7e   : > { %495 = vst [vmem:[%s3780_s29 + $0x274] sm:$0xf] %v494_v29  ;;  %v496_v30 = vld [vmem:[%s3776_s28 + $0x4f0] sm:$0xf]  ;;  %v498_v31 = vld [vmem:[%s3776_s28 + $0x4f8] sm:$0xf] }
  0x7f   : > { %v500_v32 = vld [vmem:[%s3776_s28 + $0x500] sm:$0xf]  ;;  %497 = vst [vmem:[%s3780_s29 + $0x278] sm:$0xf] %v496_v30  ;;  %499 = vst [vmem:[%s3780_s29 + $0x27c] sm:$0xf] %v498_v31 }
  0x80   : > { %501 = vst [vmem:[%s3780_s29 + $0x280] sm:$0xf] %v500_v32  ;;  %v502_v33 = vld [vmem:[%s3776_s28 + $0x508] sm:$0xf]  ;;  %v504_v34 = vld [vmem:[%s3776_s28 + $0x510] sm:$0xf] }
  0x81   : > { %v506_v35 = vld [vmem:[%s3776_s28 + $0x518] sm:$0xf]  ;;  %503 = vst [vmem:[%s3780_s29 + $0x284] sm:$0xf] %v502_v33  ;;  %505 = vst [vmem:[%s3780_s29 + $0x288] sm:$0xf] %v504_v34 }
  0x82   : > { %507 = vst [vmem:[%s3780_s29 + $0x28c] sm:$0xf] %v506_v35  ;;  %v508_v36 = vld [vmem:[%s3776_s28 + $0x520] sm:$0xf]  ;;  %v510_v37 = vld [vmem:[%s3776_s28 + $0x528] sm:$0xf] }
  0x83   : > { %v512_v38 = vld [vmem:[%s3776_s28 + $0x530] sm:$0xf]  ;;  %509 = vst [vmem:[%s3780_s29 + $0x290] sm:$0xf] %v508_v36  ;;  %511 = vst [vmem:[%s3780_s29 + $0x294] sm:$0xf] %v510_v37 }
  0x84   : > { %513 = vst [vmem:[%s3780_s29 + $0x298] sm:$0xf] %v512_v38  ;;  %v514_v39 = vld [vmem:[%s3776_s28 + $0x538] sm:$0xf]  ;;  %v516_v40 = vld [vmem:[%s3776_s28 + $0x540] sm:$0xf] }
  0x85   : > { %v518_v41 = vld [vmem:[%s3776_s28 + $0x548] sm:$0xf]  ;;  %515 = vst [vmem:[%s3780_s29 + $0x29c] sm:$0xf] %v514_v39  ;;  %517 = vst [vmem:[%s3780_s29 + $0x2a0] sm:$0xf] %v516_v40 }
  0x86   : > { %519 = vst [vmem:[%s3780_s29 + $0x2a4] sm:$0xf] %v518_v41  ;;  %v520_v42 = vld [vmem:[%s3776_s28 + $0x550] sm:$0xf]  ;;  %v522_v43 = vld [vmem:[%s3776_s28 + $0x558] sm:$0xf] }
  0x87   : > { %v524_v44 = vld [vmem:[%s3776_s28 + $0x560] sm:$0xf]  ;;  %521 = vst [vmem:[%s3780_s29 + $0x2a8] sm:$0xf] %v520_v42  ;;  %523 = vst [vmem:[%s3780_s29 + $0x2ac] sm:$0xf] %v522_v43 }
  0x88   : > { %525 = vst [vmem:[%s3780_s29 + $0x2b0] sm:$0xf] %v524_v44  ;;  %v526_v45 = vld [vmem:[%s3776_s28 + $0x568] sm:$0xf]  ;;  %v528_v46 = vld [vmem:[%s3776_s28 + $0x570] sm:$0xf] }
  0x89   : > { %v530_v47 = vld [vmem:[%s3776_s28 + $0x578] sm:$0xf]  ;;  %527 = vst [vmem:[%s3780_s29 + $0x2b4] sm:$0xf] %v526_v45  ;;  %529 = vst [vmem:[%s3780_s29 + $0x2b8] sm:$0xf] %v528_v46 }
  0x8a   : > { %531 = vst [vmem:[%s3780_s29 + $0x2bc] sm:$0xf] %v530_v47  ;;  %v532_v48 = vld [vmem:[%s3776_s28 + $0x580] sm:$0xf]  ;;  %v534_v49 = vld [vmem:[%s3776_s28 + $0x588] sm:$0xf] }
  0x8b   : > { %v536_v50 = vld [vmem:[%s3776_s28 + $0x590] sm:$0xf]  ;;  %533 = vst [vmem:[%s3780_s29 + $0x2c0] sm:$0xf] %v532_v48  ;;  %535 = vst [vmem:[%s3780_s29 + $0x2c4] sm:$0xf] %v534_v49 }
  0x8c   : > { %537 = vst [vmem:[%s3780_s29 + $0x2c8] sm:$0xf] %v536_v50  ;;  %v538_v51 = vld [vmem:[%s3776_s28 + $0x598] sm:$0xf]  ;;  %v540_v52 = vld [vmem:[%s3776_s28 + $0x5a0] sm:$0xf] }
  0x8d   : > { %v542_v53 = vld [vmem:[%s3776_s28 + $0x5a8] sm:$0xf]  ;;  %539 = vst [vmem:[%s3780_s29 + $0x2cc] sm:$0xf] %v538_v51  ;;  %541 = vst [vmem:[%s3780_s29 + $0x2d0] sm:$0xf] %v540_v52 }
  0x8e   : > { %543 = vst [vmem:[%s3780_s29 + $0x2d4] sm:$0xf] %v542_v53  ;;  %v544_v54 = vld [vmem:[%s3776_s28 + $0x5b0] sm:$0xf]  ;;  %v546_v55 = vld [vmem:[%s3776_s28 + $0x5b8] sm:$0xf] }
  0x8f   : > { %v548_v56 = vld [vmem:[%s3776_s28 + $0x5c0] sm:$0xf]  ;;  %545 = vst [vmem:[%s3780_s29 + $0x2d8] sm:$0xf] %v544_v54  ;;  %547 = vst [vmem:[%s3780_s29 + $0x2dc] sm:$0xf] %v546_v55 }
  0x90   : > { %549 = vst [vmem:[%s3780_s29 + $0x2e0] sm:$0xf] %v548_v56  ;;  %v550_v57 = vld [vmem:[%s3776_s28 + $0x5c8] sm:$0xf]  ;;  %v552_v58 = vld [vmem:[%s3776_s28 + $0x5d0] sm:$0xf] }
  0x91   : > { %v554_v59 = vld [vmem:[%s3776_s28 + $0x5d8] sm:$0xf]  ;;  %551 = vst [vmem:[%s3780_s29 + $0x2e4] sm:$0xf] %v550_v57  ;;  %553 = vst [vmem:[%s3780_s29 + $0x2e8] sm:$0xf] %v552_v58 }
  0x92   : > { %555 = vst [vmem:[%s3780_s29 + $0x2ec] sm:$0xf] %v554_v59  ;;  %v556_v60 = vld [vmem:[%s3776_s28 + $0x5e0] sm:$0xf]  ;;  %v558_v61 = vld [vmem:[%s3776_s28 + $0x5e8] sm:$0xf] }
  0x93   : > { %v560_v62 = vld [vmem:[%s3776_s28 + $0x5f0] sm:$0xf]  ;;  %557 = vst [vmem:[%s3780_s29 + $0x2f0] sm:$0xf] %v556_v60  ;;  %559 = vst [vmem:[%s3780_s29 + $0x2f4] sm:$0xf] %v558_v61 }
  0x94   : > { %561 = vst [vmem:[%s3780_s29 + $0x2f8] sm:$0xf] %v560_v62  ;;  %v562_v63 = vld [vmem:[%s3776_s28 + $0x5f8] sm:$0xf]  ;;  %v564_v0 = vld [vmem:[%s3776_s28 + $0x600] sm:$0xf] }
  0x95   : > { %v566_v1 = vld [vmem:[%s3776_s28 + $0x608] sm:$0xf]  ;;  %563 = vst [vmem:[%s3780_s29 + $0x2fc] sm:$0xf] %v562_v63  ;;  %565 = vst [vmem:[%s3780_s29 + $0x300] sm:$0xf] %v564_v0 }
  0x96   : > { %567 = vst [vmem:[%s3780_s29 + $0x304] sm:$0xf] %v566_v1  ;;  %v568_v2 = vld [vmem:[%s3776_s28 + $0x610] sm:$0xf]  ;;  %v570_v3 = vld [vmem:[%s3776_s28 + $0x618] sm:$0xf] }
  0x97   : > { %v572_v4 = vld [vmem:[%s3776_s28 + $0x620] sm:$0xf]  ;;  %569 = vst [vmem:[%s3780_s29 + $0x308] sm:$0xf] %v568_v2  ;;  %571 = vst [vmem:[%s3780_s29 + $0x30c] sm:$0xf] %v570_v3 }
  0x98   : > { %573 = vst [vmem:[%s3780_s29 + $0x310] sm:$0xf] %v572_v4  ;;  %v574_v5 = vld [vmem:[%s3776_s28 + $0x628] sm:$0xf]  ;;  %v576_v6 = vld [vmem:[%s3776_s28 + $0x630] sm:$0xf] }
  0x99   : > { %v578_v7 = vld [vmem:[%s3776_s28 + $0x638] sm:$0xf]  ;;  %575 = vst [vmem:[%s3780_s29 + $0x314] sm:$0xf] %v574_v5  ;;  %577 = vst [vmem:[%s3780_s29 + $0x318] sm:$0xf] %v576_v6 }
  0x9a   : > { %579 = vst [vmem:[%s3780_s29 + $0x31c] sm:$0xf] %v578_v7  ;;  %v580_v8 = vld [vmem:[%s3776_s28 + $0x640] sm:$0xf]  ;;  %v582_v9 = vld [vmem:[%s3776_s28 + $0x648] sm:$0xf] }
  0x9b   : > { %v584_v10 = vld [vmem:[%s3776_s28 + $0x650] sm:$0xf]  ;;  %581 = vst [vmem:[%s3780_s29 + $0x320] sm:$0xf] %v580_v8  ;;  %583 = vst [vmem:[%s3780_s29 + $0x324] sm:$0xf] %v582_v9 }
  0x9c   : > { %585 = vst [vmem:[%s3780_s29 + $0x328] sm:$0xf] %v584_v10  ;;  %v586_v11 = vld [vmem:[%s3776_s28 + $0x658] sm:$0xf]  ;;  %v588_v12 = vld [vmem:[%s3776_s28 + $0x660] sm:$0xf] }
  0x9d   : > { %v590_v13 = vld [vmem:[%s3776_s28 + $0x668] sm:$0xf]  ;;  %587 = vst [vmem:[%s3780_s29 + $0x32c] sm:$0xf] %v586_v11  ;;  %589 = vst [vmem:[%s3780_s29 + $0x330] sm:$0xf] %v588_v12 }
  0x9e   : > { %591 = vst [vmem:[%s3780_s29 + $0x334] sm:$0xf] %v590_v13  ;;  %v592_v14 = vld [vmem:[%s3776_s28 + $0x670] sm:$0xf]  ;;  %v594_v15 = vld [vmem:[%s3776_s28 + $0x678] sm:$0xf] }
  0x9f   : > { %v596_v16 = vld [vmem:[%s3776_s28 + $0x680] sm:$0xf]  ;;  %593 = vst [vmem:[%s3780_s29 + $0x338] sm:$0xf] %v592_v14  ;;  %595 = vst [vmem:[%s3780_s29 + $0x33c] sm:$0xf] %v594_v15 }
  0xa0   : > { %597 = vst [vmem:[%s3780_s29 + $0x340] sm:$0xf] %v596_v16  ;;  %v598_v17 = vld [vmem:[%s3776_s28 + $0x688] sm:$0xf]  ;;  %v600_v18 = vld [vmem:[%s3776_s28 + $0x690] sm:$0xf] }
  0xa1   : > { %v602_v19 = vld [vmem:[%s3776_s28 + $0x698] sm:$0xf]  ;;  %599 = vst [vmem:[%s3780_s29 + $0x344] sm:$0xf] %v598_v17  ;;  %601 = vst [vmem:[%s3780_s29 + $0x348] sm:$0xf] %v600_v18 }
  0xa2   : > { %603 = vst [vmem:[%s3780_s29 + $0x34c] sm:$0xf] %v602_v19  ;;  %v604_v20 = vld [vmem:[%s3776_s28 + $0x6a0] sm:$0xf]  ;;  %v606_v21 = vld [vmem:[%s3776_s28 + $0x6a8] sm:$0xf] }
  0xa3   : > { %v608_v22 = vld [vmem:[%s3776_s28 + $0x6b0] sm:$0xf]  ;;  %605 = vst [vmem:[%s3780_s29 + $0x350] sm:$0xf] %v604_v20  ;;  %607 = vst [vmem:[%s3780_s29 + $0x354] sm:$0xf] %v606_v21 }
  0xa4   : > { %609 = vst [vmem:[%s3780_s29 + $0x358] sm:$0xf] %v608_v22  ;;  %v610_v23 = vld [vmem:[%s3776_s28 + $0x6b8] sm:$0xf]  ;;  %v612_v24 = vld [vmem:[%s3776_s28 + $0x6c0] sm:$0xf] }
  0xa5   : > { %v614_v25 = vld [vmem:[%s3776_s28 + $0x6c8] sm:$0xf]  ;;  %611 = vst [vmem:[%s3780_s29 + $0x35c] sm:$0xf] %v610_v23  ;;  %613 = vst [vmem:[%s3780_s29 + $0x360] sm:$0xf] %v612_v24 }
  0xa6   : > { %615 = vst [vmem:[%s3780_s29 + $0x364] sm:$0xf] %v614_v25  ;;  %v616_v26 = vld [vmem:[%s3776_s28 + $0x6d0] sm:$0xf]  ;;  %v618_v27 = vld [vmem:[%s3776_s28 + $0x6d8] sm:$0xf] }
  0xa7   : > { %v620_v28 = vld [vmem:[%s3776_s28 + $0x6e0] sm:$0xf]  ;;  %617 = vst [vmem:[%s3780_s29 + $0x368] sm:$0xf] %v616_v26  ;;  %619 = vst [vmem:[%s3780_s29 + $0x36c] sm:$0xf] %v618_v27 }
  0xa8   : > { %621 = vst [vmem:[%s3780_s29 + $0x370] sm:$0xf] %v620_v28  ;;  %v622_v29 = vld [vmem:[%s3776_s28 + $0x6e8] sm:$0xf]  ;;  %v624_v30 = vld [vmem:[%s3776_s28 + $0x6f0] sm:$0xf] }
  0xa9   : > { %v626_v31 = vld [vmem:[%s3776_s28 + $0x6f8] sm:$0xf]  ;;  %623 = vst [vmem:[%s3780_s29 + $0x374] sm:$0xf] %v622_v29  ;;  %625 = vst [vmem:[%s3780_s29 + $0x378] sm:$0xf] %v624_v30 }
  0xaa   : > { %627 = vst [vmem:[%s3780_s29 + $0x37c] sm:$0xf] %v626_v31  ;;  %v628_v32 = vld [vmem:[%s3776_s28 + $0x700] sm:$0xf]  ;;  %v630_v33 = vld [vmem:[%s3776_s28 + $0x708] sm:$0xf] }
  0xab   : > { %v632_v34 = vld [vmem:[%s3776_s28 + $0x710] sm:$0xf]  ;;  %629 = vst [vmem:[%s3780_s29 + $0x380] sm:$0xf] %v628_v32  ;;  %631 = vst [vmem:[%s3780_s29 + $0x384] sm:$0xf] %v630_v33 }
  0xac   : > { %633 = vst [vmem:[%s3780_s29 + $0x388] sm:$0xf] %v632_v34  ;;  %v634_v35 = vld [vmem:[%s3776_s28 + $0x718] sm:$0xf]  ;;  %v636_v36 = vld [vmem:[%s3776_s28 + $0x720] sm:$0xf] }
  0xad   : > { %v638_v37 = vld [vmem:[%s3776_s28 + $0x728] sm:$0xf]  ;;  %635 = vst [vmem:[%s3780_s29 + $0x38c] sm:$0xf] %v634_v35  ;;  %637 = vst [vmem:[%s3780_s29 + $0x390] sm:$0xf] %v636_v36 }
  0xae   : > { %639 = vst [vmem:[%s3780_s29 + $0x394] sm:$0xf] %v638_v37  ;;  %v640_v38 = vld [vmem:[%s3776_s28 + $0x730] sm:$0xf]  ;;  %v642_v39 = vld [vmem:[%s3776_s28 + $0x738] sm:$0xf] }
  0xaf   : > { %v644_v40 = vld [vmem:[%s3776_s28 + $0x740] sm:$0xf]  ;;  %641 = vst [vmem:[%s3780_s29 + $0x398] sm:$0xf] %v640_v38  ;;  %643 = vst [vmem:[%s3780_s29 + $0x39c] sm:$0xf] %v642_v39 }
  0xb0   : > { %645 = vst [vmem:[%s3780_s29 + $0x3a0] sm:$0xf] %v644_v40  ;;  %v646_v41 = vld [vmem:[%s3776_s28 + $0x748] sm:$0xf]  ;;  %v648_v42 = vld [vmem:[%s3776_s28 + $0x750] sm:$0xf] }
  0xb1   : > { %v650_v43 = vld [vmem:[%s3776_s28 + $0x758] sm:$0xf]  ;;  %647 = vst [vmem:[%s3780_s29 + $0x3a4] sm:$0xf] %v646_v41  ;;  %649 = vst [vmem:[%s3780_s29 + $0x3a8] sm:$0xf] %v648_v42 }
  0xb2   : > { %651 = vst [vmem:[%s3780_s29 + $0x3ac] sm:$0xf] %v650_v43  ;;  %v652_v44 = vld [vmem:[%s3776_s28 + $0x760] sm:$0xf]  ;;  %v654_v45 = vld [vmem:[%s3776_s28 + $0x768] sm:$0xf] }
  0xb3   : > { %v656_v46 = vld [vmem:[%s3776_s28 + $0x770] sm:$0xf]  ;;  %653 = vst [vmem:[%s3780_s29 + $0x3b0] sm:$0xf] %v652_v44  ;;  %655 = vst [vmem:[%s3780_s29 + $0x3b4] sm:$0xf] %v654_v45 }
  0xb4   : > { %657 = vst [vmem:[%s3780_s29 + $0x3b8] sm:$0xf] %v656_v46  ;;  %v658_v47 = vld [vmem:[%s3776_s28 + $0x778] sm:$0xf]  ;;  %v660_v48 = vld [vmem:[%s3776_s28 + $0x780] sm:$0xf] }
  0xb5   : > { %v662_v49 = vld [vmem:[%s3776_s28 + $0x788] sm:$0xf]  ;;  %659 = vst [vmem:[%s3780_s29 + $0x3bc] sm:$0xf] %v658_v47  ;;  %661 = vst [vmem:[%s3780_s29 + $0x3c0] sm:$0xf] %v660_v48 }
  0xb6   : > { %663 = vst [vmem:[%s3780_s29 + $0x3c4] sm:$0xf] %v662_v49  ;;  %v664_v50 = vld [vmem:[%s3776_s28 + $0x790] sm:$0xf]  ;;  %v666_v51 = vld [vmem:[%s3776_s28 + $0x798] sm:$0xf] }
  0xb7   : > { %v668_v52 = vld [vmem:[%s3776_s28 + $0x7a0] sm:$0xf]  ;;  %665 = vst [vmem:[%s3780_s29 + $0x3c8] sm:$0xf] %v664_v50  ;;  %667 = vst [vmem:[%s3780_s29 + $0x3cc] sm:$0xf] %v666_v51 }
  0xb8   : > { %669 = vst [vmem:[%s3780_s29 + $0x3d0] sm:$0xf] %v668_v52  ;;  %v670_v53 = vld [vmem:[%s3776_s28 + $0x7a8] sm:$0xf]  ;;  %v672_v54 = vld [vmem:[%s3776_s28 + $0x7b0] sm:$0xf] }
  0xb9   : > { %v674_v55 = vld [vmem:[%s3776_s28 + $0x7b8] sm:$0xf]  ;;  %671 = vst [vmem:[%s3780_s29 + $0x3d4] sm:$0xf] %v670_v53  ;;  %673 = vst [vmem:[%s3780_s29 + $0x3d8] sm:$0xf] %v672_v54 }
  0xba   : > { %675 = vst [vmem:[%s3780_s29 + $0x3dc] sm:$0xf] %v674_v55  ;;  %v676_v56 = vld [vmem:[%s3776_s28 + $0x7c0] sm:$0xf]  ;;  %v678_v57 = vld [vmem:[%s3776_s28 + $0x7c8] sm:$0xf] }
  0xbb   : > { %v680_v58 = vld [vmem:[%s3776_s28 + $0x7d0] sm:$0xf]  ;;  %677 = vst [vmem:[%s3780_s29 + $0x3e0] sm:$0xf] %v676_v56  ;;  %679 = vst [vmem:[%s3780_s29 + $0x3e4] sm:$0xf] %v678_v57 }
  0xbc   : > { %681 = vst [vmem:[%s3780_s29 + $0x3e8] sm:$0xf] %v680_v58  ;;  %v682_v59 = vld [vmem:[%s3776_s28 + $0x7d8] sm:$0xf]  ;;  %v684_v60 = vld [vmem:[%s3776_s28 + $0x7e0] sm:$0xf] }
  0xbd   : > { %v686_v61 = vld [vmem:[%s3776_s28 + $0x7e8] sm:$0xf]  ;;  %683 = vst [vmem:[%s3780_s29 + $0x3ec] sm:$0xf] %v682_v59  ;;  %685 = vst [vmem:[%s3780_s29 + $0x3f0] sm:$0xf] %v684_v60 }
  0xbe   : > { %687 = vst [vmem:[%s3780_s29 + $0x3f4] sm:$0xf] %v686_v61  ;;  %v688_v62 = vld [vmem:[%s3776_s28 + $0x7f0] sm:$0xf]  ;;  %v690_v63 = vld [vmem:[%s3776_s28 + $0x7f8] sm:$0xf] }
  0xbf   : > { %689 = vst [vmem:[%s3780_s29 + $0x3f8] sm:$0xf] %v688_v62  ;;  %691 = vst [vmem:[%s3780_s29 + $0x3fc] sm:$0xf] %v690_v63 }
  0xc0 PF: > { %p3089_p8 = scmp.ge.s32.totalorder %s3706_s16, 1  ;;  %p1231_p9 = scmp.lt.s32.totalorder %s3706_s16, 3 }
  0xc2   : > { %p1232_p10 = pnand %p3089_p8, %p1231_p9 }
  0xc3   : > { %s1238_s30 = sand.u32 (!%p1232_p10), 1, %s3690_s12   ;;  %v4298_v0 = vld [vmem:[%s4567_s0] sm:$0xff] (!%p1232_p10)  ;;  %v4308_v2 = vld [vmem:[%s4567_s0 + $0x8] sm:$0xff] (!%p1232_p10)  ;;  %p1276_p11 = scmp.lt.s32.totalorder (!%p1232_p10), %s3698_s14, 1 }
  0xc4   : > { %1235 = sbr.rel (%p1232_p10) target bundleno = 571 (0x23b), region = 69  ;;  %v4303_v1 = vld [vmem:[%s4567_s0 + $0x40] sm:$0xff] (!%p1232_p10)  ;;  %s3090_s10 = sshll.u32 (!%p1232_p10), %s1238_s30, 10  ;;  %v4317_v4 = vld [vmem:[%s4567_s0 + $0x48] sm:$0xff] (!%p1232_p10) }
  0xc5   : > { %v3094_v3 = vcombine.high (!%p1232_p10), %v4298_v0, %v4303_v1  ;;  %v3096_v5 = vcombine.high (!%p1232_p10), %v4308_v2, %v4317_v4  ;;  %s4321_s19 = scalar_lea.vmem (!%p1232_p10), [#allocation2], %s3090_s10  ;;  %v1297_v35 = vld [vmem:[%s4567_s0 + $0x80] sm:$0xff] (!%p1232_p10)  ;;  %v1298_v38 = vld [vmem:[%s4567_s0 + $0x88] sm:$0xff] (!%p1232_p10)  ;;  %v3093_v42 = vcombine.low (!%p1232_p10), %v4298_v0, %v4303_v1  ;;  %v3095_v43 = vcombine.low (!%p1232_p10), %v4308_v2, %v4317_v4  ;;  %s3091_s4 = sshll.u32 (!%p1232_p10), %s1238_s30, 4 }
  0xc6   : > { %v3540_v6 = vld [vmem:[%s4321_s19 + $0x40] sm:$0xff] (!%p1232_p10)   ;;  %v3544_v10 = vld [vmem:[%s4321_s19 + $0x48] sm:$0xff] (!%p1232_p10)   ;;  %v3548_v14 = vld [vmem:[%s4321_s19 + $0x50] sm:$0xff] (!%p1232_p10)   ;;  %s1268_s12 = scalar_lea.vmem (!%p1232_p10), [#allocation3], %s3091_s4 }
  0xc7   : > { %2536 = vmatprep.mubr.bf16.mxu0 (!%p1232_p10), %v3094_v3  ;;  %v3541_v7 = vld [vmem:[%s4321_s19 + $0xc0] sm:$0xff] (!%p1232_p10)   ;;  %2585 = vmatprep.mubr.bf16.mxu1 (!%p1232_p10), %v3096_v5  ;;  %v3545_v11 = vld [vmem:[%s4321_s19 + $0xc8] sm:$0xff] (!%p1232_p10)   ;;  %v3549_v15 = vld [vmem:[%s4321_s19 + $0xd0] sm:$0xff] (!%p1232_p10)  }
  0xc8   : > { %3276 = vmatprep.subr.bf16.mxu0 (!%p1232_p10), %v3540_v6  ;;  %v3542_v8 = vld [vmem:[%s4321_s19] sm:$0xff] (!%p1232_p10)   ;;  %3304 = vmatprep.subr.bf16.mxu1 (!%p1232_p10), %v3541_v7  ;;  %v3546_v12 = vld [vmem:[%s4321_s19 + $0x8] sm:$0xff] (!%p1232_p10)   ;;  %v3550_v16 = vld [vmem:[%s4321_s19 + $0x10] sm:$0xff] (!%p1232_p10)  }
  0xc9   : > { %v3543_v9 = vld [vmem:[%s4321_s19 + $0x80] sm:$0xff] (!%p1232_p10)   ;;  %3277 = vmatpush3.bf16.msra.mxu0 (!%p1232_p10), %v3542_v8  ;;  %v3547_v13 = vld [vmem:[%s4321_s19 + $0x88] sm:$0xff] (!%p1232_p10)   ;;  %v3551_v17 = vld [vmem:[%s4321_s19 + $0x90] sm:$0xff] (!%p1232_p10)  }
  0xca   : > { %3305 = vmatpush3.bf16.msra.mxu1 (!%p1232_p10), %v3543_v9  ;;  %3278 = vmatprep.subr.bf16.mxu0 (!%p1232_p10), %v3544_v10  ;;  %v3552_v18 = vld [vmem:[%s4321_s19 + $0x58] sm:$0xff] (!%p1232_p10)   ;;  %v3556_v22 = vld [vmem:[%s4321_s19 + $0x60] sm:$0xff] (!%p1232_p10)   ;;  %v3560_v26 = vld [vmem:[%s4321_s19 + $0x68] sm:$0xff] (!%p1232_p10)  }
  0xcb   : > { %3306 = vmatprep.subr.bf16.mxu1 %v3545_v11  ;;  %v3553_v19 = vld [vmem:[%s4321_s19 + $0xd8] sm:$0xff]   ;;  %v3557_v23 = vld [vmem:[%s4321_s19 + $0xe0] sm:$0xff]   ;;  %v3561_v27 = vld [vmem:[%s4321_s19 + $0xe8] sm:$0xff]   ;;  %s1277_s26 = scalar_select %p1276_p11, %s3698_s14, 1 }
  0xcc   : > { %v3554_v20 = vld [vmem:[%s4321_s19 + $0x18] sm:$0xff]   ;;  %v3558_v24 = vld [vmem:[%s4321_s19 + $0x20] sm:$0xff]   ;;  %v3562_v28 = vld [vmem:[%s4321_s19 + $0x28] sm:$0xff]   ;;  %s3258_s30 = sshll.u32 (%p3763_p6), %s3698_s14, 2 }
  0xcd   : > { %3279 = vmatpush3.bf16.msra.mxu0 %v3546_v12  ;;  %v3555_v21 = vld [vmem:[%s4321_s19 + $0x98] sm:$0xff]   ;;  %v3559_v25 = vld [vmem:[%s4321_s19 + $0xa0] sm:$0xff]   ;;  %v3563_v29 = vld [vmem:[%s4321_s19 + $0xa8] sm:$0xff]   ;;  %s1278_s29 = scalar_lea.vmem %s4569_s2, %s1277_s26  ;;  %s2939_s7 = scalar_lea.vmem (%p3763_p6), %s4570_s3, %s3258_s30 }
  0xce   : > { %3307 = vmatpush3.bf16.msra.mxu1 %v3547_v13  ;;  %3280 = vmatprep.subr.bf16.mxu0 %v3548_v14  ;;  %v3564_v30 = vld [vmem:[%s4321_s19 + $0x70] sm:$0xff]   ;;  %v3568_v34 = vld [vmem:[%s4321_s19 + $0x78] sm:$0xff]   ;;  %v1305_v36 = vld [vmem:[%s4567_s0 + $0xc0] sm:$0xff] }
  0xcf   : > { %3308 = vmatprep.subr.bf16.mxu1 %v3549_v15  ;;  %v3565_v31 = vld [vmem:[%s4321_s19 + $0xf0] sm:$0xff]   ;;  %v3569_v37 = vld [vmem:[%s4321_s19 + $0xf8] sm:$0xff]   ;;  %v1306_v39 = vld [vmem:[%s4567_s0 + $0xc8] sm:$0xff]  ;;  %v3110_v46 = vcombine.high %v1297_v35, %v1305_v36  ;;  %v3109_v54 = vcombine.low %v1297_v35, %v1305_v36 }
  0xd0   : > { %v3566_v32 = vld [vmem:[%s4321_s19 + $0x30] sm:$0xff]   ;;  %v3570_v40 = vld [vmem:[%s4321_s19 + $0x38] sm:$0xff]   ;;  %v3572_v44 = vld [vmem:[%s4321_s19 + $0x140] sm:$0xff]   ;;  %v3112_v48 = vcombine.high %v1298_v38, %v1306_v39  ;;  %v3111_v56 = vcombine.low %v1298_v38, %v1306_v39 }
  0xd1   : > { %3281 = vmatpush3.bf16.msra.mxu0 %v3550_v16  ;;  %v3567_v33 = vld [vmem:[%s4321_s19 + $0xb0] sm:$0xff]   ;;  %v3571_v41 = vld [vmem:[%s4321_s19 + $0xb8] sm:$0xff]   ;;  %v3573_v45 = vld [vmem:[%s4321_s19 + $0x1c0] sm:$0xff]  }
  0xd2   : > { %3309 = vmatpush3.bf16.msra.mxu1 %v3551_v17  ;;  %3282 = vmatprep.subr.bf16.mxu0 %v3552_v18  ;;  %v3574_v47 = vld [vmem:[%s4321_s19 + $0x100] sm:$0xff]   ;;  %v3576_v50 = vld [vmem:[%s4321_s19 + $0x148] sm:$0xff]   ;;  %v3580_v55 = vld [vmem:[%s4321_s19 + $0x150] sm:$0xff]  }
  0xd3   : > { %3310 = vmatprep.subr.bf16.mxu1 %v3553_v19  ;;  %v3575_v49 = vld [vmem:[%s4321_s19 + $0x180] sm:$0xff]   ;;  %v3577_v51 = vld [vmem:[%s4321_s19 + $0x1c8] sm:$0xff]   ;;  %v3581_v57 = vld [vmem:[%s4321_s19 + $0x1d0] sm:$0xff]  }
  0xd4   : > { %v3578_v52 = vld [vmem:[%s4321_s19 + $0x108] sm:$0xff]   ;;  %v3582_v58 = vld [vmem:[%s4321_s19 + $0x110] sm:$0xff]   ;;  %v3584_v60 = vld [vmem:[%s4321_s19 + $0x158] sm:$0xff]  }
  0xd5   : > { %3283 = vmatpush3.bf16.msra.mxu0 %v3554_v20  ;;  %v3579_v53 = vld [vmem:[%s4321_s19 + $0x188] sm:$0xff]   ;;  %v3583_v59 = vld [vmem:[%s4321_s19 + $0x190] sm:$0xff]   ;;  %v3585_v61 = vld [vmem:[%s4321_s19 + $0x1d8] sm:$0xff]  }
  0xd6   : > { %3311 = vmatpush3.bf16.msra.mxu1 %v3555_v21  ;;  %3284 = vmatprep.subr.bf16.mxu0 %v3556_v22  ;;  %v3586_v62 = vld [vmem:[%s4321_s19 + $0x118] sm:$0xff]   ;;  %v3588_v0 = vld [vmem:[%s4321_s19 + $0x160] sm:$0xff]   ;;  %v3592_v4 = vld [vmem:[%s4321_s19 + $0x168] sm:$0xff]  }
  0xd7   : > { %3312 = vmatprep.subr.bf16.mxu1 %v3557_v23  ;;  %v3587_v63 = vld [vmem:[%s4321_s19 + $0x198] sm:$0xff]   ;;  %v3589_v1 = vld [vmem:[%s4321_s19 + $0x1e0] sm:$0xff]   ;;  %v3593_v5 = vld [vmem:[%s4321_s19 + $0x1e8] sm:$0xff]  }
  0xd8   : > { %v3590_v2 = vld [vmem:[%s4321_s19 + $0x120] sm:$0xff]   ;;  %v3594_v6 = vld [vmem:[%s4321_s19 + $0x128] sm:$0xff]   ;;  %v3596_v8 = vld [vmem:[%s4321_s19 + $0x170] sm:$0xff]  }
  0xd9   : > { %3285 = vmatpush3.bf16.msra.mxu0 %v3558_v24  ;;  %v3591_v3 = vld [vmem:[%s4321_s19 + $0x1a0] sm:$0xff]   ;;  %v3595_v7 = vld [vmem:[%s4321_s19 + $0x1a8] sm:$0xff]   ;;  %v3597_v9 = vld [vmem:[%s4321_s19 + $0x1f0] sm:$0xff]  }
  0xda   : > { %3313 = vmatpush3.bf16.msra.mxu1 %v3559_v25  ;;  %3286 = vmatprep.subr.bf16.mxu0 %v3560_v26  ;;  %v3598_v10 = vld [vmem:[%s4321_s19 + $0x130] sm:$0xff]   ;;  %v3600_v12 = vld [vmem:[%s4321_s19 + $0x178] sm:$0xff]   ;;  %v3604_v24 = vld [vmem:[%s4321_s19 + $0x240] sm:$0xff]  }
  0xdb   : > { %3314 = vmatprep.subr.bf16.mxu1 %v3561_v27  ;;  %v3599_v11 = vld [vmem:[%s4321_s19 + $0x1b0] sm:$0xff]   ;;  %v3601_v14 = vld [vmem:[%s4321_s19 + $0x1f8] sm:$0xff]   ;;  %v3605_v25 = vld [vmem:[%s4321_s19 + $0x2c0] sm:$0xff]  }
  0xdc   : > { %v1283_v13 = vld [vmem:[%s4567_s0 + $0x10] sm:$0xff]  ;;  %v3602_v15 = vld [vmem:[%s4321_s19 + $0x138] sm:$0xff]   ;;  %v3606_v26 = vld [vmem:[%s4321_s19 + $0x200] sm:$0xff]  }
  0xdd   : > { %3287 = vmatpush3.bf16.msra.mxu0 %v3562_v28  ;;  %v3603_v16 = vld [vmem:[%s4321_s19 + $0x1b8] sm:$0xff]   ;;  %v1291_v17 = vld [vmem:[%s4567_s0 + $0x50] sm:$0xff]  ;;  %v3607_v27 = vld [vmem:[%s4321_s19 + $0x280] sm:$0xff]  }
  0xde   : > { %3315 = vmatpush3.bf16.msra.mxu1 %v3563_v29  ;;  %3288 = vmatprep.subr.bf16.mxu0 %v3564_v30  ;;  %v1284_v18 = vld [vmem:[%s4567_s0 + $0x18] sm:$0xff]  ;;  %v3097_v20 = vcombine.low %v1283_v13, %v1291_v17  ;;  %v3098_v21 = vcombine.high %v1283_v13, %v1291_v17  ;;  %v3608_v28 = vld [vmem:[%s4321_s19 + $0x248] sm:$0xff]   ;;  %v3612_v36 = vld [vmem:[%s4321_s19 + $0x250] sm:$0xff]  }
  0xdf   : > { %3316 = vmatprep.subr.bf16.mxu1 %v3565_v31  ;;  %v1292_v19 = vld [vmem:[%s4567_s0 + $0x58] sm:$0xff]  ;;  %v3609_v29 = vld [vmem:[%s4321_s19 + $0x2c8] sm:$0xff]   ;;  %v1309_v17 = vld [vmem:[%s4567_s0 + $0xe0] sm:$0xff] }
  0xe0   : > { %v3099_v22 = vcombine.low %v1284_v18, %v1292_v19  ;;  %v3100_v23 = vcombine.high %v1284_v18, %v1292_v19  ;;  %v3610_v30 = vld [vmem:[%s4321_s19 + $0x208] sm:$0xff]   ;;  %v1300_v38 = vld [vmem:[%s4567_s0 + $0x98] sm:$0xff] }
  0xe1   : > { %3289 = vmatpush3.bf16.msra.mxu0 %v3566_v32  ;;  %v3611_v31 = vld [vmem:[%s4321_s19 + $0x288] sm:$0xff]   ;;  %v1299_v32 = vld [vmem:[%s4567_s0 + $0x90] sm:$0xff]  ;;  %v1308_v39 = vld [vmem:[%s4567_s0 + $0xd8] sm:$0xff] }
  0xe2   : > { %3317 = vmatpush3.bf16.msra.mxu1 %v3567_v33  ;;  %3290 = vmatprep.subr.bf16.mxu0 %v3568_v34  ;;  %v1307_v33 = vld [vmem:[%s4567_s0 + $0xd0] sm:$0xff]  ;;  %v3641_v13 = vld [vmem:[%s4321_s19 + $0x3c8] sm:$0xff]  }
  0xe3   : > { %3318 = vmatprep.subr.bf16.mxu1 %v3569_v37  ;;  %v3114_v34 = vcombine.high %v1299_v32, %v1307_v33  ;;  %v3113_v35 = vcombine.low %v1299_v32, %v1307_v33  ;;  %v3613_v37 = vld [vmem:[%s4321_s19 + $0x2d0] sm:$0xff]   ;;  %v3652_v32 = vld [vmem:[%s4321_s19 + $0x360] sm:$0xff]  }
  0xe4   : > { %v3653_v33 = vld [vmem:[%s4321_s19 + $0x3e0] sm:$0xff]  }
  0xe5   : > { %3291 = vmatpush3.bf16.msra.mxu0 %v3570_v40  ;;  %v3116_v40 = vcombine.high %v1300_v38, %v1308_v39 }
  0xe6   : > { %3319 = vmatpush3.bf16.msra.mxu1 %v3571_v41  ;;  %3332 = vmatprep.subr.bf16.mxu0 %v3572_v44  ;;  %v3614_v41 = vld [vmem:[%s4321_s19 + $0x210] sm:$0xff]   ;;  %v3616_v44 = vld [vmem:[%s4321_s19 + $0x258] sm:$0xff]  }
  0xe7   : > { %3360 = vmatprep.subr.bf16.mxu1 %v3573_v45  ;;  %v3617_v45 = vld [vmem:[%s4321_s19 + $0x2d8] sm:$0xff]  }
  0xe8   : > { %2537 = vmatmul.mubr.bf16.vlgmr.msra.gmra.mrb[0].mxu0 %v3093_v42  ;;  %v3115_v42 = vcombine.low %v1300_v38, %v1308_v39  ;;  %v3658_v38 = vld [vmem:[%s4321_s19 + $0x328] sm:$0xff]  }
  0xe9   : > { %2586 = vmatmul.mubr.bf16.vlgmr.msra.gmra.mrb[0].mxu1 %v3095_v43  ;;  %3333 = vmatpush3.bf16.msra.mxu0 %v3574_v47  ;;  %v3615_v43 = vld [vmem:[%s4321_s19 + $0x290] sm:$0xff]   ;;  %v3619_v47 = vld [vmem:[%s4321_s19 + $0x298] sm:$0xff]   ;;  %v3659_v39 = vld [vmem:[%s4321_s19 + $0x3a8] sm:$0xff]  }
  0xea   : > { %3361 = vmatpush3.bf16.msra.mxu1 %v3575_v49  ;;  %2544 = vmatprep.mubr.bf16.mxu0 %v3110_v46  ;;  %v3618_v46 = vld [vmem:[%s4321_s19 + $0x218] sm:$0xff]   ;;  %v3621_v49 = vld [vmem:[%s4321_s19 + $0x2e0] sm:$0xff]  }
  0xeb   : > { %3334 = vmatprep.subr.bf16.mxu0 %v3576_v50  ;;  %2593 = vmatprep.mubr.bf16.mxu1 %v3112_v48  ;;  %v3620_v48 = vld [vmem:[%s4321_s19 + $0x260] sm:$0xff]  }
  0xec   : > { %3362 = vmatprep.subr.bf16.mxu1 %v3577_v51  ;;  %v3622_v50 = vld [vmem:[%s4321_s19 + $0x220] sm:$0xff]  }
  0xed   : > { %3335 = vmatpush3.bf16.msra.mxu0 %v3578_v52  ;;  %v3623_v51 = vld [vmem:[%s4321_s19 + $0x2a0] sm:$0xff]   ;;  %v3624_v52 = vld [vmem:[%s4321_s19 + $0x268] sm:$0xff]  }
  0xee   : > { %3363 = vmatpush3.bf16.msra.mxu1 %v3579_v53  ;;  %3336 = vmatprep.subr.bf16.mxu0 %v3580_v55  ;;  %v3625_v53 = vld [vmem:[%s4321_s19 + $0x2e8] sm:$0xff]  }
  0xef   : > { %3364 = vmatprep.subr.bf16.mxu1 %v3581_v57  ;;  %v3627_v55 = vld [vmem:[%s4321_s19 + $0x2a8] sm:$0xff]   ;;  %v3629_v57 = vld [vmem:[%s4321_s19 + $0x2f0] sm:$0xff]  }
  0xf0   : > { %2545 = vmatmul.mubr.bf16.gmra.mrb[4].mxu0 %v3109_v54  ;;  %v3626_v54 = vld [vmem:[%s4321_s19 + $0x228] sm:$0xff]  }
  0xf1   : > { %3337 = vmatpush3.bf16.msra.mxu0 %v3582_v58  ;;  %2594 = vmatmul.mubr.bf16.gmra.mrb[4].mxu1 %v3111_v56  ;;  %v3628_v56 = vld [vmem:[%s4321_s19 + $0x270] sm:$0xff]  }
  0xf2   : > { %3365 = vmatpush3.bf16.msra.mxu1 %v3583_v59  ;;  %3338 = vmatprep.subr.bf16.mxu0 %v3584_v60  ;;  %v3630_v58 = vld [vmem:[%s4321_s19 + $0x230] sm:$0xff]   ;;  %v3632_v60 = vld [vmem:[%s4321_s19 + $0x278] sm:$0xff]  }
  0xf3   : > { %3366 = vmatprep.subr.bf16.mxu1 %v3585_v61  ;;  %2634 = vmatprep.mubr.bf16.mxu0 %v3098_v21  ;;  %v3631_v59 = vld [vmem:[%s4321_s19 + $0x2b0] sm:$0xff]   ;;  %v3633_v61 = vld [vmem:[%s4321_s19 + $0x2f8] sm:$0xff]  }
  0xf4   : > { %2683 = vmatprep.mubr.bf16.mxu1 %v3100_v23  ;;  %v3645_v21 = vld [vmem:[%s4321_s19 + $0x3d0] sm:$0xff]   ;;  %v1310_v23 = vld [vmem:[%s4567_s0 + $0xe8] sm:$0xff] }
  0xf5   : > { %3339 = vmatpush3.bf16.msra.mxu0 %v3586_v62  ;;  %v3634_v62 = vld [vmem:[%s4321_s19 + $0x238] sm:$0xff]  }
  0xf6   : > { %3367 = vmatpush3.bf16.msra.mxu1 %v3587_v63  ;;  %3340 = vmatprep.subr.bf16.mxu0 %v3588_v0  ;;  %v3635_v63 = vld [vmem:[%s4321_s19 + $0x2b8] sm:$0xff]   ;;  %v1285_v0 = vld [vmem:[%s4567_s0 + $0x20] sm:$0xff] }
  0xf7   : > { %3368 = vmatprep.subr.bf16.mxu1 %v3589_v1  ;;  %v1293_v1 = vld [vmem:[%s4567_s0 + $0x60] sm:$0xff] }
  0xf9   : > { %3341 = vmatpush3.bf16.msra.mxu0 %v3590_v2  ;;  %v3101_v2 = vcombine.low %v1285_v0, %v1293_v1 }
  0xfa   : > { %3369 = vmatpush3.bf16.msra.mxu1 %v3591_v3  ;;  %3342 = vmatprep.subr.bf16.mxu0 %v3592_v4  ;;  %v3102_v3 = vcombine.high %v1285_v0, %v1293_v1  ;;  %v1286_v4 = vld [vmem:[%s4567_s0 + $0x28] sm:$0xff] }
  0xfb   : > { %3370 = vmatprep.subr.bf16.mxu1 %v3593_v5  ;;  %v1294_v5 = vld [vmem:[%s4567_s0 + $0x68] sm:$0xff] }
  0xfd   : > { %3343 = vmatpush3.bf16.msra.mxu0 %v3594_v6  ;;  %v3103_v6 = vcombine.low %v1286_v4, %v1294_v5 }
  0xfe   : > { %3371 = vmatpush3.bf16.msra.mxu1 %v3595_v7  ;;  %3344 = vmatprep.subr.bf16.mxu0 %v3596_v8  ;;  %v3104_v7 = vcombine.high %v1286_v4, %v1294_v5  ;;  %v3636_v8 = vld [vmem:[%s4321_s19 + $0x340] sm:$0xff]  }
  0xff   : > { %3372 = vmatprep.subr.bf16.mxu1 %v3597_v9  ;;  %v3637_v9 = vld [vmem:[%s4321_s19 + $0x3c0] sm:$0xff]  }
 0x101   : > { %3345 = vmatpush3.bf16.msra.mxu0 %v3598_v10  ;;  %v3638_v10 = vld [vmem:[%s4321_s19 + $0x300] sm:$0xff]  }
 0x102   : > { %3373 = vmatpush3.bf16.msra.mxu1 %v3599_v11  ;;  %3346 = vmatprep.subr.bf16.mxu0 %v3600_v12  ;;  %v3639_v11 = vld [vmem:[%s4321_s19 + $0x380] sm:$0xff]   ;;  %v3640_v12 = vld [vmem:[%s4321_s19 + $0x348] sm:$0xff]  }
 0x103   : > { %3374 = vmatprep.subr.bf16.mxu1 %v3601_v14  ;;  %v3642_v14 = vld [vmem:[%s4321_s19 + $0x308] sm:$0xff]  }
 0x105   : > { %3347 = vmatpush3.bf16.msra.mxu0 %v3602_v15  ;;  %v3643_v15 = vld [vmem:[%s4321_s19 + $0x388] sm:$0xff]  }
 0x106   : > { %3375 = vmatpush3.bf16.msra.mxu1 %v3603_v16  ;;  %3388 = vmatprep.subr.bf16.mxu0 %v3604_v24  ;;  %v1301_v16 = vld [vmem:[%s4567_s0 + $0xa0] sm:$0xff] }
 0x107   : > { %3416 = vmatprep.subr.bf16.mxu1 %v3605_v25  ;;  %v3118_v18 = vcombine.high %v1301_v16, %v1309_v17  ;;  %v3117_v19 = vcombine.low %v1301_v16, %v1309_v17  ;;  %v3646_v25 = vld [vmem:[%s4321_s19 + $0x310] sm:$0xff]  }
 0x108   : > { %2635 = vmatmul.mubr.bf16.vlgmr.msra.gmra.mrb[8].mxu0 %v3097_v20  ;;  %v3644_v20 = vld [vmem:[%s4321_s19 + $0x350] sm:$0xff]  }
 0x109   : > { %2684 = vmatmul.mubr.bf16.vlgmr.msra.gmra.mrb[8].mxu1 %v3099_v22  ;;  %3389 = vmatpush3.bf16.msra.mxu0 %v3606_v26  ;;  %v1302_v22 = vld [vmem:[%s4567_s0 + $0xa8] sm:$0xff] }
 0x10a   : > { %3417 = vmatpush3.bf16.msra.mxu1 %v3607_v27  ;;  %3390 = vmatprep.subr.bf16.mxu0 %v3608_v28  ;;  %v3120_v24 = vcombine.high %v1302_v22, %v1310_v23  ;;  %v3119_v26 = vcombine.low %v1302_v22, %v1310_v23  ;;  %v3647_v27 = vld [vmem:[%s4321_s19 + $0x390] sm:$0xff]   ;;  %v3648_v28 = vld [vmem:[%s4321_s19 + $0x358] sm:$0xff]  }
 0x10b   : > { %3418 = vmatprep.subr.bf16.mxu1 %v3609_v29  ;;  %2642 = vmatprep.mubr.bf16.mxu0 %v3114_v34  ;;  %v3649_v29 = vld [vmem:[%s4321_s19 + $0x3d8] sm:$0xff]   ;;  %v3654_v34 = vld [vmem:[%s4321_s19 + $0x320] sm:$0xff]  }
 0x10c   : > { %2691 = vmatprep.mubr.bf16.mxu1 %v3116_v40  ;;  %v3660_v40 = vld [vmem:[%s4321_s19 + $0x370] sm:$0xff]  }
 0x10d   : > { %3391 = vmatpush3.bf16.msra.mxu0 %v3610_v30  ;;  %v3650_v30 = vld [vmem:[%s4321_s19 + $0x318] sm:$0xff]  }
 0x10e   : > { %3419 = vmatpush3.bf16.msra.mxu1 %v3611_v31  ;;  %3392 = vmatprep.subr.bf16.mxu0 %v3612_v36  ;;  %v3651_v31 = vld [vmem:[%s4321_s19 + $0x398] sm:$0xff]   ;;  %v3656_v36 = vld [vmem:[%s4321_s19 + $0x368] sm:$0xff]  }
 0x10f   : > { %3420 = vmatprep.subr.bf16.mxu1 %v3613_v37  ;;  %v3657_v37 = vld [vmem:[%s4321_s19 + $0x3e8] sm:$0xff]  }
 0x110   : > { %2643 = vmatmul.mubr.bf16.gmra.mrb[12].mxu0 %v3113_v35  ;;  %v3655_v35 = vld [vmem:[%s4321_s19 + $0x3a0] sm:$0xff]  }
 0x111   : > { %3393 = vmatpush3.bf16.msra.mxu0 %v3614_v41  ;;  %2692 = vmatmul.mubr.bf16.gmra.mrb[12].mxu1 %v3115_v42  ;;  %v3661_v41 = vld [vmem:[%s4321_s19 + $0x3f0] sm:$0xff]  }
 0x112   : > { %3421 = vmatpush3.bf16.msra.mxu1 %v3615_v43  ;;  %3394 = vmatprep.subr.bf16.mxu0 %v3616_v44  ;;  %v3662_v42 = vld [vmem:[%s4321_s19 + $0x330] sm:$0xff]   ;;  %v3664_v44 = vld [vmem:[%s4321_s19 + $0x378] sm:$0xff]  }
 0x113   : > { %3422 = vmatprep.subr.bf16.mxu1 %v3617_v45  ;;  %2732 = vmatprep.mubr.bf16.mxu0 %v3102_v3  ;;  %v3663_v43 = vld [vmem:[%s4321_s19 + $0x3b0] sm:$0xff]   ;;  %v3665_v45 = vld [vmem:[%s4321_s19 + $0x3f8] sm:$0xff]  }
 0x114   : > { %2781 = vmatprep.mubr.bf16.mxu1 %v3104_v7 }
 0x115   : > { %3395 = vmatpush3.bf16.msra.mxu0 %v3618_v46  ;;  %v3666_v46 = vld [vmem:[%s4321_s19 + $0x338] sm:$0xff]  }
 0x116   : > { %3423 = vmatpush3.bf16.msra.mxu1 %v3619_v47  ;;  %3396 = vmatprep.subr.bf16.mxu0 %v3620_v48  ;;  %v3667_v47 = vld [vmem:[%s4321_s19 + $0x3b8] sm:$0xff]   ;;  %v1287_v48 = vld [vmem:[%s4567_s0 + $0x30] sm:$0xff] }
 0x117   : > { %3424 = vmatprep.subr.bf16.mxu1 %v3621_v49  ;;  %v1295_v49 = vld [vmem:[%s4567_s0 + $0x70] sm:$0xff] }
 0x119   : > { %3397 = vmatpush3.bf16.msra.mxu0 %v3622_v50  ;;  %v1288_v50 = vld [vmem:[%s4567_s0 + $0x38] sm:$0xff] }
 0x11a   : > { %3425 = vmatpush3.bf16.msra.mxu1 %v3623_v51  ;;  %3398 = vmatprep.subr.bf16.mxu0 %v3624_v52  ;;  %v3105_v51 = vcombine.low %v1287_v48, %v1295_v49  ;;  %v3106_v52 = vcombine.high %v1287_v48, %v1295_v49 }
 0x11b   : > { %3426 = vmatprep.subr.bf16.mxu1 %v3625_v53  ;;  %v1296_v53 = vld [vmem:[%s4567_s0 + $0x78] sm:$0xff] }
 0x11d   : > { %3399 = vmatpush3.bf16.msra.mxu0 %v3626_v54  ;;  %v1303_v54 = vld [vmem:[%s4567_s0 + $0xb0] sm:$0xff] }
 0x11e   : > { %3427 = vmatpush3.bf16.msra.mxu1 %v3627_v55  ;;  %3400 = vmatprep.subr.bf16.mxu0 %v3628_v56  ;;  %v1311_v55 = vld [vmem:[%s4567_s0 + $0xf0] sm:$0xff]  ;;  %v3107_v56 = vcombine.low %v1288_v50, %v1296_v53 }
 0x11f   : > { %3428 = vmatprep.subr.bf16.mxu1 %v3629_v57  ;;  %v3108_v57 = vcombine.high %v1288_v50, %v1296_v53 }
 0x121   : > { %3401 = vmatpush3.bf16.msra.mxu0 %v3630_v58  ;;  %v3122_v58 = vcombine.high %v1303_v54, %v1311_v55 }
 0x122   : > { %3429 = vmatpush3.bf16.msra.mxu1 %v3631_v59  ;;  %3402 = vmatprep.subr.bf16.mxu0 %v3632_v60  ;;  %v1304_v59 = vld [vmem:[%s4567_s0 + $0xb8] sm:$0xff] }
 0x123   : > { %3430 = vmatprep.subr.bf16.mxu1 %v3633_v61  ;;  %v1312_v60 = vld [vmem:[%s4567_s0 + $0xf8] sm:$0xff] }
 0x124   : > { %v3124_v61 = vcombine.high %v1304_v59, %v1312_v60 }
 0x125   : > { %3403 = vmatpush3.bf16.msra.mxu0 %v3634_v62  ;;  %v3121_v62 = vcombine.low %v1303_v54, %v1311_v55 }
 0x126   : > { %3431 = vmatpush3.bf16.msra.mxu1 %v3635_v63  ;;  %3444 = vmatprep.subr.bf16.mxu0 %v3636_v8  ;;  %v3123_v63 = vcombine.low %v1304_v59, %v1312_v60 }
 0x127   : > { %3472 = vmatprep.subr.bf16.mxu1 %v3637_v9 }
 0x128   : > { %2733 = vmatmul.mubr.bf16.vlgmr.msra.gmra.mrb[16].mxu0 %v3101_v2  ;;  %v3092_v2 = vld [vmem:[%s1278_s29] ss:$0 sm:$0xff] }
 0x129   : > { %2782 = vmatmul.mubr.bf16.vlgmr.msra.gmra.mrb[16].mxu1 %v3103_v6  ;;  %3445 = vmatpush3.bf16.msra.mxu0 %v3638_v10 }
 0x12a   : > { %3473 = vmatpush3.bf16.msra.mxu1 %v3639_v11  ;;  %3446 = vmatprep.subr.bf16.mxu0 %v3640_v12 }
 0x12b   : > { %3474 = vmatprep.subr.bf16.mxu1 %v3641_v13  ;;  %2740 = vmatprep.mubr.bf16.mxu0 %v3118_v18 }
 0x12c   : > { %2789 = vmatprep.mubr.bf16.mxu1 %v3120_v24 }
 0x12d   : > { %3447 = vmatpush3.bf16.msra.mxu0 %v3642_v14 }
 0x12e   : > { %3475 = vmatpush3.bf16.msra.mxu1 %v3643_v15  ;;  %3448 = vmatprep.subr.bf16.mxu0 %v3644_v20 }
 0x12f   : > { %3476 = vmatprep.subr.bf16.mxu1 %v3645_v21 }
 0x130   : > { %2741 = vmatmul.mubr.bf16.gmra.mrb[20].mxu0 %v3117_v19 }
 0x131   : > { %3449 = vmatpush3.bf16.msra.mxu0 %v3646_v25  ;;  %2790 = vmatmul.mubr.bf16.gmra.mrb[20].mxu1 %v3119_v26 }
 0x132   : > { %3477 = vmatpush3.bf16.msra.mxu1 %v3647_v27  ;;  %3450 = vmatprep.subr.bf16.mxu0 %v3648_v28 }
 0x133   : > { %3478 = vmatprep.subr.bf16.mxu1 %v3649_v29  ;;  %2830 = vmatprep.mubr.bf16.mxu0 %v3106_v52 }
 0x134   : > { %2879 = vmatprep.mubr.bf16.mxu1 %v3108_v57 }
 0x135   : > { %3451 = vmatpush3.bf16.msra.mxu0 %v3650_v30 }
 0x136   : > { %3479 = vmatpush3.bf16.msra.mxu1 %v3651_v31  ;;  %3452 = vmatprep.subr.bf16.mxu0 %v3652_v32 }
 0x137   : > { %3480 = vmatprep.subr.bf16.mxu1 %v3653_v33 }
 0x139   : > { %3453 = vmatpush3.bf16.msra.mxu0 %v3654_v34 }
 0x13a   : > { %3481 = vmatpush3.bf16.msra.mxu1 %v3655_v35  ;;  %3454 = vmatprep.subr.bf16.mxu0 %v3656_v36 }
 0x13b   : > { %3482 = vmatprep.subr.bf16.mxu1 %v3657_v37 }
 0x13d   : > { %3455 = vmatpush3.bf16.msra.mxu0 %v3658_v38 }
 0x13e   : > { %3483 = vmatpush3.bf16.msra.mxu1 %v3659_v39  ;;  %3456 = vmatprep.subr.bf16.mxu0 %v3660_v40 }
 0x13f   : > { %3484 = vmatprep.subr.bf16.mxu1 %v3661_v41 }
 0x141   : > { %3457 = vmatpush3.bf16.msra.mxu0 %v3662_v42 }
 0x142   : > { %3485 = vmatpush3.bf16.msra.mxu1 %v3663_v43  ;;  %3458 = vmatprep.subr.bf16.mxu0 %v3664_v44 }
 0x143   : > { %3486 = vmatprep.subr.bf16.mxu1 %v3665_v45 }
 0x145   : > { %3459 = vmatpush3.bf16.msra.mxu0 %v3666_v46 }
 0x146   : > { %3487 = vmatpush3.bf16.msra.mxu1 %v3667_v47 }
 0x148   : > { %2831 = vmatmul.mubr.bf16.vlgmr.msra.gmra.mrb[24].mxu0 %v3105_v51 }
 0x149   : > { %2880 = vmatmul.mubr.bf16.vlgmr.msra.gmra.mrb[24].mxu1 %v3107_v56  ;;  %2838 = vmatprep.mubr.bf16.mxu0 %v3122_v58 }
 0x14a   : > { %2887 = vmatprep.mubr.bf16.mxu1 %v3124_v61 }
 0x150   : > { %2839 = vmatmul.mubr.bf16.gmra.mrb[28].mxu0 %v3121_v62 }
 0x151   : > { %2888 = vmatmul.mubr.bf16.gmra.mrb[28].mxu1 %v3123_v63 }
 0x1bb   : > { %v3292_v0 = vpop.f32.mrb[0].mxu0 }
 0x1bc   : > { %v3320_v1 = vpop.f32.mrb[0].mxu1  ;;  %v3293_v3 = vpop.f32.mrb[1].mxu0 }
 0x1bd   : > { %v3294_v4 = vadd.f32 %v3293_v3, %v3292_v0  ;;  %v3321_v5 = vpop.f32.mrb[1].mxu1  ;;  %v3295_v6 = vpop.f32.mrb[2].mxu0 }
 0x1be   : > { %v3322_v7 = vadd.f32 %v3321_v5, %v3320_v1  ;;  %v3323_v8 = vpop.f32.mrb[2].mxu1  ;;  %v3296_v9 = vpop.f32.mrb[3].mxu0 }
 0x1bf   : > { %v2539_v10 = vadd.f32 %v3294_v4, %v3092_v2  ;;  %v3297_v11 = vadd.f32 %v3296_v9, %v3295_v6  ;;  %v3324_v12 = vpop.f32.mrb[3].mxu1 }
 0x1c0   : > { %v3325_v13 = vadd.f32 %v3324_v12, %v3323_v8 }
 0x1c1   : > { %v2588_v14 = vadd.f32 %v3322_v7, %v2539_v10  ;;  %v2542_v15 = vadd.f32 %v3297_v11, %v3092_v2 }
 0x1c3   : > { %v2591_v16 = vadd.f32 %v3325_v13, %v2542_v15  ;;  %v3298_v17 = vpop.f32.mrb[4].mxu0 }
 0x1c4   : > { %v3299_v18 = vpop.f32.mrb[5].mxu0  ;;  %v3326_v19 = vpop.f32.mrb[4].mxu1 }
 0x1c5   : > { %v3300_v20 = vadd.f32 %v3299_v18, %v3298_v17  ;;  %v3301_v21 = vpop.f32.mrb[6].mxu0  ;;  %v3327_v22 = vpop.f32.mrb[5].mxu1 }
 0x1c6   : > { %v3302_v23 = vpop.f32.mrb[7].mxu0  ;;  %v3328_v24 = vadd.f32 %v3327_v22, %v3326_v19  ;;  %v3329_v25 = vpop.f32.mrb[6].mxu1 }
 0x1c7   : > { %v2547_v26 = vadd.f32 %v3300_v20, %v3092_v2  ;;  %v3303_v27 = vadd.f32 %v3302_v23, %v3301_v21  ;;  %v3330_v28 = vpop.f32.mrb[7].mxu1 }
 0x1c8   : > { %v3331_v29 = vadd.f32 %v3330_v28, %v3329_v25 }
 0x1c9   : > { %v2550_v30 = vadd.f32 %v3303_v27, %v3092_v2  ;;  %v2596_v31 = vadd.f32 %v3328_v24, %v2547_v26 }
 0x1cb   : > { %v2599_v32 = vadd.f32 %v3331_v29, %v2550_v30 }
 0x1db   : > { %v3348_v33 = vpop.f32.mrb[8].mxu0 }
 0x1dc   : > { %v3376_v34 = vpop.f32.mrb[8].mxu1  ;;  %v3349_v35 = vpop.f32.mrb[9].mxu0 }
 0x1dd   : > { %v3377_v36 = vpop.f32.mrb[9].mxu1  ;;  %v3350_v37 = vadd.f32 %v3349_v35, %v3348_v33  ;;  %v3351_v39 = vpop.f32.mrb[10].mxu0 }
 0x1de   : > { %v3378_v38 = vadd.f32 %v3377_v36, %v3376_v34  ;;  %v3379_v40 = vpop.f32.mrb[10].mxu1  ;;  %v3352_v41 = vpop.f32.mrb[11].mxu0 }
 0x1df   : > { %v3380_v42 = vpop.f32.mrb[11].mxu1  ;;  %v2637_v43 = vadd.f32 %v3350_v37, %v2588_v14  ;;  %v3353_v44 = vadd.f32 %v3352_v41, %v3351_v39 }
 0x1e0   : > { %v3381_v45 = vadd.f32 %v3380_v42, %v3379_v40 }
 0x1e1   : > { %v2686_v46 = vadd.f32 %v3378_v38, %v2637_v43  ;;  %v2640_v47 = vadd.f32 %v3353_v44, %v2591_v16 }
 0x1e3   : > { %v2689_v48 = vadd.f32 %v3381_v45, %v2640_v47  ;;  %v3354_v49 = vpop.f32.mrb[12].mxu0 }
 0x1e4   : > { %v3355_v50 = vpop.f32.mrb[13].mxu0  ;;  %v3382_v55 = vpop.f32.mrb[12].mxu1 }
 0x1e5   : > { %v3356_v51 = vadd.f32 %v3355_v50, %v3354_v49  ;;  %v3357_v52 = vpop.f32.mrb[14].mxu0  ;;  %v3383_v57 = vpop.f32.mrb[13].mxu1 }
 0x1e6   : > { %v3358_v53 = vpop.f32.mrb[15].mxu0  ;;  %v3384_v59 = vadd.f32 %v3383_v57, %v3382_v55  ;;  %v3385_v60 = vpop.f32.mrb[14].mxu1 }
 0x1e7   : > { %v2645_v54 = vadd.f32 %v3356_v51, %v2596_v31  ;;  %v3359_v56 = vadd.f32 %v3358_v53, %v3357_v52  ;;  %v3386_v61 = vpop.f32.mrb[15].mxu1 }
 0x1e8   : > { %v3387_v63 = vadd.f32 %v3386_v61, %v3385_v60 }
 0x1e9   : > { %v2648_v58 = vadd.f32 %v3359_v56, %v2599_v32  ;;  %v2694_v62 = vadd.f32 %v3384_v59, %v2645_v54 }
 0x1eb   : > { %v2697_v0 = vadd.f32 %v3387_v63, %v2648_v58 }
 0x1fb   : > { %v3404_v1 = vpop.f32.mrb[16].mxu0 }
 0x1fc   : > { %v3432_v2 = vpop.f32.mrb[16].mxu1  ;;  %v3405_v3 = vpop.f32.mrb[17].mxu0 }
 0x1fd   : > { %v3406_v4 = vadd.f32 %v3405_v3, %v3404_v1  ;;  %v3433_v5 = vpop.f32.mrb[17].mxu1  ;;  %v3407_v6 = vpop.f32.mrb[18].mxu0 }
 0x1fe   : > { %v3434_v7 = vadd.f32 %v3433_v5, %v3432_v2  ;;  %v3435_v8 = vpop.f32.mrb[18].mxu1  ;;  %v3408_v9 = vpop.f32.mrb[19].mxu0 }
 0x1ff   : > { %v2735_v10 = vadd.f32 %v3406_v4, %v2686_v46  ;;  %v3409_v11 = vadd.f32 %v3408_v9, %v3407_v6  ;;  %v3436_v12 = vpop.f32.mrb[19].mxu1 }
 0x200   : > { %v3437_v13 = vadd.f32 %v3436_v12, %v3435_v8 }
 0x201   : > { %v2784_v14 = vadd.f32 %v3434_v7, %v2735_v10  ;;  %v2738_v15 = vadd.f32 %v3409_v11, %v2689_v48 }
 0x203   : > { %v2787_v16 = vadd.f32 %v3437_v13, %v2738_v15  ;;  %v3410_v17 = vpop.f32.mrb[20].mxu0 }
 0x204   : > { %v3411_v18 = vpop.f32.mrb[21].mxu0  ;;  %v3438_v21 = vpop.f32.mrb[20].mxu1 }
 0x205   : > { %v3412_v19 = vadd.f32 %v3411_v18, %v3410_v17  ;;  %v3413_v20 = vpop.f32.mrb[22].mxu0  ;;  %v3439_v25 = vpop.f32.mrb[21].mxu1 }
 0x206   : > { %v3414_v22 = vpop.f32.mrb[23].mxu0  ;;  %v3440_v26 = vadd.f32 %v3439_v25, %v3438_v21  ;;  %v3441_v27 = vpop.f32.mrb[22].mxu1 }
 0x207   : > { %v2743_v23 = vadd.f32 %v3412_v19, %v2694_v62  ;;  %v3415_v24 = vadd.f32 %v3414_v22, %v3413_v20  ;;  %v3442_v29 = vpop.f32.mrb[23].mxu1 }
 0x208   : > { %v3443_v31 = vadd.f32 %v3442_v29, %v3441_v27 }
 0x209   : > { %v2746_v28 = vadd.f32 %v3415_v24, %v2697_v0  ;;  %v2792_v30 = vadd.f32 %v3440_v26, %v2743_v23 }
 0x20b   : > { %v2795_v32 = vadd.f32 %v3443_v31, %v2746_v28 }
 0x21b   : > { %v3460_v33 = vpop.f32.mrb[24].mxu0 }
 0x21c   : > { %v3488_v34 = vpop.f32.mrb[24].mxu1  ;;  %v3461_v35 = vpop.f32.mrb[25].mxu0 }
 0x21d   : > { %v3462_v36 = vadd.f32 %v3461_v35, %v3460_v33  ;;  %v3489_v37 = vpop.f32.mrb[25].mxu1  ;;  %v3463_v38 = vpop.f32.mrb[26].mxu0 }
 0x21e   : > { %v3490_v39 = vadd.f32 %v3489_v37, %v3488_v34  ;;  %v3491_v40 = vpop.f32.mrb[26].mxu1  ;;  %v3464_v41 = vpop.f32.mrb[27].mxu0 }
 0x21f   : > { %v2833_v42 = vadd.f32 %v3462_v36, %v2784_v14  ;;  %v3465_v43 = vadd.f32 %v3464_v41, %v3463_v38  ;;  %v3492_v44 = vpop.f32.mrb[27].mxu1 }
 0x220   : > { %v3493_v45 = vadd.f32 %v3492_v44, %v3491_v40 }
 0x221   : > { %v2882_v46 = vadd.f32 %v3490_v39, %v2833_v42  ;;  %v2836_v47 = vadd.f32 %v3465_v43, %v2787_v16 }
 0x223   : > { %v2900_v48 = vmul.f32 0.2, %v2882_v46  ;;  %v2885_v49 = vadd.f32 %v3493_v45, %v2836_v47  ;;  %v3466_v50 = vpop.f32.mrb[28].mxu0  ;;  %vm2896_vm0 = vcmp.ge.f32.partialorder %v2882_v46, 0.0 }
 0x224   : > { %v3494_v51 = vpop.f32.mrb[28].mxu1  ;;  %v3467_v52 = vpop.f32.mrb[29].mxu0 }
 0x225   : > { %vm2897_vm1 = vcmp.ge.f32.partialorder %v2885_v49, 0.0  ;;  %v2901_v53 = vmul.f32 0.2, %v2885_v49  ;;  %v3468_v54 = vadd.f32 %v3467_v52, %v3466_v50  ;;  %v3495_v55 = vpop.f32.mrb[29].mxu1  ;;  %v3469_v56 = vpop.f32.mrb[30].mxu0  ;;  %v2904_v60 = vsel %vm2896_vm0, %v2882_v46, %v2900_v48 }
 0x226   : > { %v3496_v57 = vadd.f32 %v3495_v55, %v3494_v51  ;;  %v3497_v58 = vpop.f32.mrb[30].mxu1  ;;  %v3470_v59 = vpop.f32.mrb[31].mxu0 }
 0x227   : > { %v2905_v61 = vsel %vm2897_vm1, %v2885_v49, %v2901_v53  ;;  %v2841_v62 = vadd.f32 %v3468_v54, %v2792_v30  ;;  %v3471_v63 = vadd.f32 %v3470_v59, %v3469_v56  ;;  %v3498_v0 = vpop.f32.mrb[31].mxu1 }
 0x228   : > { %v3268_v1 = vpack.c.bf16 %v2905_v61, %v2904_v60  ;;  %v3499_v2 = vadd.f32 %v3498_v0, %v3497_v58 }
 0x229   : > { %v2890_v3 = vadd.f32 %v3496_v57, %v2841_v62  ;;  %v2844_v4 = vadd.f32 %v3471_v63, %v2795_v32 }
 0x22a   : > { %3269 = vst [vmem:[%s1268_s12] sm:$0xff] %v3268_v1  }
 0x22b   : > { %v2902_v5 = vmul.f32 0.2, %v2890_v3  ;;  %v2893_v6 = vadd.f32 %v3499_v2, %v2844_v4  ;;  %vm2898_vm2 = vcmp.ge.f32.partialorder %v2890_v3, 0.0 }
 0x22c   : > { %2934 = sbr.rel (!%p3763_p6) target bundleno = 571 (0x23b), region = 77 }
 0x22d   : > { %vm2899_vm3 = vcmp.ge.f32.partialorder %v2893_v6, 0.0  ;;  %v2903_v7 = vmul.f32 0.2, %v2893_v6  ;;  %v2906_v8 = vsel %vm2898_vm2, %v2890_v3, %v2902_v5 }
 0x22f   : > { %v2907_v9 = vsel %vm2899_vm3, %v2893_v6, %v2903_v7 }
 0x230   : > { %v3273_v10 = vpack.c.bf16 %v2907_v9, %v2906_v8 }
 0x231   : > { %v2955_v11 = vld [vmem:[%s1268_s12] sm:$0xf] (%p3763_p6)  ;;  %v2957_v12 = vld [vmem:[%s1268_s12 + $0x4] sm:$0xf] (%p3763_p6) }
 0x232   : > { %3275 = vst [vmem:[%s1268_s12 + $0x8] sm:$0xff] %v3273_v10   ;;  %2956 = vst [vmem:[%s2939_s7] sm:$0xf] (%p3763_p6), %v2955_v11 }
 0x233   : > { %2958 = vst [vmem:[%s2939_s7 + $0x8] sm:$0xf] %v2957_v12 }
 0x239   : > { %v2959_v13 = vld [vmem:[%s1268_s12 + $0x8] sm:$0xf]  ;;  %v2961_v14 = vld [vmem:[%s1268_s12 + $0xc] sm:$0xf] }
 0x23a   : > { %2960 = vst [vmem:[%s2939_s7 + $0x10] sm:$0xf] %v2959_v13  ;;  %2962 = vst [vmem:[%s2939_s7 + $0x18] sm:$0xf] %v2961_v14 }
 0x23b PF: > { %s13_s16 = sadd.s32 1, %s3706_s16   ;;  %s4572_s12 = smov %s3694_s13 }
 0x23c   : > { %p10_p12 = scmp.ge.s32.totalorder %s13_s16, 4   ;;  %s4573_s13 = smov %s3768_s22 }
 0x23d   : > { %s4574_s14 = smov %s3702_s15  ;;  %s4575_s15 = smov %s4577_s17 }
 0x23e   :  { %12 = sbr.rel (!%p10_p12) target bundleno = 3 (0x3), region = 155 }

// kernel: discriminator_forward.8
= control target key start
LH: loop header
LB: loop body
LE: loop exit
PB: predicated region body
PF: predicated region fallthrough
CT: control target
= control target key end

     0   :  { %s8952_s12 = smov 0   ;;  %s8954_s13 = smov 0   ;;  %s10536_s0 = inlined_call_operand.vmem [shape: bf16[30,4096], index: 0, kind: input, shape index: {}]   ;;  %s10537_s1 = inlined_call_operand.vmem [shape: bf16[4096,512], index: 1, kind: input, shape index: {}]   ;;  %s10538_s2 = inlined_call_operand.vmem [shape: f32[1,512], index: 2, kind: input, shape index: {}]   ;;  %s10539_s3 = inlined_call_operand.vmem [shape: bf16[30,512], index: 3, kind: output, shape index: {}]  }
   0x1   :  { %s8956_s14 = smov 0   ;;  %s8958_s15 = smov 0  }
   0x2   :  { %s8960_s16 = smov 0  }
   0x3 LB: > { %s25_s17 = sadd.s32 1, %s8926_s15  ;;  %s7800_s18 = sadd.s32 4294967295, %s8930_s16   ;;  %s8930_s16 = sphi %s8960_s16, %s13_s16   ;;  %s8926_s15 = sphi %s8958_s15, %s10544_s15   ;;  %s8922_s14 = sphi %s8956_s14, %s10543_s14   ;;  %s8918_s13 = sphi %s8954_s13, %s10542_s13   ;;  %s8914_s12 = sphi %s8952_s12, %s10541_s12  }
   0x4   : > { %p27_p0 = scmp.ge.s32.totalorder %s25_s17, 4  ;;  %p65_p1 = scmp.ne.s32.totalorder %s8918_s13, %s8914_s12 }
   0x5   : > { %p66_p2 = scmp.eq.s32.totalorder %s8930_s16, 0  ;;  %p123_p4 = scmp.eq.s32.totalorder %s7800_s18, 3 }
   0x6   : > { %s10546_s17 = smov (%p27_p0, %s25_s17), 0  ;;  %s58_s20 = sadd.s32 1, %s8918_s13 }
   0x7   : > { %p67_p3 = por %p66_p2, %p65_p1  ;;  %s55_s19 = ssub.s32 %s8926_s15, %s10546_s17 }
   0x8   : > { %p56_p5 = scmp.eq.s32.totalorder %s55_s19, 0  ;;  %p8987_p6 = por %p123_p4, %p65_p1 }
   0x9   : > { %p7804_p7 = scmp.ge.s32.totalorder %s8930_s16, 4 }
   0xa   : > { %s8992_s22 = scalar_select %p56_p5, %s8918_s13, %s58_s20  }
   0xb   : > { %155 = sbr.rel (%p7804_p7) target bundleno = 363 (0x16b), region = 20 }
  0x12   : > { %158 = sbr.rel (!%p67_p3) target bundleno = 363 (0x16b), region = 24  ;;  %s160_s23 = sand.u32 (%p67_p3), 1, %s8918_s13  }
  0x13   : > { %s7806_s24 = sshll.u32 (%p67_p3), %s8926_s15, 2  ;;  %s7805_s25 = sshll.u32 (%p67_p3), %s160_s23, 11 }
  0x14   : > { %s9000_s28 = scalar_lea.vmem (%p67_p3), %s10537_s1, %s7806_s24  ;;  %s9004_s29 = scalar_lea.vmem (%p67_p3), [#allocation2], %s7805_s25 }
  0x15   : > { %v180_v0 = vld [vmem:[%s9000_s28] sm:$0xf] (%p67_p3)  ;;  %v182_v1 = vld [vmem:[%s9000_s28 + $0x10] sm:$0xf] (%p67_p3) }
  0x16   : > { %181 = vst [vmem:[%s9004_s29] sm:$0xf] (%p67_p3), %v180_v0  ;;  %183 = vst [vmem:[%s9004_s29 + $0x4] sm:$0xf] (%p67_p3), %v182_v1  ;;  %v184_v2 = vld [vmem:[%s9000_s28 + $0x20] sm:$0xf] (%p67_p3) }
  0x17   : > { %v186_v3 = vld [vmem:[%s9000_s28 + $0x30] sm:$0xf] (%p67_p3)  ;;  %v188_v4 = vld [vmem:[%s9000_s28 + $0x40] sm:$0xf] (%p67_p3)  ;;  %185 = vst [vmem:[%s9004_s29 + $0x8] sm:$0xf] (%p67_p3), %v184_v2 }
  0x18   : > { %187 = vst [vmem:[%s9004_s29 + $0xc] sm:$0xf] (%p67_p3), %v186_v3  ;;  %189 = vst [vmem:[%s9004_s29 + $0x10] sm:$0xf] (%p67_p3), %v188_v4  ;;  %v190_v5 = vld [vmem:[%s9000_s28 + $0x50] sm:$0xf] (%p67_p3) }
  0x19   : > { %v192_v6 = vld [vmem:[%s9000_s28 + $0x60] sm:$0xf]  ;;  %v194_v7 = vld [vmem:[%s9000_s28 + $0x70] sm:$0xf]  ;;  %191 = vst [vmem:[%s9004_s29 + $0x14] sm:$0xf] %v190_v5 }
  0x1a   : > { %193 = vst [vmem:[%s9004_s29 + $0x18] sm:$0xf] %v192_v6  ;;  %195 = vst [vmem:[%s9004_s29 + $0x1c] sm:$0xf] %v194_v7  ;;  %v196_v8 = vld [vmem:[%s9000_s28 + $0x80] sm:$0xf] }
  0x1b   : > { %v198_v9 = vld [vmem:[%s9000_s28 + $0x90] sm:$0xf]  ;;  %v200_v10 = vld [vmem:[%s9000_s28 + $0xa0] sm:$0xf]  ;;  %197 = vst [vmem:[%s9004_s29 + $0x20] sm:$0xf] %v196_v8 }
  0x1c   : > { %199 = vst [vmem:[%s9004_s29 + $0x24] sm:$0xf] %v198_v9  ;;  %201 = vst [vmem:[%s9004_s29 + $0x28] sm:$0xf] %v200_v10  ;;  %v202_v11 = vld [vmem:[%s9000_s28 + $0xb0] sm:$0xf] }
  0x1d   : > { %v204_v12 = vld [vmem:[%s9000_s28 + $0xc0] sm:$0xf]  ;;  %v206_v13 = vld [vmem:[%s9000_s28 + $0xd0] sm:$0xf]  ;;  %203 = vst [vmem:[%s9004_s29 + $0x2c] sm:$0xf] %v202_v11 }
  0x1e   : > { %205 = vst [vmem:[%s9004_s29 + $0x30] sm:$0xf] %v204_v12  ;;  %207 = vst [vmem:[%s9004_s29 + $0x34] sm:$0xf] %v206_v13  ;;  %v208_v14 = vld [vmem:[%s9000_s28 + $0xe0] sm:$0xf] }
  0x1f   : > { %v210_v15 = vld [vmem:[%s9000_s28 + $0xf0] sm:$0xf]  ;;  %v212_v16 = vld [vmem:[%s9000_s28 + $0x100] sm:$0xf]  ;;  %209 = vst [vmem:[%s9004_s29 + $0x38] sm:$0xf] %v208_v14 }
  0x20   : > { %211 = vst [vmem:[%s9004_s29 + $0x3c] sm:$0xf] %v210_v15  ;;  %213 = vst [vmem:[%s9004_s29 + $0x40] sm:$0xf] %v212_v16  ;;  %v214_v17 = vld [vmem:[%s9000_s28 + $0x110] sm:$0xf] }
  0x21   : > { %v216_v18 = vld [vmem:[%s9000_s28 + $0x120] sm:$0xf]  ;;  %v218_v19 = vld [vmem:[%s9000_s28 + $0x130] sm:$0xf]  ;;  %215 = vst [vmem:[%s9004_s29 + $0x44] sm:$0xf] %v214_v17 }
  0x22   : > { %217 = vst [vmem:[%s9004_s29 + $0x48] sm:$0xf] %v216_v18  ;;  %219 = vst [vmem:[%s9004_s29 + $0x4c] sm:$0xf] %v218_v19  ;;  %v220_v20 = vld [vmem:[%s9000_s28 + $0x140] sm:$0xf] }
  0x23   : > { %v222_v21 = vld [vmem:[%s9000_s28 + $0x150] sm:$0xf]  ;;  %v224_v22 = vld [vmem:[%s9000_s28 + $0x160] sm:$0xf]  ;;  %221 = vst [vmem:[%s9004_s29 + $0x50] sm:$0xf] %v220_v20 }
  0x24   : > { %223 = vst [vmem:[%s9004_s29 + $0x54] sm:$0xf] %v222_v21  ;;  %225 = vst [vmem:[%s9004_s29 + $0x58] sm:$0xf] %v224_v22  ;;  %v226_v23 = vld [vmem:[%s9000_s28 + $0x170] sm:$0xf] }
  0x25   : > { %v228_v24 = vld [vmem:[%s9000_s28 + $0x180] sm:$0xf]  ;;  %v230_v25 = vld [vmem:[%s9000_s28 + $0x190] sm:$0xf]  ;;  %227 = vst [vmem:[%s9004_s29 + $0x5c] sm:$0xf] %v226_v23 }
  0x26   : > { %229 = vst [vmem:[%s9004_s29 + $0x60] sm:$0xf] %v228_v24  ;;  %231 = vst [vmem:[%s9004_s29 + $0x64] sm:$0xf] %v230_v25  ;;  %v232_v26 = vld [vmem:[%s9000_s28 + $0x1a0] sm:$0xf] }
  0x27   : > { %v234_v27 = vld [vmem:[%s9000_s28 + $0x1b0] sm:$0xf]  ;;  %v236_v28 = vld [vmem:[%s9000_s28 + $0x1c0] sm:$0xf]  ;;  %233 = vst [vmem:[%s9004_s29 + $0x68] sm:$0xf] %v232_v26 }
  0x28   : > { %235 = vst [vmem:[%s9004_s29 + $0x6c] sm:$0xf] %v234_v27  ;;  %237 = vst [vmem:[%s9004_s29 + $0x70] sm:$0xf] %v236_v28  ;;  %v238_v29 = vld [vmem:[%s9000_s28 + $0x1d0] sm:$0xf] }
  0x29   : > { %v240_v30 = vld [vmem:[%s9000_s28 + $0x1e0] sm:$0xf]  ;;  %v242_v31 = vld [vmem:[%s9000_s28 + $0x1f0] sm:$0xf]  ;;  %239 = vst [vmem:[%s9004_s29 + $0x74] sm:$0xf] %v238_v29 }
  0x2a   : > { %241 = vst [vmem:[%s9004_s29 + $0x78] sm:$0xf] %v240_v30  ;;  %243 = vst [vmem:[%s9004_s29 + $0x7c] sm:$0xf] %v242_v31  ;;  %v244_v32 = vld [vmem:[%s9000_s28 + $0x200] sm:$0xf] }
  0x2b   : > { %v246_v33 = vld [vmem:[%s9000_s28 + $0x210] sm:$0xf]  ;;  %v248_v34 = vld [vmem:[%s9000_s28 + $0x220] sm:$0xf]  ;;  %245 = vst [vmem:[%s9004_s29 + $0x80] sm:$0xf] %v244_v32 }
  0x2c   : > { %247 = vst [vmem:[%s9004_s29 + $0x84] sm:$0xf] %v246_v33  ;;  %249 = vst [vmem:[%s9004_s29 + $0x88] sm:$0xf] %v248_v34  ;;  %v250_v35 = vld [vmem:[%s9000_s28 + $0x230] sm:$0xf] }
  0x2d   : > { %v252_v36 = vld [vmem:[%s9000_s28 + $0x240] sm:$0xf]  ;;  %v254_v37 = vld [vmem:[%s9000_s28 + $0x250] sm:$0xf]  ;;  %251 = vst [vmem:[%s9004_s29 + $0x8c] sm:$0xf] %v250_v35 }
  0x2e   : > { %253 = vst [vmem:[%s9004_s29 + $0x90] sm:$0xf] %v252_v36  ;;  %255 = vst [vmem:[%s9004_s29 + $0x94] sm:$0xf] %v254_v37  ;;  %v256_v38 = vld [vmem:[%s9000_s28 + $0x260] sm:$0xf] }
  0x2f   : > { %v258_v39 = vld [vmem:[%s9000_s28 + $0x270] sm:$0xf]  ;;  %v260_v40 = vld [vmem:[%s9000_s28 + $0x280] sm:$0xf]  ;;  %257 = vst [vmem:[%s9004_s29 + $0x98] sm:$0xf] %v256_v38 }
  0x30   : > { %259 = vst [vmem:[%s9004_s29 + $0x9c] sm:$0xf] %v258_v39  ;;  %261 = vst [vmem:[%s9004_s29 + $0xa0] sm:$0xf] %v260_v40  ;;  %v262_v41 = vld [vmem:[%s9000_s28 + $0x290] sm:$0xf] }
  0x31   : > { %v264_v42 = vld [vmem:[%s9000_s28 + $0x2a0] sm:$0xf]  ;;  %v266_v43 = vld [vmem:[%s9000_s28 + $0x2b0] sm:$0xf]  ;;  %263 = vst [vmem:[%s9004_s29 + $0xa4] sm:$0xf] %v262_v41 }
  0x32   : > { %265 = vst [vmem:[%s9004_s29 + $0xa8] sm:$0xf] %v264_v42  ;;  %267 = vst [vmem:[%s9004_s29 + $0xac] sm:$0xf] %v266_v43  ;;  %v268_v44 = vld [vmem:[%s9000_s28 + $0x2c0] sm:$0xf] }
  0x33   : > { %v270_v45 = vld [vmem:[%s9000_s28 + $0x2d0] sm:$0xf]  ;;  %v272_v46 = vld [vmem:[%s9000_s28 + $0x2e0] sm:$0xf]  ;;  %269 = vst [vmem:[%s9004_s29 + $0xb0] sm:$0xf] %v268_v44 }
  0x34   : > { %271 = vst [vmem:[%s9004_s29 + $0xb4] sm:$0xf] %v270_v45  ;;  %273 = vst [vmem:[%s9004_s29 + $0xb8] sm:$0xf] %v272_v46  ;;  %v274_v47 = vld [vmem:[%s9000_s28 + $0x2f0] sm:$0xf] }
  0x35   : > { %v276_v48 = vld [vmem:[%s9000_s28 + $0x300] sm:$0xf]  ;;  %v278_v49 = vld [vmem:[%s9000_s28 + $0x310] sm:$0xf]  ;;  %275 = vst [vmem:[%s9004_s29 + $0xbc] sm:$0xf] %v274_v47 }
  0x36   : > { %277 = vst [vmem:[%s9004_s29 + $0xc0] sm:$0xf] %v276_v48  ;;  %279 = vst [vmem:[%s9004_s29 + $0xc4] sm:$0xf] %v278_v49  ;;  %v280_v50 = vld [vmem:[%s9000_s28 + $0x320] sm:$0xf] }
  0x37   : > { %v282_v51 = vld [vmem:[%s9000_s28 + $0x330] sm:$0xf]  ;;  %v284_v52 = vld [vmem:[%s9000_s28 + $0x340] sm:$0xf]  ;;  %281 = vst [vmem:[%s9004_s29 + $0xc8] sm:$0xf] %v280_v50 }
  0x38   : > { %283 = vst [vmem:[%s9004_s29 + $0xcc] sm:$0xf] %v282_v51  ;;  %285 = vst [vmem:[%s9004_s29 + $0xd0] sm:$0xf] %v284_v52  ;;  %v286_v53 = vld [vmem:[%s9000_s28 + $0x350] sm:$0xf] }
  0x39   : > { %v288_v54 = vld [vmem:[%s9000_s28 + $0x360] sm:$0xf]  ;;  %v290_v55 = vld [vmem:[%s9000_s28 + $0x370] sm:$0xf]  ;;  %287 = vst [vmem:[%s9004_s29 + $0xd4] sm:$0xf] %v286_v53 }
  0x3a   : > { %289 = vst [vmem:[%s9004_s29 + $0xd8] sm:$0xf] %v288_v54  ;;  %291 = vst [vmem:[%s9004_s29 + $0xdc] sm:$0xf] %v290_v55  ;;  %v292_v56 = vld [vmem:[%s9000_s28 + $0x380] sm:$0xf] }
  0x3b   : > { %v294_v57 = vld [vmem:[%s9000_s28 + $0x390] sm:$0xf]  ;;  %v296_v58 = vld [vmem:[%s9000_s28 + $0x3a0] sm:$0xf]  ;;  %293 = vst [vmem:[%s9004_s29 + $0xe0] sm:$0xf] %v292_v56 }
  0x3c   : > { %295 = vst [vmem:[%s9004_s29 + $0xe4] sm:$0xf] %v294_v57  ;;  %297 = vst [vmem:[%s9004_s29 + $0xe8] sm:$0xf] %v296_v58  ;;  %v298_v59 = vld [vmem:[%s9000_s28 + $0x3b0] sm:$0xf] }
  0x3d   : > { %v300_v60 = vld [vmem:[%s9000_s28 + $0x3c0] sm:$0xf]  ;;  %v302_v61 = vld [vmem:[%s9000_s28 + $0x3d0] sm:$0xf]  ;;  %299 = vst [vmem:[%s9004_s29 + $0xec] sm:$0xf] %v298_v59 }
  0x3e   : > { %301 = vst [vmem:[%s9004_s29 + $0xf0] sm:$0xf] %v300_v60  ;;  %303 = vst [vmem:[%s9004_s29 + $0xf4] sm:$0xf] %v302_v61  ;;  %v304_v62 = vld [vmem:[%s9000_s28 + $0x3e0] sm:$0xf] }
  0x3f   : > { %v306_v63 = vld [vmem:[%s9000_s28 + $0x3f0] sm:$0xf]  ;;  %v308_v0 = vld [vmem:[%s9000_s28 + $0x400] sm:$0xf]  ;;  %305 = vst [vmem:[%s9004_s29 + $0xf8] sm:$0xf] %v304_v62 }
  0x40   : > { %307 = vst [vmem:[%s9004_s29 + $0xfc] sm:$0xf] %v306_v63  ;;  %309 = vst [vmem:[%s9004_s29 + $0x100] sm:$0xf] %v308_v0  ;;  %v310_v1 = vld [vmem:[%s9000_s28 + $0x410] sm:$0xf] }
  0x41   : > { %v312_v2 = vld [vmem:[%s9000_s28 + $0x420] sm:$0xf]  ;;  %v314_v3 = vld [vmem:[%s9000_s28 + $0x430] sm:$0xf]  ;;  %311 = vst [vmem:[%s9004_s29 + $0x104] sm:$0xf] %v310_v1 }
  0x42   : > { %313 = vst [vmem:[%s9004_s29 + $0x108] sm:$0xf] %v312_v2  ;;  %315 = vst [vmem:[%s9004_s29 + $0x10c] sm:$0xf] %v314_v3  ;;  %v316_v4 = vld [vmem:[%s9000_s28 + $0x440] sm:$0xf] }
  0x43   : > { %v318_v5 = vld [vmem:[%s9000_s28 + $0x450] sm:$0xf]  ;;  %v320_v6 = vld [vmem:[%s9000_s28 + $0x460] sm:$0xf]  ;;  %317 = vst [vmem:[%s9004_s29 + $0x110] sm:$0xf] %v316_v4 }
  0x44   : > { %319 = vst [vmem:[%s9004_s29 + $0x114] sm:$0xf] %v318_v5  ;;  %321 = vst [vmem:[%s9004_s29 + $0x118] sm:$0xf] %v320_v6  ;;  %v322_v7 = vld [vmem:[%s9000_s28 + $0x470] sm:$0xf] }
  0x45   : > { %v324_v8 = vld [vmem:[%s9000_s28 + $0x480] sm:$0xf]  ;;  %v326_v9 = vld [vmem:[%s9000_s28 + $0x490] sm:$0xf]  ;;  %323 = vst [vmem:[%s9004_s29 + $0x11c] sm:$0xf] %v322_v7 }
  0x46   : > { %325 = vst [vmem:[%s9004_s29 + $0x120] sm:$0xf] %v324_v8  ;;  %327 = vst [vmem:[%s9004_s29 + $0x124] sm:$0xf] %v326_v9  ;;  %v328_v10 = vld [vmem:[%s9000_s28 + $0x4a0] sm:$0xf] }
  0x47   : > { %v330_v11 = vld [vmem:[%s9000_s28 + $0x4b0] sm:$0xf]  ;;  %v332_v12 = vld [vmem:[%s9000_s28 + $0x4c0] sm:$0xf]  ;;  %329 = vst [vmem:[%s9004_s29 + $0x128] sm:$0xf] %v328_v10 }
  0x48   : > { %331 = vst [vmem:[%s9004_s29 + $0x12c] sm:$0xf] %v330_v11  ;;  %333 = vst [vmem:[%s9004_s29 + $0x130] sm:$0xf] %v332_v12  ;;  %v334_v13 = vld [vmem:[%s9000_s28 + $0x4d0] sm:$0xf] }
  0x49   : > { %v336_v14 = vld [vmem:[%s9000_s28 + $0x4e0] sm:$0xf]  ;;  %v338_v15 = vld [vmem:[%s9000_s28 + $0x4f0] sm:$0xf]  ;;  %335 = vst [vmem:[%s9004_s29 + $0x134] sm:$0xf] %v334_v13 }
  0x4a   : > { %337 = vst [vmem:[%s9004_s29 + $0x138] sm:$0xf] %v336_v14  ;;  %339 = vst [vmem:[%s9004_s29 + $0x13c] sm:$0xf] %v338_v15  ;;  %v340_v16 = vld [vmem:[%s9000_s28 + $0x500] sm:$0xf] }
  0x4b   : > { %v342_v17 = vld [vmem:[%s9000_s28 + $0x510] sm:$0xf]  ;;  %v344_v18 = vld [vmem:[%s9000_s28 + $0x520] sm:$0xf]  ;;  %341 = vst [vmem:[%s9004_s29 + $0x140] sm:$0xf] %v340_v16 }
  0x4c   : > { %343 = vst [vmem:[%s9004_s29 + $0x144] sm:$0xf] %v342_v17  ;;  %345 = vst [vmem:[%s9004_s29 + $0x148] sm:$0xf] %v344_v18  ;;  %v346_v19 = vld [vmem:[%s9000_s28 + $0x530] sm:$0xf] }
  0x4d   : > { %v348_v20 = vld [vmem:[%s9000_s28 + $0x540] sm:$0xf]  ;;  %v350_v21 = vld [vmem:[%s9000_s28 + $0x550] sm:$0xf]  ;;  %347 = vst [vmem:[%s9004_s29 + $0x14c] sm:$0xf] %v346_v19 }
  0x4e   : > { %349 = vst [vmem:[%s9004_s29 + $0x150] sm:$0xf] %v348_v20  ;;  %351 = vst [vmem:[%s9004_s29 + $0x154] sm:$0xf] %v350_v21  ;;  %v352_v22 = vld [vmem:[%s9000_s28 + $0x560] sm:$0xf] }
  0x4f   : > { %v354_v23 = vld [vmem:[%s9000_s28 + $0x570] sm:$0xf]  ;;  %v356_v24 = vld [vmem:[%s9000_s28 + $0x580] sm:$0xf]  ;;  %353 = vst [vmem:[%s9004_s29 + $0x158] sm:$0xf] %v352_v22 }
  0x50   : > { %355 = vst [vmem:[%s9004_s29 + $0x15c] sm:$0xf] %v354_v23  ;;  %357 = vst [vmem:[%s9004_s29 + $0x160] sm:$0xf] %v356_v24  ;;  %v358_v25 = vld [vmem:[%s9000_s28 + $0x590] sm:$0xf] }
  0x51   : > { %v360_v26 = vld [vmem:[%s9000_s28 + $0x5a0] sm:$0xf]  ;;  %v362_v27 = vld [vmem:[%s9000_s28 + $0x5b0] sm:$0xf]  ;;  %359 = vst [vmem:[%s9004_s29 + $0x164] sm:$0xf] %v358_v25 }
  0x52   : > { %361 = vst [vmem:[%s9004_s29 + $0x168] sm:$0xf] %v360_v26  ;;  %363 = vst [vmem:[%s9004_s29 + $0x16c] sm:$0xf] %v362_v27  ;;  %v364_v28 = vld [vmem:[%s9000_s28 + $0x5c0] sm:$0xf] }
  0x53   : > { %v366_v29 = vld [vmem:[%s9000_s28 + $0x5d0] sm:$0xf]  ;;  %v368_v30 = vld [vmem:[%s9000_s28 + $0x5e0] sm:$0xf]  ;;  %365 = vst [vmem:[%s9004_s29 + $0x170] sm:$0xf] %v364_v28 }
  0x54   : > { %367 = vst [vmem:[%s9004_s29 + $0x174] sm:$0xf] %v366_v29  ;;  %369 = vst [vmem:[%s9004_s29 + $0x178] sm:$0xf] %v368_v30  ;;  %v370_v31 = vld [vmem:[%s9000_s28 + $0x5f0] sm:$0xf] }
  0x55   : > { %v372_v32 = vld [vmem:[%s9000_s28 + $0x600] sm:$0xf]  ;;  %v374_v33 = vld [vmem:[%s9000_s28 + $0x610] sm:$0xf]  ;;  %371 = vst [vmem:[%s9004_s29 + $0x17c] sm:$0xf] %v370_v31 }
  0x56   : > { %373 = vst [vmem:[%s9004_s29 + $0x180] sm:$0xf] %v372_v32  ;;  %375 = vst [vmem:[%s9004_s29 + $0x184] sm:$0xf] %v374_v33  ;;  %v376_v34 = vld [vmem:[%s9000_s28 + $0x620] sm:$0xf] }
  0x57   : > { %v378_v35 = vld [vmem:[%s9000_s28 + $0x630] sm:$0xf]  ;;  %v380_v36 = vld [vmem:[%s9000_s28 + $0x640] sm:$0xf]  ;;  %377 = vst [vmem:[%s9004_s29 + $0x188] sm:$0xf] %v376_v34 }
  0x58   : > { %379 = vst [vmem:[%s9004_s29 + $0x18c] sm:$0xf] %v378_v35  ;;  %381 = vst [vmem:[%s9004_s29 + $0x190] sm:$0xf] %v380_v36  ;;  %v382_v37 = vld [vmem:[%s9000_s28 + $0x650] sm:$0xf] }
  0x59   : > { %v384_v38 = vld [vmem:[%s9000_s28 + $0x660] sm:$0xf]  ;;  %v386_v39 = vld [vmem:[%s9000_s28 + $0x670] sm:$0xf]  ;;  %383 = vst [vmem:[%s9004_s29 + $0x194] sm:$0xf] %v382_v37 }
  0x5a   : > { %385 = vst [vmem:[%s9004_s29 + $0x198] sm:$0xf] %v384_v38  ;;  %387 = vst [vmem:[%s9004_s29 + $0x19c] sm:$0xf] %v386_v39  ;;  %v388_v40 = vld [vmem:[%s9000_s28 + $0x680] sm:$0xf] }
  0x5b   : > { %v390_v41 = vld [vmem:[%s9000_s28 + $0x690] sm:$0xf]  ;;  %v392_v42 = vld [vmem:[%s9000_s28 + $0x6a0] sm:$0xf]  ;;  %389 = vst [vmem:[%s9004_s29 + $0x1a0] sm:$0xf] %v388_v40 }
  0x5c   : > { %391 = vst [vmem:[%s9004_s29 + $0x1a4] sm:$0xf] %v390_v41  ;;  %393 = vst [vmem:[%s9004_s29 + $0x1a8] sm:$0xf] %v392_v42  ;;  %v394_v43 = vld [vmem:[%s9000_s28 + $0x6b0] sm:$0xf] }
  0x5d   : > { %v396_v44 = vld [vmem:[%s9000_s28 + $0x6c0] sm:$0xf]  ;;  %v398_v45 = vld [vmem:[%s9000_s28 + $0x6d0] sm:$0xf]  ;;  %395 = vst [vmem:[%s9004_s29 + $0x1ac] sm:$0xf] %v394_v43 }
  0x5e   : > { %397 = vst [vmem:[%s9004_s29 + $0x1b0] sm:$0xf] %v396_v44  ;;  %399 = vst [vmem:[%s9004_s29 + $0x1b4] sm:$0xf] %v398_v45  ;;  %v400_v46 = vld [vmem:[%s9000_s28 + $0x6e0] sm:$0xf] }
  0x5f   : > { %v402_v47 = vld [vmem:[%s9000_s28 + $0x6f0] sm:$0xf]  ;;  %v404_v48 = vld [vmem:[%s9000_s28 + $0x700] sm:$0xf]  ;;  %401 = vst [vmem:[%s9004_s29 + $0x1b8] sm:$0xf] %v400_v46 }
  0x60   : > { %403 = vst [vmem:[%s9004_s29 + $0x1bc] sm:$0xf] %v402_v47  ;;  %405 = vst [vmem:[%s9004_s29 + $0x1c0] sm:$0xf] %v404_v48  ;;  %v406_v49 = vld [vmem:[%s9000_s28 + $0x710] sm:$0xf] }
  0x61   : > { %v408_v50 = vld [vmem:[%s9000_s28 + $0x720] sm:$0xf]  ;;  %v410_v51 = vld [vmem:[%s9000_s28 + $0x730] sm:$0xf]  ;;  %407 = vst [vmem:[%s9004_s29 + $0x1c4] sm:$0xf] %v406_v49 }
  0x62   : > { %409 = vst [vmem:[%s9004_s29 + $0x1c8] sm:$0xf] %v408_v50  ;;  %411 = vst [vmem:[%s9004_s29 + $0x1cc] sm:$0xf] %v410_v51  ;;  %v412_v52 = vld [vmem:[%s9000_s28 + $0x740] sm:$0xf] }
  0x63   : > { %v414_v53 = vld [vmem:[%s9000_s28 + $0x750] sm:$0xf]  ;;  %v416_v54 = vld [vmem:[%s9000_s28 + $0x760] sm:$0xf]  ;;  %413 = vst [vmem:[%s9004_s29 + $0x1d0] sm:$0xf] %v412_v52 }
  0x64   : > { %415 = vst [vmem:[%s9004_s29 + $0x1d4] sm:$0xf] %v414_v53  ;;  %417 = vst [vmem:[%s9004_s29 + $0x1d8] sm:$0xf] %v416_v54  ;;  %v418_v55 = vld [vmem:[%s9000_s28 + $0x770] sm:$0xf] }
  0x65   : > { %v420_v56 = vld [vmem:[%s9000_s28 + $0x780] sm:$0xf]  ;;  %v422_v57 = vld [vmem:[%s9000_s28 + $0x790] sm:$0xf]  ;;  %419 = vst [vmem:[%s9004_s29 + $0x1dc] sm:$0xf] %v418_v55 }
  0x66   : > { %421 = vst [vmem:[%s9004_s29 + $0x1e0] sm:$0xf] %v420_v56  ;;  %423 = vst [vmem:[%s9004_s29 + $0x1e4] sm:$0xf] %v422_v57  ;;  %v424_v58 = vld [vmem:[%s9000_s28 + $0x7a0] sm:$0xf] }
  0x67   : > { %v426_v59 = vld [vmem:[%s9000_s28 + $0x7b0] sm:$0xf]  ;;  %v428_v60 = vld [vmem:[%s9000_s28 + $0x7c0] sm:$0xf]  ;;  %425 = vst [vmem:[%s9004_s29 + $0x1e8] sm:$0xf] %v424_v58 }
  0x68   : > { %427 = vst [vmem:[%s9004_s29 + $0x1ec] sm:$0xf] %v426_v59  ;;  %429 = vst [vmem:[%s9004_s29 + $0x1f0] sm:$0xf] %v428_v60  ;;  %v430_v61 = vld [vmem:[%s9000_s28 + $0x7d0] sm:$0xf] }
  0x69   : > { %v432_v62 = vld [vmem:[%s9000_s28 + $0x7e0] sm:$0xf]  ;;  %v434_v63 = vld [vmem:[%s9000_s28 + $0x7f0] sm:$0xf]  ;;  %431 = vst [vmem:[%s9004_s29 + $0x1f4] sm:$0xf] %v430_v61 }
  0x6a   : > { %433 = vst [vmem:[%s9004_s29 + $0x1f8] sm:$0xf] %v432_v62  ;;  %435 = vst [vmem:[%s9004_s29 + $0x1fc] sm:$0xf] %v434_v63  ;;  %v436_v0 = vld [vmem:[%s9000_s28 + $0x800] sm:$0xf] }
  0x6b   : > { %v438_v1 = vld [vmem:[%s9000_s28 + $0x810] sm:$0xf]  ;;  %v440_v2 = vld [vmem:[%s9000_s28 + $0x820] sm:$0xf]  ;;  %437 = vst [vmem:[%s9004_s29 + $0x200] sm:$0xf] %v436_v0 }
  0x6c   : > { %439 = vst [vmem:[%s9004_s29 + $0x204] sm:$0xf] %v438_v1  ;;  %441 = vst [vmem:[%s9004_s29 + $0x208] sm:$0xf] %v440_v2  ;;  %v442_v3 = vld [vmem:[%s9000_s28 + $0x830] sm:$0xf] }
  0x6d   : > { %v444_v4 = vld [vmem:[%s9000_s28 + $0x840] sm:$0xf]  ;;  %v446_v5 = vld [vmem:[%s9000_s28 + $0x850] sm:$0xf]  ;;  %443 = vst [vmem:[%s9004_s29 + $0x20c] sm:$0xf] %v442_v3 }
  0x6e   : > { %445 = vst [vmem:[%s9004_s29 + $0x210] sm:$0xf] %v444_v4  ;;  %447 = vst [vmem:[%s9004_s29 + $0x214] sm:$0xf] %v446_v5  ;;  %v448_v6 = vld [vmem:[%s9000_s28 + $0x860] sm:$0xf] }
  0x6f   : > { %v450_v7 = vld [vmem:[%s9000_s28 + $0x870] sm:$0xf]  ;;  %v452_v8 = vld [vmem:[%s9000_s28 + $0x880] sm:$0xf]  ;;  %449 = vst [vmem:[%s9004_s29 + $0x218] sm:$0xf] %v448_v6 }
  0x70   : > { %451 = vst [vmem:[%s9004_s29 + $0x21c] sm:$0xf] %v450_v7  ;;  %453 = vst [vmem:[%s9004_s29 + $0x220] sm:$0xf] %v452_v8  ;;  %v454_v9 = vld [vmem:[%s9000_s28 + $0x890] sm:$0xf] }
  0x71   : > { %v456_v10 = vld [vmem:[%s9000_s28 + $0x8a0] sm:$0xf]  ;;  %v458_v11 = vld [vmem:[%s9000_s28 + $0x8b0] sm:$0xf]  ;;  %455 = vst [vmem:[%s9004_s29 + $0x224] sm:$0xf] %v454_v9 }
  0x72   : > { %457 = vst [vmem:[%s9004_s29 + $0x228] sm:$0xf] %v456_v10  ;;  %459 = vst [vmem:[%s9004_s29 + $0x22c] sm:$0xf] %v458_v11  ;;  %v460_v12 = vld [vmem:[%s9000_s28 + $0x8c0] sm:$0xf] }
  0x73   : > { %v462_v13 = vld [vmem:[%s9000_s28 + $0x8d0] sm:$0xf]  ;;  %v464_v14 = vld [vmem:[%s9000_s28 + $0x8e0] sm:$0xf]  ;;  %461 = vst [vmem:[%s9004_s29 + $0x230] sm:$0xf] %v460_v12 }
  0x74   : > { %463 = vst [vmem:[%s9004_s29 + $0x234] sm:$0xf] %v462_v13  ;;  %465 = vst [vmem:[%s9004_s29 + $0x238] sm:$0xf] %v464_v14  ;;  %v466_v15 = vld [vmem:[%s9000_s28 + $0x8f0] sm:$0xf] }
  0x75   : > { %v468_v16 = vld [vmem:[%s9000_s28 + $0x900] sm:$0xf]  ;;  %v470_v17 = vld [vmem:[%s9000_s28 + $0x910] sm:$0xf]  ;;  %467 = vst [vmem:[%s9004_s29 + $0x23c] sm:$0xf] %v466_v15 }
  0x76   : > { %469 = vst [vmem:[%s9004_s29 + $0x240] sm:$0xf] %v468_v16  ;;  %471 = vst [vmem:[%s9004_s29 + $0x244] sm:$0xf] %v470_v17  ;;  %v472_v18 = vld [vmem:[%s9000_s28 + $0x920] sm:$0xf] }
  0x77   : > { %v474_v19 = vld [vmem:[%s9000_s28 + $0x930] sm:$0xf]  ;;  %v476_v20 = vld [vmem:[%s9000_s28 + $0x940] sm:$0xf]  ;;  %473 = vst [vmem:[%s9004_s29 + $0x248] sm:$0xf] %v472_v18 }
  0x78   : > { %475 = vst [vmem:[%s9004_s29 + $0x24c] sm:$0xf] %v474_v19  ;;  %477 = vst [vmem:[%s9004_s29 + $0x250] sm:$0xf] %v476_v20  ;;  %v478_v21 = vld [vmem:[%s9000_s28 + $0x950] sm:$0xf] }
  0x79   : > { %v480_v22 = vld [vmem:[%s9000_s28 + $0x960] sm:$0xf]  ;;  %v482_v23 = vld [vmem:[%s9000_s28 + $0x970] sm:$0xf]  ;;  %479 = vst [vmem:[%s9004_s29 + $0x254] sm:$0xf] %v478_v21 }
  0x7a   : > { %481 = vst [vmem:[%s9004_s29 + $0x258] sm:$0xf] %v480_v22  ;;  %483 = vst [vmem:[%s9004_s29 + $0x25c] sm:$0xf] %v482_v23  ;;  %v484_v24 = vld [vmem:[%s9000_s28 + $0x980] sm:$0xf] }
  0x7b   : > { %v486_v25 = vld [vmem:[%s9000_s28 + $0x990] sm:$0xf]  ;;  %v488_v26 = vld [vmem:[%s9000_s28 + $0x9a0] sm:$0xf]  ;;  %485 = vst [vmem:[%s9004_s29 + $0x260] sm:$0xf] %v484_v24 }
  0x7c   : > { %487 = vst [vmem:[%s9004_s29 + $0x264] sm:$0xf] %v486_v25  ;;  %489 = vst [vmem:[%s9004_s29 + $0x268] sm:$0xf] %v488_v26  ;;  %v490_v27 = vld [vmem:[%s9000_s28 + $0x9b0] sm:$0xf] }
  0x7d   : > { %v492_v28 = vld [vmem:[%s9000_s28 + $0x9c0] sm:$0xf]  ;;  %v494_v29 = vld [vmem:[%s9000_s28 + $0x9d0] sm:$0xf]  ;;  %491 = vst [vmem:[%s9004_s29 + $0x26c] sm:$0xf] %v490_v27 }
  0x7e   : > { %493 = vst [vmem:[%s9004_s29 + $0x270] sm:$0xf] %v492_v28  ;;  %495 = vst [vmem:[%s9004_s29 + $0x274] sm:$0xf] %v494_v29  ;;  %v496_v30 = vld [vmem:[%s9000_s28 + $0x9e0] sm:$0xf] }
  0x7f   : > { %v498_v31 = vld [vmem:[%s9000_s28 + $0x9f0] sm:$0xf]  ;;  %v500_v32 = vld [vmem:[%s9000_s28 + $0xa00] sm:$0xf]  ;;  %497 = vst [vmem:[%s9004_s29 + $0x278] sm:$0xf] %v496_v30 }
  0x80   : > { %499 = vst [vmem:[%s9004_s29 + $0x27c] sm:$0xf] %v498_v31  ;;  %501 = vst [vmem:[%s9004_s29 + $0x280] sm:$0xf] %v500_v32  ;;  %v502_v33 = vld [vmem:[%s9000_s28 + $0xa10] sm:$0xf] }
  0x81   : > { %v504_v34 = vld [vmem:[%s9000_s28 + $0xa20] sm:$0xf]  ;;  %v506_v35 = vld [vmem:[%s9000_s28 + $0xa30] sm:$0xf]  ;;  %503 = vst [vmem:[%s9004_s29 + $0x284] sm:$0xf] %v502_v33 }
  0x82   : > { %505 = vst [vmem:[%s9004_s29 + $0x288] sm:$0xf] %v504_v34  ;;  %507 = vst [vmem:[%s9004_s29 + $0x28c] sm:$0xf] %v506_v35  ;;  %v508_v36 = vld [vmem:[%s9000_s28 + $0xa40] sm:$0xf] }
  0x83   : > { %v510_v37 = vld [vmem:[%s9000_s28 + $0xa50] sm:$0xf]  ;;  %v512_v38 = vld [vmem:[%s9000_s28 + $0xa60] sm:$0xf]  ;;  %509 = vst [vmem:[%s9004_s29 + $0x290] sm:$0xf] %v508_v36 }
  0x84   : > { %511 = vst [vmem:[%s9004_s29 + $0x294] sm:$0xf] %v510_v37  ;;  %513 = vst [vmem:[%s9004_s29 + $0x298] sm:$0xf] %v512_v38  ;;  %v514_v39 = vld [vmem:[%s9000_s28 + $0xa70] sm:$0xf] }
  0x85   : > { %v516_v40 = vld [vmem:[%s9000_s28 + $0xa80] sm:$0xf]  ;;  %v518_v41 = vld [vmem:[%s9000_s28 + $0xa90] sm:$0xf]  ;;  %515 = vst [vmem:[%s9004_s29 + $0x29c] sm:$0xf] %v514_v39 }
  0x86   : > { %517 = vst [vmem:[%s9004_s29 + $0x2a0] sm:$0xf] %v516_v40  ;;  %519 = vst [vmem:[%s9004_s29 + $0x2a4] sm:$0xf] %v518_v41  ;;  %v520_v42 = vld [vmem:[%s9000_s28 + $0xaa0] sm:$0xf] }
  0x87   : > { %v522_v43 = vld [vmem:[%s9000_s28 + $0xab0] sm:$0xf]  ;;  %v524_v44 = vld [vmem:[%s9000_s28 + $0xac0] sm:$0xf]  ;;  %521 = vst [vmem:[%s9004_s29 + $0x2a8] sm:$0xf] %v520_v42 }
  0x88   : > { %523 = vst [vmem:[%s9004_s29 + $0x2ac] sm:$0xf] %v522_v43  ;;  %525 = vst [vmem:[%s9004_s29 + $0x2b0] sm:$0xf] %v524_v44  ;;  %v526_v45 = vld [vmem:[%s9000_s28 + $0xad0] sm:$0xf] }
  0x89   : > { %v528_v46 = vld [vmem:[%s9000_s28 + $0xae0] sm:$0xf]  ;;  %v530_v47 = vld [vmem:[%s9000_s28 + $0xaf0] sm:$0xf]  ;;  %527 = vst [vmem:[%s9004_s29 + $0x2b4] sm:$0xf] %v526_v45 }
  0x8a   : > { %529 = vst [vmem:[%s9004_s29 + $0x2b8] sm:$0xf] %v528_v46  ;;  %531 = vst [vmem:[%s9004_s29 + $0x2bc] sm:$0xf] %v530_v47  ;;  %v532_v48 = vld [vmem:[%s9000_s28 + $0xb00] sm:$0xf] }
  0x8b   : > { %v534_v49 = vld [vmem:[%s9000_s28 + $0xb10] sm:$0xf]  ;;  %v536_v50 = vld [vmem:[%s9000_s28 + $0xb20] sm:$0xf]  ;;  %533 = vst [vmem:[%s9004_s29 + $0x2c0] sm:$0xf] %v532_v48 }
  0x8c   : > { %535 = vst [vmem:[%s9004_s29 + $0x2c4] sm:$0xf] %v534_v49  ;;  %537 = vst [vmem:[%s9004_s29 + $0x2c8] sm:$0xf] %v536_v50  ;;  %v538_v51 = vld [vmem:[%s9000_s28 + $0xb30] sm:$0xf] }
  0x8d   : > { %v540_v52 = vld [vmem:[%s9000_s28 + $0xb40] sm:$0xf]  ;;  %v542_v53 = vld [vmem:[%s9000_s28 + $0xb50] sm:$0xf]  ;;  %539 = vst [vmem:[%s9004_s29 + $0x2cc] sm:$0xf] %v538_v51 }
  0x8e   : > { %541 = vst [vmem:[%s9004_s29 + $0x2d0] sm:$0xf] %v540_v52  ;;  %543 = vst [vmem:[%s9004_s29 + $0x2d4] sm:$0xf] %v542_v53  ;;  %v544_v54 = vld [vmem:[%s9000_s28 + $0xb60] sm:$0xf] }
  0x8f   : > { %v546_v55 = vld [vmem:[%s9000_s28 + $0xb70] sm:$0xf]  ;;  %v548_v56 = vld [vmem:[%s9000_s28 + $0xb80] sm:$0xf]  ;;  %545 = vst [vmem:[%s9004_s29 + $0x2d8] sm:$0xf] %v544_v54 }
  0x90   : > { %547 = vst [vmem:[%s9004_s29 + $0x2dc] sm:$0xf] %v546_v55  ;;  %549 = vst [vmem:[%s9004_s29 + $0x2e0] sm:$0xf] %v548_v56  ;;  %v550_v57 = vld [vmem:[%s9000_s28 + $0xb90] sm:$0xf] }
  0x91   : > { %v552_v58 = vld [vmem:[%s9000_s28 + $0xba0] sm:$0xf]  ;;  %v554_v59 = vld [vmem:[%s9000_s28 + $0xbb0] sm:$0xf]  ;;  %551 = vst [vmem:[%s9004_s29 + $0x2e4] sm:$0xf] %v550_v57 }
  0x92   : > { %553 = vst [vmem:[%s9004_s29 + $0x2e8] sm:$0xf] %v552_v58  ;;  %555 = vst [vmem:[%s9004_s29 + $0x2ec] sm:$0xf] %v554_v59  ;;  %v556_v60 = vld [vmem:[%s9000_s28 + $0xbc0] sm:$0xf] }
  0x93   : > { %v558_v61 = vld [vmem:[%s9000_s28 + $0xbd0] sm:$0xf]  ;;  %v560_v62 = vld [vmem:[%s9000_s28 + $0xbe0] sm:$0xf]  ;;  %557 = vst [vmem:[%s9004_s29 + $0x2f0] sm:$0xf] %v556_v60 }
  0x94   : > { %559 = vst [vmem:[%s9004_s29 + $0x2f4] sm:$0xf] %v558_v61  ;;  %561 = vst [vmem:[%s9004_s29 + $0x2f8] sm:$0xf] %v560_v62  ;;  %v562_v63 = vld [vmem:[%s9000_s28 + $0xbf0] sm:$0xf] }
  0x95   : > { %v564_v0 = vld [vmem:[%s9000_s28 + $0xc00] sm:$0xf]  ;;  %v566_v1 = vld [vmem:[%s9000_s28 + $0xc10] sm:$0xf]  ;;  %563 = vst [vmem:[%s9004_s29 + $0x2fc] sm:$0xf] %v562_v63 }
  0x96   : > { %565 = vst [vmem:[%s9004_s29 + $0x300] sm:$0xf] %v564_v0  ;;  %567 = vst [vmem:[%s9004_s29 + $0x304] sm:$0xf] %v566_v1  ;;  %v568_v2 = vld [vmem:[%s9000_s28 + $0xc20] sm:$0xf] }
  0x97   : > { %v570_v3 = vld [vmem:[%s9000_s28 + $0xc30] sm:$0xf]  ;;  %v572_v4 = vld [vmem:[%s9000_s28 + $0xc40] sm:$0xf]  ;;  %569 = vst [vmem:[%s9004_s29 + $0x308] sm:$0xf] %v568_v2 }
  0x98   : > { %571 = vst [vmem:[%s9004_s29 + $0x30c] sm:$0xf] %v570_v3  ;;  %573 = vst [vmem:[%s9004_s29 + $0x310] sm:$0xf] %v572_v4  ;;  %v574_v5 = vld [vmem:[%s9000_s28 + $0xc50] sm:$0xf] }
  0x99   : > { %v576_v6 = vld [vmem:[%s9000_s28 + $0xc60] sm:$0xf]  ;;  %v578_v7 = vld [vmem:[%s9000_s28 + $0xc70] sm:$0xf]  ;;  %575 = vst [vmem:[%s9004_s29 + $0x314] sm:$0xf] %v574_v5 }
  0x9a   : > { %577 = vst [vmem:[%s9004_s29 + $0x318] sm:$0xf] %v576_v6  ;;  %579 = vst [vmem:[%s9004_s29 + $0x31c] sm:$0xf] %v578_v7  ;;  %v580_v8 = vld [vmem:[%s9000_s28 + $0xc80] sm:$0xf] }
  0x9b   : > { %v582_v9 = vld [vmem:[%s9000_s28 + $0xc90] sm:$0xf]  ;;  %v584_v10 = vld [vmem:[%s9000_s28 + $0xca0] sm:$0xf]  ;;  %581 = vst [vmem:[%s9004_s29 + $0x320] sm:$0xf] %v580_v8 }
  0x9c   : > { %583 = vst [vmem:[%s9004_s29 + $0x324] sm:$0xf] %v582_v9  ;;  %585 = vst [vmem:[%s9004_s29 + $0x328] sm:$0xf] %v584_v10  ;;  %v586_v11 = vld [vmem:[%s9000_s28 + $0xcb0] sm:$0xf] }
  0x9d   : > { %v588_v12 = vld [vmem:[%s9000_s28 + $0xcc0] sm:$0xf]  ;;  %v590_v13 = vld [vmem:[%s9000_s28 + $0xcd0] sm:$0xf]  ;;  %587 = vst [vmem:[%s9004_s29 + $0x32c] sm:$0xf] %v586_v11 }
  0x9e   : > { %589 = vst [vmem:[%s9004_s29 + $0x330] sm:$0xf] %v588_v12  ;;  %591 = vst [vmem:[%s9004_s29 + $0x334] sm:$0xf] %v590_v13  ;;  %v592_v14 = vld [vmem:[%s9000_s28 + $0xce0] sm:$0xf] }
  0x9f   : > { %v594_v15 = vld [vmem:[%s9000_s28 + $0xcf0] sm:$0xf]  ;;  %v596_v16 = vld [vmem:[%s9000_s28 + $0xd00] sm:$0xf]  ;;  %593 = vst [vmem:[%s9004_s29 + $0x338] sm:$0xf] %v592_v14 }
  0xa0   : > { %595 = vst [vmem:[%s9004_s29 + $0x33c] sm:$0xf] %v594_v15  ;;  %597 = vst [vmem:[%s9004_s29 + $0x340] sm:$0xf] %v596_v16  ;;  %v598_v17 = vld [vmem:[%s9000_s28 + $0xd10] sm:$0xf] }
  0xa1   : > { %v600_v18 = vld [vmem:[%s9000_s28 + $0xd20] sm:$0xf]  ;;  %v602_v19 = vld [vmem:[%s9000_s28 + $0xd30] sm:$0xf]  ;;  %599 = vst [vmem:[%s9004_s29 + $0x344] sm:$0xf] %v598_v17 }
  0xa2   : > { %601 = vst [vmem:[%s9004_s29 + $0x348] sm:$0xf] %v600_v18  ;;  %603 = vst [vmem:[%s9004_s29 + $0x34c] sm:$0xf] %v602_v19  ;;  %v604_v20 = vld [vmem:[%s9000_s28 + $0xd40] sm:$0xf] }
  0xa3   : > { %v606_v21 = vld [vmem:[%s9000_s28 + $0xd50] sm:$0xf]  ;;  %v608_v22 = vld [vmem:[%s9000_s28 + $0xd60] sm:$0xf]  ;;  %605 = vst [vmem:[%s9004_s29 + $0x350] sm:$0xf] %v604_v20 }
  0xa4   : > { %607 = vst [vmem:[%s9004_s29 + $0x354] sm:$0xf] %v606_v21  ;;  %609 = vst [vmem:[%s9004_s29 + $0x358] sm:$0xf] %v608_v22  ;;  %v610_v23 = vld [vmem:[%s9000_s28 + $0xd70] sm:$0xf] }
  0xa5   : > { %v612_v24 = vld [vmem:[%s9000_s28 + $0xd80] sm:$0xf]  ;;  %v614_v25 = vld [vmem:[%s9000_s28 + $0xd90] sm:$0xf]  ;;  %611 = vst [vmem:[%s9004_s29 + $0x35c] sm:$0xf] %v610_v23 }
  0xa6   : > { %613 = vst [vmem:[%s9004_s29 + $0x360] sm:$0xf] %v612_v24  ;;  %615 = vst [vmem:[%s9004_s29 + $0x364] sm:$0xf] %v614_v25  ;;  %v616_v26 = vld [vmem:[%s9000_s28 + $0xda0] sm:$0xf] }
  0xa7   : > { %v618_v27 = vld [vmem:[%s9000_s28 + $0xdb0] sm:$0xf]  ;;  %v620_v28 = vld [vmem:[%s9000_s28 + $0xdc0] sm:$0xf]  ;;  %617 = vst [vmem:[%s9004_s29 + $0x368] sm:$0xf] %v616_v26 }
  0xa8   : > { %619 = vst [vmem:[%s9004_s29 + $0x36c] sm:$0xf] %v618_v27  ;;  %621 = vst [vmem:[%s9004_s29 + $0x370] sm:$0xf] %v620_v28  ;;  %v622_v29 = vld [vmem:[%s9000_s28 + $0xdd0] sm:$0xf] }
  0xa9   : > { %v624_v30 = vld [vmem:[%s9000_s28 + $0xde0] sm:$0xf]  ;;  %v626_v31 = vld [vmem:[%s9000_s28 + $0xdf0] sm:$0xf]  ;;  %623 = vst [vmem:[%s9004_s29 + $0x374] sm:$0xf] %v622_v29 }
  0xaa   : > { %625 = vst [vmem:[%s9004_s29 + $0x378] sm:$0xf] %v624_v30  ;;  %627 = vst [vmem:[%s9004_s29 + $0x37c] sm:$0xf] %v626_v31  ;;  %v628_v32 = vld [vmem:[%s9000_s28 + $0xe00] sm:$0xf] }
  0xab   : > { %v630_v33 = vld [vmem:[%s9000_s28 + $0xe10] sm:$0xf]  ;;  %v632_v34 = vld [vmem:[%s9000_s28 + $0xe20] sm:$0xf]  ;;  %629 = vst [vmem:[%s9004_s29 + $0x380] sm:$0xf] %v628_v32 }
  0xac   : > { %631 = vst [vmem:[%s9004_s29 + $0x384] sm:$0xf] %v630_v33  ;;  %633 = vst [vmem:[%s9004_s29 + $0x388] sm:$0xf] %v632_v34  ;;  %v634_v35 = vld [vmem:[%s9000_s28 + $0xe30] sm:$0xf] }
  0xad   : > { %v636_v36 = vld [vmem:[%s9000_s28 + $0xe40] sm:$0xf]  ;;  %v638_v37 = vld [vmem:[%s9000_s28 + $0xe50] sm:$0xf]  ;;  %635 = vst [vmem:[%s9004_s29 + $0x38c] sm:$0xf] %v634_v35 }
  0xae   : > { %637 = vst [vmem:[%s9004_s29 + $0x390] sm:$0xf] %v636_v36  ;;  %639 = vst [vmem:[%s9004_s29 + $0x394] sm:$0xf] %v638_v37  ;;  %v640_v38 = vld [vmem:[%s9000_s28 + $0xe60] sm:$0xf] }
  0xaf   : > { %v642_v39 = vld [vmem:[%s9000_s28 + $0xe70] sm:$0xf]  ;;  %v644_v40 = vld [vmem:[%s9000_s28 + $0xe80] sm:$0xf]  ;;  %641 = vst [vmem:[%s9004_s29 + $0x398] sm:$0xf] %v640_v38 }
  0xb0   : > { %643 = vst [vmem:[%s9004_s29 + $0x39c] sm:$0xf] %v642_v39  ;;  %645 = vst [vmem:[%s9004_s29 + $0x3a0] sm:$0xf] %v644_v40  ;;  %v646_v41 = vld [vmem:[%s9000_s28 + $0xe90] sm:$0xf] }
  0xb1   : > { %v648_v42 = vld [vmem:[%s9000_s28 + $0xea0] sm:$0xf]  ;;  %v650_v43 = vld [vmem:[%s9000_s28 + $0xeb0] sm:$0xf]  ;;  %647 = vst [vmem:[%s9004_s29 + $0x3a4] sm:$0xf] %v646_v41 }
  0xb2   : > { %649 = vst [vmem:[%s9004_s29 + $0x3a8] sm:$0xf] %v648_v42  ;;  %651 = vst [vmem:[%s9004_s29 + $0x3ac] sm:$0xf] %v650_v43  ;;  %v652_v44 = vld [vmem:[%s9000_s28 + $0xec0] sm:$0xf] }
  0xb3   : > { %v654_v45 = vld [vmem:[%s9000_s28 + $0xed0] sm:$0xf]  ;;  %v656_v46 = vld [vmem:[%s9000_s28 + $0xee0] sm:$0xf]  ;;  %653 = vst [vmem:[%s9004_s29 + $0x3b0] sm:$0xf] %v652_v44 }
  0xb4   : > { %655 = vst [vmem:[%s9004_s29 + $0x3b4] sm:$0xf] %v654_v45  ;;  %657 = vst [vmem:[%s9004_s29 + $0x3b8] sm:$0xf] %v656_v46  ;;  %v658_v47 = vld [vmem:[%s9000_s28 + $0xef0] sm:$0xf] }
  0xb5   : > { %v660_v48 = vld [vmem:[%s9000_s28 + $0xf00] sm:$0xf]  ;;  %v662_v49 = vld [vmem:[%s9000_s28 + $0xf10] sm:$0xf]  ;;  %659 = vst [vmem:[%s9004_s29 + $0x3bc] sm:$0xf] %v658_v47 }
  0xb6   : > { %661 = vst [vmem:[%s9004_s29 + $0x3c0] sm:$0xf] %v660_v48  ;;  %663 = vst [vmem:[%s9004_s29 + $0x3c4] sm:$0xf] %v662_v49  ;;  %v664_v50 = vld [vmem:[%s9000_s28 + $0xf20] sm:$0xf] }
  0xb7   : > { %v666_v51 = vld [vmem:[%s9000_s28 + $0xf30] sm:$0xf]  ;;  %v668_v52 = vld [vmem:[%s9000_s28 + $0xf40] sm:$0xf]  ;;  %665 = vst [vmem:[%s9004_s29 + $0x3c8] sm:$0xf] %v664_v50 }
  0xb8   : > { %667 = vst [vmem:[%s9004_s29 + $0x3cc] sm:$0xf] %v666_v51  ;;  %669 = vst [vmem:[%s9004_s29 + $0x3d0] sm:$0xf] %v668_v52  ;;  %v670_v53 = vld [vmem:[%s9000_s28 + $0xf50] sm:$0xf] }
  0xb9   : > { %v672_v54 = vld [vmem:[%s9000_s28 + $0xf60] sm:$0xf]  ;;  %v674_v55 = vld [vmem:[%s9000_s28 + $0xf70] sm:$0xf]  ;;  %671 = vst [vmem:[%s9004_s29 + $0x3d4] sm:$0xf] %v670_v53 }
  0xba   : > { %673 = vst [vmem:[%s9004_s29 + $0x3d8] sm:$0xf] %v672_v54  ;;  %675 = vst [vmem:[%s9004_s29 + $0x3dc] sm:$0xf] %v674_v55  ;;  %v676_v56 = vld [vmem:[%s9000_s28 + $0xf80] sm:$0xf] }
  0xbb   : > { %v678_v57 = vld [vmem:[%s9000_s28 + $0xf90] sm:$0xf]  ;;  %v680_v58 = vld [vmem:[%s9000_s28 + $0xfa0] sm:$0xf]  ;;  %677 = vst [vmem:[%s9004_s29 + $0x3e0] sm:$0xf] %v676_v56 }
  0xbc   : > { %679 = vst [vmem:[%s9004_s29 + $0x3e4] sm:$0xf] %v678_v57  ;;  %681 = vst [vmem:[%s9004_s29 + $0x3e8] sm:$0xf] %v680_v58  ;;  %v682_v59 = vld [vmem:[%s9000_s28 + $0xfb0] sm:$0xf] }
  0xbd   : > { %v684_v60 = vld [vmem:[%s9000_s28 + $0xfc0] sm:$0xf]  ;;  %v686_v61 = vld [vmem:[%s9000_s28 + $0xfd0] sm:$0xf]  ;;  %683 = vst [vmem:[%s9004_s29 + $0x3ec] sm:$0xf] %v682_v59 }
  0xbe   : > { %685 = vst [vmem:[%s9004_s29 + $0x3f0] sm:$0xf] %v684_v60  ;;  %687 = vst [vmem:[%s9004_s29 + $0x3f4] sm:$0xf] %v686_v61  ;;  %v688_v62 = vld [vmem:[%s9000_s28 + $0xfe0] sm:$0xf] }
  0xbf   : > { %v690_v63 = vld [vmem:[%s9000_s28 + $0xff0] sm:$0xf]  ;;  %v692_v0 = vld [vmem:[%s9000_s28 + $0x1000] sm:$0xf]  ;;  %689 = vst [vmem:[%s9004_s29 + $0x3f8] sm:$0xf] %v688_v62 }
  0xc0   : > { %691 = vst [vmem:[%s9004_s29 + $0x3fc] sm:$0xf] %v690_v63  ;;  %693 = vst [vmem:[%s9004_s29 + $0x400] sm:$0xf] %v692_v0  ;;  %v694_v1 = vld [vmem:[%s9000_s28 + $0x1010] sm:$0xf] }
  0xc1   : > { %v696_v2 = vld [vmem:[%s9000_s28 + $0x1020] sm:$0xf]  ;;  %v698_v3 = vld [vmem:[%s9000_s28 + $0x1030] sm:$0xf]  ;;  %695 = vst [vmem:[%s9004_s29 + $0x404] sm:$0xf] %v694_v1 }
  0xc2   : > { %697 = vst [vmem:[%s9004_s29 + $0x408] sm:$0xf] %v696_v2  ;;  %699 = vst [vmem:[%s9004_s29 + $0x40c] sm:$0xf] %v698_v3  ;;  %v700_v4 = vld [vmem:[%s9000_s28 + $0x1040] sm:$0xf] }
  0xc3   : > { %v702_v5 = vld [vmem:[%s9000_s28 + $0x1050] sm:$0xf]  ;;  %v704_v6 = vld [vmem:[%s9000_s28 + $0x1060] sm:$0xf]  ;;  %701 = vst [vmem:[%s9004_s29 + $0x410] sm:$0xf] %v700_v4 }
  0xc4   : > { %703 = vst [vmem:[%s9004_s29 + $0x414] sm:$0xf] %v702_v5  ;;  %705 = vst [vmem:[%s9004_s29 + $0x418] sm:$0xf] %v704_v6  ;;  %v706_v7 = vld [vmem:[%s9000_s28 + $0x1070] sm:$0xf] }
  0xc5   : > { %v708_v8 = vld [vmem:[%s9000_s28 + $0x1080] sm:$0xf]  ;;  %v710_v9 = vld [vmem:[%s9000_s28 + $0x1090] sm:$0xf]  ;;  %707 = vst [vmem:[%s9004_s29 + $0x41c] sm:$0xf] %v706_v7 }
  0xc6   : > { %709 = vst [vmem:[%s9004_s29 + $0x420] sm:$0xf] %v708_v8  ;;  %711 = vst [vmem:[%s9004_s29 + $0x424] sm:$0xf] %v710_v9  ;;  %v712_v10 = vld [vmem:[%s9000_s28 + $0x10a0] sm:$0xf] }
  0xc7   : > { %v714_v11 = vld [vmem:[%s9000_s28 + $0x10b0] sm:$0xf]  ;;  %v716_v12 = vld [vmem:[%s9000_s28 + $0x10c0] sm:$0xf]  ;;  %713 = vst [vmem:[%s9004_s29 + $0x428] sm:$0xf] %v712_v10 }
  0xc8   : > { %715 = vst [vmem:[%s9004_s29 + $0x42c] sm:$0xf] %v714_v11  ;;  %717 = vst [vmem:[%s9004_s29 + $0x430] sm:$0xf] %v716_v12  ;;  %v718_v13 = vld [vmem:[%s9000_s28 + $0x10d0] sm:$0xf] }
  0xc9   : > { %v720_v14 = vld [vmem:[%s9000_s28 + $0x10e0] sm:$0xf]  ;;  %v722_v15 = vld [vmem:[%s9000_s28 + $0x10f0] sm:$0xf]  ;;  %719 = vst [vmem:[%s9004_s29 + $0x434] sm:$0xf] %v718_v13 }
  0xca   : > { %721 = vst [vmem:[%s9004_s29 + $0x438] sm:$0xf] %v720_v14  ;;  %723 = vst [vmem:[%s9004_s29 + $0x43c] sm:$0xf] %v722_v15  ;;  %v724_v16 = vld [vmem:[%s9000_s28 + $0x1100] sm:$0xf] }
  0xcb   : > { %v726_v17 = vld [vmem:[%s9000_s28 + $0x1110] sm:$0xf]  ;;  %v728_v18 = vld [vmem:[%s9000_s28 + $0x1120] sm:$0xf]  ;;  %725 = vst [vmem:[%s9004_s29 + $0x440] sm:$0xf] %v724_v16 }
  0xcc   : > { %727 = vst [vmem:[%s9004_s29 + $0x444] sm:$0xf] %v726_v17  ;;  %729 = vst [vmem:[%s9004_s29 + $0x448] sm:$0xf] %v728_v18  ;;  %v730_v19 = vld [vmem:[%s9000_s28 + $0x1130] sm:$0xf] }
  0xcd   : > { %v732_v20 = vld [vmem:[%s9000_s28 + $0x1140] sm:$0xf]  ;;  %v734_v21 = vld [vmem:[%s9000_s28 + $0x1150] sm:$0xf]  ;;  %731 = vst [vmem:[%s9004_s29 + $0x44c] sm:$0xf] %v730_v19 }
  0xce   : > { %733 = vst [vmem:[%s9004_s29 + $0x450] sm:$0xf] %v732_v20  ;;  %735 = vst [vmem:[%s9004_s29 + $0x454] sm:$0xf] %v734_v21  ;;  %v736_v22 = vld [vmem:[%s9000_s28 + $0x1160] sm:$0xf] }
  0xcf   : > { %v738_v23 = vld [vmem:[%s9000_s28 + $0x1170] sm:$0xf]  ;;  %v740_v24 = vld [vmem:[%s9000_s28 + $0x1180] sm:$0xf]  ;;  %737 = vst [vmem:[%s9004_s29 + $0x458] sm:$0xf] %v736_v22 }
  0xd0   : > { %739 = vst [vmem:[%s9004_s29 + $0x45c] sm:$0xf] %v738_v23  ;;  %741 = vst [vmem:[%s9004_s29 + $0x460] sm:$0xf] %v740_v24  ;;  %v742_v25 = vld [vmem:[%s9000_s28 + $0x1190] sm:$0xf] }
  0xd1   : > { %v744_v26 = vld [vmem:[%s9000_s28 + $0x11a0] sm:$0xf]  ;;  %v746_v27 = vld [vmem:[%s9000_s28 + $0x11b0] sm:$0xf]  ;;  %743 = vst [vmem:[%s9004_s29 + $0x464] sm:$0xf] %v742_v25 }
  0xd2   : > { %745 = vst [vmem:[%s9004_s29 + $0x468] sm:$0xf] %v744_v26  ;;  %747 = vst [vmem:[%s9004_s29 + $0x46c] sm:$0xf] %v746_v27  ;;  %v748_v28 = vld [vmem:[%s9000_s28 + $0x11c0] sm:$0xf] }
  0xd3   : > { %v750_v29 = vld [vmem:[%s9000_s28 + $0x11d0] sm:$0xf]  ;;  %v752_v30 = vld [vmem:[%s9000_s28 + $0x11e0] sm:$0xf]  ;;  %749 = vst [vmem:[%s9004_s29 + $0x470] sm:$0xf] %v748_v28 }
  0xd4   : > { %751 = vst [vmem:[%s9004_s29 + $0x474] sm:$0xf] %v750_v29  ;;  %753 = vst [vmem:[%s9004_s29 + $0x478] sm:$0xf] %v752_v30  ;;  %v754_v31 = vld [vmem:[%s9000_s28 + $0x11f0] sm:$0xf] }
  0xd5   : > { %v756_v32 = vld [vmem:[%s9000_s28 + $0x1200] sm:$0xf]  ;;  %v758_v33 = vld [vmem:[%s9000_s28 + $0x1210] sm:$0xf]  ;;  %755 = vst [vmem:[%s9004_s29 + $0x47c] sm:$0xf] %v754_v31 }
  0xd6   : > { %757 = vst [vmem:[%s9004_s29 + $0x480] sm:$0xf] %v756_v32  ;;  %759 = vst [vmem:[%s9004_s29 + $0x484] sm:$0xf] %v758_v33  ;;  %v760_v34 = vld [vmem:[%s9000_s28 + $0x1220] sm:$0xf] }
  0xd7   : > { %v762_v35 = vld [vmem:[%s9000_s28 + $0x1230] sm:$0xf]  ;;  %v764_v36 = vld [vmem:[%s9000_s28 + $0x1240] sm:$0xf]  ;;  %761 = vst [vmem:[%s9004_s29 + $0x488] sm:$0xf] %v760_v34 }
  0xd8   : > { %763 = vst [vmem:[%s9004_s29 + $0x48c] sm:$0xf] %v762_v35  ;;  %765 = vst [vmem:[%s9004_s29 + $0x490] sm:$0xf] %v764_v36  ;;  %v766_v37 = vld [vmem:[%s9000_s28 + $0x1250] sm:$0xf] }
  0xd9   : > { %v768_v38 = vld [vmem:[%s9000_s28 + $0x1260] sm:$0xf]  ;;  %v770_v39 = vld [vmem:[%s9000_s28 + $0x1270] sm:$0xf]  ;;  %767 = vst [vmem:[%s9004_s29 + $0x494] sm:$0xf] %v766_v37 }
  0xda   : > { %769 = vst [vmem:[%s9004_s29 + $0x498] sm:$0xf] %v768_v38  ;;  %771 = vst [vmem:[%s9004_s29 + $0x49c] sm:$0xf] %v770_v39  ;;  %v772_v40 = vld [vmem:[%s9000_s28 + $0x1280] sm:$0xf] }
  0xdb   : > { %v774_v41 = vld [vmem:[%s9000_s28 + $0x1290] sm:$0xf]  ;;  %v776_v42 = vld [vmem:[%s9000_s28 + $0x12a0] sm:$0xf]  ;;  %773 = vst [vmem:[%s9004_s29 + $0x4a0] sm:$0xf] %v772_v40 }
  0xdc   : > { %775 = vst [vmem:[%s9004_s29 + $0x4a4] sm:$0xf] %v774_v41  ;;  %777 = vst [vmem:[%s9004_s29 + $0x4a8] sm:$0xf] %v776_v42  ;;  %v778_v43 = vld [vmem:[%s9000_s28 + $0x12b0] sm:$0xf] }
  0xdd   : > { %v780_v44 = vld [vmem:[%s9000_s28 + $0x12c0] sm:$0xf]  ;;  %v782_v45 = vld [vmem:[%s9000_s28 + $0x12d0] sm:$0xf]  ;;  %779 = vst [vmem:[%s9004_s29 + $0x4ac] sm:$0xf] %v778_v43 }
  0xde   : > { %781 = vst [vmem:[%s9004_s29 + $0x4b0] sm:$0xf] %v780_v44  ;;  %783 = vst [vmem:[%s9004_s29 + $0x4b4] sm:$0xf] %v782_v45  ;;  %v784_v46 = vld [vmem:[%s9000_s28 + $0x12e0] sm:$0xf] }
  0xdf   : > { %v786_v47 = vld [vmem:[%s9000_s28 + $0x12f0] sm:$0xf]  ;;  %v788_v48 = vld [vmem:[%s9000_s28 + $0x1300] sm:$0xf]  ;;  %785 = vst [vmem:[%s9004_s29 + $0x4b8] sm:$0xf] %v784_v46 }
  0xe0   : > { %787 = vst [vmem:[%s9004_s29 + $0x4bc] sm:$0xf] %v786_v47  ;;  %789 = vst [vmem:[%s9004_s29 + $0x4c0] sm:$0xf] %v788_v48  ;;  %v790_v49 = vld [vmem:[%s9000_s28 + $0x1310] sm:$0xf] }
  0xe1   : > { %v792_v50 = vld [vmem:[%s9000_s28 + $0x1320] sm:$0xf]  ;;  %v794_v51 = vld [vmem:[%s9000_s28 + $0x1330] sm:$0xf]  ;;  %791 = vst [vmem:[%s9004_s29 + $0x4c4] sm:$0xf] %v790_v49 }
  0xe2   : > { %793 = vst [vmem:[%s9004_s29 + $0x4c8] sm:$0xf] %v792_v50  ;;  %795 = vst [vmem:[%s9004_s29 + $0x4cc] sm:$0xf] %v794_v51  ;;  %v796_v52 = vld [vmem:[%s9000_s28 + $0x1340] sm:$0xf] }
  0xe3   : > { %v798_v53 = vld [vmem:[%s9000_s28 + $0x1350] sm:$0xf]  ;;  %v800_v54 = vld [vmem:[%s9000_s28 + $0x1360] sm:$0xf]  ;;  %797 = vst [vmem:[%s9004_s29 + $0x4d0] sm:$0xf] %v796_v52 }
  0xe4   : > { %799 = vst [vmem:[%s9004_s29 + $0x4d4] sm:$0xf] %v798_v53  ;;  %801 = vst [vmem:[%s9004_s29 + $0x4d8] sm:$0xf] %v800_v54  ;;  %v802_v55 = vld [vmem:[%s9000_s28 + $0x1370] sm:$0xf] }
  0xe5   : > { %v804_v56 = vld [vmem:[%s9000_s28 + $0x1380] sm:$0xf]  ;;  %v806_v57 = vld [vmem:[%s9000_s28 + $0x1390] sm:$0xf]  ;;  %803 = vst [vmem:[%s9004_s29 + $0x4dc] sm:$0xf] %v802_v55 }
  0xe6   : > { %805 = vst [vmem:[%s9004_s29 + $0x4e0] sm:$0xf] %v804_v56  ;;  %807 = vst [vmem:[%s9004_s29 + $0x4e4] sm:$0xf] %v806_v57  ;;  %v808_v58 = vld [vmem:[%s9000_s28 + $0x13a0] sm:$0xf] }
  0xe7   : > { %v810_v59 = vld [vmem:[%s9000_s28 + $0x13b0] sm:$0xf]  ;;  %v812_v60 = vld [vmem:[%s9000_s28 + $0x13c0] sm:$0xf]  ;;  %809 = vst [vmem:[%s9004_s29 + $0x4e8] sm:$0xf] %v808_v58 }
  0xe8   : > { %811 = vst [vmem:[%s9004_s29 + $0x4ec] sm:$0xf] %v810_v59  ;;  %813 = vst [vmem:[%s9004_s29 + $0x4f0] sm:$0xf] %v812_v60  ;;  %v814_v61 = vld [vmem:[%s9000_s28 + $0x13d0] sm:$0xf] }
  0xe9   : > { %v816_v62 = vld [vmem:[%s9000_s28 + $0x13e0] sm:$0xf]  ;;  %v818_v63 = vld [vmem:[%s9000_s28 + $0x13f0] sm:$0xf]  ;;  %815 = vst [vmem:[%s9004_s29 + $0x4f4] sm:$0xf] %v814_v61 }
  0xea   : > { %817 = vst [vmem:[%s9004_s29 + $0x4f8] sm:$0xf] %v816_v62  ;;  %819 = vst [vmem:[%s9004_s29 + $0x4fc] sm:$0xf] %v818_v63  ;;  %v820_v0 = vld [vmem:[%s9000_s28 + $0x1400] sm:$0xf] }
  0xeb   : > { %v822_v1 = vld [vmem:[%s9000_s28 + $0x1410] sm:$0xf]  ;;  %v824_v2 = vld [vmem:[%s9000_s28 + $0x1420] sm:$0xf]  ;;  %821 = vst [vmem:[%s9004_s29 + $0x500] sm:$0xf] %v820_v0 }
  0xec   : > { %823 = vst [vmem:[%s9004_s29 + $0x504] sm:$0xf] %v822_v1  ;;  %825 = vst [vmem:[%s9004_s29 + $0x508] sm:$0xf] %v824_v2  ;;  %v826_v3 = vld [vmem:[%s9000_s28 + $0x1430] sm:$0xf] }
  0xed   : > { %v828_v4 = vld [vmem:[%s9000_s28 + $0x1440] sm:$0xf]  ;;  %v830_v5 = vld [vmem:[%s9000_s28 + $0x1450] sm:$0xf]  ;;  %827 = vst [vmem:[%s9004_s29 + $0x50c] sm:$0xf] %v826_v3 }
  0xee   : > { %829 = vst [vmem:[%s9004_s29 + $0x510] sm:$0xf] %v828_v4  ;;  %831 = vst [vmem:[%s9004_s29 + $0x514] sm:$0xf] %v830_v5  ;;  %v832_v6 = vld [vmem:[%s9000_s28 + $0x1460] sm:$0xf] }
  0xef   : > { %v834_v7 = vld [vmem:[%s9000_s28 + $0x1470] sm:$0xf]  ;;  %v836_v8 = vld [vmem:[%s9000_s28 + $0x1480] sm:$0xf]  ;;  %833 = vst [vmem:[%s9004_s29 + $0x518] sm:$0xf] %v832_v6 }
  0xf0   : > { %835 = vst [vmem:[%s9004_s29 + $0x51c] sm:$0xf] %v834_v7  ;;  %837 = vst [vmem:[%s9004_s29 + $0x520] sm:$0xf] %v836_v8  ;;  %v838_v9 = vld [vmem:[%s9000_s28 + $0x1490] sm:$0xf] }
  0xf1   : > { %v840_v10 = vld [vmem:[%s9000_s28 + $0x14a0] sm:$0xf]  ;;  %v842_v11 = vld [vmem:[%s9000_s28 + $0x14b0] sm:$0xf]  ;;  %839 = vst [vmem:[%s9004_s29 + $0x524] sm:$0xf] %v838_v9 }
  0xf2   : > { %841 = vst [vmem:[%s9004_s29 + $0x528] sm:$0xf] %v840_v10  ;;  %843 = vst [vmem:[%s9004_s29 + $0x52c] sm:$0xf] %v842_v11  ;;  %v844_v12 = vld [vmem:[%s9000_s28 + $0x14c0] sm:$0xf] }
  0xf3   : > { %v846_v13 = vld [vmem:[%s9000_s28 + $0x14d0] sm:$0xf]  ;;  %v848_v14 = vld [vmem:[%s9000_s28 + $0x14e0] sm:$0xf]  ;;  %845 = vst [vmem:[%s9004_s29 + $0x530] sm:$0xf] %v844_v12 }
  0xf4   : > { %847 = vst [vmem:[%s9004_s29 + $0x534] sm:$0xf] %v846_v13  ;;  %849 = vst [vmem:[%s9004_s29 + $0x538] sm:$0xf] %v848_v14  ;;  %v850_v15 = vld [vmem:[%s9000_s28 + $0x14f0] sm:$0xf] }
  0xf5   : > { %v852_v16 = vld [vmem:[%s9000_s28 + $0x1500] sm:$0xf]  ;;  %v854_v17 = vld [vmem:[%s9000_s28 + $0x1510] sm:$0xf]  ;;  %851 = vst [vmem:[%s9004_s29 + $0x53c] sm:$0xf] %v850_v15 }
  0xf6   : > { %853 = vst [vmem:[%s9004_s29 + $0x540] sm:$0xf] %v852_v16  ;;  %855 = vst [vmem:[%s9004_s29 + $0x544] sm:$0xf] %v854_v17  ;;  %v856_v18 = vld [vmem:[%s9000_s28 + $0x1520] sm:$0xf] }
  0xf7   : > { %v858_v19 = vld [vmem:[%s9000_s28 + $0x1530] sm:$0xf]  ;;  %v860_v20 = vld [vmem:[%s9000_s28 + $0x1540] sm:$0xf]  ;;  %857 = vst [vmem:[%s9004_s29 + $0x548] sm:$0xf] %v856_v18 }
  0xf8   : > { %859 = vst [vmem:[%s9004_s29 + $0x54c] sm:$0xf] %v858_v19  ;;  %861 = vst [vmem:[%s9004_s29 + $0x550] sm:$0xf] %v860_v20  ;;  %v862_v21 = vld [vmem:[%s9000_s28 + $0x1550] sm:$0xf] }
  0xf9   : > { %v864_v22 = vld [vmem:[%s9000_s28 + $0x1560] sm:$0xf]  ;;  %v866_v23 = vld [vmem:[%s9000_s28 + $0x1570] sm:$0xf]  ;;  %863 = vst [vmem:[%s9004_s29 + $0x554] sm:$0xf] %v862_v21 }
  0xfa   : > { %865 = vst [vmem:[%s9004_s29 + $0x558] sm:$0xf] %v864_v22  ;;  %867 = vst [vmem:[%s9004_s29 + $0x55c] sm:$0xf] %v866_v23  ;;  %v868_v24 = vld [vmem:[%s9000_s28 + $0x1580] sm:$0xf] }
  0xfb   : > { %v870_v25 = vld [vmem:[%s9000_s28 + $0x1590] sm:$0xf]  ;;  %v872_v26 = vld [vmem:[%s9000_s28 + $0x15a0] sm:$0xf]  ;;  %869 = vst [vmem:[%s9004_s29 + $0x560] sm:$0xf] %v868_v24 }
  0xfc   : > { %871 = vst [vmem:[%s9004_s29 + $0x564] sm:$0xf] %v870_v25  ;;  %873 = vst [vmem:[%s9004_s29 + $0x568] sm:$0xf] %v872_v26  ;;  %v874_v27 = vld [vmem:[%s9000_s28 + $0x15b0] sm:$0xf] }
  0xfd   : > { %v876_v28 = vld [vmem:[%s9000_s28 + $0x15c0] sm:$0xf]  ;;  %v878_v29 = vld [vmem:[%s9000_s28 + $0x15d0] sm:$0xf]  ;;  %875 = vst [vmem:[%s9004_s29 + $0x56c] sm:$0xf] %v874_v27 }
  0xfe   : > { %877 = vst [vmem:[%s9004_s29 + $0x570] sm:$0xf] %v876_v28  ;;  %879 = vst [vmem:[%s9004_s29 + $0x574] sm:$0xf] %v878_v29  ;;  %v880_v30 = vld [vmem:[%s9000_s28 + $0x15e0] sm:$0xf] }
  0xff   : > { %v882_v31 = vld [vmem:[%s9000_s28 + $0x15f0] sm:$0xf]  ;;  %v884_v32 = vld [vmem:[%s9000_s28 + $0x1600] sm:$0xf]  ;;  %881 = vst [vmem:[%s9004_s29 + $0x578] sm:$0xf] %v880_v30 }
 0x100   : > { %883 = vst [vmem:[%s9004_s29 + $0x57c] sm:$0xf] %v882_v31  ;;  %885 = vst [vmem:[%s9004_s29 + $0x580] sm:$0xf] %v884_v32  ;;  %v886_v33 = vld [vmem:[%s9000_s28 + $0x1610] sm:$0xf] }
 0x101   : > { %v888_v34 = vld [vmem:[%s9000_s28 + $0x1620] sm:$0xf]  ;;  %v890_v35 = vld [vmem:[%s9000_s28 + $0x1630] sm:$0xf]  ;;  %887 = vst [vmem:[%s9004_s29 + $0x584] sm:$0xf] %v886_v33 }
 0x102   : > { %889 = vst [vmem:[%s9004_s29 + $0x588] sm:$0xf] %v888_v34  ;;  %891 = vst [vmem:[%s9004_s29 + $0x58c] sm:$0xf] %v890_v35  ;;  %v892_v36 = vld [vmem:[%s9000_s28 + $0x1640] sm:$0xf] }
 0x103   : > { %v894_v37 = vld [vmem:[%s9000_s28 + $0x1650] sm:$0xf]  ;;  %v896_v38 = vld [vmem:[%s9000_s28 + $0x1660] sm:$0xf]  ;;  %893 = vst [vmem:[%s9004_s29 + $0x590] sm:$0xf] %v892_v36 }
 0x104   : > { %895 = vst [vmem:[%s9004_s29 + $0x594] sm:$0xf] %v894_v37  ;;  %897 = vst [vmem:[%s9004_s29 + $0x598] sm:$0xf] %v896_v38  ;;  %v898_v39 = vld [vmem:[%s9000_s28 + $0x1670] sm:$0xf] }
 0x105   : > { %v900_v40 = vld [vmem:[%s9000_s28 + $0x1680] sm:$0xf]  ;;  %v902_v41 = vld [vmem:[%s9000_s28 + $0x1690] sm:$0xf]  ;;  %899 = vst [vmem:[%s9004_s29 + $0x59c] sm:$0xf] %v898_v39 }
 0x106   : > { %901 = vst [vmem:[%s9004_s29 + $0x5a0] sm:$0xf] %v900_v40  ;;  %903 = vst [vmem:[%s9004_s29 + $0x5a4] sm:$0xf] %v902_v41  ;;  %v904_v42 = vld [vmem:[%s9000_s28 + $0x16a0] sm:$0xf] }
 0x107   : > { %v906_v43 = vld [vmem:[%s9000_s28 + $0x16b0] sm:$0xf]  ;;  %v908_v44 = vld [vmem:[%s9000_s28 + $0x16c0] sm:$0xf]  ;;  %905 = vst [vmem:[%s9004_s29 + $0x5a8] sm:$0xf] %v904_v42 }
 0x108   : > { %907 = vst [vmem:[%s9004_s29 + $0x5ac] sm:$0xf] %v906_v43  ;;  %909 = vst [vmem:[%s9004_s29 + $0x5b0] sm:$0xf] %v908_v44  ;;  %v910_v45 = vld [vmem:[%s9000_s28 + $0x16d0] sm:$0xf] }
 0x109   : > { %v912_v46 = vld [vmem:[%s9000_s28 + $0x16e0] sm:$0xf]  ;;  %v914_v47 = vld [vmem:[%s9000_s28 + $0x16f0] sm:$0xf]  ;;  %911 = vst [vmem:[%s9004_s29 + $0x5b4] sm:$0xf] %v910_v45 }
 0x10a   : > { %913 = vst [vmem:[%s9004_s29 + $0x5b8] sm:$0xf] %v912_v46  ;;  %915 = vst [vmem:[%s9004_s29 + $0x5bc] sm:$0xf] %v914_v47  ;;  %v916_v48 = vld [vmem:[%s9000_s28 + $0x1700] sm:$0xf] }
 0x10b   : > { %v918_v49 = vld [vmem:[%s9000_s28 + $0x1710] sm:$0xf]  ;;  %v920_v50 = vld [vmem:[%s9000_s28 + $0x1720] sm:$0xf]  ;;  %917 = vst [vmem:[%s9004_s29 + $0x5c0] sm:$0xf] %v916_v48 }
 0x10c   : > { %919 = vst [vmem:[%s9004_s29 + $0x5c4] sm:$0xf] %v918_v49  ;;  %921 = vst [vmem:[%s9004_s29 + $0x5c8] sm:$0xf] %v920_v50  ;;  %v922_v51 = vld [vmem:[%s9000_s28 + $0x1730] sm:$0xf] }
 0x10d   : > { %v924_v52 = vld [vmem:[%s9000_s28 + $0x1740] sm:$0xf]  ;;  %v926_v53 = vld [vmem:[%s9000_s28 + $0x1750] sm:$0xf]  ;;  %923 = vst [vmem:[%s9004_s29 + $0x5cc] sm:$0xf] %v922_v51 }
 0x10e   : > { %925 = vst [vmem:[%s9004_s29 + $0x5d0] sm:$0xf] %v924_v52  ;;  %927 = vst [vmem:[%s9004_s29 + $0x5d4] sm:$0xf] %v926_v53  ;;  %v928_v54 = vld [vmem:[%s9000_s28 + $0x1760] sm:$0xf] }
 0x10f   : > { %v930_v55 = vld [vmem:[%s9000_s28 + $0x1770] sm:$0xf]  ;;  %v932_v56 = vld [vmem:[%s9000_s28 + $0x1780] sm:$0xf]  ;;  %929 = vst [vmem:[%s9004_s29 + $0x5d8] sm:$0xf] %v928_v54 }
 0x110   : > { %931 = vst [vmem:[%s9004_s29 + $0x5dc] sm:$0xf] %v930_v55  ;;  %933 = vst [vmem:[%s9004_s29 + $0x5e0] sm:$0xf] %v932_v56  ;;  %v934_v57 = vld [vmem:[%s9000_s28 + $0x1790] sm:$0xf] }
 0x111   : > { %v936_v58 = vld [vmem:[%s9000_s28 + $0x17a0] sm:$0xf]  ;;  %v938_v59 = vld [vmem:[%s9000_s28 + $0x17b0] sm:$0xf]  ;;  %935 = vst [vmem:[%s9004_s29 + $0x5e4] sm:$0xf] %v934_v57 }
 0x112   : > { %937 = vst [vmem:[%s9004_s29 + $0x5e8] sm:$0xf] %v936_v58  ;;  %939 = vst [vmem:[%s9004_s29 + $0x5ec] sm:$0xf] %v938_v59  ;;  %v940_v60 = vld [vmem:[%s9000_s28 + $0x17c0] sm:$0xf] }
 0x113   : > { %v942_v61 = vld [vmem:[%s9000_s28 + $0x17d0] sm:$0xf]  ;;  %v944_v62 = vld [vmem:[%s9000_s28 + $0x17e0] sm:$0xf]  ;;  %941 = vst [vmem:[%s9004_s29 + $0x5f0] sm:$0xf] %v940_v60 }
 0x114   : > { %943 = vst [vmem:[%s9004_s29 + $0x5f4] sm:$0xf] %v942_v61  ;;  %945 = vst [vmem:[%s9004_s29 + $0x5f8] sm:$0xf] %v944_v62  ;;  %v946_v63 = vld [vmem:[%s9000_s28 + $0x17f0] sm:$0xf] }
 0x115   : > { %v948_v0 = vld [vmem:[%s9000_s28 + $0x1800] sm:$0xf]  ;;  %v950_v1 = vld [vmem:[%s9000_s28 + $0x1810] sm:$0xf]  ;;  %947 = vst [vmem:[%s9004_s29 + $0x5fc] sm:$0xf] %v946_v63 }
 0x116   : > { %949 = vst [vmem:[%s9004_s29 + $0x600] sm:$0xf] %v948_v0  ;;  %951 = vst [vmem:[%s9004_s29 + $0x604] sm:$0xf] %v950_v1  ;;  %v952_v2 = vld [vmem:[%s9000_s28 + $0x1820] sm:$0xf] }
 0x117   : > { %v954_v3 = vld [vmem:[%s9000_s28 + $0x1830] sm:$0xf]  ;;  %v956_v4 = vld [vmem:[%s9000_s28 + $0x1840] sm:$0xf]  ;;  %953 = vst [vmem:[%s9004_s29 + $0x608] sm:$0xf] %v952_v2 }
 0x118   : > { %955 = vst [vmem:[%s9004_s29 + $0x60c] sm:$0xf] %v954_v3  ;;  %957 = vst [vmem:[%s9004_s29 + $0x610] sm:$0xf] %v956_v4  ;;  %v958_v5 = vld [vmem:[%s9000_s28 + $0x1850] sm:$0xf] }
 0x119   : > { %v960_v6 = vld [vmem:[%s9000_s28 + $0x1860] sm:$0xf]  ;;  %v962_v7 = vld [vmem:[%s9000_s28 + $0x1870] sm:$0xf]  ;;  %959 = vst [vmem:[%s9004_s29 + $0x614] sm:$0xf] %v958_v5 }
 0x11a   : > { %961 = vst [vmem:[%s9004_s29 + $0x618] sm:$0xf] %v960_v6  ;;  %963 = vst [vmem:[%s9004_s29 + $0x61c] sm:$0xf] %v962_v7  ;;  %v964_v8 = vld [vmem:[%s9000_s28 + $0x1880] sm:$0xf] }
 0x11b   : > { %v966_v9 = vld [vmem:[%s9000_s28 + $0x1890] sm:$0xf]  ;;  %v968_v10 = vld [vmem:[%s9000_s28 + $0x18a0] sm:$0xf]  ;;  %965 = vst [vmem:[%s9004_s29 + $0x620] sm:$0xf] %v964_v8 }
 0x11c   : > { %967 = vst [vmem:[%s9004_s29 + $0x624] sm:$0xf] %v966_v9  ;;  %969 = vst [vmem:[%s9004_s29 + $0x628] sm:$0xf] %v968_v10  ;;  %v970_v11 = vld [vmem:[%s9000_s28 + $0x18b0] sm:$0xf] }
 0x11d   : > { %v972_v12 = vld [vmem:[%s9000_s28 + $0x18c0] sm:$0xf]  ;;  %v974_v13 = vld [vmem:[%s9000_s28 + $0x18d0] sm:$0xf]  ;;  %971 = vst [vmem:[%s9004_s29 + $0x62c] sm:$0xf] %v970_v11 }
 0x11e   : > { %973 = vst [vmem:[%s9004_s29 + $0x630] sm:$0xf] %v972_v12  ;;  %975 = vst [vmem:[%s9004_s29 + $0x634] sm:$0xf] %v974_v13  ;;  %v976_v14 = vld [vmem:[%s9000_s28 + $0x18e0] sm:$0xf] }
 0x11f   : > { %v978_v15 = vld [vmem:[%s9000_s28 + $0x18f0] sm:$0xf]  ;;  %v980_v16 = vld [vmem:[%s9000_s28 + $0x1900] sm:$0xf]  ;;  %977 = vst [vmem:[%s9004_s29 + $0x638] sm:$0xf] %v976_v14 }
 0x120   : > { %979 = vst [vmem:[%s9004_s29 + $0x63c] sm:$0xf] %v978_v15  ;;  %981 = vst [vmem:[%s9004_s29 + $0x640] sm:$0xf] %v980_v16  ;;  %v982_v17 = vld [vmem:[%s9000_s28 + $0x1910] sm:$0xf] }
 0x121   : > { %v984_v18 = vld [vmem:[%s9000_s28 + $0x1920] sm:$0xf]  ;;  %v986_v19 = vld [vmem:[%s9000_s28 + $0x1930] sm:$0xf]  ;;  %983 = vst [vmem:[%s9004_s29 + $0x644] sm:$0xf] %v982_v17 }
 0x122   : > { %985 = vst [vmem:[%s9004_s29 + $0x648] sm:$0xf] %v984_v18  ;;  %987 = vst [vmem:[%s9004_s29 + $0x64c] sm:$0xf] %v986_v19  ;;  %v988_v20 = vld [vmem:[%s9000_s28 + $0x1940] sm:$0xf] }
 0x123   : > { %v990_v21 = vld [vmem:[%s9000_s28 + $0x1950] sm:$0xf]  ;;  %v992_v22 = vld [vmem:[%s9000_s28 + $0x1960] sm:$0xf]  ;;  %989 = vst [vmem:[%s9004_s29 + $0x650] sm:$0xf] %v988_v20 }
 0x124   : > { %991 = vst [vmem:[%s9004_s29 + $0x654] sm:$0xf] %v990_v21  ;;  %993 = vst [vmem:[%s9004_s29 + $0x658] sm:$0xf] %v992_v22  ;;  %v994_v23 = vld [vmem:[%s9000_s28 + $0x1970] sm:$0xf] }
 0x125   : > { %v996_v24 = vld [vmem:[%s9000_s28 + $0x1980] sm:$0xf]  ;;  %v998_v25 = vld [vmem:[%s9000_s28 + $0x1990] sm:$0xf]  ;;  %995 = vst [vmem:[%s9004_s29 + $0x65c] sm:$0xf] %v994_v23 }
 0x126   : > { %997 = vst [vmem:[%s9004_s29 + $0x660] sm:$0xf] %v996_v24  ;;  %999 = vst [vmem:[%s9004_s29 + $0x664] sm:$0xf] %v998_v25  ;;  %v1000_v26 = vld [vmem:[%s9000_s28 + $0x19a0] sm:$0xf] }
 0x127   : > { %v1002_v27 = vld [vmem:[%s9000_s28 + $0x19b0] sm:$0xf]  ;;  %v1004_v28 = vld [vmem:[%s9000_s28 + $0x19c0] sm:$0xf]  ;;  %1001 = vst [vmem:[%s9004_s29 + $0x668] sm:$0xf] %v1000_v26 }
 0x128   : > { %1003 = vst [vmem:[%s9004_s29 + $0x66c] sm:$0xf] %v1002_v27  ;;  %1005 = vst [vmem:[%s9004_s29 + $0x670] sm:$0xf] %v1004_v28  ;;  %v1006_v29 = vld [vmem:[%s9000_s28 + $0x19d0] sm:$0xf] }
 0x129   : > { %v1008_v30 = vld [vmem:[%s9000_s28 + $0x19e0] sm:$0xf]  ;;  %v1010_v31 = vld [vmem:[%s9000_s28 + $0x19f0] sm:$0xf]  ;;  %1007 = vst [vmem:[%s9004_s29 + $0x674] sm:$0xf] %v1006_v29 }
 0x12a   : > { %1009 = vst [vmem:[%s9004_s29 + $0x678] sm:$0xf] %v1008_v30  ;;  %1011 = vst [vmem:[%s9004_s29 + $0x67c] sm:$0xf] %v1010_v31  ;;  %v1012_v32 = vld [vmem:[%s9000_s28 + $0x1a00] sm:$0xf] }
 0x12b   : > { %v1014_v33 = vld [vmem:[%s9000_s28 + $0x1a10] sm:$0xf]  ;;  %v1016_v34 = vld [vmem:[%s9000_s28 + $0x1a20] sm:$0xf]  ;;  %1013 = vst [vmem:[%s9004_s29 + $0x680] sm:$0xf] %v1012_v32 }
 0x12c   : > { %1015 = vst [vmem:[%s9004_s29 + $0x684] sm:$0xf] %v1014_v33  ;;  %1017 = vst [vmem:[%s9004_s29 + $0x688] sm:$0xf] %v1016_v34  ;;  %v1018_v35 = vld [vmem:[%s9000_s28 + $0x1a30] sm:$0xf] }
 0x12d   : > { %v1020_v36 = vld [vmem:[%s9000_s28 + $0x1a40] sm:$0xf]  ;;  %v1022_v37 = vld [vmem:[%s9000_s28 + $0x1a50] sm:$0xf]  ;;  %1019 = vst [vmem:[%s9004_s29 + $0x68c] sm:$0xf] %v1018_v35 }
 0x12e   : > { %1021 = vst [vmem:[%s9004_s29 + $0x690] sm:$0xf] %v1020_v36  ;;  %1023 = vst [vmem:[%s9004_s29 + $0x694] sm:$0xf] %v1022_v37  ;;  %v1024_v38 = vld [vmem:[%s9000_s28 + $0x1a60] sm:$0xf] }
 0x12f   : > { %v1026_v39 = vld [vmem:[%s9000_s28 + $0x1a70] sm:$0xf]  ;;  %v1028_v40 = vld [vmem:[%s9000_s28 + $0x1a80] sm:$0xf]  ;;  %1025 = vst [vmem:[%s9004_s29 + $0x698] sm:$0xf] %v1024_v38 }
 0x130   : > { %1027 = vst [vmem:[%s9004_s29 + $0x69c] sm:$0xf] %v1026_v39  ;;  %1029 = vst [vmem:[%s9004_s29 + $0x6a0] sm:$0xf] %v1028_v40  ;;  %v1030_v41 = vld [vmem:[%s9000_s28 + $0x1a90] sm:$0xf] }
 0x131   : > { %v1032_v42 = vld [vmem:[%s9000_s28 + $0x1aa0] sm:$0xf]  ;;  %v1034_v43 = vld [vmem:[%s9000_s28 + $0x1ab0] sm:$0xf]  ;;  %1031 = vst [vmem:[%s9004_s29 + $0x6a4] sm:$0xf] %v1030_v41 }
 0x132   : > { %1033 = vst [vmem:[%s9004_s29 + $0x6a8] sm:$0xf] %v1032_v42  ;;  %1035 = vst [vmem:[%s9004_s29 + $0x6ac] sm:$0xf] %v1034_v43  ;;  %v1036_v44 = vld [vmem:[%s9000_s28 + $0x1ac0] sm:$0xf] }
 0x133   : > { %v1038_v45 = vld [vmem:[%s9000_s28 + $0x1ad0] sm:$0xf]  ;;  %v1040_v46 = vld [vmem:[%s9000_s28 + $0x1ae0] sm:$0xf]  ;;  %1037 = vst [vmem:[%s9004_s29 + $0x6b0] sm:$0xf] %v1036_v44 }
 0x134   : > { %1039 = vst [vmem:[%s9004_s29 + $0x6b4] sm:$0xf] %v1038_v45  ;;  %1041 = vst [vmem:[%s9004_s29 + $0x6b8] sm:$0xf] %v1040_v46  ;;  %v1042_v47 = vld [vmem:[%s9000_s28 + $0x1af0] sm:$0xf] }
 0x135   : > { %v1044_v48 = vld [vmem:[%s9000_s28 + $0x1b00] sm:$0xf]  ;;  %v1046_v49 = vld [vmem:[%s9000_s28 + $0x1b10] sm:$0xf]  ;;  %1043 = vst [vmem:[%s9004_s29 + $0x6bc] sm:$0xf] %v1042_v47 }
 0x136   : > { %1045 = vst [vmem:[%s9004_s29 + $0x6c0] sm:$0xf] %v1044_v48  ;;  %1047 = vst [vmem:[%s9004_s29 + $0x6c4] sm:$0xf] %v1046_v49  ;;  %v1048_v50 = vld [vmem:[%s9000_s28 + $0x1b20] sm:$0xf] }
 0x137   : > { %v1050_v51 = vld [vmem:[%s9000_s28 + $0x1b30] sm:$0xf]  ;;  %v1052_v52 = vld [vmem:[%s9000_s28 + $0x1b40] sm:$0xf]  ;;  %1049 = vst [vmem:[%s9004_s29 + $0x6c8] sm:$0xf] %v1048_v50 }
 0x138   : > { %1051 = vst [vmem:[%s9004_s29 + $0x6cc] sm:$0xf] %v1050_v51  ;;  %1053 = vst [vmem:[%s9004_s29 + $0x6d0] sm:$0xf] %v1052_v52  ;;  %v1054_v53 = vld [vmem:[%s9000_s28 + $0x1b50] sm:$0xf] }
 0x139   : > { %v1056_v54 = vld [vmem:[%s9000_s28 + $0x1b60] sm:$0xf]  ;;  %v1058_v55 = vld [vmem:[%s9000_s28 + $0x1b70] sm:$0xf]  ;;  %1055 = vst [vmem:[%s9004_s29 + $0x6d4] sm:$0xf] %v1054_v53 }
 0x13a   : > { %1057 = vst [vmem:[%s9004_s29 + $0x6d8] sm:$0xf] %v1056_v54  ;;  %1059 = vst [vmem:[%s9004_s29 + $0x6dc] sm:$0xf] %v1058_v55  ;;  %v1060_v56 = vld [vmem:[%s9000_s28 + $0x1b80] sm:$0xf] }
 0x13b   : > { %v1062_v57 = vld [vmem:[%s9000_s28 + $0x1b90] sm:$0xf]  ;;  %v1064_v58 = vld [vmem:[%s9000_s28 + $0x1ba0] sm:$0xf]  ;;  %1061 = vst [vmem:[%s9004_s29 + $0x6e0] sm:$0xf] %v1060_v56 }
 0x13c   : > { %1063 = vst [vmem:[%s9004_s29 + $0x6e4] sm:$0xf] %v1062_v57  ;;  %1065 = vst [vmem:[%s9004_s29 + $0x6e8] sm:$0xf] %v1064_v58  ;;  %v1066_v59 = vld [vmem:[%s9000_s28 + $0x1bb0] sm:$0xf] }
 0x13d   : > { %v1068_v60 = vld [vmem:[%s9000_s28 + $0x1bc0] sm:$0xf]  ;;  %v1070_v61 = vld [vmem:[%s9000_s28 + $0x1bd0] sm:$0xf]  ;;  %1067 = vst [vmem:[%s9004_s29 + $0x6ec] sm:$0xf] %v1066_v59 }
 0x13e   : > { %1069 = vst [vmem:[%s9004_s29 + $0x6f0] sm:$0xf] %v1068_v60  ;;  %1071 = vst [vmem:[%s9004_s29 + $0x6f4] sm:$0xf] %v1070_v61  ;;  %v1072_v62 = vld [vmem:[%s9000_s28 + $0x1be0] sm:$0xf] }
 0x13f   : > { %v1074_v63 = vld [vmem:[%s9000_s28 + $0x1bf0] sm:$0xf]  ;;  %v1076_v0 = vld [vmem:[%s9000_s28 + $0x1c00] sm:$0xf]  ;;  %1073 = vst [vmem:[%s9004_s29 + $0x6f8] sm:$0xf] %v1072_v62 }
 0x140   : > { %1075 = vst [vmem:[%s9004_s29 + $0x6fc] sm:$0xf] %v1074_v63  ;;  %1077 = vst [vmem:[%s9004_s29 + $0x700] sm:$0xf] %v1076_v0  ;;  %v1078_v1 = vld [vmem:[%s9000_s28 + $0x1c10] sm:$0xf] }
 0x141   : > { %v1080_v2 = vld [vmem:[%s9000_s28 + $0x1c20] sm:$0xf]  ;;  %v1082_v3 = vld [vmem:[%s9000_s28 + $0x1c30] sm:$0xf]  ;;  %1079 = vst [vmem:[%s9004_s29 + $0x704] sm:$0xf] %v1078_v1 }
 0x142   : > { %1081 = vst [vmem:[%s9004_s29 + $0x708] sm:$0xf] %v1080_v2  ;;  %1083 = vst [vmem:[%s9004_s29 + $0x70c] sm:$0xf] %v1082_v3  ;;  %v1084_v4 = vld [vmem:[%s9000_s28 + $0x1c40] sm:$0xf] }
 0x143   : > { %v1086_v5 = vld [vmem:[%s9000_s28 + $0x1c50] sm:$0xf]  ;;  %v1088_v6 = vld [vmem:[%s9000_s28 + $0x1c60] sm:$0xf]  ;;  %1085 = vst [vmem:[%s9004_s29 + $0x710] sm:$0xf] %v1084_v4 }
 0x144   : > { %1087 = vst [vmem:[%s9004_s29 + $0x714] sm:$0xf] %v1086_v5  ;;  %1089 = vst [vmem:[%s9004_s29 + $0x718] sm:$0xf] %v1088_v6  ;;  %v1090_v7 = vld [vmem:[%s9000_s28 + $0x1c70] sm:$0xf] }
 0x145   : > { %v1092_v8 = vld [vmem:[%s9000_s28 + $0x1c80] sm:$0xf]  ;;  %v1094_v9 = vld [vmem:[%s9000_s28 + $0x1c90] sm:$0xf]  ;;  %1091 = vst [vmem:[%s9004_s29 + $0x71c] sm:$0xf] %v1090_v7 }
 0x146   : > { %1093 = vst [vmem:[%s9004_s29 + $0x720] sm:$0xf] %v1092_v8  ;;  %1095 = vst [vmem:[%s9004_s29 + $0x724] sm:$0xf] %v1094_v9  ;;  %v1096_v10 = vld [vmem:[%s9000_s28 + $0x1ca0] sm:$0xf] }
 0x147   : > { %v1098_v11 = vld [vmem:[%s9000_s28 + $0x1cb0] sm:$0xf]  ;;  %v1100_v12 = vld [vmem:[%s9000_s28 + $0x1cc0] sm:$0xf]  ;;  %1097 = vst [vmem:[%s9004_s29 + $0x728] sm:$0xf] %v1096_v10 }
 0x148   : > { %1099 = vst [vmem:[%s9004_s29 + $0x72c] sm:$0xf] %v1098_v11  ;;  %1101 = vst [vmem:[%s9004_s29 + $0x730] sm:$0xf] %v1100_v12  ;;  %v1102_v13 = vld [vmem:[%s9000_s28 + $0x1cd0] sm:$0xf] }
 0x149   : > { %v1104_v14 = vld [vmem:[%s9000_s28 + $0x1ce0] sm:$0xf]  ;;  %v1106_v15 = vld [vmem:[%s9000_s28 + $0x1cf0] sm:$0xf]  ;;  %1103 = vst [vmem:[%s9004_s29 + $0x734] sm:$0xf] %v1102_v13 }
 0x14a   : > { %1105 = vst [vmem:[%s9004_s29 + $0x738] sm:$0xf] %v1104_v14  ;;  %1107 = vst [vmem:[%s9004_s29 + $0x73c] sm:$0xf] %v1106_v15  ;;  %v1108_v16 = vld [vmem:[%s9000_s28 + $0x1d00] sm:$0xf] }
 0x14b   : > { %v1110_v17 = vld [vmem:[%s9000_s28 + $0x1d10] sm:$0xf]  ;;  %v1112_v18 = vld [vmem:[%s9000_s28 + $0x1d20] sm:$0xf]  ;;  %1109 = vst [vmem:[%s9004_s29 + $0x740] sm:$0xf] %v1108_v16 }
 0x14c   : > { %1111 = vst [vmem:[%s9004_s29 + $0x744] sm:$0xf] %v1110_v17  ;;  %1113 = vst [vmem:[%s9004_s29 + $0x748] sm:$0xf] %v1112_v18  ;;  %v1114_v19 = vld [vmem:[%s9000_s28 + $0x1d30] sm:$0xf] }
 0x14d   : > { %v1116_v20 = vld [vmem:[%s9000_s28 + $0x1d40] sm:$0xf]  ;;  %v1118_v21 = vld [vmem:[%s9000_s28 + $0x1d50] sm:$0xf]  ;;  %1115 = vst [vmem:[%s9004_s29 + $0x74c] sm:$0xf] %v1114_v19 }
 0x14e   : > { %1117 = vst [vmem:[%s9004_s29 + $0x750] sm:$0xf] %v1116_v20  ;;  %1119 = vst [vmem:[%s9004_s29 + $0x754] sm:$0xf] %v1118_v21  ;;  %v1120_v22 = vld [vmem:[%s9000_s28 + $0x1d60] sm:$0xf] }
 0x14f   : > { %v1122_v23 = vld [vmem:[%s9000_s28 + $0x1d70] sm:$0xf]  ;;  %v1124_v24 = vld [vmem:[%s9000_s28 + $0x1d80] sm:$0xf]  ;;  %1121 = vst [vmem:[%s9004_s29 + $0x758] sm:$0xf] %v1120_v22 }
 0x150   : > { %1123 = vst [vmem:[%s9004_s29 + $0x75c] sm:$0xf] %v1122_v23  ;;  %1125 = vst [vmem:[%s9004_s29 + $0x760] sm:$0xf] %v1124_v24  ;;  %v1126_v25 = vld [vmem:[%s9000_s28 + $0x1d90] sm:$0xf] }
 0x151   : > { %v1128_v26 = vld [vmem:[%s9000_s28 + $0x1da0] sm:$0xf]  ;;  %v1130_v27 = vld [vmem:[%s9000_s28 + $0x1db0] sm:$0xf]  ;;  %1127 = vst [vmem:[%s9004_s29 + $0x764] sm:$0xf] %v1126_v25 }
 0x152   : > { %1129 = vst [vmem:[%s9004_s29 + $0x768] sm:$0xf] %v1128_v26  ;;  %1131 = vst [vmem:[%s9004_s29 + $0x76c] sm:$0xf] %v1130_v27  ;;  %v1132_v28 = vld [vmem:[%s9000_s28 + $0x1dc0] sm:$0xf] }
 0x153   : > { %v1134_v29 = vld [vmem:[%s9000_s28 + $0x1dd0] sm:$0xf]  ;;  %v1136_v30 = vld [vmem:[%s9000_s28 + $0x1de0] sm:$0xf]  ;;  %1133 = vst [vmem:[%s9004_s29 + $0x770] sm:$0xf] %v1132_v28 }
 0x154   : > { %1135 = vst [vmem:[%s9004_s29 + $0x774] sm:$0xf] %v1134_v29  ;;  %1137 = vst [vmem:[%s9004_s29 + $0x778] sm:$0xf] %v1136_v30  ;;  %v1138_v31 = vld [vmem:[%s9000_s28 + $0x1df0] sm:$0xf] }
 0x155   : > { %v1140_v32 = vld [vmem:[%s9000_s28 + $0x1e00] sm:$0xf]  ;;  %v1142_v33 = vld [vmem:[%s9000_s28 + $0x1e10] sm:$0xf]  ;;  %1139 = vst [vmem:[%s9004_s29 + $0x77c] sm:$0xf] %v1138_v31 }
 0x156   : > { %1141 = vst [vmem:[%s9004_s29 + $0x780] sm:$0xf] %v1140_v32  ;;  %1143 = vst [vmem:[%s9004_s29 + $0x784] sm:$0xf] %v1142_v33  ;;  %v1144_v34 = vld [vmem:[%s9000_s28 + $0x1e20] sm:$0xf] }
 0x157   : > { %v1146_v35 = vld [vmem:[%s9000_s28 + $0x1e30] sm:$0xf]  ;;  %v1148_v36 = vld [vmem:[%s9000_s28 + $0x1e40] sm:$0xf]  ;;  %1145 = vst [vmem:[%s9004_s29 + $0x788] sm:$0xf] %v1144_v34 }
 0x158   : > { %1147 = vst [vmem:[%s9004_s29 + $0x78c] sm:$0xf] %v1146_v35  ;;  %1149 = vst [vmem:[%s9004_s29 + $0x790] sm:$0xf] %v1148_v36  ;;  %v1150_v37 = vld [vmem:[%s9000_s28 + $0x1e50] sm:$0xf] }
 0x159   : > { %v1152_v38 = vld [vmem:[%s9000_s28 + $0x1e60] sm:$0xf]  ;;  %v1154_v39 = vld [vmem:[%s9000_s28 + $0x1e70] sm:$0xf]  ;;  %1151 = vst [vmem:[%s9004_s29 + $0x794] sm:$0xf] %v1150_v37 }
 0x15a   : > { %1153 = vst [vmem:[%s9004_s29 + $0x798] sm:$0xf] %v1152_v38  ;;  %1155 = vst [vmem:[%s9004_s29 + $0x79c] sm:$0xf] %v1154_v39  ;;  %v1156_v40 = vld [vmem:[%s9000_s28 + $0x1e80] sm:$0xf] }
 0x15b   : > { %v1158_v41 = vld [vmem:[%s9000_s28 + $0x1e90] sm:$0xf]  ;;  %v1160_v42 = vld [vmem:[%s9000_s28 + $0x1ea0] sm:$0xf]  ;;  %1157 = vst [vmem:[%s9004_s29 + $0x7a0] sm:$0xf] %v1156_v40 }
 0x15c   : > { %1159 = vst [vmem:[%s9004_s29 + $0x7a4] sm:$0xf] %v1158_v41  ;;  %1161 = vst [vmem:[%s9004_s29 + $0x7a8] sm:$0xf] %v1160_v42  ;;  %v1162_v43 = vld [vmem:[%s9000_s28 + $0x1eb0] sm:$0xf] }
 0x15d   : > { %v1164_v44 = vld [vmem:[%s9000_s28 + $0x1ec0] sm:$0xf]  ;;  %v1166_v45 = vld [vmem:[%s9000_s28 + $0x1ed0] sm:$0xf]  ;;  %1163 = vst [vmem:[%s9004_s29 + $0x7ac] sm:$0xf] %v1162_v43 }
 0x15e   : > { %1165 = vst [vmem:[%s9004_s29 + $0x7b0] sm:$0xf] %v1164_v44  ;;  %1167 = vst [vmem:[%s9004_s29 + $0x7b4] sm:$0xf] %v1166_v45  ;;  %v1168_v46 = vld [vmem:[%s9000_s28 + $0x1ee0] sm:$0xf] }
 0x15f   : > { %v1170_v47 = vld [vmem:[%s9000_s28 + $0x1ef0] sm:$0xf]  ;;  %v1172_v48 = vld [vmem:[%s9000_s28 + $0x1f00] sm:$0xf]  ;;  %1169 = vst [vmem:[%s9004_s29 + $0x7b8] sm:$0xf] %v1168_v46 }
 0x160   : > { %1171 = vst [vmem:[%s9004_s29 + $0x7bc] sm:$0xf] %v1170_v47  ;;  %1173 = vst [vmem:[%s9004_s29 + $0x7c0] sm:$0xf] %v1172_v48  ;;  %v1174_v49 = vld [vmem:[%s9000_s28 + $0x1f10] sm:$0xf] }
 0x161   : > { %v1176_v50 = vld [vmem:[%s9000_s28 + $0x1f20] sm:$0xf]  ;;  %v1178_v51 = vld [vmem:[%s9000_s28 + $0x1f30] sm:$0xf]  ;;  %1175 = vst [vmem:[%s9004_s29 + $0x7c4] sm:$0xf] %v1174_v49 }
 0x162   : > { %1177 = vst [vmem:[%s9004_s29 + $0x7c8] sm:$0xf] %v1176_v50  ;;  %1179 = vst [vmem:[%s9004_s29 + $0x7cc] sm:$0xf] %v1178_v51  ;;  %v1180_v52 = vld [vmem:[%s9000_s28 + $0x1f40] sm:$0xf] }
 0x163   : > { %v1182_v53 = vld [vmem:[%s9000_s28 + $0x1f50] sm:$0xf]  ;;  %v1184_v54 = vld [vmem:[%s9000_s28 + $0x1f60] sm:$0xf]  ;;  %1181 = vst [vmem:[%s9004_s29 + $0x7d0] sm:$0xf] %v1180_v52 }
 0x164   : > { %1183 = vst [vmem:[%s9004_s29 + $0x7d4] sm:$0xf] %v1182_v53  ;;  %1185 = vst [vmem:[%s9004_s29 + $0x7d8] sm:$0xf] %v1184_v54  ;;  %v1186_v55 = vld [vmem:[%s9000_s28 + $0x1f70] sm:$0xf] }
 0x165   : > { %v1188_v56 = vld [vmem:[%s9000_s28 + $0x1f80] sm:$0xf]  ;;  %v1190_v57 = vld [vmem:[%s9000_s28 + $0x1f90] sm:$0xf]  ;;  %1187 = vst [vmem:[%s9004_s29 + $0x7dc] sm:$0xf] %v1186_v55 }
 0x166   : > { %1189 = vst [vmem:[%s9004_s29 + $0x7e0] sm:$0xf] %v1188_v56  ;;  %1191 = vst [vmem:[%s9004_s29 + $0x7e4] sm:$0xf] %v1190_v57  ;;  %v1192_v58 = vld [vmem:[%s9000_s28 + $0x1fa0] sm:$0xf] }
 0x167   : > { %v1194_v59 = vld [vmem:[%s9000_s28 + $0x1fb0] sm:$0xf]  ;;  %v1196_v60 = vld [vmem:[%s9000_s28 + $0x1fc0] sm:$0xf]  ;;  %1193 = vst [vmem:[%s9004_s29 + $0x7e8] sm:$0xf] %v1192_v58 }
 0x168   : > { %1195 = vst [vmem:[%s9004_s29 + $0x7ec] sm:$0xf] %v1194_v59  ;;  %1197 = vst [vmem:[%s9004_s29 + $0x7f0] sm:$0xf] %v1196_v60  ;;  %v1198_v61 = vld [vmem:[%s9000_s28 + $0x1fd0] sm:$0xf] }
 0x169   : > { %v1200_v62 = vld [vmem:[%s9000_s28 + $0x1fe0] sm:$0xf]  ;;  %v1202_v63 = vld [vmem:[%s9000_s28 + $0x1ff0] sm:$0xf]  ;;  %1199 = vst [vmem:[%s9004_s29 + $0x7f4] sm:$0xf] %v1198_v61 }
 0x16a   : > { %1201 = vst [vmem:[%s9004_s29 + $0x7f8] sm:$0xf] %v1200_v62  ;;  %1203 = vst [vmem:[%s9004_s29 + $0x7fc] sm:$0xf] %v1202_v63 }
 0x16b PF: > { %p7807_p8 = scmp.ge.s32.totalorder %s8930_s16, 1  ;;  %p4333_p9 = scmp.lt.s32.totalorder %s8930_s16, 5 }
 0x16d   : > { %p4334_p10 = pnand %p7807_p8, %p4333_p9 }
 0x16e   : > { %s4340_s30 = sand.u32 (!%p4334_p10), 1, %s8914_s12   ;;  %v10034_v0 = vld [vmem:[%s10536_s0] sm:$0xff] (!%p4334_p10)  ;;  %v10044_v2 = vld [vmem:[%s10536_s0 + $0x8] sm:$0xff] (!%p4334_p10)  ;;  %p4378_p11 = scmp.lt.s32.totalorder (!%p4334_p10), %s8922_s14, 3 }
 0x16f   : > { %4337 = sbr.rel (%p4334_p10) target bundleno = 870 (0x366), region = 80  ;;  %v10039_v1 = vld [vmem:[%s10536_s0 + $0x80] sm:$0xff] (!%p4334_p10)  ;;  %s7808_s10 = sshll.u32 (!%p4334_p10), %s4340_s30, 11  ;;  %v10053_v4 = vld [vmem:[%s10536_s0 + $0x88] sm:$0xff] (!%p4334_p10) }
 0x170   : > { %v7812_v3 = vcombine.high (!%p4334_p10), %v10034_v0, %v10039_v1  ;;  %v7814_v5 = vcombine.high (!%p4334_p10), %v10044_v2, %v10053_v4  ;;  %s10057_s19 = scalar_lea.vmem (!%p4334_p10), [#allocation2], %s7808_s10  ;;  %v4415_v35 = vld [vmem:[%s10536_s0 + $0x100] sm:$0xff] (!%p4334_p10)  ;;  %v4416_v38 = vld [vmem:[%s10536_s0 + $0x108] sm:$0xff] (!%p4334_p10)  ;;  %v7811_v42 = vcombine.low (!%p4334_p10), %v10034_v0, %v10039_v1  ;;  %v7813_v43 = vcombine.low (!%p4334_p10), %v10044_v2, %v10053_v4  ;;  %s7809_s26 = sshll.u32 (!%p4334_p10), %s4340_s30, 4 }
 0x171   : > { %v8636_v6 = vld [vmem:[%s10057_s19 + $0x40] sm:$0xff] (!%p4334_p10)   ;;  %v8640_v10 = vld [vmem:[%s10057_s19 + $0x48] sm:$0xff] (!%p4334_p10)   ;;  %v8644_v14 = vld [vmem:[%s10057_s19 + $0x50] sm:$0xff] (!%p4334_p10)   ;;  %s4370_s12 = scalar_lea.vmem (!%p4334_p10), [#allocation3], %s7809_s26 }
 0x172   : > { %6854 = vmatprep.mubr.bf16.mxu0 (!%p4334_p10), %v7812_v3  ;;  %v8637_v7 = vld [vmem:[%s10057_s19 + $0xc0] sm:$0xff] (!%p4334_p10)   ;;  %6903 = vmatprep.mubr.bf16.mxu1 (!%p4334_p10), %v7814_v5  ;;  %v8641_v11 = vld [vmem:[%s10057_s19 + $0xc8] sm:$0xff] (!%p4334_p10)   ;;  %v8645_v15 = vld [vmem:[%s10057_s19 + $0xd0] sm:$0xff] (!%p4334_p10)  }
 0x173   : > { %8148 = vmatprep.subr.bf16.mxu0 (!%p4334_p10), %v8636_v6  ;;  %v8638_v8 = vld [vmem:[%s10057_s19] sm:$0xff] (!%p4334_p10)   ;;  %8176 = vmatprep.subr.bf16.mxu1 (!%p4334_p10), %v8637_v7  ;;  %v8642_v12 = vld [vmem:[%s10057_s19 + $0x8] sm:$0xff] (!%p4334_p10)   ;;  %v8646_v16 = vld [vmem:[%s10057_s19 + $0x10] sm:$0xff] (!%p4334_p10)  }
 0x174   : > { %v8639_v9 = vld [vmem:[%s10057_s19 + $0x80] sm:$0xff] (!%p4334_p10)   ;;  %8149 = vmatpush3.bf16.msra.mxu0 (!%p4334_p10), %v8638_v8  ;;  %v8643_v13 = vld [vmem:[%s10057_s19 + $0x88] sm:$0xff] (!%p4334_p10)   ;;  %v8647_v17 = vld [vmem:[%s10057_s19 + $0x90] sm:$0xff] (!%p4334_p10)  }
 0x175   : > { %8177 = vmatpush3.bf16.msra.mxu1 (!%p4334_p10), %v8639_v9  ;;  %8150 = vmatprep.subr.bf16.mxu0 (!%p4334_p10), %v8640_v10  ;;  %v8648_v18 = vld [vmem:[%s10057_s19 + $0x58] sm:$0xff] (!%p4334_p10)   ;;  %v8652_v22 = vld [vmem:[%s10057_s19 + $0x60] sm:$0xff] (!%p4334_p10)   ;;  %v8656_v26 = vld [vmem:[%s10057_s19 + $0x68] sm:$0xff] (!%p4334_p10)  }
 0x176   : > { %8178 = vmatprep.subr.bf16.mxu1 %v8641_v11  ;;  %v8649_v19 = vld [vmem:[%s10057_s19 + $0xd8] sm:$0xff]   ;;  %v8653_v23 = vld [vmem:[%s10057_s19 + $0xe0] sm:$0xff]   ;;  %v8657_v27 = vld [vmem:[%s10057_s19 + $0xe8] sm:$0xff]   ;;  %s10447_s11 = scalar_select %p4378_p11, %s8922_s14, 3 }
 0x177   : > { %v8650_v20 = vld [vmem:[%s10057_s19 + $0x18] sm:$0xff]   ;;  %v8654_v24 = vld [vmem:[%s10057_s19 + $0x20] sm:$0xff]   ;;  %v8658_v28 = vld [vmem:[%s10057_s19 + $0x28] sm:$0xff]   ;;  %s8136_s30 = sshll.u32 (%p8987_p6), %s8922_s14, 2 }
 0x178   : > { %8151 = vmatpush3.bf16.msra.mxu0 %v8642_v12  ;;  %v8651_v21 = vld [vmem:[%s10057_s19 + $0x98] sm:$0xff]   ;;  %v8655_v25 = vld [vmem:[%s10057_s19 + $0xa0] sm:$0xff]   ;;  %v8659_v29 = vld [vmem:[%s10057_s19 + $0xa8] sm:$0xff]   ;;  %s4380_s27 = scalar_lea.vmem %s10538_s2, %s10447_s11  ;;  %s7649_s29 = scalar_lea.vmem (%p8987_p6), %s10539_s3, %s8136_s30 }
 0x179   : > { %8179 = vmatpush3.bf16.msra.mxu1 %v8643_v13  ;;  %8152 = vmatprep.subr.bf16.mxu0 %v8644_v14  ;;  %v8660_v30 = vld [vmem:[%s10057_s19 + $0x70] sm:$0xff]   ;;  %v8664_v34 = vld [vmem:[%s10057_s19 + $0x78] sm:$0xff]   ;;  %v4431_v36 = vld [vmem:[%s10536_s0 + $0x180] sm:$0x77] }
 0x17a   : > { %8180 = vmatprep.subr.bf16.mxu1 %v8645_v15  ;;  %v8661_v31 = vld [vmem:[%s10057_s19 + $0xf0] sm:$0xff]   ;;  %v8665_v37 = vld [vmem:[%s10057_s19 + $0xf8] sm:$0xff]   ;;  %v4432_v39 = vld [vmem:[%s10536_s0 + $0x188] sm:$0x77]  ;;  %v7844_v46 = vcombine.high %v4415_v35, %v4431_v36  ;;  %v7843_v54 = vcombine.low %v4415_v35, %v4431_v36 }
 0x17b   : > { %v8662_v32 = vld [vmem:[%s10057_s19 + $0x30] sm:$0xff]   ;;  %v8666_v40 = vld [vmem:[%s10057_s19 + $0x38] sm:$0xff]   ;;  %v8668_v44 = vld [vmem:[%s10057_s19 + $0x140] sm:$0xff]   ;;  %v7846_v48 = vcombine.high %v4416_v38, %v4432_v39  ;;  %v7845_v56 = vcombine.low %v4416_v38, %v4432_v39 }
 0x17c   : > { %8153 = vmatpush3.bf16.msra.mxu0 %v8646_v16  ;;  %v8663_v33 = vld [vmem:[%s10057_s19 + $0xb0] sm:$0xff]   ;;  %v8667_v41 = vld [vmem:[%s10057_s19 + $0xb8] sm:$0xff]   ;;  %v8669_v45 = vld [vmem:[%s10057_s19 + $0x1c0] sm:$0xff]  }
 0x17d   : > { %8181 = vmatpush3.bf16.msra.mxu1 %v8647_v17  ;;  %8154 = vmatprep.subr.bf16.mxu0 %v8648_v18  ;;  %v8670_v47 = vld [vmem:[%s10057_s19 + $0x100] sm:$0xff]   ;;  %v8672_v50 = vld [vmem:[%s10057_s19 + $0x148] sm:$0xff]   ;;  %v8676_v55 = vld [vmem:[%s10057_s19 + $0x150] sm:$0xff]  }
 0x17e   : > { %8182 = vmatprep.subr.bf16.mxu1 %v8649_v19  ;;  %v8671_v49 = vld [vmem:[%s10057_s19 + $0x180] sm:$0xff]   ;;  %v8673_v51 = vld [vmem:[%s10057_s19 + $0x1c8] sm:$0xff]   ;;  %v8677_v57 = vld [vmem:[%s10057_s19 + $0x1d0] sm:$0xff]  }
 0x17f   : > { %v8674_v52 = vld [vmem:[%s10057_s19 + $0x108] sm:$0xff]   ;;  %v8678_v58 = vld [vmem:[%s10057_s19 + $0x110] sm:$0xff]   ;;  %v8680_v60 = vld [vmem:[%s10057_s19 + $0x158] sm:$0xff]  }
 0x180   : > { %8155 = vmatpush3.bf16.msra.mxu0 %v8650_v20  ;;  %v8675_v53 = vld [vmem:[%s10057_s19 + $0x188] sm:$0xff]   ;;  %v8679_v59 = vld [vmem:[%s10057_s19 + $0x190] sm:$0xff]   ;;  %v8681_v61 = vld [vmem:[%s10057_s19 + $0x1d8] sm:$0xff]  }
 0x181   : > { %8183 = vmatpush3.bf16.msra.mxu1 %v8651_v21  ;;  %8156 = vmatprep.subr.bf16.mxu0 %v8652_v22  ;;  %v8682_v62 = vld [vmem:[%s10057_s19 + $0x118] sm:$0xff]   ;;  %v8684_v0 = vld [vmem:[%s10057_s19 + $0x160] sm:$0xff]   ;;  %v8688_v4 = vld [vmem:[%s10057_s19 + $0x168] sm:$0xff]  }
 0x182   : > { %8184 = vmatprep.subr.bf16.mxu1 %v8653_v23  ;;  %v8683_v63 = vld [vmem:[%s10057_s19 + $0x198] sm:$0xff]   ;;  %v8685_v1 = vld [vmem:[%s10057_s19 + $0x1e0] sm:$0xff]   ;;  %v8689_v5 = vld [vmem:[%s10057_s19 + $0x1e8] sm:$0xff]  }
 0x183   : > { %v8686_v2 = vld [vmem:[%s10057_s19 + $0x120] sm:$0xff]   ;;  %v8690_v6 = vld [vmem:[%s10057_s19 + $0x128] sm:$0xff]   ;;  %v8692_v8 = vld [vmem:[%s10057_s19 + $0x170] sm:$0xff]  }
 0x184   : > { %8157 = vmatpush3.bf16.msra.mxu0 %v8654_v24  ;;  %v8687_v3 = vld [vmem:[%s10057_s19 + $0x1a0] sm:$0xff]   ;;  %v8691_v7 = vld [vmem:[%s10057_s19 + $0x1a8] sm:$0xff]   ;;  %v8693_v9 = vld [vmem:[%s10057_s19 + $0x1f0] sm:$0xff]  }
 0x185   : > { %8185 = vmatpush3.bf16.msra.mxu1 %v8655_v25  ;;  %8158 = vmatprep.subr.bf16.mxu0 %v8656_v26  ;;  %v8694_v10 = vld [vmem:[%s10057_s19 + $0x130] sm:$0xff]   ;;  %v8696_v12 = vld [vmem:[%s10057_s19 + $0x178] sm:$0xff]   ;;  %v8700_v24 = vld [vmem:[%s10057_s19 + $0x240] sm:$0xff]  }
 0x186   : > { %8186 = vmatprep.subr.bf16.mxu1 %v8657_v27  ;;  %v8695_v11 = vld [vmem:[%s10057_s19 + $0x1b0] sm:$0xff]   ;;  %v8697_v14 = vld [vmem:[%s10057_s19 + $0x1f8] sm:$0xff]   ;;  %v8701_v25 = vld [vmem:[%s10057_s19 + $0x2c0] sm:$0xff]  }
 0x187   : > { %v4385_v13 = vld [vmem:[%s10536_s0 + $0x10] sm:$0xff]  ;;  %v8698_v15 = vld [vmem:[%s10057_s19 + $0x138] sm:$0xff]   ;;  %v8702_v26 = vld [vmem:[%s10057_s19 + $0x200] sm:$0xff]  }
 0x188   : > { %8159 = vmatpush3.bf16.msra.mxu0 %v8658_v28  ;;  %v8699_v16 = vld [vmem:[%s10057_s19 + $0x1b8] sm:$0xff]   ;;  %v4401_v17 = vld [vmem:[%s10536_s0 + $0x90] sm:$0xff]  ;;  %v8703_v27 = vld [vmem:[%s10057_s19 + $0x280] sm:$0xff]  }
 0x189   : > { %8187 = vmatpush3.bf16.msra.mxu1 %v8659_v29  ;;  %8160 = vmatprep.subr.bf16.mxu0 %v8660_v30  ;;  %v4386_v18 = vld [vmem:[%s10536_s0 + $0x18] sm:$0xff]  ;;  %v7815_v20 = vcombine.low %v4385_v13, %v4401_v17  ;;  %v7816_v21 = vcombine.high %v4385_v13, %v4401_v17  ;;  %v8704_v28 = vld [vmem:[%s10057_s19 + $0x248] sm:$0xff]   ;;  %v8708_v36 = vld [vmem:[%s10057_s19 + $0x250] sm:$0xff]  }
 0x18a   : > { %8188 = vmatprep.subr.bf16.mxu1 %v8661_v31  ;;  %v4402_v19 = vld [vmem:[%s10536_s0 + $0x98] sm:$0xff]  ;;  %v8705_v29 = vld [vmem:[%s10057_s19 + $0x2c8] sm:$0xff]   ;;  %v4435_v17 = vld [vmem:[%s10536_s0 + $0x1a0] sm:$0x77] }
 0x18b   : > { %v7817_v22 = vcombine.low %v4386_v18, %v4402_v19  ;;  %v7818_v23 = vcombine.high %v4386_v18, %v4402_v19  ;;  %v8706_v30 = vld [vmem:[%s10057_s19 + $0x208] sm:$0xff]   ;;  %v4418_v38 = vld [vmem:[%s10536_s0 + $0x118] sm:$0xff] }
 0x18c   : > { %8161 = vmatpush3.bf16.msra.mxu0 %v8662_v32  ;;  %v8707_v31 = vld [vmem:[%s10057_s19 + $0x288] sm:$0xff]   ;;  %v4417_v32 = vld [vmem:[%s10536_s0 + $0x110] sm:$0xff]  ;;  %v4434_v39 = vld [vmem:[%s10536_s0 + $0x198] sm:$0x77] }
 0x18d   : > { %8189 = vmatpush3.bf16.msra.mxu1 %v8663_v33  ;;  %8162 = vmatprep.subr.bf16.mxu0 %v8664_v34  ;;  %v4433_v33 = vld [vmem:[%s10536_s0 + $0x190] sm:$0x77]  ;;  %v8737_v13 = vld [vmem:[%s10057_s19 + $0x3c8] sm:$0xff]  }
 0x18e   : > { %8190 = vmatprep.subr.bf16.mxu1 %v8665_v37  ;;  %v7848_v34 = vcombine.high %v4417_v32, %v4433_v33  ;;  %v7847_v35 = vcombine.low %v4417_v32, %v4433_v33  ;;  %v8709_v37 = vld [vmem:[%s10057_s19 + $0x2d0] sm:$0xff]   ;;  %v8748_v32 = vld [vmem:[%s10057_s19 + $0x360] sm:$0xff]  }
 0x18f   : > { %v8749_v33 = vld [vmem:[%s10057_s19 + $0x3e0] sm:$0xff]  }
 0x190   : > { %8163 = vmatpush3.bf16.msra.mxu0 %v8666_v40  ;;  %v7850_v40 = vcombine.high %v4418_v38, %v4434_v39 }
 0x191   : > { %8191 = vmatpush3.bf16.msra.mxu1 %v8667_v41  ;;  %8204 = vmatprep.subr.bf16.mxu0 %v8668_v44  ;;  %v8710_v41 = vld [vmem:[%s10057_s19 + $0x210] sm:$0xff]   ;;  %v8712_v44 = vld [vmem:[%s10057_s19 + $0x258] sm:$0xff]  }
 0x192   : > { %8232 = vmatprep.subr.bf16.mxu1 %v8669_v45  ;;  %v8713_v45 = vld [vmem:[%s10057_s19 + $0x2d8] sm:$0xff]  }
 0x193   : > { %6855 = vmatmul.mubr.bf16.vlgmr.msra.gmra.mrb[0].mxu0 %v7811_v42  ;;  %v7849_v42 = vcombine.low %v4418_v38, %v4434_v39  ;;  %v8754_v38 = vld [vmem:[%s10057_s19 + $0x328] sm:$0xff]  }
 0x194   : > { %6904 = vmatmul.mubr.bf16.vlgmr.msra.gmra.mrb[0].mxu1 %v7813_v43  ;;  %8205 = vmatpush3.bf16.msra.mxu0 %v8670_v47  ;;  %v8711_v43 = vld [vmem:[%s10057_s19 + $0x290] sm:$0xff]   ;;  %v8715_v47 = vld [vmem:[%s10057_s19 + $0x298] sm:$0xff]   ;;  %v8755_v39 = vld [vmem:[%s10057_s19 + $0x3a8] sm:$0xff]  }
 0x195   : > { %8233 = vmatpush3.bf16.msra.mxu1 %v8671_v49  ;;  %6862 = vmatprep.mubr.bf16.mxu0 %v7844_v46  ;;  %v8714_v46 = vld [vmem:[%s10057_s19 + $0x218] sm:$0xff]   ;;  %v8717_v49 = vld [vmem:[%s10057_s19 + $0x2e0] sm:$0xff]  }
 0x196   : > { %8206 = vmatprep.subr.bf16.mxu0 %v8672_v50  ;;  %6911 = vmatprep.mubr.bf16.mxu1 %v7846_v48  ;;  %v8716_v48 = vld [vmem:[%s10057_s19 + $0x260] sm:$0xff]  }
 0x197   : > { %8234 = vmatprep.subr.bf16.mxu1 %v8673_v51  ;;  %v8718_v50 = vld [vmem:[%s10057_s19 + $0x220] sm:$0xff]  }
 0x198   : > { %8207 = vmatpush3.bf16.msra.mxu0 %v8674_v52  ;;  %v8719_v51 = vld [vmem:[%s10057_s19 + $0x2a0] sm:$0xff]   ;;  %v8720_v52 = vld [vmem:[%s10057_s19 + $0x268] sm:$0xff]  }
 0x199   : > { %8235 = vmatpush3.bf16.msra.mxu1 %v8675_v53  ;;  %8208 = vmatprep.subr.bf16.mxu0 %v8676_v55  ;;  %v8721_v53 = vld [vmem:[%s10057_s19 + $0x2e8] sm:$0xff]  }
 0x19a   : > { %8236 = vmatprep.subr.bf16.mxu1 %v8677_v57  ;;  %v8723_v55 = vld [vmem:[%s10057_s19 + $0x2a8] sm:$0xff]   ;;  %v8725_v57 = vld [vmem:[%s10057_s19 + $0x2f0] sm:$0xff]  }
 0x19b   : > { %6863 = vmatmul.mubr.bf16.gmra.mrb[4].mxu0 %v7843_v54  ;;  %v8722_v54 = vld [vmem:[%s10057_s19 + $0x228] sm:$0xff]  }
 0x19c   : > { %8209 = vmatpush3.bf16.msra.mxu0 %v8678_v58  ;;  %6912 = vmatmul.mubr.bf16.gmra.mrb[4].mxu1 %v7845_v56  ;;  %v8724_v56 = vld [vmem:[%s10057_s19 + $0x270] sm:$0xff]  }
 0x19d   : > { %8237 = vmatpush3.bf16.msra.mxu1 %v8679_v59  ;;  %8210 = vmatprep.subr.bf16.mxu0 %v8680_v60  ;;  %v8726_v58 = vld [vmem:[%s10057_s19 + $0x230] sm:$0xff]   ;;  %v8728_v60 = vld [vmem:[%s10057_s19 + $0x278] sm:$0xff]  }
 0x19e   : > { %8238 = vmatprep.subr.bf16.mxu1 %v8681_v61  ;;  %6952 = vmatprep.mubr.bf16.mxu0 %v7816_v21  ;;  %v8727_v59 = vld [vmem:[%s10057_s19 + $0x2b0] sm:$0xff]   ;;  %v8729_v61 = vld [vmem:[%s10057_s19 + $0x2f8] sm:$0xff]  }
 0x19f   : > { %7001 = vmatprep.mubr.bf16.mxu1 %v7818_v23  ;;  %v8741_v21 = vld [vmem:[%s10057_s19 + $0x3d0] sm:$0xff]   ;;  %v4436_v23 = vld [vmem:[%s10536_s0 + $0x1a8] sm:$0x77] }
 0x1a0   : > { %8211 = vmatpush3.bf16.msra.mxu0 %v8682_v62  ;;  %v8730_v62 = vld [vmem:[%s10057_s19 + $0x238] sm:$0xff]  }
 0x1a1   : > { %8239 = vmatpush3.bf16.msra.mxu1 %v8683_v63  ;;  %8212 = vmatprep.subr.bf16.mxu0 %v8684_v0  ;;  %v8731_v63 = vld [vmem:[%s10057_s19 + $0x2b8] sm:$0xff]   ;;  %v4387_v0 = vld [vmem:[%s10536_s0 + $0x20] sm:$0xff] }
 0x1a2   : > { %8240 = vmatprep.subr.bf16.mxu1 %v8685_v1  ;;  %v4403_v1 = vld [vmem:[%s10536_s0 + $0xa0] sm:$0xff] }
 0x1a4   : > { %8213 = vmatpush3.bf16.msra.mxu0 %v8686_v2  ;;  %v7819_v2 = vcombine.low %v4387_v0, %v4403_v1 }
 0x1a5   : > { %8241 = vmatpush3.bf16.msra.mxu1 %v8687_v3  ;;  %8214 = vmatprep.subr.bf16.mxu0 %v8688_v4  ;;  %v7820_v3 = vcombine.high %v4387_v0, %v4403_v1  ;;  %v4388_v4 = vld [vmem:[%s10536_s0 + $0x28] sm:$0xff]  ;;  %v4421_v0 = vld [vmem:[%s10536_s0 + $0x130] sm:$0xff] }
 0x1a6   : > { %8242 = vmatprep.subr.bf16.mxu1 %v8689_v5  ;;  %v4404_v5 = vld [vmem:[%s10536_s0 + $0xa8] sm:$0xff]  ;;  %v4437_v1 = vld [vmem:[%s10536_s0 + $0x1b0] sm:$0x77] }
 0x1a8   : > { %8215 = vmatpush3.bf16.msra.mxu0 %v8690_v6  ;;  %v7821_v6 = vcombine.low %v4388_v4, %v4404_v5 }
 0x1a9   : > { %8243 = vmatpush3.bf16.msra.mxu1 %v8691_v7  ;;  %8216 = vmatprep.subr.bf16.mxu0 %v8692_v8  ;;  %v7822_v7 = vcombine.high %v4388_v4, %v4404_v5  ;;  %v8732_v8 = vld [vmem:[%s10057_s19 + $0x340] sm:$0xff]   ;;  %v8772_v4 = vld [vmem:[%s10057_s19 + $0x450] sm:$0xff]  }
 0x1aa   : > { %8244 = vmatprep.subr.bf16.mxu1 %v8693_v9  ;;  %v8733_v9 = vld [vmem:[%s10057_s19 + $0x3c0] sm:$0xff]   ;;  %v8773_v5 = vld [vmem:[%s10057_s19 + $0x4d0] sm:$0xff]  }
 0x1ac   : > { %8217 = vmatpush3.bf16.msra.mxu0 %v8694_v10  ;;  %v8734_v10 = vld [vmem:[%s10057_s19 + $0x300] sm:$0xff]  }
 0x1ad   : > { %8245 = vmatpush3.bf16.msra.mxu1 %v8695_v11  ;;  %8218 = vmatprep.subr.bf16.mxu0 %v8696_v12  ;;  %v8735_v11 = vld [vmem:[%s10057_s19 + $0x380] sm:$0xff]   ;;  %v8736_v12 = vld [vmem:[%s10057_s19 + $0x348] sm:$0xff]  }
 0x1ae   : > { %8246 = vmatprep.subr.bf16.mxu1 %v8697_v14  ;;  %v8738_v14 = vld [vmem:[%s10057_s19 + $0x308] sm:$0xff]  }
 0x1b0   : > { %8219 = vmatpush3.bf16.msra.mxu0 %v8698_v15  ;;  %v8739_v15 = vld [vmem:[%s10057_s19 + $0x388] sm:$0xff]  }
 0x1b1   : > { %8247 = vmatpush3.bf16.msra.mxu1 %v8699_v16  ;;  %8260 = vmatprep.subr.bf16.mxu0 %v8700_v24  ;;  %v4419_v16 = vld [vmem:[%s10536_s0 + $0x120] sm:$0xff] }
 0x1b2   : > { %8288 = vmatprep.subr.bf16.mxu1 %v8701_v25  ;;  %v7852_v18 = vcombine.high %v4419_v16, %v4435_v17  ;;  %v7851_v19 = vcombine.low %v4419_v16, %v4435_v17  ;;  %v8742_v25 = vld [vmem:[%s10057_s19 + $0x310] sm:$0xff]   ;;  %v8780_v16 = vld [vmem:[%s10057_s19 + $0x460] sm:$0xff]  }
 0x1b3   : > { %6953 = vmatmul.mubr.bf16.vlgmr.msra.gmra.mrb[8].mxu0 %v7815_v20  ;;  %v8740_v20 = vld [vmem:[%s10057_s19 + $0x350] sm:$0xff]   ;;  %v8781_v17 = vld [vmem:[%s10057_s19 + $0x4e0] sm:$0xff]  }
 0x1b4   : > { %7002 = vmatmul.mubr.bf16.vlgmr.msra.gmra.mrb[8].mxu1 %v7817_v22  ;;  %8261 = vmatpush3.bf16.msra.mxu0 %v8702_v26  ;;  %v4420_v22 = vld [vmem:[%s10536_s0 + $0x128] sm:$0xff] }
 0x1b5   : > { %8289 = vmatpush3.bf16.msra.mxu1 %v8703_v27  ;;  %8262 = vmatprep.subr.bf16.mxu0 %v8704_v28  ;;  %v7854_v24 = vcombine.high %v4420_v22, %v4436_v23  ;;  %v7853_v26 = vcombine.low %v4420_v22, %v4436_v23  ;;  %v8743_v27 = vld [vmem:[%s10057_s19 + $0x390] sm:$0xff]   ;;  %v8744_v28 = vld [vmem:[%s10057_s19 + $0x358] sm:$0xff]   ;;  %v8786_v22 = vld [vmem:[%s10057_s19 + $0x428] sm:$0xff]  }
 0x1b6   : > { %8290 = vmatprep.subr.bf16.mxu1 %v8705_v29  ;;  %6960 = vmatprep.mubr.bf16.mxu0 %v7848_v34  ;;  %v8745_v29 = vld [vmem:[%s10057_s19 + $0x3d8] sm:$0xff]   ;;  %v8750_v34 = vld [vmem:[%s10057_s19 + $0x320] sm:$0xff]   ;;  %v8787_v23 = vld [vmem:[%s10057_s19 + $0x4a8] sm:$0xff]  }
 0x1b7   : > { %7009 = vmatprep.mubr.bf16.mxu1 %v7850_v40  ;;  %v8756_v40 = vld [vmem:[%s10057_s19 + $0x370] sm:$0xff]  }
 0x1b8   : > { %8263 = vmatpush3.bf16.msra.mxu0 %v8706_v30  ;;  %v8746_v30 = vld [vmem:[%s10057_s19 + $0x318] sm:$0xff]  }
 0x1b9   : > { %8291 = vmatpush3.bf16.msra.mxu1 %v8707_v31  ;;  %8264 = vmatprep.subr.bf16.mxu0 %v8708_v36  ;;  %v8747_v31 = vld [vmem:[%s10057_s19 + $0x398] sm:$0xff]   ;;  %v8752_v36 = vld [vmem:[%s10057_s19 + $0x368] sm:$0xff]  }
 0x1ba   : > { %8292 = vmatprep.subr.bf16.mxu1 %v8709_v37  ;;  %v8753_v37 = vld [vmem:[%s10057_s19 + $0x3e8] sm:$0xff]  }
 0x1bb   : > { %6961 = vmatmul.mubr.bf16.gmra.mrb[12].mxu0 %v7847_v35  ;;  %v8751_v35 = vld [vmem:[%s10057_s19 + $0x3a0] sm:$0xff]  }
 0x1bc   : > { %8265 = vmatpush3.bf16.msra.mxu0 %v8710_v41  ;;  %7010 = vmatmul.mubr.bf16.gmra.mrb[12].mxu1 %v7849_v42  ;;  %v8757_v41 = vld [vmem:[%s10057_s19 + $0x3f0] sm:$0xff]  }
 0x1bd   : > { %8293 = vmatpush3.bf16.msra.mxu1 %v8711_v43  ;;  %8266 = vmatprep.subr.bf16.mxu0 %v8712_v44  ;;  %v8758_v42 = vld [vmem:[%s10057_s19 + $0x330] sm:$0xff]   ;;  %v8760_v44 = vld [vmem:[%s10057_s19 + $0x378] sm:$0xff]  }
 0x1be   : > { %8294 = vmatprep.subr.bf16.mxu1 %v8713_v45  ;;  %7050 = vmatprep.mubr.bf16.mxu0 %v7820_v3  ;;  %v8759_v43 = vld [vmem:[%s10057_s19 + $0x3b0] sm:$0xff]   ;;  %v8761_v45 = vld [vmem:[%s10057_s19 + $0x3f8] sm:$0xff]   ;;  %v7855_v3 = vcombine.low %v4421_v0, %v4437_v1 }
 0x1bf   : > { %7099 = vmatprep.mubr.bf16.mxu1 %v7822_v7  ;;  %v4438_v7 = vld [vmem:[%s10536_s0 + $0x1b8] sm:$0x77] }
 0x1c0   : > { %8267 = vmatpush3.bf16.msra.mxu0 %v8714_v46  ;;  %v8762_v46 = vld [vmem:[%s10057_s19 + $0x338] sm:$0xff]  }
 0x1c1   : > { %8295 = vmatpush3.bf16.msra.mxu1 %v8715_v47  ;;  %8268 = vmatprep.subr.bf16.mxu0 %v8716_v48  ;;  %v8763_v47 = vld [vmem:[%s10057_s19 + $0x3b8] sm:$0xff]   ;;  %v4389_v48 = vld [vmem:[%s10536_s0 + $0x30] sm:$0xff] }
 0x1c2   : > { %8296 = vmatprep.subr.bf16.mxu1 %v8717_v49  ;;  %v4405_v49 = vld [vmem:[%s10536_s0 + $0xb0] sm:$0xff] }
 0x1c4   : > { %8269 = vmatpush3.bf16.msra.mxu0 %v8718_v50  ;;  %v4390_v50 = vld [vmem:[%s10536_s0 + $0x38] sm:$0xff] }
 0x1c5   : > { %8297 = vmatpush3.bf16.msra.mxu1 %v8719_v51  ;;  %8270 = vmatprep.subr.bf16.mxu0 %v8720_v52  ;;  %v7823_v51 = vcombine.low %v4389_v48, %v4405_v49  ;;  %v7824_v52 = vcombine.high %v4389_v48, %v4405_v49  ;;  %v4423_v48 = vld [vmem:[%s10536_s0 + $0x140] sm:$0xff] }
 0x1c6   : > { %8298 = vmatprep.subr.bf16.mxu1 %v8721_v53  ;;  %v4406_v53 = vld [vmem:[%s10536_s0 + $0xb8] sm:$0xff]  ;;  %v4439_v49 = vld [vmem:[%s10536_s0 + $0x1c0] sm:$0x77] }
 0x1c8   : > { %8271 = vmatpush3.bf16.msra.mxu0 %v8722_v54  ;;  %v7825_v54 = vcombine.low %v4390_v50, %v4406_v53 }
 0x1c9   : > { %8299 = vmatpush3.bf16.msra.mxu1 %v8723_v55  ;;  %8272 = vmatprep.subr.bf16.mxu0 %v8724_v56  ;;  %v7826_v55 = vcombine.high %v4390_v50, %v4406_v53  ;;  %v8764_v56 = vld [vmem:[%s10057_s19 + $0x440] sm:$0xff]   ;;  %v7860_v50 = vcombine.high %v4423_v48, %v4439_v49  ;;  %v8805_v53 = vld [vmem:[%s10057_s19 + $0x5d0] sm:$0xff]  }
 0x1ca   : > { %8300 = vmatprep.subr.bf16.mxu1 %v8725_v57  ;;  %v8765_v57 = vld [vmem:[%s10057_s19 + $0x4c0] sm:$0xff]  }
 0x1cc   : > { %8273 = vmatpush3.bf16.msra.mxu0 %v8726_v58  ;;  %v8766_v58 = vld [vmem:[%s10057_s19 + $0x400] sm:$0xff]  }
 0x1cd   : > { %8301 = vmatpush3.bf16.msra.mxu1 %v8727_v59  ;;  %8274 = vmatprep.subr.bf16.mxu0 %v8728_v60  ;;  %v8767_v59 = vld [vmem:[%s10057_s19 + $0x480] sm:$0xff]   ;;  %v8768_v60 = vld [vmem:[%s10057_s19 + $0x448] sm:$0xff]  }
 0x1ce   : > { %8302 = vmatprep.subr.bf16.mxu1 %v8729_v61  ;;  %v8769_v61 = vld [vmem:[%s10057_s19 + $0x4c8] sm:$0xff]  }
 0x1d0   : > { %8275 = vmatpush3.bf16.msra.mxu0 %v8730_v62  ;;  %v8770_v62 = vld [vmem:[%s10057_s19 + $0x408] sm:$0xff]  }
 0x1d1   : > { %8303 = vmatpush3.bf16.msra.mxu1 %v8731_v63  ;;  %8316 = vmatprep.subr.bf16.mxu0 %v8732_v8  ;;  %v8771_v63 = vld [vmem:[%s10057_s19 + $0x488] sm:$0xff]  }
 0x1d2   : > { %8344 = vmatprep.subr.bf16.mxu1 %v8733_v9  ;;  %v8774_v9 = vld [vmem:[%s10057_s19 + $0x410] sm:$0xff]  }
 0x1d3   : > { %7051 = vmatmul.mubr.bf16.vlgmr.msra.gmra.mrb[16].mxu0 %v7819_v2  ;;  %v7856_v2 = vcombine.high %v4421_v0, %v4437_v1  ;;  %v8812_v0 = vld [vmem:[%s10057_s19 + $0x560] sm:$0xff]  }
 0x1d4   : > { %7100 = vmatmul.mubr.bf16.vlgmr.msra.gmra.mrb[16].mxu1 %v7821_v6  ;;  %8317 = vmatpush3.bf16.msra.mxu0 %v8734_v10  ;;  %v4422_v6 = vld [vmem:[%s10536_s0 + $0x138] sm:$0xff]  ;;  %v8813_v1 = vld [vmem:[%s10057_s19 + $0x5e0] sm:$0xff]  }
 0x1d5   : > { %8345 = vmatpush3.bf16.msra.mxu1 %v8735_v11  ;;  %8318 = vmatprep.subr.bf16.mxu0 %v8736_v12  ;;  %v7858_v8 = vcombine.high %v4422_v6, %v4438_v7  ;;  %v7857_v10 = vcombine.low %v4422_v6, %v4438_v7  ;;  %v8775_v11 = vld [vmem:[%s10057_s19 + $0x490] sm:$0xff]   ;;  %v8776_v12 = vld [vmem:[%s10057_s19 + $0x458] sm:$0xff]   ;;  %v8818_v6 = vld [vmem:[%s10057_s19 + $0x528] sm:$0xff]  }
 0x1d6   : > { %8346 = vmatprep.subr.bf16.mxu1 %v8737_v13  ;;  %7058 = vmatprep.mubr.bf16.mxu0 %v7852_v18  ;;  %v8777_v13 = vld [vmem:[%s10057_s19 + $0x4d8] sm:$0xff]   ;;  %v8782_v18 = vld [vmem:[%s10057_s19 + $0x420] sm:$0xff]   ;;  %v8819_v7 = vld [vmem:[%s10057_s19 + $0x5a8] sm:$0xff]  }
 0x1d7   : > { %7107 = vmatprep.mubr.bf16.mxu1 %v7854_v24  ;;  %v8788_v24 = vld [vmem:[%s10057_s19 + $0x470] sm:$0xff]  }
 0x1d8   : > { %8319 = vmatpush3.bf16.msra.mxu0 %v8738_v14  ;;  %v8778_v14 = vld [vmem:[%s10057_s19 + $0x418] sm:$0xff]  }
 0x1d9   : > { %8347 = vmatpush3.bf16.msra.mxu1 %v8739_v15  ;;  %8320 = vmatprep.subr.bf16.mxu0 %v8740_v20  ;;  %v8779_v15 = vld [vmem:[%s10057_s19 + $0x498] sm:$0xff]   ;;  %v8784_v20 = vld [vmem:[%s10057_s19 + $0x468] sm:$0xff]  }
 0x1da   : > { %8348 = vmatprep.subr.bf16.mxu1 %v8741_v21  ;;  %v8785_v21 = vld [vmem:[%s10057_s19 + $0x4e8] sm:$0xff]  }
 0x1db   : > { %7059 = vmatmul.mubr.bf16.gmra.mrb[20].mxu0 %v7851_v19  ;;  %v8783_v19 = vld [vmem:[%s10057_s19 + $0x4a0] sm:$0xff]  }
 0x1dc   : > { %8321 = vmatpush3.bf16.msra.mxu0 %v8742_v25  ;;  %7108 = vmatmul.mubr.bf16.gmra.mrb[20].mxu1 %v7853_v26  ;;  %v8789_v25 = vld [vmem:[%s10057_s19 + $0x4f0] sm:$0xff]  }
 0x1dd   : > { %8349 = vmatpush3.bf16.msra.mxu1 %v8743_v27  ;;  %8322 = vmatprep.subr.bf16.mxu0 %v8744_v28  ;;  %v8790_v26 = vld [vmem:[%s10057_s19 + $0x430] sm:$0xff]   ;;  %v8792_v28 = vld [vmem:[%s10057_s19 + $0x478] sm:$0xff]  }
 0x1de   : > { %8350 = vmatprep.subr.bf16.mxu1 %v8745_v29  ;;  %7148 = vmatprep.mubr.bf16.mxu0 %v7824_v52  ;;  %v8791_v27 = vld [vmem:[%s10057_s19 + $0x4b0] sm:$0xff]   ;;  %v8793_v29 = vld [vmem:[%s10057_s19 + $0x4f8] sm:$0xff]  }
 0x1df   : > { %7197 = vmatprep.mubr.bf16.mxu1 %v7826_v55  ;;  %v8804_v52 = vld [vmem:[%s10057_s19 + $0x550] sm:$0xff]   ;;  %v4440_v55 = vld [vmem:[%s10536_s0 + $0x1c8] sm:$0x77] }
 0x1e0   : > { %8323 = vmatpush3.bf16.msra.mxu0 %v8746_v30  ;;  %v8794_v30 = vld [vmem:[%s10057_s19 + $0x438] sm:$0xff]  }
 0x1e1   : > { %8351 = vmatpush3.bf16.msra.mxu1 %v8747_v31  ;;  %8324 = vmatprep.subr.bf16.mxu0 %v8748_v32  ;;  %v8795_v31 = vld [vmem:[%s10057_s19 + $0x4b8] sm:$0xff]   ;;  %v4391_v32 = vld [vmem:[%s10536_s0 + $0x40] sm:$0xff] }
 0x1e2   : > { %8352 = vmatprep.subr.bf16.mxu1 %v8749_v33  ;;  %v4407_v33 = vld [vmem:[%s10536_s0 + $0xc0] sm:$0xff] }
 0x1e4   : > { %8325 = vmatpush3.bf16.msra.mxu0 %v8750_v34  ;;  %v4392_v34 = vld [vmem:[%s10536_s0 + $0x48] sm:$0xff] }
 0x1e5   : > { %8353 = vmatpush3.bf16.msra.mxu1 %v8751_v35  ;;  %8326 = vmatprep.subr.bf16.mxu0 %v8752_v36  ;;  %v4408_v35 = vld [vmem:[%s10536_s0 + $0xc8] sm:$0xff]  ;;  %v7827_v36 = vcombine.low %v4391_v32, %v4407_v33 }
 0x1e6   : > { %8354 = vmatprep.subr.bf16.mxu1 %v8753_v37  ;;  %v7828_v37 = vcombine.high %v4391_v32, %v4407_v33  ;;  %v4425_v32 = vld [vmem:[%s10536_s0 + $0x150] sm:$0xff] }
 0x1e7   : > { %v4441_v33 = vld [vmem:[%s10536_s0 + $0x1d0] sm:$0x77] }
 0x1e8   : > { %8327 = vmatpush3.bf16.msra.mxu0 %v8754_v38  ;;  %v7829_v38 = vcombine.low %v4392_v34, %v4408_v35 }
 0x1e9   : > { %8355 = vmatpush3.bf16.msra.mxu1 %v8755_v39  ;;  %8328 = vmatprep.subr.bf16.mxu0 %v8756_v40  ;;  %v7830_v39 = vcombine.high %v4392_v34, %v4408_v35  ;;  %v8796_v40 = vld [vmem:[%s10057_s19 + $0x540] sm:$0xff]   ;;  %v7864_v34 = vcombine.high %v4425_v32, %v4441_v33  ;;  %v7863_v35 = vcombine.low %v4425_v32, %v4441_v33 }
 0x1ea   : > { %8356 = vmatprep.subr.bf16.mxu1 %v8757_v41  ;;  %v8797_v41 = vld [vmem:[%s10057_s19 + $0x5c0] sm:$0xff]  }
 0x1ec   : > { %8329 = vmatpush3.bf16.msra.mxu0 %v8758_v42  ;;  %v8798_v42 = vld [vmem:[%s10057_s19 + $0x500] sm:$0xff]  }
 0x1ed   : > { %8357 = vmatpush3.bf16.msra.mxu1 %v8759_v43  ;;  %8330 = vmatprep.subr.bf16.mxu0 %v8760_v44  ;;  %v8799_v43 = vld [vmem:[%s10057_s19 + $0x580] sm:$0xff]   ;;  %v8800_v44 = vld [vmem:[%s10057_s19 + $0x548] sm:$0xff]  }
 0x1ee   : > { %8358 = vmatprep.subr.bf16.mxu1 %v8761_v45  ;;  %v8801_v45 = vld [vmem:[%s10057_s19 + $0x5c8] sm:$0xff]  }
 0x1f0   : > { %8331 = vmatpush3.bf16.msra.mxu0 %v8762_v46  ;;  %v8802_v46 = vld [vmem:[%s10057_s19 + $0x508] sm:$0xff]  }
 0x1f1   : > { %8359 = vmatpush3.bf16.msra.mxu1 %v8763_v47  ;;  %8372 = vmatprep.subr.bf16.mxu0 %v8764_v56  ;;  %v8803_v47 = vld [vmem:[%s10057_s19 + $0x588] sm:$0xff]  }
 0x1f2   : > { %8400 = vmatprep.subr.bf16.mxu1 %v8765_v57  ;;  %v8806_v57 = vld [vmem:[%s10057_s19 + $0x510] sm:$0xff]  }
 0x1f3   : > { %7149 = vmatmul.mubr.bf16.vlgmr.msra.gmra.mrb[24].mxu0 %v7823_v51  ;;  %v7859_v51 = vcombine.low %v4423_v48, %v4439_v49  ;;  %v8844_v48 = vld [vmem:[%s10057_s19 + $0x660] sm:$0xff]  }
 0x1f4   : > { %7198 = vmatmul.mubr.bf16.vlgmr.msra.gmra.mrb[24].mxu1 %v7825_v54  ;;  %8373 = vmatpush3.bf16.msra.mxu0 %v8766_v58  ;;  %v4424_v54 = vld [vmem:[%s10536_s0 + $0x148] sm:$0xff]  ;;  %v8845_v49 = vld [vmem:[%s10057_s19 + $0x6e0] sm:$0xff]  }
 0x1f5   : > { %8401 = vmatpush3.bf16.msra.mxu1 %v8767_v59  ;;  %8374 = vmatprep.subr.bf16.mxu0 %v8768_v60  ;;  %v7862_v56 = vcombine.high %v4424_v54, %v4440_v55  ;;  %v7861_v58 = vcombine.low %v4424_v54, %v4440_v55  ;;  %v8807_v59 = vld [vmem:[%s10057_s19 + $0x590] sm:$0xff]   ;;  %v8808_v60 = vld [vmem:[%s10057_s19 + $0x558] sm:$0xff]   ;;  %v8850_v54 = vld [vmem:[%s10057_s19 + $0x628] sm:$0xff]  }
 0x1f6   : > { %8402 = vmatprep.subr.bf16.mxu1 %v8769_v61  ;;  %7156 = vmatprep.mubr.bf16.mxu0 %v7856_v2  ;;  %v8809_v61 = vld [vmem:[%s10057_s19 + $0x5d8] sm:$0xff]   ;;  %v8814_v2 = vld [vmem:[%s10057_s19 + $0x520] sm:$0xff]   ;;  %v8851_v55 = vld [vmem:[%s10057_s19 + $0x6a8] sm:$0xff]  }
 0x1f7   : > { %7205 = vmatprep.mubr.bf16.mxu1 %v7858_v8  ;;  %v8820_v8 = vld [vmem:[%s10057_s19 + $0x570] sm:$0xff]  }
 0x1f8   : > { %8375 = vmatpush3.bf16.msra.mxu0 %v8770_v62  ;;  %v8810_v62 = vld [vmem:[%s10057_s19 + $0x518] sm:$0xff]  }
 0x1f9   : > { %8403 = vmatpush3.bf16.msra.mxu1 %v8771_v63  ;;  %8376 = vmatprep.subr.bf16.mxu0 %v8772_v4  ;;  %v8811_v63 = vld [vmem:[%s10057_s19 + $0x598] sm:$0xff]   ;;  %v8816_v4 = vld [vmem:[%s10057_s19 + $0x568] sm:$0xff]  }
 0x1fa   : > { %8404 = vmatprep.subr.bf16.mxu1 %v8773_v5  ;;  %v8817_v5 = vld [vmem:[%s10057_s19 + $0x5e8] sm:$0xff]  }
 0x1fb   : > { %7157 = vmatmul.mubr.bf16.gmra.mrb[28].mxu0 %v7855_v3  ;;  %v8815_v3 = vld [vmem:[%s10057_s19 + $0x5a0] sm:$0xff]  }
 0x1fc   : > { %8377 = vmatpush3.bf16.msra.mxu0 %v8774_v9  ;;  %7206 = vmatmul.mubr.bf16.gmra.mrb[28].mxu1 %v7857_v10  ;;  %v8821_v9 = vld [vmem:[%s10057_s19 + $0x5f0] sm:$0xff]  }
 0x1fd   : > { %8405 = vmatpush3.bf16.msra.mxu1 %v8775_v11  ;;  %8378 = vmatprep.subr.bf16.mxu0 %v8776_v12  ;;  %v8822_v10 = vld [vmem:[%s10057_s19 + $0x530] sm:$0xff]   ;;  %v8824_v12 = vld [vmem:[%s10057_s19 + $0x578] sm:$0xff]  }
 0x1fe   : > { %8406 = vmatprep.subr.bf16.mxu1 %v8777_v13  ;;  %7246 = vmatprep.mubr.bf16.mxu0 %v7828_v37  ;;  %v8823_v11 = vld [vmem:[%s10057_s19 + $0x5b0] sm:$0xff]   ;;  %v8825_v13 = vld [vmem:[%s10057_s19 + $0x5f8] sm:$0xff]  }
 0x1ff   : > { %7295 = vmatprep.mubr.bf16.mxu1 %v7830_v39  ;;  %v8837_v37 = vld [vmem:[%s10057_s19 + $0x6d0] sm:$0xff]   ;;  %v4442_v39 = vld [vmem:[%s10536_s0 + $0x1d8] sm:$0x77] }
 0x200   : > { %8379 = vmatpush3.bf16.msra.mxu0 %v8778_v14  ;;  %v8826_v14 = vld [vmem:[%s10057_s19 + $0x538] sm:$0xff]  }
 0x201   : > { %8407 = vmatpush3.bf16.msra.mxu1 %v8779_v15  ;;  %8380 = vmatprep.subr.bf16.mxu0 %v8780_v16  ;;  %v8827_v15 = vld [vmem:[%s10057_s19 + $0x5b8] sm:$0xff]   ;;  %v4393_v16 = vld [vmem:[%s10536_s0 + $0x50] sm:$0xff] }
 0x202   : > { %8408 = vmatprep.subr.bf16.mxu1 %v8781_v17  ;;  %v4409_v17 = vld [vmem:[%s10536_s0 + $0xd0] sm:$0xff] }
 0x204   : > { %8381 = vmatpush3.bf16.msra.mxu0 %v8782_v18  ;;  %v7831_v18 = vcombine.low %v4393_v16, %v4409_v17 }
 0x205   : > { %8409 = vmatpush3.bf16.msra.mxu1 %v8783_v19  ;;  %8382 = vmatprep.subr.bf16.mxu0 %v8784_v20  ;;  %v7832_v19 = vcombine.high %v4393_v16, %v4409_v17  ;;  %v4394_v20 = vld [vmem:[%s10536_s0 + $0x58] sm:$0xff]  ;;  %v4427_v16 = vld [vmem:[%s10536_s0 + $0x160] sm:$0xff] }
 0x206   : > { %8410 = vmatprep.subr.bf16.mxu1 %v8785_v21  ;;  %v4410_v21 = vld [vmem:[%s10536_s0 + $0xd8] sm:$0xff]  ;;  %v4443_v17 = vld [vmem:[%s10536_s0 + $0x1e0] sm:$0x77] }
 0x208   : > { %8383 = vmatpush3.bf16.msra.mxu0 %v8786_v22  ;;  %v7833_v22 = vcombine.low %v4394_v20, %v4410_v21 }
 0x209   : > { %8411 = vmatpush3.bf16.msra.mxu1 %v8787_v23  ;;  %8384 = vmatprep.subr.bf16.mxu0 %v8788_v24  ;;  %v7834_v23 = vcombine.high %v4394_v20, %v4410_v21  ;;  %v8828_v24 = vld [vmem:[%s10057_s19 + $0x640] sm:$0xff]   ;;  %v7867_v20 = vcombine.low %v4427_v16, %v4443_v17  ;;  %v8868_v21 = vld [vmem:[%s10057_s19 + $0x750] sm:$0xff]  }
 0x20a   : > { %8412 = vmatprep.subr.bf16.mxu1 %v8789_v25  ;;  %v8829_v25 = vld [vmem:[%s10057_s19 + $0x6c0] sm:$0xff]  }
 0x20c   : > { %8385 = vmatpush3.bf16.msra.mxu0 %v8790_v26  ;;  %v8830_v26 = vld [vmem:[%s10057_s19 + $0x600] sm:$0xff]  }
 0x20d   : > { %8413 = vmatpush3.bf16.msra.mxu1 %v8791_v27  ;;  %8386 = vmatprep.subr.bf16.mxu0 %v8792_v28  ;;  %v8831_v27 = vld [vmem:[%s10057_s19 + $0x680] sm:$0xff]   ;;  %v8832_v28 = vld [vmem:[%s10057_s19 + $0x648] sm:$0xff]  }
 0x20e   : > { %8414 = vmatprep.subr.bf16.mxu1 %v8793_v29  ;;  %v8833_v29 = vld [vmem:[%s10057_s19 + $0x6c8] sm:$0xff]  }
 0x210   : > { %8387 = vmatpush3.bf16.msra.mxu0 %v8794_v30  ;;  %v8834_v30 = vld [vmem:[%s10057_s19 + $0x608] sm:$0xff]  }
 0x211   : > { %8415 = vmatpush3.bf16.msra.mxu1 %v8795_v31  ;;  %8428 = vmatprep.subr.bf16.mxu0 %v8796_v40  ;;  %v8835_v31 = vld [vmem:[%s10057_s19 + $0x688] sm:$0xff]  }
 0x212   : > { %8456 = vmatprep.subr.bf16.mxu1 %v8797_v41  ;;  %v8838_v41 = vld [vmem:[%s10057_s19 + $0x610] sm:$0xff]  }
 0x213   : > { %7247 = vmatmul.mubr.bf16.vlgmr.msra.gmra.mrb[32].mxu0 %v7827_v36  ;;  %v8836_v36 = vld [vmem:[%s10057_s19 + $0x650] sm:$0xff]  }
 0x214   : > { %7296 = vmatmul.mubr.bf16.vlgmr.msra.gmra.mrb[32].mxu1 %v7829_v38  ;;  %8429 = vmatpush3.bf16.msra.mxu0 %v8798_v42  ;;  %v4426_v38 = vld [vmem:[%s10536_s0 + $0x158] sm:$0xff] }
 0x215   : > { %8457 = vmatpush3.bf16.msra.mxu1 %v8799_v43  ;;  %8430 = vmatprep.subr.bf16.mxu0 %v8800_v44  ;;  %v7866_v40 = vcombine.high %v4426_v38, %v4442_v39  ;;  %v7865_v42 = vcombine.low %v4426_v38, %v4442_v39  ;;  %v8839_v43 = vld [vmem:[%s10057_s19 + $0x690] sm:$0xff]   ;;  %v8840_v44 = vld [vmem:[%s10057_s19 + $0x658] sm:$0xff]  }
 0x216   : > { %8458 = vmatprep.subr.bf16.mxu1 %v8801_v45  ;;  %7254 = vmatprep.mubr.bf16.mxu0 %v7860_v50  ;;  %v8841_v45 = vld [vmem:[%s10057_s19 + $0x6d8] sm:$0xff]   ;;  %v8846_v50 = vld [vmem:[%s10057_s19 + $0x620] sm:$0xff]  }
 0x217   : > { %7303 = vmatprep.mubr.bf16.mxu1 %v7862_v56  ;;  %v8852_v56 = vld [vmem:[%s10057_s19 + $0x670] sm:$0xff]   ;;  %v8873_v38 = vld [vmem:[%s10057_s19 + $0x7d8] sm:$0xff]  }
 0x218   : > { %8431 = vmatpush3.bf16.msra.mxu0 %v8802_v46  ;;  %v8842_v46 = vld [vmem:[%s10057_s19 + $0x618] sm:$0xff]  }
 0x219   : > { %8459 = vmatpush3.bf16.msra.mxu1 %v8803_v47  ;;  %8432 = vmatprep.subr.bf16.mxu0 %v8804_v52  ;;  %v8843_v47 = vld [vmem:[%s10057_s19 + $0x698] sm:$0xff]   ;;  %v8848_v52 = vld [vmem:[%s10057_s19 + $0x668] sm:$0xff]  }
 0x21a   : > { %8460 = vmatprep.subr.bf16.mxu1 %v8805_v53  ;;  %v8849_v53 = vld [vmem:[%s10057_s19 + $0x6e8] sm:$0xff]  }
 0x21b   : > { %7255 = vmatmul.mubr.bf16.gmra.mrb[36].mxu0 %v7859_v51  ;;  %v8847_v51 = vld [vmem:[%s10057_s19 + $0x6a0] sm:$0xff]  }
 0x21c   : > { %8433 = vmatpush3.bf16.msra.mxu0 %v8806_v57  ;;  %7304 = vmatmul.mubr.bf16.gmra.mrb[36].mxu1 %v7861_v58  ;;  %v8853_v57 = vld [vmem:[%s10057_s19 + $0x6f0] sm:$0xff]  }
 0x21d   : > { %8461 = vmatpush3.bf16.msra.mxu1 %v8807_v59  ;;  %8434 = vmatprep.subr.bf16.mxu0 %v8808_v60  ;;  %v8854_v58 = vld [vmem:[%s10057_s19 + $0x630] sm:$0xff]   ;;  %v8856_v60 = vld [vmem:[%s10057_s19 + $0x678] sm:$0xff]  }
 0x21e   : > { %8462 = vmatprep.subr.bf16.mxu1 %v8809_v61  ;;  %7344 = vmatprep.mubr.bf16.mxu0 %v7832_v19  ;;  %v8855_v59 = vld [vmem:[%s10057_s19 + $0x6b0] sm:$0xff]   ;;  %v8857_v61 = vld [vmem:[%s10057_s19 + $0x6f8] sm:$0xff]   ;;  %v7868_v19 = vcombine.high %v4427_v16, %v4443_v17 }
 0x21f   : > { %7393 = vmatprep.mubr.bf16.mxu1 %v7834_v23  ;;  %v8869_v23 = vld [vmem:[%s10057_s19 + $0x7d0] sm:$0xff]   ;;  %v8891_v16 = vld [vmem:[%s10057_s19 + $0x7b8] sm:$0xff]  }
 0x220   : > { %8435 = vmatpush3.bf16.msra.mxu0 %v8810_v62  ;;  %v8858_v62 = vld [vmem:[%s10057_s19 + $0x638] sm:$0xff]   ;;  %v4397_v17 = vld [vmem:[%s10536_s0 + $0x70] sm:$0xff] }
 0x221   : > { %8463 = vmatpush3.bf16.msra.mxu1 %v8811_v63  ;;  %8436 = vmatprep.subr.bf16.mxu0 %v8812_v0  ;;  %v8859_v63 = vld [vmem:[%s10057_s19 + $0x6b8] sm:$0xff]   ;;  %v4395_v0 = vld [vmem:[%s10536_s0 + $0x60] sm:$0xff] }
 0x222   : > { %8464 = vmatprep.subr.bf16.mxu1 %v8813_v1  ;;  %v4411_v1 = vld [vmem:[%s10536_s0 + $0xe0] sm:$0xff] }
 0x224   : > { %8437 = vmatpush3.bf16.msra.mxu0 %v8814_v2  ;;  %v4396_v2 = vld [vmem:[%s10536_s0 + $0x68] sm:$0xff] }
 0x225   : > { %8465 = vmatpush3.bf16.msra.mxu1 %v8815_v3  ;;  %8438 = vmatprep.subr.bf16.mxu0 %v8816_v4  ;;  %v7835_v3 = vcombine.low %v4395_v0, %v4411_v1  ;;  %v7836_v4 = vcombine.high %v4395_v0, %v4411_v1 }
 0x226   : > { %8466 = vmatprep.subr.bf16.mxu1 %v8817_v5  ;;  %v4412_v5 = vld [vmem:[%s10536_s0 + $0xe8] sm:$0xff] }
 0x228   : > { %8439 = vmatpush3.bf16.msra.mxu0 %v8818_v6  ;;  %v7837_v6 = vcombine.low %v4396_v2, %v4412_v5 }
 0x229   : > { %8467 = vmatpush3.bf16.msra.mxu1 %v8819_v7  ;;  %8440 = vmatprep.subr.bf16.mxu0 %v8820_v8  ;;  %v7838_v7 = vcombine.high %v4396_v2, %v4412_v5  ;;  %v8860_v8 = vld [vmem:[%s10057_s19 + $0x740] sm:$0xff]  }
 0x22a   : > { %8468 = vmatprep.subr.bf16.mxu1 %v8821_v9  ;;  %v8861_v9 = vld [vmem:[%s10057_s19 + $0x7c0] sm:$0xff]  }
 0x22c   : > { %8441 = vmatpush3.bf16.msra.mxu0 %v8822_v10  ;;  %v8862_v10 = vld [vmem:[%s10057_s19 + $0x700] sm:$0xff]  }
 0x22d   : > { %8469 = vmatpush3.bf16.msra.mxu1 %v8823_v11  ;;  %8442 = vmatprep.subr.bf16.mxu0 %v8824_v12  ;;  %v8863_v11 = vld [vmem:[%s10057_s19 + $0x780] sm:$0xff]   ;;  %v8864_v12 = vld [vmem:[%s10057_s19 + $0x748] sm:$0xff]  }
 0x22e   : > { %8470 = vmatprep.subr.bf16.mxu1 %v8825_v13  ;;  %v8865_v13 = vld [vmem:[%s10057_s19 + $0x7c8] sm:$0xff]  }
 0x230   : > { %8443 = vmatpush3.bf16.msra.mxu0 %v8826_v14  ;;  %v8866_v14 = vld [vmem:[%s10057_s19 + $0x708] sm:$0xff]  }
 0x231   : > { %8471 = vmatpush3.bf16.msra.mxu1 %v8827_v15  ;;  %8484 = vmatprep.subr.bf16.mxu0 %v8828_v24  ;;  %v8867_v15 = vld [vmem:[%s10057_s19 + $0x788] sm:$0xff]  }
 0x232   : > { %8512 = vmatprep.subr.bf16.mxu1 %v8829_v25  ;;  %v4428_v25 = vld [vmem:[%s10536_s0 + $0x168] sm:$0xff] }
 0x233   : > { %7345 = vmatmul.mubr.bf16.vlgmr.msra.gmra.mrb[40].mxu0 %v7831_v18 }
 0x234   : > { %7394 = vmatmul.mubr.bf16.vlgmr.msra.gmra.mrb[40].mxu1 %v7833_v22  ;;  %8485 = vmatpush3.bf16.msra.mxu0 %v8830_v26  ;;  %v4444_v26 = vld [vmem:[%s10536_s0 + $0x1e8] sm:$0x77] }
 0x235   : > { %8513 = vmatpush3.bf16.msra.mxu1 %v8831_v27  ;;  %8486 = vmatprep.subr.bf16.mxu0 %v8832_v28 }
 0x236   : > { %8514 = vmatprep.subr.bf16.mxu1 %v8833_v29  ;;  %7352 = vmatprep.mubr.bf16.mxu0 %v7864_v34  ;;  %v7870_v29 = vcombine.high %v4428_v25, %v4444_v26  ;;  %v8871_v34 = vld [vmem:[%s10057_s19 + $0x790] sm:$0xff]  }
 0x237   : > { %7401 = vmatprep.mubr.bf16.mxu1 %v7866_v40 }
 0x238   : > { %8487 = vmatpush3.bf16.msra.mxu0 %v8834_v30  ;;  %v8870_v30 = vld [vmem:[%s10057_s19 + $0x710] sm:$0xff]  }
 0x239   : > { %8515 = vmatpush3.bf16.msra.mxu1 %v8835_v31  ;;  %8488 = vmatprep.subr.bf16.mxu0 %v8836_v36  ;;  %v7869_v31 = vcombine.low %v4428_v25, %v4444_v26  ;;  %v8872_v36 = vld [vmem:[%s10057_s19 + $0x758] sm:$0xff]  }
 0x23a   : > { %8516 = vmatprep.subr.bf16.mxu1 %v8837_v37 }
 0x23b   : > { %7353 = vmatmul.mubr.bf16.gmra.mrb[44].mxu0 %v7863_v35 }
 0x23c   : > { %8489 = vmatpush3.bf16.msra.mxu0 %v8838_v41  ;;  %7402 = vmatmul.mubr.bf16.gmra.mrb[44].mxu1 %v7865_v42  ;;  %v8874_v41 = vld [vmem:[%s10057_s19 + $0x718] sm:$0xff]  }
 0x23d   : > { %8517 = vmatpush3.bf16.msra.mxu1 %v8839_v43  ;;  %8490 = vmatprep.subr.bf16.mxu0 %v8840_v44  ;;  %v8875_v44 = vld [vmem:[%s10057_s19 + $0x798] sm:$0xff]  }
 0x23e   : > { %8518 = vmatprep.subr.bf16.mxu1 %v8841_v45  ;;  %7442 = vmatprep.mubr.bf16.mxu0 %v7836_v4 }
 0x23f   : > { %7491 = vmatprep.mubr.bf16.mxu1 %v7838_v7  ;;  %v8883_v7 = vld [vmem:[%s10057_s19 + $0x7a8] sm:$0xff]  }
 0x240   : > { %8491 = vmatpush3.bf16.msra.mxu0 %v8842_v46  ;;  %v8876_v46 = vld [vmem:[%s10057_s19 + $0x760] sm:$0xff]  }
 0x241   : > { %8519 = vmatpush3.bf16.msra.mxu1 %v8843_v47  ;;  %8492 = vmatprep.subr.bf16.mxu0 %v8844_v48 }
 0x242   : > { %8520 = vmatprep.subr.bf16.mxu1 %v8845_v49  ;;  %v8877_v49 = vld [vmem:[%s10057_s19 + $0x7e0] sm:$0xff]  }
 0x244   : > { %8493 = vmatpush3.bf16.msra.mxu0 %v8846_v50 }
 0x245   : > { %8521 = vmatpush3.bf16.msra.mxu1 %v8847_v51  ;;  %8494 = vmatprep.subr.bf16.mxu0 %v8848_v52  ;;  %v8878_v51 = vld [vmem:[%s10057_s19 + $0x720] sm:$0xff]  }
 0x246   : > { %8522 = vmatprep.subr.bf16.mxu1 %v8849_v53  ;;  %v8879_v53 = vld [vmem:[%s10057_s19 + $0x7a0] sm:$0xff]  }
 0x248   : > { %8495 = vmatpush3.bf16.msra.mxu0 %v8850_v54  ;;  %v7810_v54 = vld [vmem:[%s4380_s27] ss:$0 sm:$0xff] }
 0x249   : > { %8523 = vmatpush3.bf16.msra.mxu1 %v8851_v55  ;;  %8496 = vmatprep.subr.bf16.mxu0 %v8852_v56 }
 0x24a   : > { %8524 = vmatprep.subr.bf16.mxu1 %v8853_v57 }
 0x24c   : > { %8497 = vmatpush3.bf16.msra.mxu0 %v8854_v58  ;;  %v8880_v58 = vld [vmem:[%s10057_s19 + $0x768] sm:$0xff]  }
 0x24d   : > { %8525 = vmatpush3.bf16.msra.mxu1 %v8855_v59  ;;  %8498 = vmatprep.subr.bf16.mxu0 %v8856_v60 }
 0x24e   : > { %8526 = vmatprep.subr.bf16.mxu1 %v8857_v61 }
 0x250   : > { %8499 = vmatpush3.bf16.msra.mxu0 %v8858_v62 }
 0x251   : > { %8527 = vmatpush3.bf16.msra.mxu1 %v8859_v63  ;;  %8540 = vmatprep.subr.bf16.mxu0 %v8860_v8  ;;  %v8881_v63 = vld [vmem:[%s10057_s19 + $0x7e8] sm:$0xff]   ;;  %v8884_v8 = vld [vmem:[%s10057_s19 + $0x770] sm:$0xff]  }
 0x252   : > { %8568 = vmatprep.subr.bf16.mxu1 %v8861_v9 }
 0x253   : > { %7443 = vmatmul.mubr.bf16.vlgmr.msra.gmra.mrb[48].mxu0 %v7835_v3  ;;  %v8882_v3 = vld [vmem:[%s10057_s19 + $0x728] sm:$0xff]  }
 0x254   : > { %7492 = vmatmul.mubr.bf16.vlgmr.msra.gmra.mrb[48].mxu1 %v7837_v6  ;;  %8541 = vmatpush3.bf16.msra.mxu0 %v8862_v10  ;;  %v8885_v10 = vld [vmem:[%s10057_s19 + $0x7f0] sm:$0xff]  }
 0x255   : > { %8569 = vmatpush3.bf16.msra.mxu1 %v8863_v11  ;;  %8542 = vmatprep.subr.bf16.mxu0 %v8864_v12  ;;  %v8886_v11 = vld [vmem:[%s10057_s19 + $0x730] sm:$0xff]  }
 0x256   : > { %8570 = vmatprep.subr.bf16.mxu1 %v8865_v13  ;;  %7450 = vmatprep.mubr.bf16.mxu0 %v7868_v19  ;;  %v8887_v12 = vld [vmem:[%s10057_s19 + $0x7b0] sm:$0xff]   ;;  %v8888_v13 = vld [vmem:[%s10057_s19 + $0x778] sm:$0xff]  }
 0x257   : > { %7499 = vmatprep.mubr.bf16.mxu1 %v7870_v29  ;;  %v4398_v19 = vld [vmem:[%s10536_s0 + $0x78] sm:$0xff] }
 0x258   : > { %8543 = vmatpush3.bf16.msra.mxu0 %v8866_v14  ;;  %v8889_v14 = vld [vmem:[%s10057_s19 + $0x7f8] sm:$0xff]  }
 0x259   : > { %8571 = vmatpush3.bf16.msra.mxu1 %v8867_v15  ;;  %8544 = vmatprep.subr.bf16.mxu0 %v8868_v21  ;;  %v8890_v15 = vld [vmem:[%s10057_s19 + $0x738] sm:$0xff]  }
 0x25a   : > { %8572 = vmatprep.subr.bf16.mxu1 %v8869_v23  ;;  %v4429_v23 = vld [vmem:[%s10536_s0 + $0x170] sm:$0xff]  ;;  %v4446_v29 = vld [vmem:[%s10536_s0 + $0x1f8] sm:$0x77] }
 0x25b   : > { %7451 = vmatmul.mubr.bf16.gmra.mrb[52].mxu0 %v7867_v20 }
 0x25c   : > { %8545 = vmatpush3.bf16.msra.mxu0 %v8870_v30  ;;  %7500 = vmatmul.mubr.bf16.gmra.mrb[52].mxu1 %v7869_v31 }
 0x25d   : > { %8573 = vmatpush3.bf16.msra.mxu1 %v8871_v34  ;;  %8546 = vmatprep.subr.bf16.mxu0 %v8872_v36 }
 0x25e   : > { %8574 = vmatprep.subr.bf16.mxu1 %v8873_v38 }
 0x260   : > { %8547 = vmatpush3.bf16.msra.mxu0 %v8874_v41 }
 0x261   : > { %8575 = vmatpush3.bf16.msra.mxu1 %v8875_v44  ;;  %8548 = vmatprep.subr.bf16.mxu0 %v8876_v46 }
 0x262   : > { %8576 = vmatprep.subr.bf16.mxu1 %v8877_v49 }
 0x264   : > { %8549 = vmatpush3.bf16.msra.mxu0 %v8878_v51 }
 0x265   : > { %8577 = vmatpush3.bf16.msra.mxu1 %v8879_v53  ;;  %8550 = vmatprep.subr.bf16.mxu0 %v8880_v58 }
 0x266   : > { %v8164_v18 = vpop.f32.mrb[0].mxu0  ;;  %8578 = vmatprep.subr.bf16.mxu1 %v8881_v63 }
 0x267   : > { %v8192_v22 = vpop.f32.mrb[0].mxu1  ;;  %v8165_v24 = vpop.f32.mrb[1].mxu0 }
 0x268   : > { %v8166_v27 = vadd.f32 %v8165_v24, %v8164_v18  ;;  %v8193_v28 = vpop.f32.mrb[1].mxu1  ;;  %v8167_v33 = vpop.f32.mrb[2].mxu0  ;;  %8551 = vmatpush3.bf16.msra.mxu0 %v8882_v3  ;;  %v4413_v18 = vld [vmem:[%s10536_s0 + $0xf0] sm:$0xff] }
 0x269   : > { %v8194_v32 = vadd.f32 %v8193_v28, %v8192_v22  ;;  %v8195_v35 = vpop.f32.mrb[2].mxu1  ;;  %v8168_v37 = vpop.f32.mrb[3].mxu0  ;;  %8579 = vmatpush3.bf16.msra.mxu1 %v8883_v7  ;;  %8552 = vmatprep.subr.bf16.mxu0 %v8884_v8  ;;  %v7839_v20 = vcombine.low %v4397_v17, %v4413_v18  ;;  %v7840_v21 = vcombine.high %v4397_v17, %v4413_v18  ;;  %v4414_v22 = vld [vmem:[%s10536_s0 + $0xf8] sm:$0xff]  ;;  %v4445_v24 = vld [vmem:[%s10536_s0 + $0x1f0] sm:$0x77] }
 0x26a   : > { %v8169_v39 = vadd.f32 %v8168_v37, %v8167_v33  ;;  %v8196_v40 = vpop.f32.mrb[3].mxu1  ;;  %v6857_v57 = vadd.f32 %v8166_v27, %v7810_v54  ;;  %8580 = vmatprep.subr.bf16.mxu1 %v8885_v10  ;;  %v7841_v25 = vcombine.low %v4398_v19, %v4414_v22  ;;  %v7842_v26 = vcombine.high %v4398_v19, %v4414_v22  ;;  %v4430_v28 = vld [vmem:[%s10536_s0 + $0x178] sm:$0xff] }
 0x26b   : > { %v8197_v42 = vadd.f32 %v8196_v40, %v8195_v35  ;;  %v7872_v27 = vcombine.high %v4429_v23, %v4445_v24  ;;  %7540 = vmatprep.mubr.bf16.mxu0 %v7840_v21  ;;  %v7874_v30 = vcombine.high %v4430_v28, %v4446_v29  ;;  %v7871_v33 = vcombine.low %v4429_v23, %v4445_v24 }
 0x26c   : > { %v6860_v59 = vadd.f32 %v8169_v39, %v7810_v54  ;;  %v6906_v2 = vadd.f32 %v8194_v32, %v6857_v57  ;;  %8553 = vmatpush3.bf16.msra.mxu0 %v8886_v11  ;;  %7589 = vmatprep.mubr.bf16.mxu1 %v7842_v26  ;;  %v7873_v36 = vcombine.low %v4430_v28, %v4446_v29 }
 0x26d   : > { %8581 = vmatpush3.bf16.msra.mxu1 %v8887_v12  ;;  %8554 = vmatprep.subr.bf16.mxu0 %v8888_v13 }
 0x26e   : > { %v8170_v43 = vpop.f32.mrb[4].mxu0  ;;  %v6909_v4 = vadd.f32 %v8197_v42, %v6860_v59  ;;  %8582 = vmatprep.subr.bf16.mxu1 %v8889_v14 }
 0x26f   : > { %v8171_v45 = vpop.f32.mrb[5].mxu0  ;;  %v8198_v50 = vpop.f32.mrb[4].mxu1 }
 0x270   : > { %v8172_v47 = vadd.f32 %v8171_v45, %v8170_v43  ;;  %v8173_v48 = vpop.f32.mrb[6].mxu0  ;;  %v8199_v56 = vpop.f32.mrb[5].mxu1  ;;  %8555 = vmatpush3.bf16.msra.mxu0 %v8890_v15 }
 0x271   : > { %v8174_v52 = vpop.f32.mrb[7].mxu0  ;;  %v8200_v61 = vadd.f32 %v8199_v56, %v8198_v50  ;;  %v8201_v62 = vpop.f32.mrb[6].mxu1  ;;  %8583 = vmatpush3.bf16.msra.mxu1 %v8891_v16 }
 0x272   : > { %v8175_v55 = vadd.f32 %v8174_v52, %v8173_v48  ;;  %v6865_v60 = vadd.f32 %v8172_v47, %v7810_v54  ;;  %v8202_v1 = vpop.f32.mrb[7].mxu1 }
 0x273   : > { %v8203_v6 = vadd.f32 %v8202_v1, %v8201_v62  ;;  %7541 = vmatmul.mubr.bf16.vlgmr.msra.gmra.mrb[56].mxu0 %v7839_v20 }
 0x274   : > { %v6868_v0 = vadd.f32 %v8175_v55, %v7810_v54  ;;  %v10474_v5 = vadd.f32 %v8200_v61, %v6865_v60  ;;  %7590 = vmatmul.mubr.bf16.vlgmr.msra.gmra.mrb[56].mxu1 %v7841_v25  ;;  %7548 = vmatprep.mubr.bf16.mxu0 %v7872_v27 }
 0x275   : > { %7597 = vmatprep.mubr.bf16.mxu1 %v7874_v30 }
 0x276   : > { %v10478_v9 = vadd.f32 %v8203_v6, %v6868_v0 }
 0x27b   : > { %7549 = vmatmul.mubr.bf16.gmra.mrb[60].mxu0 %v7871_v33 }
 0x27c   : > { %7598 = vmatmul.mubr.bf16.gmra.mrb[60].mxu1 %v7873_v36 }
 0x286   : > { %v8220_v31 = vpop.f32.mrb[8].mxu0 }
 0x287   : > { %v8248_v32 = vpop.f32.mrb[8].mxu1  ;;  %v8221_v34 = vpop.f32.mrb[9].mxu0 }
 0x288   : > { %v8249_v35 = vpop.f32.mrb[9].mxu1  ;;  %v8222_v37 = vadd.f32 %v8221_v34, %v8220_v31  ;;  %v8223_v39 = vpop.f32.mrb[10].mxu0 }
 0x289   : > { %v8250_v38 = vadd.f32 %v8249_v35, %v8248_v32  ;;  %v8251_v40 = vpop.f32.mrb[10].mxu1  ;;  %v8224_v41 = vpop.f32.mrb[11].mxu0 }
 0x28a   : > { %v8252_v42 = vpop.f32.mrb[11].mxu1  ;;  %v6955_v43 = vadd.f32 %v8222_v37, %v6906_v2  ;;  %v8225_v44 = vadd.f32 %v8224_v41, %v8223_v39 }
 0x28b   : > { %v8253_v45 = vadd.f32 %v8252_v42, %v8251_v40 }
 0x28c   : > { %v7004_v46 = vadd.f32 %v8250_v38, %v6955_v43  ;;  %v6958_v47 = vadd.f32 %v8225_v44, %v6909_v4 }
 0x28e   : > { %v7007_v48 = vadd.f32 %v8253_v45, %v6958_v47  ;;  %v8226_v49 = vpop.f32.mrb[12].mxu0 }
 0x28f   : > { %v8227_v50 = vpop.f32.mrb[13].mxu0  ;;  %v8254_v55 = vpop.f32.mrb[12].mxu1 }
 0x290   : > { %v8228_v51 = vadd.f32 %v8227_v50, %v8226_v49  ;;  %v8229_v52 = vpop.f32.mrb[14].mxu0  ;;  %v8255_v57 = vpop.f32.mrb[13].mxu1 }
 0x291   : > { %v8230_v53 = vpop.f32.mrb[15].mxu0  ;;  %v8256_v59 = vadd.f32 %v8255_v57, %v8254_v55  ;;  %v8257_v60 = vpop.f32.mrb[14].mxu1 }
 0x292   : > { %v6963_v54 = vadd.f32 %v8228_v51, %v10474_v5  ;;  %v8231_v56 = vadd.f32 %v8230_v53, %v8229_v52  ;;  %v8258_v61 = vpop.f32.mrb[15].mxu1 }
 0x293   : > { %v8259_v63 = vadd.f32 %v8258_v61, %v8257_v60 }
 0x294   : > { %v6966_v58 = vadd.f32 %v8231_v56, %v10478_v9  ;;  %v7012_v62 = vadd.f32 %v8256_v59, %v6963_v54 }
 0x296   : > { %v7015_v0 = vadd.f32 %v8259_v63, %v6966_v58 }
 0x2a6   : > { %v8276_v1 = vpop.f32.mrb[16].mxu0 }
 0x2a7   : > { %v8304_v2 = vpop.f32.mrb[16].mxu1  ;;  %v8277_v3 = vpop.f32.mrb[17].mxu0 }
 0x2a8   : > { %v8278_v4 = vadd.f32 %v8277_v3, %v8276_v1  ;;  %v8305_v6 = vpop.f32.mrb[17].mxu1  ;;  %v8279_v7 = vpop.f32.mrb[18].mxu0 }
 0x2a9   : > { %v8306_v8 = vadd.f32 %v8305_v6, %v8304_v2  ;;  %v8307_v10 = vpop.f32.mrb[18].mxu1  ;;  %v8280_v5 = vpop.f32.mrb[19].mxu0 }
 0x2aa   : > { %v7053_v11 = vadd.f32 %v8278_v4, %v7004_v46  ;;  %v8281_v12 = vadd.f32 %v8280_v5, %v8279_v7  ;;  %v8308_v13 = vpop.f32.mrb[19].mxu1 }
 0x2ab   : > { %v8309_v14 = vadd.f32 %v8308_v13, %v8307_v10 }
 0x2ac   : > { %v7102_v9 = vadd.f32 %v8306_v8, %v7053_v11  ;;  %v7056_v15 = vadd.f32 %v8281_v12, %v7007_v48 }
 0x2ae   : > { %v7105_v16 = vadd.f32 %v8309_v14, %v7056_v15  ;;  %v8282_v17 = vpop.f32.mrb[20].mxu0 }
 0x2af   : > { %v8283_v18 = vpop.f32.mrb[21].mxu0  ;;  %v8310_v21 = vpop.f32.mrb[20].mxu1 }
 0x2b0   : > { %v8284_v19 = vadd.f32 %v8283_v18, %v8282_v17  ;;  %v8285_v20 = vpop.f32.mrb[22].mxu0  ;;  %v8311_v25 = vpop.f32.mrb[21].mxu1 }
 0x2b1   : > { %v8286_v22 = vpop.f32.mrb[23].mxu0  ;;  %v8312_v26 = vadd.f32 %v8311_v25, %v8310_v21  ;;  %v8313_v27 = vpop.f32.mrb[22].mxu1 }
 0x2b2   : > { %v7061_v23 = vadd.f32 %v8284_v19, %v7012_v62  ;;  %v8287_v24 = vadd.f32 %v8286_v22, %v8285_v20  ;;  %v8314_v29 = vpop.f32.mrb[23].mxu1 }
 0x2b3   : > { %v8315_v31 = vadd.f32 %v8314_v29, %v8313_v27 }
 0x2b4   : > { %v7064_v28 = vadd.f32 %v8287_v24, %v7015_v0  ;;  %v7110_v30 = vadd.f32 %v8312_v26, %v7061_v23 }
 0x2b6   : > { %v7113_v32 = vadd.f32 %v8315_v31, %v7064_v28 }
 0x2c6   : > { %v8332_v33 = vpop.f32.mrb[24].mxu0 }
 0x2c7   : > { %v8360_v34 = vpop.f32.mrb[24].mxu1  ;;  %v8333_v35 = vpop.f32.mrb[25].mxu0 }
 0x2c8   : > { %v8334_v36 = vadd.f32 %v8333_v35, %v8332_v33  ;;  %v8361_v37 = vpop.f32.mrb[25].mxu1  ;;  %v8335_v38 = vpop.f32.mrb[26].mxu0 }
 0x2c9   : > { %v8362_v39 = vadd.f32 %v8361_v37, %v8360_v34  ;;  %v8363_v40 = vpop.f32.mrb[26].mxu1  ;;  %v8336_v41 = vpop.f32.mrb[27].mxu0 }
 0x2ca   : > { %v7151_v42 = vadd.f32 %v8334_v36, %v7102_v9  ;;  %v8337_v43 = vadd.f32 %v8336_v41, %v8335_v38  ;;  %v8364_v44 = vpop.f32.mrb[27].mxu1 }
 0x2cb   : > { %v8365_v45 = vadd.f32 %v8364_v44, %v8363_v40 }
 0x2cc   : > { %v7200_v46 = vadd.f32 %v8362_v39, %v7151_v42  ;;  %v7154_v47 = vadd.f32 %v8337_v43, %v7105_v16 }
 0x2ce   : > { %v7203_v48 = vadd.f32 %v8365_v45, %v7154_v47  ;;  %v8338_v49 = vpop.f32.mrb[28].mxu0 }
 0x2cf   : > { %v8339_v50 = vpop.f32.mrb[29].mxu0  ;;  %v8366_v55 = vpop.f32.mrb[28].mxu1 }
 0x2d0   : > { %v8340_v51 = vadd.f32 %v8339_v50, %v8338_v49  ;;  %v8341_v52 = vpop.f32.mrb[30].mxu0  ;;  %v8367_v57 = vpop.f32.mrb[29].mxu1 }
 0x2d1   : > { %v8342_v53 = vpop.f32.mrb[31].mxu0  ;;  %v8368_v59 = vadd.f32 %v8367_v57, %v8366_v55  ;;  %v8369_v60 = vpop.f32.mrb[30].mxu1 }
 0x2d2   : > { %v7159_v54 = vadd.f32 %v8340_v51, %v7110_v30  ;;  %v8343_v56 = vadd.f32 %v8342_v53, %v8341_v52  ;;  %v8370_v61 = vpop.f32.mrb[31].mxu1 }
 0x2d3   : > { %v8371_v63 = vadd.f32 %v8370_v61, %v8369_v60 }
 0x2d4   : > { %v7162_v58 = vadd.f32 %v8343_v56, %v7113_v32  ;;  %v7208_v62 = vadd.f32 %v8368_v59, %v7159_v54 }
 0x2d6   : > { %v7211_v0 = vadd.f32 %v8371_v63, %v7162_v58 }
 0x2e6   : > { %v8388_v1 = vpop.f32.mrb[32].mxu0 }
 0x2e7   : > { %v8416_v2 = vpop.f32.mrb[32].mxu1  ;;  %v8389_v3 = vpop.f32.mrb[33].mxu0 }
 0x2e8   : > { %v8417_v4 = vpop.f32.mrb[33].mxu1  ;;  %v8390_v6 = vadd.f32 %v8389_v3, %v8388_v1  ;;  %v8391_v8 = vpop.f32.mrb[34].mxu0 }
 0x2e9   : > { %v8418_v7 = vadd.f32 %v8417_v4, %v8416_v2  ;;  %v8419_v10 = vpop.f32.mrb[34].mxu1  ;;  %v8392_v5 = vpop.f32.mrb[35].mxu0 }
 0x2ea   : > { %v8420_v11 = vpop.f32.mrb[35].mxu1  ;;  %v7249_v12 = vadd.f32 %v8390_v6, %v7200_v46  ;;  %v8393_v13 = vadd.f32 %v8392_v5, %v8391_v8 }
 0x2eb   : > { %v8421_v14 = vadd.f32 %v8420_v11, %v8419_v10 }
 0x2ec   : > { %v7298_v9 = vadd.f32 %v8418_v7, %v7249_v12  ;;  %v7252_v15 = vadd.f32 %v8393_v13, %v7203_v48 }
 0x2ee   : > { %v7301_v16 = vadd.f32 %v8421_v14, %v7252_v15  ;;  %v8394_v17 = vpop.f32.mrb[36].mxu0 }
 0x2ef   : > { %v8395_v18 = vpop.f32.mrb[37].mxu0  ;;  %v8422_v23 = vpop.f32.mrb[36].mxu1 }
 0x2f0   : > { %v8396_v19 = vadd.f32 %v8395_v18, %v8394_v17  ;;  %v8397_v20 = vpop.f32.mrb[38].mxu0  ;;  %v8423_v25 = vpop.f32.mrb[37].mxu1 }
 0x2f1   : > { %v8398_v21 = vpop.f32.mrb[39].mxu0  ;;  %v8424_v27 = vadd.f32 %v8423_v25, %v8422_v23  ;;  %v8425_v28 = vpop.f32.mrb[38].mxu1 }
 0x2f2   : > { %v7257_v22 = vadd.f32 %v8396_v19, %v7208_v62  ;;  %v8399_v24 = vadd.f32 %v8398_v21, %v8397_v20  ;;  %v8426_v29 = vpop.f32.mrb[39].mxu1 }
 0x2f3   : > { %v8427_v31 = vadd.f32 %v8426_v29, %v8425_v28 }
 0x2f4   : > { %v7260_v26 = vadd.f32 %v8399_v24, %v7211_v0  ;;  %v7306_v30 = vadd.f32 %v8424_v27, %v7257_v22 }
 0x2f6   : > { %v7309_v32 = vadd.f32 %v8427_v31, %v7260_v26 }
 0x306   : > { %v8444_v33 = vpop.f32.mrb[40].mxu0 }
 0x307   : > { %v8472_v34 = vpop.f32.mrb[40].mxu1  ;;  %v8445_v35 = vpop.f32.mrb[41].mxu0 }
 0x308   : > { %v8446_v36 = vadd.f32 %v8445_v35, %v8444_v33  ;;  %v8473_v37 = vpop.f32.mrb[41].mxu1  ;;  %v8447_v38 = vpop.f32.mrb[42].mxu0 }
 0x309   : > { %v8474_v39 = vadd.f32 %v8473_v37, %v8472_v34  ;;  %v8475_v40 = vpop.f32.mrb[42].mxu1  ;;  %v8448_v41 = vpop.f32.mrb[43].mxu0 }
 0x30a   : > { %v7347_v42 = vadd.f32 %v8446_v36, %v7298_v9  ;;  %v8449_v43 = vadd.f32 %v8448_v41, %v8447_v38  ;;  %v8476_v44 = vpop.f32.mrb[43].mxu1 }
 0x30b   : > { %v8477_v45 = vadd.f32 %v8476_v44, %v8475_v40 }
 0x30c   : > { %v7396_v46 = vadd.f32 %v8474_v39, %v7347_v42  ;;  %v7350_v47 = vadd.f32 %v8449_v43, %v7301_v16 }
 0x30e   : > { %v7399_v48 = vadd.f32 %v8477_v45, %v7350_v47  ;;  %v8450_v49 = vpop.f32.mrb[44].mxu0 }
 0x30f   : > { %v8451_v50 = vpop.f32.mrb[45].mxu0  ;;  %v8478_v53 = vpop.f32.mrb[44].mxu1 }
 0x310   : > { %v8452_v51 = vadd.f32 %v8451_v50, %v8450_v49  ;;  %v8453_v52 = vpop.f32.mrb[46].mxu0  ;;  %v8479_v57 = vpop.f32.mrb[45].mxu1 }
 0x311   : > { %v8454_v54 = vpop.f32.mrb[47].mxu0  ;;  %v8480_v58 = vadd.f32 %v8479_v57, %v8478_v53  ;;  %v8481_v59 = vpop.f32.mrb[46].mxu1 }
 0x312   : > { %v7355_v55 = vadd.f32 %v8452_v51, %v7306_v30  ;;  %v8455_v56 = vadd.f32 %v8454_v54, %v8453_v52  ;;  %v8482_v61 = vpop.f32.mrb[47].mxu1 }
 0x313   : > { %v8483_v63 = vadd.f32 %v8482_v61, %v8481_v59 }
 0x314   : > { %v7358_v60 = vadd.f32 %v8455_v56, %v7309_v32  ;;  %v7404_v62 = vadd.f32 %v8480_v58, %v7355_v55 }
 0x316   : > { %v7407_v0 = vadd.f32 %v8483_v63, %v7358_v60 }
 0x326   : > { %v8500_v1 = vpop.f32.mrb[48].mxu0 }
 0x327   : > { %v8528_v2 = vpop.f32.mrb[48].mxu1  ;;  %v8501_v3 = vpop.f32.mrb[49].mxu0 }
 0x328   : > { %v8502_v4 = vadd.f32 %v8501_v3, %v8500_v1  ;;  %v8529_v6 = vpop.f32.mrb[49].mxu1  ;;  %v8503_v7 = vpop.f32.mrb[50].mxu0 }
 0x329   : > { %v8530_v8 = vadd.f32 %v8529_v6, %v8528_v2  ;;  %v8531_v10 = vpop.f32.mrb[50].mxu1  ;;  %v8504_v5 = vpop.f32.mrb[51].mxu0 }
 0x32a   : > { %v7445_v11 = vadd.f32 %v8502_v4, %v7396_v46  ;;  %v8505_v12 = vadd.f32 %v8504_v5, %v8503_v7  ;;  %v8532_v13 = vpop.f32.mrb[51].mxu1 }
 0x32b   : > { %v8533_v14 = vadd.f32 %v8532_v13, %v8531_v10 }
 0x32c   : > { %v7494_v9 = vadd.f32 %v8530_v8, %v7445_v11  ;;  %v7448_v15 = vadd.f32 %v8505_v12, %v7399_v48 }
 0x32e   : > { %v7497_v16 = vadd.f32 %v8533_v14, %v7448_v15  ;;  %v8506_v17 = vpop.f32.mrb[52].mxu0 }
 0x32f   : > { %v8507_v18 = vpop.f32.mrb[53].mxu0  ;;  %v8534_v23 = vpop.f32.mrb[52].mxu1 }
 0x330   : > { %v8508_v19 = vadd.f32 %v8507_v18, %v8506_v17  ;;  %v8509_v20 = vpop.f32.mrb[54].mxu0  ;;  %v8535_v25 = vpop.f32.mrb[53].mxu1 }
 0x331   : > { %v8510_v21 = vpop.f32.mrb[55].mxu0  ;;  %v8536_v27 = vadd.f32 %v8535_v25, %v8534_v23  ;;  %v8537_v28 = vpop.f32.mrb[54].mxu1 }
 0x332   : > { %v7453_v22 = vadd.f32 %v8508_v19, %v7404_v62  ;;  %v8511_v24 = vadd.f32 %v8510_v21, %v8509_v20  ;;  %v8538_v29 = vpop.f32.mrb[55].mxu1 }
 0x333   : > { %v8539_v31 = vadd.f32 %v8538_v29, %v8537_v28 }
 0x334   : > { %v7456_v26 = vadd.f32 %v8511_v24, %v7407_v0  ;;  %v7502_v30 = vadd.f32 %v8536_v27, %v7453_v22 }
 0x336   : > { %v7505_v32 = vadd.f32 %v8539_v31, %v7456_v26 }
 0x346   : > { %v8556_v33 = vpop.f32.mrb[56].mxu0 }
 0x347   : > { %v8584_v34 = vpop.f32.mrb[56].mxu1  ;;  %v8557_v35 = vpop.f32.mrb[57].mxu0 }
 0x348   : > { %v8558_v36 = vadd.f32 %v8557_v35, %v8556_v33  ;;  %v8585_v37 = vpop.f32.mrb[57].mxu1  ;;  %v8559_v38 = vpop.f32.mrb[58].mxu0 }
 0x349   : > { %v8586_v39 = vadd.f32 %v8585_v37, %v8584_v34  ;;  %v8587_v40 = vpop.f32.mrb[58].mxu1  ;;  %v8560_v41 = vpop.f32.mrb[59].mxu0 }
 0x34a   : > { %v7543_v42 = vadd.f32 %v8558_v36, %v7494_v9  ;;  %v8561_v43 = vadd.f32 %v8560_v41, %v8559_v38  ;;  %v8588_v44 = vpop.f32.mrb[59].mxu1 }
 0x34b   : > { %v8589_v45 = vadd.f32 %v8588_v44, %v8587_v40 }
 0x34c   : > { %v7592_v46 = vadd.f32 %v8586_v39, %v7543_v42  ;;  %v7546_v47 = vadd.f32 %v8561_v43, %v7497_v16 }
 0x34e   : > { %v7610_v48 = vmul.f32 0.2, %v7592_v46  ;;  %v7595_v49 = vadd.f32 %v8589_v45, %v7546_v47  ;;  %v8562_v50 = vpop.f32.mrb[60].mxu0  ;;  %vm7606_vm0 = vcmp.ge.f32.partialorder %v7592_v46, 0.0 }
 0x34f   : > { %v8590_v51 = vpop.f32.mrb[60].mxu1  ;;  %v8563_v52 = vpop.f32.mrb[61].mxu0 }
 0x350   : > { %vm7607_vm1 = vcmp.ge.f32.partialorder %v7595_v49, 0.0  ;;  %v7611_v53 = vmul.f32 0.2, %v7595_v49  ;;  %v8564_v54 = vadd.f32 %v8563_v52, %v8562_v50  ;;  %v8591_v55 = vpop.f32.mrb[61].mxu1  ;;  %v8565_v56 = vpop.f32.mrb[62].mxu0  ;;  %v7614_v60 = vsel %vm7606_vm0, %v7592_v46, %v7610_v48 }
 0x351   : > { %v8592_v57 = vadd.f32 %v8591_v55, %v8590_v51  ;;  %v8593_v58 = vpop.f32.mrb[62].mxu1  ;;  %v8566_v59 = vpop.f32.mrb[63].mxu0 }
 0x352   : > { %v7615_v61 = vsel %vm7607_vm1, %v7595_v49, %v7611_v53  ;;  %v7551_v62 = vadd.f32 %v8564_v54, %v7502_v30  ;;  %v8567_v63 = vadd.f32 %v8566_v59, %v8565_v56  ;;  %v8594_v0 = vpop.f32.mrb[63].mxu1 }
 0x353   : > { %v8146_v1 = vpack.c.bf16 %v7615_v61, %v7614_v60  ;;  %v8595_v2 = vadd.f32 %v8594_v0, %v8593_v58 }
 0x354   : > { %v7600_v3 = vadd.f32 %v8592_v57, %v7551_v62  ;;  %v7554_v4 = vadd.f32 %v8567_v63, %v7505_v32 }
 0x355   : > { %8147 = vst [vmem:[%s4370_s12] sm:$0xff] %v8146_v1  }
 0x356   : > { %vm7608_vm2 = vcmp.ge.f32.partialorder %v7600_v3, 0.0  ;;  %v7612_v6 = vmul.f32 0.2, %v7600_v3  ;;  %v7603_v7 = vadd.f32 %v8595_v2, %v7554_v4 }
 0x357   : > { %7644 = sbr.rel (!%p8987_p6) target bundleno = 870 (0x366), region = 88 }
 0x358   : > { %v7616_v8 = vsel %vm7608_vm2, %v7600_v3, %v7612_v6  ;;  %vm7609_vm3 = vcmp.ge.f32.partialorder %v7603_v7, 0.0  ;;  %v7613_v10 = vmul.f32 0.2, %v7603_v7 }
 0x359   : > { %v8141_v5 = vpack.c.bf16 %v7616_v8, %v7616_v8 }
 0x35a   : > { %v7617_v11 = vsel %vm7609_vm3, %v7603_v7, %v7613_v10 }
 0x35b   : > { %7636 = vst [vmem:[%s4370_s12 + $0x8] sm:$0xf] %v8141_v5  ;;  %v8142_v12 = vpack.c.bf16 %v7617_v11, %v7617_v11 }
 0x35c   : > { %v7665_v13 = vld [vmem:[%s4370_s12] sm:$0xf] (%p8987_p6)  ;;  %v7667_v14 = vld [vmem:[%s4370_s12 + $0x4] sm:$0xf] (%p8987_p6) }
 0x35d   : > { %7637 = vst [vmem:[%s4370_s12 + $0xc] sm:$0x7] %v8142_v12  ;;  %7666 = vst [vmem:[%s7649_s29] sm:$0xf] (%p8987_p6), %v7665_v13 }
 0x35e   : > { %7668 = vst [vmem:[%s7649_s29 + $0x10] sm:$0xf] %v7667_v14 }
 0x362   : > { %v7669_v9 = vld [vmem:[%s4370_s12 + $0x8] sm:$0xf] }
 0x363   : > { %7670 = vst [vmem:[%s7649_s29 + $0x20] sm:$0xf] %v7669_v9 }
 0x364   : > { %v7671_v15 = vld [vmem:[%s4370_s12 + $0xc] sm:$0xf] }
 0x365   : > { %7672 = vst [vmem:[%s7649_s29 + $0x30] sm:$0xf] %v7671_v15 }
 0x366 PF: > { %s13_s16 = sadd.s32 1, %s8930_s16   ;;  %s10541_s12 = smov %s8918_s13 }
 0x367   : > { %p10_p12 = scmp.ge.s32.totalorder %s13_s16, 6   ;;  %s10542_s13 = smov %s8992_s22 }
 0x368   : > { %s10543_s14 = smov %s8926_s15  ;;  %s10544_s15 = smov %s10546_s17 }
 0x369   :  { %12 = sbr.rel (!%p10_p12) target bundleno = 3 (0x3), region = 170 }

// kernel: discriminator_forward.9
= control target key start
LH: loop header
LB: loop body
LE: loop exit
PB: predicated region body
PF: predicated region fallthrough
CT: control target
= control target key end

     0   :  { %s8014_s14 = smov 0   ;;  %s8016_s15 = smov 0   ;;  %s9704_s0 = inlined_call_operand.vmem [shape: bf16[32,8192], index: 0, kind: input, shape index: {}]   ;;  %s9705_s1 = inlined_call_operand.vmem [shape: bf16[8192,1], index: 1, kind: input, shape index: {}]   ;;  %s9706_s2 = inlined_call_operand.<no memory space> [shape: f32[1,1], index: 2, kind: input, shape index: {}]   ;;  %s9707_s3 = inlined_call_operand.vmem [shape: f32[32,1], index: 3, kind: output, shape index: {}]  }
   0x1   :  { %v8_v0 = vstv %s9706_s2  ;;  %s8018_s16 = smov 0  }
   0x2   :  { %9 = vst [vmem:[#allocation2] sm:$0x1] %v8_v0 }
   0x3 LB: > { %s24_s2 = sadd.s32 1, %s7985_s15  ;;  %p6141_p0 = scmp.ge.s32.totalorder %s7989_s16, 1  ;;  %s7989_s16 = sphi %s8018_s16, %s15_s16   ;;  %s7985_s15 = sphi %s8016_s15, %s9709_s15   ;;  %s7981_s14 = sphi %s8014_s14, %s9708_s14  }
   0x4   : > { %p25_p1 = scmp.ge.s32.totalorder %s24_s2, 2  ;;  %p172_p2 = scmp.lt.s32.totalorder %s7989_s16, 3 }
   0x6   : > { %s9711_s2 = smov (%p25_p1, %s24_s2), 0  ;;  %p173_p3 = pnand %p6141_p0, %p172_p2 }
   0x7   : > { %v7455_v1 = vld [vmem:[%s9705_s1 + $0x40] sm:$0xff] (!%p173_p3)   ;;  %v7459_v5 = vld [vmem:[%s9705_s1 + $0x48] sm:$0xff] (!%p173_p3)   ;;  %v7463_v9 = vld [vmem:[%s9705_s1 + $0x50] sm:$0xff] (!%p173_p3)   ;;  %s6142_s25 = sshll.u32 (!%p173_p3), %s7981_s14, 1  ;;  %vm6030_vm0 = vcmask (!%p173_p3), 7168  }
   0x8   : > { %176 = sbr.rel (%p173_p3) target bundleno = 744 (0x2e8), region = 32  ;;  %v7456_v2 = vld [vmem:[%s9705_s1 + $0xc0] sm:$0xff] (!%p173_p3)   ;;  %6727 = vmatprep.subr.bf16.mxu0 (!%p173_p3), %v7455_v1  ;;  %v7460_v6 = vld [vmem:[%s9705_s1 + $0xc8] sm:$0xff] (!%p173_p3)   ;;  %v7464_v10 = vld [vmem:[%s9705_s1 + $0xd0] sm:$0xff] (!%p173_p3)   ;;  %p208_p4 = scmp.lt.s32.totalorder (!%p173_p3), %s6142_s25, 3 }
   0x9   : > { %v7457_v3 = vld [vmem:[%s9705_s1] sm:$0xff] (!%p173_p3)   ;;  %6749 = vmatprep.subr.bf16.mxu1 (!%p173_p3), %v7456_v2  ;;  %v7461_v7 = vld [vmem:[%s9705_s1 + $0x8] sm:$0xff] (!%p173_p3)   ;;  %v7465_v11 = vld [vmem:[%s9705_s1 + $0x10] sm:$0xff] (!%p173_p3)  }
   0xa   : > { %v7458_v4 = vld [vmem:[%s9705_s1 + $0x80] sm:$0xff] (!%p173_p3)   ;;  %6728 = vmatpush3.bf16.msra.mxu0 (!%p173_p3), %v7457_v3  ;;  %v7462_v8 = vld [vmem:[%s9705_s1 + $0x88] sm:$0xff] (!%p173_p3)   ;;  %v7466_v12 = vld [vmem:[%s9705_s1 + $0x90] sm:$0xff] (!%p173_p3)  }
   0xb   : > { %6750 = vmatpush3.bf16.msra.mxu1 (!%p173_p3), %v7458_v4  ;;  %6729 = vmatprep.subr.bf16.mxu0 (!%p173_p3), %v7459_v5  ;;  %v7467_v13 = vld [vmem:[%s9705_s1 + $0x58] sm:$0xff] (!%p173_p3)   ;;  %v7471_v17 = vld [vmem:[%s9705_s1 + $0x60] sm:$0xff] (!%p173_p3)   ;;  %v7475_v21 = vld [vmem:[%s9705_s1 + $0x68] sm:$0xff] (!%p173_p3)  }
   0xc   : > { %6751 = vmatprep.subr.bf16.mxu1 (!%p173_p3), %v7460_v6  ;;  %v7468_v14 = vld [vmem:[%s9705_s1 + $0xd8] sm:$0xff] (!%p173_p3)   ;;  %v7472_v18 = vld [vmem:[%s9705_s1 + $0xe0] sm:$0xff] (!%p173_p3)   ;;  %v7476_v22 = vld [vmem:[%s9705_s1 + $0xe8] sm:$0xff] (!%p173_p3)  }
   0xd   : > { %v7469_v15 = vld [vmem:[%s9705_s1 + $0x18] sm:$0xff] (!%p173_p3)   ;;  %v7473_v19 = vld [vmem:[%s9705_s1 + $0x20] sm:$0xff] (!%p173_p3)   ;;  %v7477_v23 = vld [vmem:[%s9705_s1 + $0x28] sm:$0xff] (!%p173_p3)  }
   0xe   : > { %6730 = vmatpush3.bf16.msra.mxu0 (!%p173_p3), %v7461_v7  ;;  %v7470_v16 = vld [vmem:[%s9705_s1 + $0x98] sm:$0xff] (!%p173_p3)   ;;  %v7474_v20 = vld [vmem:[%s9705_s1 + $0xa0] sm:$0xff] (!%p173_p3)   ;;  %v7478_v24 = vld [vmem:[%s9705_s1 + $0xa8] sm:$0xff] (!%p173_p3)  }
   0xf   : > { %6752 = vmatpush3.bf16.msra.mxu1 %v7462_v8  ;;  %6731 = vmatprep.subr.bf16.mxu0 %v7463_v9  ;;  %s9713_s25 = smov (!%p208_p4, %s6142_s25), 3  ;;  %v7479_v25 = vld [vmem:[%s9705_s1 + $0x70] sm:$0xff]   ;;  %v7483_v29 = vld [vmem:[%s9705_s1 + $0x78] sm:$0xff]   ;;  %v7487_v41 = vld [vmem:[%s9705_s1 + $0x140] sm:$0xff]  }
  0x10   : > { %6753 = vmatprep.subr.bf16.mxu1 %v7464_v10  ;;  %v7480_v26 = vld [vmem:[%s9705_s1 + $0xf0] sm:$0xff]   ;;  %s6726_s23 = sshll.u32 %s9713_s25, 8  ;;  %v7484_v30 = vld [vmem:[%s9705_s1 + $0xf8] sm:$0xff]   ;;  %v7488_v42 = vld [vmem:[%s9705_s1 + $0x1c0] sm:$0xff]  }
  0x11   : > { %v7481_v27 = vld [vmem:[%s9705_s1 + $0x30] sm:$0xff]   ;;  %s8131_s6 = scalar_lea.vmem %s9704_s0, %s6726_s23  ;;  %v7485_v31 = vld [vmem:[%s9705_s1 + $0x38] sm:$0xff]   ;;  %v7489_v43 = vld [vmem:[%s9705_s1 + $0x100] sm:$0xff]  }
  0x12   : > { %6732 = vmatpush3.bf16.msra.mxu0 %v7465_v11  ;;  %v7482_v28 = vld [vmem:[%s9705_s1 + $0xb0] sm:$0xff]   ;;  %v7486_v32 = vld [vmem:[%s9705_s1 + $0xb8] sm:$0xff]   ;;  %v231_v33 = vld [vmem:[%s8131_s6] sm:$0xff] }
  0x13   : > { %6754 = vmatpush3.bf16.msra.mxu1 %v7466_v12  ;;  %6733 = vmatprep.subr.bf16.mxu0 %v7467_v13  ;;  %v263_v34 = vld [vmem:[%s8131_s6 + $0x100] sm:$0xff]  ;;  %v232_v35 = vld [vmem:[%s8131_s6 + $0x8] sm:$0xff]  ;;  %v7495_v49 = vld [vmem:[%s9705_s1 + $0x150] sm:$0xff]  }
  0x14   : > { %6755 = vmatprep.subr.bf16.mxu1 %v7468_v14  ;;  %v6148_v36 = vcombine.low %v231_v33, %v263_v34  ;;  %v6149_v37 = vcombine.high %v231_v33, %v263_v34  ;;  %v264_v38 = vld [vmem:[%s8131_s6 + $0x108] sm:$0xff]  ;;  %v7490_v44 = vld [vmem:[%s9705_s1 + $0x180] sm:$0xff]   ;;  %v7496_v50 = vld [vmem:[%s9705_s1 + $0x1d0] sm:$0xff]  }
  0x15   : > { %v6150_v39 = vcombine.low %v232_v35, %v264_v38  ;;  %v6151_v40 = vcombine.high %v232_v35, %v264_v38  ;;  %v7491_v45 = vld [vmem:[%s9705_s1 + $0x148] sm:$0xff]   ;;  %v7497_v51 = vld [vmem:[%s9705_s1 + $0x110] sm:$0xff]   ;;  %v7499_v53 = vld [vmem:[%s9705_s1 + $0x158] sm:$0xff]  }
  0x16   : > { %6734 = vmatpush3.bf16.msra.mxu0 %v7469_v15  ;;  %4750 = vmatprep.mubr.bf16.mxu0 %v6149_v37  ;;  %v7492_v46 = vld [vmem:[%s9705_s1 + $0x1c8] sm:$0xff]   ;;  %v7498_v52 = vld [vmem:[%s9705_s1 + $0x190] sm:$0xff]   ;;  %v7500_v54 = vld [vmem:[%s9705_s1 + $0x1d8] sm:$0xff]  }
  0x17   : > { %6756 = vmatpush3.bf16.msra.mxu1 %v7470_v16  ;;  %6735 = vmatprep.subr.bf16.mxu0 %v7471_v17  ;;  %v7493_v47 = vld [vmem:[%s9705_s1 + $0x108] sm:$0xff]   ;;  %v7501_v55 = vld [vmem:[%s9705_s1 + $0x118] sm:$0xff]   ;;  %v7503_v57 = vld [vmem:[%s9705_s1 + $0x160] sm:$0xff]  }
  0x18   : > { %6757 = vmatprep.subr.bf16.mxu1 %v7472_v18  ;;  %4791 = vmatprep.mubr.bf16.mxu1 %v6151_v40  ;;  %v7494_v48 = vld [vmem:[%s9705_s1 + $0x188] sm:$0xff]   ;;  %v7502_v56 = vld [vmem:[%s9705_s1 + $0x198] sm:$0xff]   ;;  %v7504_v58 = vld [vmem:[%s9705_s1 + $0x1e0] sm:$0xff]  }
  0x19   : > { %v7505_v59 = vld [vmem:[%s9705_s1 + $0x120] sm:$0xff]   ;;  %v7507_v61 = vld [vmem:[%s9705_s1 + $0x168] sm:$0xff]   ;;  %v7511_v1 = vld [vmem:[%s9705_s1 + $0x170] sm:$0xff]  }
  0x1a   : > { %6736 = vmatpush3.bf16.msra.mxu0 %v7473_v19  ;;  %v7506_v60 = vld [vmem:[%s9705_s1 + $0x1a0] sm:$0xff]   ;;  %v7508_v62 = vld [vmem:[%s9705_s1 + $0x1e8] sm:$0xff]   ;;  %v7512_v2 = vld [vmem:[%s9705_s1 + $0x1f0] sm:$0xff]  }
  0x1b   : > { %6758 = vmatpush3.bf16.msra.mxu1 %v7474_v20  ;;  %6737 = vmatprep.subr.bf16.mxu0 %v7475_v21  ;;  %v7509_v63 = vld [vmem:[%s9705_s1 + $0x128] sm:$0xff]   ;;  %v7513_v3 = vld [vmem:[%s9705_s1 + $0x130] sm:$0xff]   ;;  %v7515_v5 = vld [vmem:[%s9705_s1 + $0x178] sm:$0xff]  }
  0x1c   : > { %6759 = vmatprep.subr.bf16.mxu1 %v7476_v22  ;;  %v7510_v0 = vld [vmem:[%s9705_s1 + $0x1a8] sm:$0xff]   ;;  %v7514_v4 = vld [vmem:[%s9705_s1 + $0x1b0] sm:$0xff]   ;;  %v7516_v6 = vld [vmem:[%s9705_s1 + $0x1f8] sm:$0xff]  }
  0x1d   : > { %v7517_v7 = vld [vmem:[%s9705_s1 + $0x138] sm:$0xff]   ;;  %v233_v9 = vld [vmem:[%s8131_s6 + $0x10] sm:$0xff]  ;;  %v7519_v17 = vld [vmem:[%s9705_s1 + $0x240] sm:$0xff]  }
  0x1e   : > { %6738 = vmatpush3.bf16.msra.mxu0 %v7477_v23  ;;  %v7518_v8 = vld [vmem:[%s9705_s1 + $0x1b8] sm:$0xff]   ;;  %v265_v10 = vld [vmem:[%s8131_s6 + $0x110] sm:$0xff]  ;;  %v7520_v18 = vld [vmem:[%s9705_s1 + $0x2c0] sm:$0xff]  }
  0x1f   : > { %6760 = vmatpush3.bf16.msra.mxu1 %v7478_v24  ;;  %6739 = vmatprep.subr.bf16.mxu0 %v7479_v25  ;;  %v6152_v11 = vcombine.low %v233_v9, %v265_v10  ;;  %v6153_v12 = vcombine.high %v233_v9, %v265_v10  ;;  %v234_v13 = vld [vmem:[%s8131_s6 + $0x18] sm:$0xff]  ;;  %v7521_v19 = vld [vmem:[%s9705_s1 + $0x200] sm:$0xff]   ;;  %v7523_v21 = vld [vmem:[%s9705_s1 + $0x248] sm:$0xff]  }
  0x20   : > { %6761 = vmatprep.subr.bf16.mxu1 %v7480_v26  ;;  %v266_v14 = vld [vmem:[%s8131_s6 + $0x118] sm:$0xff]  ;;  %v7522_v20 = vld [vmem:[%s9705_s1 + $0x280] sm:$0xff]   ;;  %v7524_v22 = vld [vmem:[%s9705_s1 + $0x2c8] sm:$0xff]  }
  0x21   : > { %v6154_v15 = vcombine.low %v234_v13, %v266_v14  ;;  %v6155_v16 = vcombine.high %v234_v13, %v266_v14  ;;  %v7525_v23 = vld [vmem:[%s9705_s1 + $0x208] sm:$0xff]   ;;  %v7527_v25 = vld [vmem:[%s9705_s1 + $0x250] sm:$0xff]   ;;  %v7535_v33 = vld [vmem:[%s9705_s1 + $0x260] sm:$0xff]  }
  0x22   : > { %6740 = vmatpush3.bf16.msra.mxu0 %v7481_v27  ;;  %v7526_v24 = vld [vmem:[%s9705_s1 + $0x288] sm:$0xff]   ;;  %v7528_v26 = vld [vmem:[%s9705_s1 + $0x2d0] sm:$0xff]   ;;  %v7536_v34 = vld [vmem:[%s9705_s1 + $0x2e0] sm:$0xff]  }
  0x23   : > { %6762 = vmatpush3.bf16.msra.mxu1 %v7482_v28  ;;  %6741 = vmatprep.subr.bf16.mxu0 %v7483_v29  ;;  %v7529_v27 = vld [vmem:[%s9705_s1 + $0x210] sm:$0xff]   ;;  %v7531_v29 = vld [vmem:[%s9705_s1 + $0x258] sm:$0xff]   ;;  %v7537_v35 = vld [vmem:[%s9705_s1 + $0x220] sm:$0xff]  }
  0x24   : > { %6763 = vmatprep.subr.bf16.mxu1 %v7484_v30  ;;  %v7530_v28 = vld [vmem:[%s9705_s1 + $0x290] sm:$0xff]   ;;  %v7532_v30 = vld [vmem:[%s9705_s1 + $0x2d8] sm:$0xff]   ;;  %v7539_v37 = vld [vmem:[%s9705_s1 + $0x268] sm:$0xff]  }
  0x25   : > { %v7540_v38 = vld [vmem:[%s9705_s1 + $0x2e8] sm:$0xff]   ;;  %v7567_v9 = vld [vmem:[%s9705_s1 + $0x360] sm:$0xff]  }
  0x26   : > { %6742 = vmatpush3.bf16.msra.mxu0 %v7485_v31  ;;  %v7533_v31 = vld [vmem:[%s9705_s1 + $0x218] sm:$0xff]   ;;  %v7542_v40 = vld [vmem:[%s9705_s1 + $0x2a8] sm:$0xff]   ;;  %v7568_v10 = vld [vmem:[%s9705_s1 + $0x3e0] sm:$0xff]  }
  0x27   : > { %6764 = vmatpush3.bf16.msra.mxu1 %v7486_v32  ;;  %6771 = vmatprep.subr.bf16.mxu0 %v7487_v41  ;;  %v7534_v32 = vld [vmem:[%s9705_s1 + $0x298] sm:$0xff]   ;;  %v7543_v41 = vld [vmem:[%s9705_s1 + $0x270] sm:$0xff]   ;;  %v7571_v13 = vld [vmem:[%s9705_s1 + $0x368] sm:$0xff]  }
  0x28   : > { %6793 = vmatprep.subr.bf16.mxu1 %v7488_v42  ;;  %v7544_v42 = vld [vmem:[%s9705_s1 + $0x2f0] sm:$0xff]   ;;  %v7572_v14 = vld [vmem:[%s9705_s1 + $0x3e8] sm:$0xff]  }
  0x29   : > { %4751 = vmatmul.mubr.bf16.vlgmr.msra.gmra.mrb[0].mxu0 %v6148_v36  ;;  %v7538_v36 = vld [vmem:[%s9705_s1 + $0x2a0] sm:$0xff]  }
  0x2a   : > { %4792 = vmatmul.mubr.bf16.vlgmr.msra.gmra.mrb[0].mxu1 %v6150_v39  ;;  %6772 = vmatpush3.bf16.msra.mxu0 %v7489_v43  ;;  %v7541_v39 = vld [vmem:[%s9705_s1 + $0x228] sm:$0xff]   ;;  %v7545_v43 = vld [vmem:[%s9705_s1 + $0x230] sm:$0xff]  }
  0x2b   : > { %6794 = vmatpush3.bf16.msra.mxu1 %v7490_v44  ;;  %6773 = vmatprep.subr.bf16.mxu0 %v7491_v45  ;;  %v7546_v44 = vld [vmem:[%s9705_s1 + $0x2b0] sm:$0xff]   ;;  %v7547_v45 = vld [vmem:[%s9705_s1 + $0x278] sm:$0xff]  }
  0x2c   : > { %6795 = vmatprep.subr.bf16.mxu1 %v7492_v46  ;;  %4832 = vmatprep.mubr.bf16.mxu0 %v6153_v12  ;;  %v7548_v46 = vld [vmem:[%s9705_s1 + $0x2f8] sm:$0xff]   ;;  %v7570_v12 = vld [vmem:[%s9705_s1 + $0x3a0] sm:$0xff]  }
  0x2d   : > { %4873 = vmatprep.mubr.bf16.mxu1 %v6155_v16  ;;  %v7574_v16 = vld [vmem:[%s9705_s1 + $0x3a8] sm:$0xff]  }
  0x2e   : > { %6774 = vmatpush3.bf16.msra.mxu0 %v7493_v47  ;;  %v7549_v47 = vld [vmem:[%s9705_s1 + $0x238] sm:$0xff]  }
  0x2f   : > { %6796 = vmatpush3.bf16.msra.mxu1 %v7494_v48  ;;  %6775 = vmatprep.subr.bf16.mxu0 %v7495_v49  ;;  %v7550_v48 = vld [vmem:[%s9705_s1 + $0x2b8] sm:$0xff]   ;;  %v235_v49 = vld [vmem:[%s8131_s6 + $0x20] sm:$0xff] }
  0x30   : > { %6797 = vmatprep.subr.bf16.mxu1 %v7496_v50  ;;  %v267_v50 = vld [vmem:[%s8131_s6 + $0x120] sm:$0xff] }
  0x32   : > { %6776 = vmatpush3.bf16.msra.mxu0 %v7497_v51  ;;  %v236_v51 = vld [vmem:[%s8131_s6 + $0x28] sm:$0xff] }
  0x33   : > { %6798 = vmatpush3.bf16.msra.mxu1 %v7498_v52  ;;  %6777 = vmatprep.subr.bf16.mxu0 %v7499_v53  ;;  %v268_v52 = vld [vmem:[%s8131_s6 + $0x128] sm:$0xff]  ;;  %v6156_v53 = vcombine.low %v235_v49, %v267_v50 }
  0x34   : > { %6799 = vmatprep.subr.bf16.mxu1 %v7500_v54  ;;  %v6157_v54 = vcombine.high %v235_v49, %v267_v50  ;;  %v7599_v49 = vld [vmem:[%s9705_s1 + $0x460] sm:$0xff]  }
  0x35   : > { %v7600_v50 = vld [vmem:[%s9705_s1 + $0x4e0] sm:$0xff]  }
  0x36   : > { %6778 = vmatpush3.bf16.msra.mxu0 %v7501_v55  ;;  %v6158_v55 = vcombine.low %v236_v51, %v268_v52 }
  0x37   : > { %6800 = vmatpush3.bf16.msra.mxu1 %v7502_v56  ;;  %6779 = vmatprep.subr.bf16.mxu0 %v7503_v57  ;;  %v6159_v56 = vcombine.high %v236_v51, %v268_v52  ;;  %v7551_v57 = vld [vmem:[%s9705_s1 + $0x340] sm:$0xff]  }
  0x38   : > { %6801 = vmatprep.subr.bf16.mxu1 %v7504_v58  ;;  %v7552_v58 = vld [vmem:[%s9705_s1 + $0x3c0] sm:$0xff]  }
  0x39   : > { %v7601_v51 = vld [vmem:[%s9705_s1 + $0x420] sm:$0xff]  }
  0x3a   : > { %6780 = vmatpush3.bf16.msra.mxu0 %v7505_v59  ;;  %v7553_v59 = vld [vmem:[%s9705_s1 + $0x300] sm:$0xff]  }
  0x3b   : > { %6802 = vmatpush3.bf16.msra.mxu1 %v7506_v60  ;;  %6781 = vmatprep.subr.bf16.mxu0 %v7507_v61  ;;  %v7554_v60 = vld [vmem:[%s9705_s1 + $0x380] sm:$0xff]   ;;  %v7555_v61 = vld [vmem:[%s9705_s1 + $0x348] sm:$0xff]  }
  0x3c   : > { %6803 = vmatprep.subr.bf16.mxu1 %v7508_v62  ;;  %v7556_v62 = vld [vmem:[%s9705_s1 + $0x3c8] sm:$0xff]   ;;  %v7602_v52 = vld [vmem:[%s9705_s1 + $0x4a0] sm:$0xff]  }
  0x3e   : > { %6782 = vmatpush3.bf16.msra.mxu0 %v7509_v63  ;;  %v7557_v63 = vld [vmem:[%s9705_s1 + $0x308] sm:$0xff]  }
  0x3f   : > { %6804 = vmatpush3.bf16.msra.mxu1 %v7510_v0  ;;  %6783 = vmatprep.subr.bf16.mxu0 %v7511_v1  ;;  %v7558_v0 = vld [vmem:[%s9705_s1 + $0x388] sm:$0xff]   ;;  %v7559_v1 = vld [vmem:[%s9705_s1 + $0x350] sm:$0xff]  }
  0x40   : > { %6805 = vmatprep.subr.bf16.mxu1 %v7512_v2  ;;  %v7560_v2 = vld [vmem:[%s9705_s1 + $0x3d0] sm:$0xff]  }
  0x42   : > { %6784 = vmatpush3.bf16.msra.mxu0 %v7513_v3  ;;  %v7561_v3 = vld [vmem:[%s9705_s1 + $0x310] sm:$0xff]  }
  0x43   : > { %6806 = vmatpush3.bf16.msra.mxu1 %v7514_v4  ;;  %6785 = vmatprep.subr.bf16.mxu0 %v7515_v5  ;;  %v7562_v4 = vld [vmem:[%s9705_s1 + $0x390] sm:$0xff]   ;;  %v7563_v5 = vld [vmem:[%s9705_s1 + $0x358] sm:$0xff]  }
  0x44   : > { %6807 = vmatprep.subr.bf16.mxu1 %v7516_v6  ;;  %v7564_v6 = vld [vmem:[%s9705_s1 + $0x3d8] sm:$0xff]  }
  0x46   : > { %6786 = vmatpush3.bf16.msra.mxu0 %v7517_v7  ;;  %v7565_v7 = vld [vmem:[%s9705_s1 + $0x318] sm:$0xff]  }
  0x47   : > { %6808 = vmatpush3.bf16.msra.mxu1 %v7518_v8  ;;  %6815 = vmatprep.subr.bf16.mxu0 %v7519_v17  ;;  %v7566_v8 = vld [vmem:[%s9705_s1 + $0x398] sm:$0xff]   ;;  %v7575_v17 = vld [vmem:[%s9705_s1 + $0x370] sm:$0xff]  }
  0x48   : > { %6837 = vmatprep.subr.bf16.mxu1 %v7520_v18  ;;  %v7576_v18 = vld [vmem:[%s9705_s1 + $0x3f0] sm:$0xff]  }
  0x49   : > { %4833 = vmatmul.mubr.bf16.vlgmr.msra.gmra.mrb[4].mxu0 %v6152_v11  ;;  %v7569_v11 = vld [vmem:[%s9705_s1 + $0x320] sm:$0xff]  }
  0x4a   : > { %4874 = vmatmul.mubr.bf16.vlgmr.msra.gmra.mrb[4].mxu1 %v6154_v15  ;;  %6816 = vmatpush3.bf16.msra.mxu0 %v7521_v19  ;;  %v7573_v15 = vld [vmem:[%s9705_s1 + $0x328] sm:$0xff]   ;;  %v7577_v19 = vld [vmem:[%s9705_s1 + $0x330] sm:$0xff]  }
  0x4b   : > { %6838 = vmatpush3.bf16.msra.mxu1 %v7522_v20  ;;  %6817 = vmatprep.subr.bf16.mxu0 %v7523_v21  ;;  %v7578_v20 = vld [vmem:[%s9705_s1 + $0x3b0] sm:$0xff]   ;;  %v7579_v21 = vld [vmem:[%s9705_s1 + $0x378] sm:$0xff]  }
  0x4c   : > { %6839 = vmatprep.subr.bf16.mxu1 %v7524_v22  ;;  %4914 = vmatprep.mubr.bf16.mxu0 %v6157_v54  ;;  %v7580_v22 = vld [vmem:[%s9705_s1 + $0x3f8] sm:$0xff]   ;;  %v7604_v54 = vld [vmem:[%s9705_s1 + $0x4e8] sm:$0xff]  }
  0x4d   : > { %4955 = vmatprep.mubr.bf16.mxu1 %v6159_v56  ;;  %v7606_v56 = vld [vmem:[%s9705_s1 + $0x4a8] sm:$0xff]  }
  0x4e   : > { %6818 = vmatpush3.bf16.msra.mxu0 %v7525_v23  ;;  %v7581_v23 = vld [vmem:[%s9705_s1 + $0x338] sm:$0xff]  }
  0x4f   : > { %6840 = vmatpush3.bf16.msra.mxu1 %v7526_v24  ;;  %6819 = vmatprep.subr.bf16.mxu0 %v7527_v25  ;;  %v7582_v24 = vld [vmem:[%s9705_s1 + $0x3b8] sm:$0xff]   ;;  %v237_v25 = vld [vmem:[%s8131_s6 + $0x30] sm:$0xff] }
  0x50   : > { %6841 = vmatprep.subr.bf16.mxu1 %v7528_v26  ;;  %v269_v26 = vld [vmem:[%s8131_s6 + $0x130] sm:$0xff] }
  0x52   : > { %6820 = vmatpush3.bf16.msra.mxu0 %v7529_v27  ;;  %v238_v27 = vld [vmem:[%s8131_s6 + $0x38] sm:$0xff] }
  0x53   : > { %6842 = vmatpush3.bf16.msra.mxu1 %v7530_v28  ;;  %6821 = vmatprep.subr.bf16.mxu0 %v7531_v29  ;;  %v6160_v28 = vcombine.low %v237_v25, %v269_v26  ;;  %v6161_v29 = vcombine.high %v237_v25, %v269_v26  ;;  %v7631_v25 = vld [vmem:[%s9705_s1 + $0x560] sm:$0xff]  }
  0x54   : > { %6843 = vmatprep.subr.bf16.mxu1 %v7532_v30  ;;  %v270_v30 = vld [vmem:[%s8131_s6 + $0x138] sm:$0xff]  ;;  %v7632_v26 = vld [vmem:[%s9705_s1 + $0x5e0] sm:$0xff]  }
  0x56   : > { %6822 = vmatpush3.bf16.msra.mxu0 %v7533_v31  ;;  %v6162_v31 = vcombine.low %v238_v27, %v270_v30 }
  0x57   : > { %6844 = vmatpush3.bf16.msra.mxu1 %v7534_v32  ;;  %6823 = vmatprep.subr.bf16.mxu0 %v7535_v33  ;;  %v6163_v32 = vcombine.high %v238_v27, %v270_v30  ;;  %v7583_v33 = vld [vmem:[%s9705_s1 + $0x440] sm:$0xff]   ;;  %v7636_v30 = vld [vmem:[%s9705_s1 + $0x5e8] sm:$0xff]  }
  0x58   : > { %6845 = vmatprep.subr.bf16.mxu1 %v7536_v34  ;;  %v7584_v34 = vld [vmem:[%s9705_s1 + $0x4c0] sm:$0xff]  }
  0x59   : > { %v7633_v27 = vld [vmem:[%s9705_s1 + $0x520] sm:$0xff]  }
  0x5a   : > { %6824 = vmatpush3.bf16.msra.mxu0 %v7537_v35  ;;  %v7585_v35 = vld [vmem:[%s9705_s1 + $0x400] sm:$0xff]  }
  0x5b   : > { %6846 = vmatpush3.bf16.msra.mxu1 %v7538_v36  ;;  %6825 = vmatprep.subr.bf16.mxu0 %v7539_v37  ;;  %v7586_v36 = vld [vmem:[%s9705_s1 + $0x480] sm:$0xff]   ;;  %v7587_v37 = vld [vmem:[%s9705_s1 + $0x448] sm:$0xff]  }
  0x5c   : > { %6847 = vmatprep.subr.bf16.mxu1 %v7540_v38  ;;  %v7588_v38 = vld [vmem:[%s9705_s1 + $0x4c8] sm:$0xff]  }
  0x5e   : > { %6826 = vmatpush3.bf16.msra.mxu0 %v7541_v39  ;;  %v7589_v39 = vld [vmem:[%s9705_s1 + $0x408] sm:$0xff]  }
  0x5f   : > { %6848 = vmatpush3.bf16.msra.mxu1 %v7542_v40  ;;  %6827 = vmatprep.subr.bf16.mxu0 %v7543_v41  ;;  %v7590_v40 = vld [vmem:[%s9705_s1 + $0x488] sm:$0xff]   ;;  %v7591_v41 = vld [vmem:[%s9705_s1 + $0x450] sm:$0xff]  }
  0x60   : > { %6849 = vmatprep.subr.bf16.mxu1 %v7544_v42  ;;  %v7592_v42 = vld [vmem:[%s9705_s1 + $0x4d0] sm:$0xff]  }
  0x62   : > { %6828 = vmatpush3.bf16.msra.mxu0 %v7545_v43  ;;  %v7593_v43 = vld [vmem:[%s9705_s1 + $0x410] sm:$0xff]  }
  0x63   : > { %6850 = vmatpush3.bf16.msra.mxu1 %v7546_v44  ;;  %6829 = vmatprep.subr.bf16.mxu0 %v7547_v45  ;;  %v7594_v44 = vld [vmem:[%s9705_s1 + $0x490] sm:$0xff]   ;;  %v7595_v45 = vld [vmem:[%s9705_s1 + $0x458] sm:$0xff]  }
  0x64   : > { %6851 = vmatprep.subr.bf16.mxu1 %v7548_v46  ;;  %v7596_v46 = vld [vmem:[%s9705_s1 + $0x4d8] sm:$0xff]  }
  0x66   : > { %6830 = vmatpush3.bf16.msra.mxu0 %v7549_v47  ;;  %v7597_v47 = vld [vmem:[%s9705_s1 + $0x418] sm:$0xff]  }
  0x67   : > { %6852 = vmatpush3.bf16.msra.mxu1 %v7550_v48  ;;  %6859 = vmatprep.subr.bf16.mxu0 %v7551_v57  ;;  %v7598_v48 = vld [vmem:[%s9705_s1 + $0x498] sm:$0xff]   ;;  %v7607_v57 = vld [vmem:[%s9705_s1 + $0x470] sm:$0xff]  }
  0x68   : > { %6881 = vmatprep.subr.bf16.mxu1 %v7552_v58  ;;  %v7608_v58 = vld [vmem:[%s9705_s1 + $0x4f0] sm:$0xff]  }
  0x69   : > { %4915 = vmatmul.mubr.bf16.vlgmr.msra.gmra.mrb[8].mxu0 %v6156_v53  ;;  %v7603_v53 = vld [vmem:[%s9705_s1 + $0x468] sm:$0xff]  }
  0x6a   : > { %4956 = vmatmul.mubr.bf16.vlgmr.msra.gmra.mrb[8].mxu1 %v6158_v55  ;;  %6860 = vmatpush3.bf16.msra.mxu0 %v7553_v59  ;;  %v7605_v55 = vld [vmem:[%s9705_s1 + $0x428] sm:$0xff]   ;;  %v7609_v59 = vld [vmem:[%s9705_s1 + $0x430] sm:$0xff]  }
  0x6b   : > { %6882 = vmatpush3.bf16.msra.mxu1 %v7554_v60  ;;  %6861 = vmatprep.subr.bf16.mxu0 %v7555_v61  ;;  %v7610_v60 = vld [vmem:[%s9705_s1 + $0x4b0] sm:$0xff]   ;;  %v7611_v61 = vld [vmem:[%s9705_s1 + $0x478] sm:$0xff]  }
  0x6c   : > { %6883 = vmatprep.subr.bf16.mxu1 %v7556_v62  ;;  %4996 = vmatprep.mubr.bf16.mxu0 %v6161_v29  ;;  %v7612_v62 = vld [vmem:[%s9705_s1 + $0x4f8] sm:$0xff]   ;;  %v7635_v29 = vld [vmem:[%s9705_s1 + $0x568] sm:$0xff]  }
  0x6d   : > { %5037 = vmatprep.mubr.bf16.mxu1 %v6163_v32  ;;  %v7638_v32 = vld [vmem:[%s9705_s1 + $0x5a8] sm:$0xff]  }
  0x6e   : > { %6862 = vmatpush3.bf16.msra.mxu0 %v7557_v63  ;;  %v7613_v63 = vld [vmem:[%s9705_s1 + $0x438] sm:$0xff]  }
  0x6f   : > { %6884 = vmatpush3.bf16.msra.mxu1 %v7558_v0  ;;  %6863 = vmatprep.subr.bf16.mxu0 %v7559_v1  ;;  %v7614_v0 = vld [vmem:[%s9705_s1 + $0x4b8] sm:$0xff]   ;;  %v239_v1 = vld [vmem:[%s8131_s6 + $0x40] sm:$0xff] }
  0x70   : > { %6885 = vmatprep.subr.bf16.mxu1 %v7560_v2  ;;  %v271_v2 = vld [vmem:[%s8131_s6 + $0x140] sm:$0xff] }
  0x72   : > { %6864 = vmatpush3.bf16.msra.mxu0 %v7561_v3  ;;  %v6164_v3 = vcombine.low %v239_v1, %v271_v2 }
  0x73   : > { %6886 = vmatpush3.bf16.msra.mxu1 %v7562_v4  ;;  %6865 = vmatprep.subr.bf16.mxu0 %v7563_v5  ;;  %v6165_v4 = vcombine.high %v239_v1, %v271_v2  ;;  %v240_v5 = vld [vmem:[%s8131_s6 + $0x48] sm:$0xff]  ;;  %v7663_v1 = vld [vmem:[%s9705_s1 + $0x660] sm:$0xff]  }
  0x74   : > { %6887 = vmatprep.subr.bf16.mxu1 %v7564_v6  ;;  %v272_v6 = vld [vmem:[%s8131_s6 + $0x148] sm:$0xff]  ;;  %v7664_v2 = vld [vmem:[%s9705_s1 + $0x6e0] sm:$0xff]  }
  0x76   : > { %6866 = vmatpush3.bf16.msra.mxu0 %v7565_v7  ;;  %v6166_v7 = vcombine.low %v240_v5, %v272_v6 }
  0x77   : > { %6888 = vmatpush3.bf16.msra.mxu1 %v7566_v8  ;;  %6867 = vmatprep.subr.bf16.mxu0 %v7567_v9  ;;  %v6167_v8 = vcombine.high %v240_v5, %v272_v6  ;;  %v7615_v9 = vld [vmem:[%s9705_s1 + $0x540] sm:$0xff]   ;;  %v7667_v5 = vld [vmem:[%s9705_s1 + $0x668] sm:$0xff]  }
  0x78   : > { %6889 = vmatprep.subr.bf16.mxu1 %v7568_v10  ;;  %v7616_v10 = vld [vmem:[%s9705_s1 + $0x5c0] sm:$0xff]   ;;  %v7668_v6 = vld [vmem:[%s9705_s1 + $0x6e8] sm:$0xff]  }
  0x7a   : > { %6868 = vmatpush3.bf16.msra.mxu0 %v7569_v11  ;;  %v7617_v11 = vld [vmem:[%s9705_s1 + $0x500] sm:$0xff]  }
  0x7b   : > { %6890 = vmatpush3.bf16.msra.mxu1 %v7570_v12  ;;  %6869 = vmatprep.subr.bf16.mxu0 %v7571_v13  ;;  %v7618_v12 = vld [vmem:[%s9705_s1 + $0x580] sm:$0xff]   ;;  %v7619_v13 = vld [vmem:[%s9705_s1 + $0x548] sm:$0xff]  }
  0x7c   : > { %6891 = vmatprep.subr.bf16.mxu1 %v7572_v14  ;;  %v7620_v14 = vld [vmem:[%s9705_s1 + $0x5c8] sm:$0xff]  }
  0x7e   : > { %6870 = vmatpush3.bf16.msra.mxu0 %v7573_v15  ;;  %v7621_v15 = vld [vmem:[%s9705_s1 + $0x508] sm:$0xff]  }
  0x7f   : > { %6892 = vmatpush3.bf16.msra.mxu1 %v7574_v16  ;;  %6871 = vmatprep.subr.bf16.mxu0 %v7575_v17  ;;  %v7622_v16 = vld [vmem:[%s9705_s1 + $0x588] sm:$0xff]   ;;  %v7623_v17 = vld [vmem:[%s9705_s1 + $0x550] sm:$0xff]  }
  0x80   : > { %6893 = vmatprep.subr.bf16.mxu1 %v7576_v18  ;;  %v7624_v18 = vld [vmem:[%s9705_s1 + $0x5d0] sm:$0xff]  }
  0x82   : > { %6872 = vmatpush3.bf16.msra.mxu0 %v7577_v19  ;;  %v7625_v19 = vld [vmem:[%s9705_s1 + $0x510] sm:$0xff]  }
  0x83   : > { %6894 = vmatpush3.bf16.msra.mxu1 %v7578_v20  ;;  %6873 = vmatprep.subr.bf16.mxu0 %v7579_v21  ;;  %v7626_v20 = vld [vmem:[%s9705_s1 + $0x590] sm:$0xff]   ;;  %v7627_v21 = vld [vmem:[%s9705_s1 + $0x558] sm:$0xff]  }
  0x84   : > { %6895 = vmatprep.subr.bf16.mxu1 %v7580_v22  ;;  %v7628_v22 = vld [vmem:[%s9705_s1 + $0x5d8] sm:$0xff]  }
  0x86   : > { %6874 = vmatpush3.bf16.msra.mxu0 %v7581_v23  ;;  %v7629_v23 = vld [vmem:[%s9705_s1 + $0x518] sm:$0xff]  }
  0x87   : > { %6896 = vmatpush3.bf16.msra.mxu1 %v7582_v24  ;;  %6903 = vmatprep.subr.bf16.mxu0 %v7583_v33  ;;  %v7630_v24 = vld [vmem:[%s9705_s1 + $0x598] sm:$0xff]   ;;  %v7639_v33 = vld [vmem:[%s9705_s1 + $0x570] sm:$0xff]  }
  0x88   : > { %6925 = vmatprep.subr.bf16.mxu1 %v7584_v34  ;;  %v7640_v34 = vld [vmem:[%s9705_s1 + $0x5f0] sm:$0xff]  }
  0x89   : > { %4997 = vmatmul.mubr.bf16.vlgmr.msra.gmra.mrb[12].mxu0 %v6160_v28  ;;  %v7634_v28 = vld [vmem:[%s9705_s1 + $0x5a0] sm:$0xff]  }
  0x8a   : > { %5038 = vmatmul.mubr.bf16.vlgmr.msra.gmra.mrb[12].mxu1 %v6162_v31  ;;  %6904 = vmatpush3.bf16.msra.mxu0 %v7585_v35  ;;  %v7637_v31 = vld [vmem:[%s9705_s1 + $0x528] sm:$0xff]   ;;  %v7641_v35 = vld [vmem:[%s9705_s1 + $0x530] sm:$0xff]  }
  0x8b   : > { %6926 = vmatpush3.bf16.msra.mxu1 %v7586_v36  ;;  %6905 = vmatprep.subr.bf16.mxu0 %v7587_v37  ;;  %v7642_v36 = vld [vmem:[%s9705_s1 + $0x5b0] sm:$0xff]   ;;  %v7643_v37 = vld [vmem:[%s9705_s1 + $0x578] sm:$0xff]  }
  0x8c   : > { %6927 = vmatprep.subr.bf16.mxu1 %v7588_v38  ;;  %5078 = vmatprep.mubr.bf16.mxu0 %v6165_v4  ;;  %v7644_v38 = vld [vmem:[%s9705_s1 + $0x5f8] sm:$0xff]   ;;  %v7666_v4 = vld [vmem:[%s9705_s1 + $0x6a0] sm:$0xff]  }
  0x8d   : > { %5119 = vmatprep.mubr.bf16.mxu1 %v6167_v8  ;;  %v7670_v8 = vld [vmem:[%s9705_s1 + $0x6a8] sm:$0xff]  }
  0x8e   : > { %6906 = vmatpush3.bf16.msra.mxu0 %v7589_v39  ;;  %v7645_v39 = vld [vmem:[%s9705_s1 + $0x538] sm:$0xff]  }
  0x8f   : > { %6928 = vmatpush3.bf16.msra.mxu1 %v7590_v40  ;;  %6907 = vmatprep.subr.bf16.mxu0 %v7591_v41  ;;  %v7646_v40 = vld [vmem:[%s9705_s1 + $0x5b8] sm:$0xff]   ;;  %v241_v41 = vld [vmem:[%s8131_s6 + $0x50] sm:$0xff] }
  0x90   : > { %6929 = vmatprep.subr.bf16.mxu1 %v7592_v42  ;;  %v273_v42 = vld [vmem:[%s8131_s6 + $0x150] sm:$0xff] }
  0x92   : > { %6908 = vmatpush3.bf16.msra.mxu0 %v7593_v43  ;;  %v242_v43 = vld [vmem:[%s8131_s6 + $0x58] sm:$0xff] }
  0x93   : > { %6930 = vmatpush3.bf16.msra.mxu1 %v7594_v44  ;;  %6909 = vmatprep.subr.bf16.mxu0 %v7595_v45  ;;  %v274_v44 = vld [vmem:[%s8131_s6 + $0x158] sm:$0xff]  ;;  %v6168_v45 = vcombine.low %v241_v41, %v273_v42 }
  0x94   : > { %6931 = vmatprep.subr.bf16.mxu1 %v7596_v46  ;;  %v6169_v46 = vcombine.high %v241_v41, %v273_v42  ;;  %v7694_v42 = vld [vmem:[%s9705_s1 + $0x798] sm:$0xff]  }
  0x96   : > { %6910 = vmatpush3.bf16.msra.mxu0 %v7597_v47  ;;  %v6170_v47 = vcombine.low %v242_v43, %v274_v44 }
  0x97   : > { %6932 = vmatpush3.bf16.msra.mxu1 %v7598_v48  ;;  %6911 = vmatprep.subr.bf16.mxu0 %v7599_v49  ;;  %v6171_v48 = vcombine.high %v242_v43, %v274_v44  ;;  %v7647_v49 = vld [vmem:[%s9705_s1 + $0x640] sm:$0xff]  }
  0x98   : > { %6933 = vmatprep.subr.bf16.mxu1 %v7600_v50  ;;  %v7648_v50 = vld [vmem:[%s9705_s1 + $0x6c0] sm:$0xff]  }
  0x99   : > { %v7695_v44 = vld [vmem:[%s9705_s1 + $0x760] sm:$0xff]  }
  0x9a   : > { %6912 = vmatpush3.bf16.msra.mxu0 %v7601_v51  ;;  %v7649_v51 = vld [vmem:[%s9705_s1 + $0x600] sm:$0xff]  }
  0x9b   : > { %6934 = vmatpush3.bf16.msra.mxu1 %v7602_v52  ;;  %6913 = vmatprep.subr.bf16.mxu0 %v7603_v53  ;;  %v7650_v52 = vld [vmem:[%s9705_s1 + $0x680] sm:$0xff]   ;;  %v7651_v53 = vld [vmem:[%s9705_s1 + $0x648] sm:$0xff]  }
  0x9c   : > { %6935 = vmatprep.subr.bf16.mxu1 %v7604_v54  ;;  %v7652_v54 = vld [vmem:[%s9705_s1 + $0x6c8] sm:$0xff]  }
  0x9e   : > { %6914 = vmatpush3.bf16.msra.mxu0 %v7605_v55  ;;  %v7653_v55 = vld [vmem:[%s9705_s1 + $0x608] sm:$0xff]  }
  0x9f   : > { %6936 = vmatpush3.bf16.msra.mxu1 %v7606_v56  ;;  %6915 = vmatprep.subr.bf16.mxu0 %v7607_v57  ;;  %v7654_v56 = vld [vmem:[%s9705_s1 + $0x688] sm:$0xff]   ;;  %v7655_v57 = vld [vmem:[%s9705_s1 + $0x650] sm:$0xff]  }
  0xa0   : > { %6937 = vmatprep.subr.bf16.mxu1 %v7608_v58  ;;  %v7656_v58 = vld [vmem:[%s9705_s1 + $0x6d0] sm:$0xff]  }
  0xa2   : > { %6916 = vmatpush3.bf16.msra.mxu0 %v7609_v59  ;;  %v7657_v59 = vld [vmem:[%s9705_s1 + $0x610] sm:$0xff]  }
  0xa3   : > { %6938 = vmatpush3.bf16.msra.mxu1 %v7610_v60  ;;  %6917 = vmatprep.subr.bf16.mxu0 %v7611_v61  ;;  %v7658_v60 = vld [vmem:[%s9705_s1 + $0x690] sm:$0xff]   ;;  %v7659_v61 = vld [vmem:[%s9705_s1 + $0x658] sm:$0xff]  }
  0xa4   : > { %6939 = vmatprep.subr.bf16.mxu1 %v7612_v62  ;;  %v7660_v62 = vld [vmem:[%s9705_s1 + $0x6d8] sm:$0xff]  }
  0xa6   : > { %6918 = vmatpush3.bf16.msra.mxu0 %v7613_v63  ;;  %v7661_v63 = vld [vmem:[%s9705_s1 + $0x618] sm:$0xff]  }
  0xa7   : > { %6940 = vmatpush3.bf16.msra.mxu1 %v7614_v0  ;;  %6947 = vmatprep.subr.bf16.mxu0 %v7615_v9  ;;  %v7662_v0 = vld [vmem:[%s9705_s1 + $0x698] sm:$0xff]   ;;  %v7671_v9 = vld [vmem:[%s9705_s1 + $0x670] sm:$0xff]  }
  0xa8   : > { %6969 = vmatprep.subr.bf16.mxu1 %v7616_v10  ;;  %v7672_v10 = vld [vmem:[%s9705_s1 + $0x6f0] sm:$0xff]  }
  0xa9   : > { %5079 = vmatmul.mubr.bf16.vlgmr.msra.gmra.mrb[16].mxu0 %v6164_v3  ;;  %v7665_v3 = vld [vmem:[%s9705_s1 + $0x620] sm:$0xff]  }
  0xaa   : > { %5120 = vmatmul.mubr.bf16.vlgmr.msra.gmra.mrb[16].mxu1 %v6166_v7  ;;  %6948 = vmatpush3.bf16.msra.mxu0 %v7617_v11  ;;  %v7669_v7 = vld [vmem:[%s9705_s1 + $0x628] sm:$0xff]   ;;  %v7673_v11 = vld [vmem:[%s9705_s1 + $0x630] sm:$0xff]  }
  0xab   : > { %6970 = vmatpush3.bf16.msra.mxu1 %v7618_v12  ;;  %6949 = vmatprep.subr.bf16.mxu0 %v7619_v13  ;;  %v7674_v12 = vld [vmem:[%s9705_s1 + $0x6b0] sm:$0xff]   ;;  %v7675_v13 = vld [vmem:[%s9705_s1 + $0x678] sm:$0xff]  }
  0xac   : > { %6971 = vmatprep.subr.bf16.mxu1 %v7620_v14  ;;  %5160 = vmatprep.mubr.bf16.mxu0 %v6169_v46  ;;  %v7676_v14 = vld [vmem:[%s9705_s1 + $0x6f8] sm:$0xff]  }
  0xad   : > { %5201 = vmatprep.mubr.bf16.mxu1 %v6171_v48 }
  0xae   : > { %6950 = vmatpush3.bf16.msra.mxu0 %v7621_v15  ;;  %v7677_v15 = vld [vmem:[%s9705_s1 + $0x638] sm:$0xff]  }
  0xaf   : > { %6972 = vmatpush3.bf16.msra.mxu1 %v7622_v16  ;;  %6951 = vmatprep.subr.bf16.mxu0 %v7623_v17  ;;  %v7678_v16 = vld [vmem:[%s9705_s1 + $0x6b8] sm:$0xff]   ;;  %v243_v17 = vld [vmem:[%s8131_s6 + $0x60] sm:$0xff] }
  0xb0   : > { %6973 = vmatprep.subr.bf16.mxu1 %v7624_v18  ;;  %v275_v18 = vld [vmem:[%s8131_s6 + $0x160] sm:$0xff] }
  0xb2   : > { %6952 = vmatpush3.bf16.msra.mxu0 %v7625_v19  ;;  %v244_v19 = vld [vmem:[%s8131_s6 + $0x68] sm:$0xff] }
  0xb3   : > { %6974 = vmatpush3.bf16.msra.mxu1 %v7626_v20  ;;  %6953 = vmatprep.subr.bf16.mxu0 %v7627_v21  ;;  %v6172_v20 = vcombine.low %v243_v17, %v275_v18  ;;  %v6173_v21 = vcombine.high %v243_v17, %v275_v18  ;;  %v7711_v18 = vld [vmem:[%s9705_s1 + $0x840] sm:$0xff]  }
  0xb4   : > { %6975 = vmatprep.subr.bf16.mxu1 %v7628_v22  ;;  %v276_v22 = vld [vmem:[%s8131_s6 + $0x168] sm:$0xff] }
  0xb6   : > { %6954 = vmatpush3.bf16.msra.mxu0 %v7629_v23  ;;  %v6174_v23 = vcombine.low %v244_v19, %v276_v22 }
  0xb7   : > { %6976 = vmatpush3.bf16.msra.mxu1 %v7630_v24  ;;  %6955 = vmatprep.subr.bf16.mxu0 %v7631_v25  ;;  %v6175_v24 = vcombine.high %v244_v19, %v276_v22  ;;  %v7679_v25 = vld [vmem:[%s9705_s1 + $0x740] sm:$0xff]   ;;  %v7715_v22 = vld [vmem:[%s9705_s1 + $0x848] sm:$0xff]  }
  0xb8   : > { %6977 = vmatprep.subr.bf16.mxu1 %v7632_v26  ;;  %v7680_v26 = vld [vmem:[%s9705_s1 + $0x7c0] sm:$0xff]  }
  0xb9   : > { %v7712_v19 = vld [vmem:[%s9705_s1 + $0x8c0] sm:$0xff]  }
  0xba   : > { %6956 = vmatpush3.bf16.msra.mxu0 %v7633_v27  ;;  %v7681_v27 = vld [vmem:[%s9705_s1 + $0x700] sm:$0xff]  }
  0xbb   : > { %6978 = vmatpush3.bf16.msra.mxu1 %v7634_v28  ;;  %6957 = vmatprep.subr.bf16.mxu0 %v7635_v29  ;;  %v7682_v28 = vld [vmem:[%s9705_s1 + $0x780] sm:$0xff]   ;;  %v7683_v29 = vld [vmem:[%s9705_s1 + $0x748] sm:$0xff]  }
  0xbc   : > { %6979 = vmatprep.subr.bf16.mxu1 %v7636_v30  ;;  %v7684_v30 = vld [vmem:[%s9705_s1 + $0x7c8] sm:$0xff]  }
  0xbe   : > { %6958 = vmatpush3.bf16.msra.mxu0 %v7637_v31  ;;  %v7685_v31 = vld [vmem:[%s9705_s1 + $0x708] sm:$0xff]  }
  0xbf   : > { %6980 = vmatpush3.bf16.msra.mxu1 %v7638_v32  ;;  %6959 = vmatprep.subr.bf16.mxu0 %v7639_v33  ;;  %v7686_v32 = vld [vmem:[%s9705_s1 + $0x788] sm:$0xff]   ;;  %v7687_v33 = vld [vmem:[%s9705_s1 + $0x750] sm:$0xff]  }
  0xc0   : > { %6981 = vmatprep.subr.bf16.mxu1 %v7640_v34  ;;  %v7688_v34 = vld [vmem:[%s9705_s1 + $0x7d0] sm:$0xff]  }
  0xc2   : > { %6960 = vmatpush3.bf16.msra.mxu0 %v7641_v35  ;;  %v7689_v35 = vld [vmem:[%s9705_s1 + $0x710] sm:$0xff]  }
  0xc3   : > { %6982 = vmatpush3.bf16.msra.mxu1 %v7642_v36  ;;  %6961 = vmatprep.subr.bf16.mxu0 %v7643_v37  ;;  %v7690_v36 = vld [vmem:[%s9705_s1 + $0x790] sm:$0xff]   ;;  %v7691_v37 = vld [vmem:[%s9705_s1 + $0x758] sm:$0xff]  }
  0xc4   : > { %6983 = vmatprep.subr.bf16.mxu1 %v7644_v38  ;;  %v7692_v38 = vld [vmem:[%s9705_s1 + $0x7d8] sm:$0xff]  }
  0xc6   : > { %6962 = vmatpush3.bf16.msra.mxu0 %v7645_v39 }
  0xc7   : > { %6984 = vmatpush3.bf16.msra.mxu1 %v7646_v40  ;;  %6991 = vmatprep.subr.bf16.mxu0 %v7647_v49  ;;  %v7693_v40 = vld [vmem:[%s9705_s1 + $0x718] sm:$0xff]  }
  0xc8   : > { %7013 = vmatprep.subr.bf16.mxu1 %v7648_v50  ;;  %v7697_v50 = vld [vmem:[%s9705_s1 + $0x720] sm:$0xff]  }
  0xc9   : > { %5161 = vmatmul.mubr.bf16.vlgmr.msra.gmra.mrb[20].mxu0 %v6168_v45 }
  0xca   : > { %5202 = vmatmul.mubr.bf16.vlgmr.msra.gmra.mrb[20].mxu1 %v6170_v47  ;;  %6992 = vmatpush3.bf16.msra.mxu0 %v7649_v51  ;;  %v7696_v47 = vld [vmem:[%s9705_s1 + $0x7e0] sm:$0xff]  }
  0xcb   : > { %7014 = vmatpush3.bf16.msra.mxu1 %v7650_v52  ;;  %6993 = vmatprep.subr.bf16.mxu0 %v7651_v53  ;;  %v7698_v52 = vld [vmem:[%s9705_s1 + $0x7a0] sm:$0xff]  }
  0xcc   : > { %7015 = vmatprep.subr.bf16.mxu1 %v7652_v54  ;;  %5242 = vmatprep.mubr.bf16.mxu0 %v6173_v21  ;;  %v6147_v53 = vld [vmem:[#allocation2] ss:$0 sm:$0xff] }
  0xcd   : > { %5283 = vmatprep.mubr.bf16.mxu1 %v6175_v24  ;;  %v7714_v21 = vld [vmem:[%s9705_s1 + $0x880] sm:$0xff]   ;;  %v7717_v24 = vld [vmem:[%s9705_s1 + $0x808] sm:$0xff]  }
  0xce   : > { %6994 = vmatpush3.bf16.msra.mxu0 %v7653_v55 }
  0xcf   : > { %7016 = vmatpush3.bf16.msra.mxu1 %v7654_v56  ;;  %6995 = vmatprep.subr.bf16.mxu0 %v7655_v57  ;;  %v7699_v56 = vld [vmem:[%s9705_s1 + $0x768] sm:$0xff]  }
  0xd0   : > { %7017 = vmatprep.subr.bf16.mxu1 %v7656_v58 }
  0xd2   : > { %6996 = vmatpush3.bf16.msra.mxu0 %v7657_v59  ;;  %v7700_v59 = vld [vmem:[%s9705_s1 + $0x7e8] sm:$0xff]  }
  0xd3   : > { %7018 = vmatpush3.bf16.msra.mxu1 %v7658_v60  ;;  %6997 = vmatprep.subr.bf16.mxu0 %v7659_v61 }
  0xd4   : > { %7019 = vmatprep.subr.bf16.mxu1 %v7660_v62  ;;  %v7701_v62 = vld [vmem:[%s9705_s1 + $0x728] sm:$0xff]  }
  0xd6   : > { %6998 = vmatpush3.bf16.msra.mxu0 %v7661_v63 }
  0xd7   : > { %7020 = vmatpush3.bf16.msra.mxu1 %v7662_v0  ;;  %6999 = vmatprep.subr.bf16.mxu0 %v7663_v1  ;;  %v7702_v0 = vld [vmem:[%s9705_s1 + $0x7a8] sm:$0xff]  }
  0xd8   : > { %7021 = vmatprep.subr.bf16.mxu1 %v7664_v2  ;;  %v7703_v2 = vld [vmem:[%s9705_s1 + $0x770] sm:$0xff]  }
  0xda   : > { %7000 = vmatpush3.bf16.msra.mxu0 %v7665_v3  ;;  %v7704_v3 = vld [vmem:[%s9705_s1 + $0x7f0] sm:$0xff]  }
  0xdb   : > { %7022 = vmatpush3.bf16.msra.mxu1 %v7666_v4  ;;  %7001 = vmatprep.subr.bf16.mxu0 %v7667_v5  ;;  %v7705_v4 = vld [vmem:[%s9705_s1 + $0x730] sm:$0xff]  }
  0xdc   : > { %7023 = vmatprep.subr.bf16.mxu1 %v7668_v6  ;;  %v7706_v5 = vld [vmem:[%s9705_s1 + $0x7b0] sm:$0xff]   ;;  %v7707_v6 = vld [vmem:[%s9705_s1 + $0x778] sm:$0xff]  }
  0xde   : > { %7002 = vmatpush3.bf16.msra.mxu0 %v7669_v7  ;;  %v7708_v7 = vld [vmem:[%s9705_s1 + $0x7f8] sm:$0xff]  }
  0xdf   : > { %7024 = vmatpush3.bf16.msra.mxu1 %v7670_v8  ;;  %7003 = vmatprep.subr.bf16.mxu0 %v7671_v9  ;;  %v7709_v8 = vld [vmem:[%s9705_s1 + $0x738] sm:$0xff]  }
  0xe0   : > { %7025 = vmatprep.subr.bf16.mxu1 %v7672_v10  ;;  %v7710_v9 = vld [vmem:[%s9705_s1 + $0x7b8] sm:$0xff]   ;;  %v245_v10 = vld [vmem:[%s8131_s6 + $0x70] sm:$0xff] }
  0xe2   : > { %7004 = vmatpush3.bf16.msra.mxu0 %v7673_v11  ;;  %v277_v11 = vld [vmem:[%s8131_s6 + $0x170] sm:$0xff] }
  0xe3   : > { %7026 = vmatpush3.bf16.msra.mxu1 %v7674_v12  ;;  %7005 = vmatprep.subr.bf16.mxu0 %v7675_v13  ;;  %v246_v12 = vld [vmem:[%s8131_s6 + $0x78] sm:$0xff] }
  0xe4   : > { %7027 = vmatprep.subr.bf16.mxu1 %v7676_v14  ;;  %v278_v13 = vld [vmem:[%s8131_s6 + $0x178] sm:$0xff]  ;;  %v6176_v14 = vcombine.low %v245_v10, %v277_v11 }
  0xe5   : > { %v6179_v17 = vcombine.high %v246_v12, %v278_v13 }
  0xe6   : > { %7006 = vmatpush3.bf16.msra.mxu0 %v7677_v15  ;;  %v6177_v15 = vcombine.high %v245_v10, %v277_v11  ;;  %v7743_v10 = vld [vmem:[%s9705_s1 + $0x940] sm:$0xff]  }
  0xe7   : > { %7028 = vmatpush3.bf16.msra.mxu1 %v7678_v16  ;;  %7035 = vmatprep.subr.bf16.mxu0 %v7679_v25  ;;  %v6178_v16 = vcombine.low %v246_v12, %v278_v13  ;;  %v7718_v25 = vld [vmem:[%s9705_s1 + $0x888] sm:$0xff]   ;;  %v7744_v11 = vld [vmem:[%s9705_s1 + $0x9c0] sm:$0xff]  }
  0xe8   : > { %7057 = vmatprep.subr.bf16.mxu1 %v7680_v26  ;;  %v7719_v26 = vld [vmem:[%s9705_s1 + $0x850] sm:$0xff]   ;;  %v7745_v12 = vld [vmem:[%s9705_s1 + $0x900] sm:$0xff]  }
  0xe9   : > { %5243 = vmatmul.mubr.bf16.vlgmr.msra.gmra.mrb[24].mxu0 %v6172_v20  ;;  %v7713_v20 = vld [vmem:[%s9705_s1 + $0x800] sm:$0xff]  }
  0xea   : > { %5284 = vmatmul.mubr.bf16.vlgmr.msra.gmra.mrb[24].mxu1 %v6174_v23  ;;  %7036 = vmatpush3.bf16.msra.mxu0 %v7681_v27  ;;  %v7716_v23 = vld [vmem:[%s9705_s1 + $0x8c8] sm:$0xff]   ;;  %v7720_v27 = vld [vmem:[%s9705_s1 + $0x8d0] sm:$0xff]   ;;  %v7746_v13 = vld [vmem:[%s9705_s1 + $0x980] sm:$0xff]  }
  0xeb   : > { %7058 = vmatpush3.bf16.msra.mxu1 %v7682_v28  ;;  %7037 = vmatprep.subr.bf16.mxu0 %v7683_v29  ;;  %v7721_v28 = vld [vmem:[%s9705_s1 + $0x810] sm:$0xff]  }
  0xec   : > { %7059 = vmatprep.subr.bf16.mxu1 %v7684_v30  ;;  %5324 = vmatprep.mubr.bf16.mxu0 %v6177_v15  ;;  %v7722_v29 = vld [vmem:[%s9705_s1 + $0x890] sm:$0xff]   ;;  %v7723_v30 = vld [vmem:[%s9705_s1 + $0x858] sm:$0xff]   ;;  %v7748_v15 = vld [vmem:[%s9705_s1 + $0x9c8] sm:$0xff]  }
  0xed   : > { %5365 = vmatprep.mubr.bf16.mxu1 %v6179_v17  ;;  %v7750_v17 = vld [vmem:[%s9705_s1 + $0x988] sm:$0xff]  }
  0xee   : > { %7038 = vmatpush3.bf16.msra.mxu0 %v7685_v31  ;;  %v7724_v31 = vld [vmem:[%s9705_s1 + $0x8d8] sm:$0xff]  }
  0xef   : > { %7060 = vmatpush3.bf16.msra.mxu1 %v7686_v32  ;;  %7039 = vmatprep.subr.bf16.mxu0 %v7687_v33  ;;  %v7725_v33 = vld [vmem:[%s9705_s1 + $0x818] sm:$0xff]  }
  0xf0   : > { %7061 = vmatprep.subr.bf16.mxu1 %v7688_v34 }
  0xf2   : > { %7040 = vmatpush3.bf16.msra.mxu0 %v7689_v35  ;;  %v7726_v35 = vld [vmem:[%s9705_s1 + $0x898] sm:$0xff]  }
  0xf3   : > { %7062 = vmatpush3.bf16.msra.mxu1 %v7690_v36  ;;  %7041 = vmatprep.subr.bf16.mxu0 %v7691_v37  ;;  %v7727_v37 = vld [vmem:[%s9705_s1 + $0x860] sm:$0xff]  }
  0xf4   : > { %7063 = vmatprep.subr.bf16.mxu1 %v7692_v38 }
  0xf6   : > { %7042 = vmatpush3.bf16.msra.mxu0 %v7693_v40  ;;  %v7728_v40 = vld [vmem:[%s9705_s1 + $0x8e0] sm:$0xff]  }
  0xf7   : > { %7064 = vmatpush3.bf16.msra.mxu1 %v7694_v42  ;;  %7043 = vmatprep.subr.bf16.mxu0 %v7695_v44 }
  0xf8   : > { %7065 = vmatprep.subr.bf16.mxu1 %v7696_v47 }
  0xfa   : > { %7044 = vmatpush3.bf16.msra.mxu0 %v7697_v50 }
  0xfb   : > { %7066 = vmatpush3.bf16.msra.mxu1 %v7698_v52  ;;  %7045 = vmatprep.subr.bf16.mxu0 %v7699_v56  ;;  %v7732_v52 = vld [vmem:[%s9705_s1 + $0x8e8] sm:$0xff]  }
  0xfc   : > { %v6743_v39 = vpop.f32.mrb[0].mxu0  ;;  %7067 = vmatprep.subr.bf16.mxu1 %v7700_v59  ;;  %v7734_v56 = vld [vmem:[%s9705_s1 + $0x8a8] sm:$0xff]   ;;  %v7736_v59 = vld [vmem:[%s9705_s1 + $0x8f0] sm:$0xff]  }
  0xfd   : > { %v6765_v41 = vpop.f32.mrb[0].mxu1  ;;  %v6744_v43 = vpop.f32.mrb[1].mxu0 }
  0xfe   : > { %v6745_v45 = vadd.f32 %v6744_v43, %v6743_v39  ;;  %v6766_v46 = vpop.f32.mrb[1].mxu1  ;;  %v6746_v49 = vpop.f32.mrb[2].mxu0  ;;  %7046 = vmatpush3.bf16.msra.mxu0 %v7701_v62  ;;  %v7729_v43 = vld [vmem:[%s9705_s1 + $0x820] sm:$0xff]   ;;  %v7739_v62 = vld [vmem:[%s9705_s1 + $0x878] sm:$0xff]  }
  0xff   : > { %v6767_v48 = vadd.f32 %v6766_v46, %v6765_v41  ;;  %v6768_v51 = vpop.f32.mrb[2].mxu1  ;;  %v6747_v54 = vpop.f32.mrb[3].mxu0  ;;  %7068 = vmatpush3.bf16.msra.mxu1 %v7702_v0  ;;  %7047 = vmatprep.subr.bf16.mxu0 %v7703_v2  ;;  %v7730_v46 = vld [vmem:[%s9705_s1 + $0x8a0] sm:$0xff]   ;;  %v7741_v0 = vld [vmem:[%s9705_s1 + $0x838] sm:$0xff]  }
 0x100   : > { %v4753_v55 = vadd.f32 %v6745_v45, %v6147_v53  ;;  %v6748_v57 = vadd.f32 %v6747_v54, %v6746_v49  ;;  %v6769_v58 = vpop.f32.mrb[3].mxu1  ;;  %7069 = vmatprep.subr.bf16.mxu1 %v7704_v3  ;;  %v7731_v49 = vld [vmem:[%s9705_s1 + $0x868] sm:$0xff]   ;;  %v247_v2 = vld [vmem:[%s8131_s6 + $0x80] sm:$0xff] }
 0x101   : > { %v6770_v60 = vadd.f32 %v6769_v58, %v6768_v51  ;;  %v7733_v54 = vld [vmem:[%s9705_s1 + $0x828] sm:$0xff]   ;;  %v7735_v58 = vld [vmem:[%s9705_s1 + $0x870] sm:$0xff]   ;;  %v279_v3 = vld [vmem:[%s8131_s6 + $0x180] sm:$0xff] }
 0x102   : > { %v8809_v61 = vadd.f32 %v6767_v48, %v4753_v55  ;;  %v4756_v63 = vadd.f32 %v6748_v57, %v6147_v53  ;;  %7048 = vmatpush3.bf16.msra.mxu0 %v7705_v4  ;;  %v248_v4 = vld [vmem:[%s8131_s6 + $0x88] sm:$0xff] }
 0x103   : > { %7070 = vmatpush3.bf16.msra.mxu1 %v7706_v5  ;;  %7049 = vmatprep.subr.bf16.mxu0 %v7707_v6  ;;  %v6180_v5 = vcombine.low %v247_v2, %v279_v3  ;;  %v6181_v6 = vcombine.high %v247_v2, %v279_v3  ;;  %v7775_v2 = vld [vmem:[%s9705_s1 + $0xa40] sm:$0xff]  }
 0x104   : > { %v8817_v1 = vadd.f32 %v6770_v60, %v4756_v63  ;;  %7071 = vmatprep.subr.bf16.mxu1 %v7708_v7  ;;  %v7737_v60 = vld [vmem:[%s9705_s1 + $0x830] sm:$0xff]   ;;  %v7740_v63 = vld [vmem:[%s9705_s1 + $0x8f8] sm:$0xff]   ;;  %v280_v7 = vld [vmem:[%s8131_s6 + $0x188] sm:$0xff] }
 0x105   : > { %v7776_v3 = vld [vmem:[%s9705_s1 + $0xac0] sm:$0xff]  }
 0x106   : > { %7050 = vmatpush3.bf16.msra.mxu0 %v7709_v8  ;;  %v6182_v8 = vcombine.low %v248_v4, %v280_v7 }
 0x107   : > { %7072 = vmatpush3.bf16.msra.mxu1 %v7710_v9  ;;  %7079 = vmatprep.subr.bf16.mxu0 %v7711_v18  ;;  %v6183_v9 = vcombine.high %v248_v4, %v280_v7  ;;  %v7751_v18 = vld [vmem:[%s9705_s1 + $0x950] sm:$0xff]   ;;  %v7777_v4 = vld [vmem:[%s9705_s1 + $0xa00] sm:$0xff]   ;;  %v7780_v7 = vld [vmem:[%s9705_s1 + $0xac8] sm:$0xff]  }
 0x108   : > { %7101 = vmatprep.subr.bf16.mxu1 %v7712_v19  ;;  %v7752_v19 = vld [vmem:[%s9705_s1 + $0x9d0] sm:$0xff]  }
 0x109   : > { %5325 = vmatmul.mubr.bf16.vlgmr.msra.gmra.mrb[28].mxu0 %v6176_v14  ;;  %v7747_v14 = vld [vmem:[%s9705_s1 + $0x948] sm:$0xff]  }
 0x10a   : > { %5366 = vmatmul.mubr.bf16.vlgmr.msra.gmra.mrb[28].mxu1 %v6178_v16  ;;  %7080 = vmatpush3.bf16.msra.mxu0 %v7713_v20  ;;  %v7749_v16 = vld [vmem:[%s9705_s1 + $0x908] sm:$0xff]   ;;  %v7753_v20 = vld [vmem:[%s9705_s1 + $0x910] sm:$0xff]  }
 0x10b   : > { %7102 = vmatpush3.bf16.msra.mxu1 %v7714_v21  ;;  %7081 = vmatprep.subr.bf16.mxu0 %v7715_v22  ;;  %v7754_v21 = vld [vmem:[%s9705_s1 + $0x990] sm:$0xff]   ;;  %v7755_v22 = vld [vmem:[%s9705_s1 + $0x958] sm:$0xff]  }
 0x10c   : > { %7103 = vmatprep.subr.bf16.mxu1 %v7716_v23  ;;  %5406 = vmatprep.mubr.bf16.mxu0 %v6181_v6  ;;  %v7756_v23 = vld [vmem:[%s9705_s1 + $0x9d8] sm:$0xff]   ;;  %v7779_v6 = vld [vmem:[%s9705_s1 + $0xa48] sm:$0xff]  }
 0x10d   : > { %5447 = vmatprep.mubr.bf16.mxu1 %v6183_v9  ;;  %v7782_v9 = vld [vmem:[%s9705_s1 + $0xa88] sm:$0xff]  }
 0x10e   : > { %7082 = vmatpush3.bf16.msra.mxu0 %v7717_v24 }
 0x10f   : > { %7104 = vmatpush3.bf16.msra.mxu1 %v7718_v25  ;;  %7083 = vmatprep.subr.bf16.mxu0 %v7719_v26  ;;  %v7757_v25 = vld [vmem:[%s9705_s1 + $0x918] sm:$0xff]  }
 0x110   : > { %7105 = vmatprep.subr.bf16.mxu1 %v7720_v27  ;;  %v7758_v27 = vld [vmem:[%s9705_s1 + $0x998] sm:$0xff]  }
 0x112   : > { %7084 = vmatpush3.bf16.msra.mxu0 %v7721_v28 }
 0x113   : > { %7106 = vmatpush3.bf16.msra.mxu1 %v7722_v29  ;;  %7085 = vmatprep.subr.bf16.mxu0 %v7723_v30  ;;  %v7759_v29 = vld [vmem:[%s9705_s1 + $0x960] sm:$0xff]  }
 0x114   : > { %7107 = vmatprep.subr.bf16.mxu1 %v7724_v31 }
 0x116   : > { %7086 = vmatpush3.bf16.msra.mxu0 %v7725_v33 }
 0x117   : > { %7108 = vmatpush3.bf16.msra.mxu1 %v7726_v35  ;;  %7087 = vmatprep.subr.bf16.mxu0 %v7727_v37  ;;  %v7761_v35 = vld [vmem:[%s9705_s1 + $0x920] sm:$0xff]  }
 0x118   : > { %7109 = vmatprep.subr.bf16.mxu1 %v7728_v40 }
 0x11a   : > { %7088 = vmatpush3.bf16.msra.mxu0 %v7729_v43 }
 0x11b   : > { %7110 = vmatpush3.bf16.msra.mxu1 %v7730_v46  ;;  %7089 = vmatprep.subr.bf16.mxu0 %v7731_v49  ;;  %v7765_v46 = vld [vmem:[%s9705_s1 + $0x928] sm:$0xff]  }
 0x11c   : > { %v6787_v32 = vpop.f32.mrb[4].mxu0  ;;  %7111 = vmatprep.subr.bf16.mxu1 %v7732_v52  ;;  %v7769_v52 = vld [vmem:[%s9705_s1 + $0x930] sm:$0xff]  }
 0x11d   : > { %v6809_v34 = vpop.f32.mrb[4].mxu1  ;;  %v6788_v36 = vpop.f32.mrb[5].mxu0 }
 0x11e   : > { %v6789_v38 = vadd.f32 %v6788_v36, %v6787_v32  ;;  %v6810_v39 = vpop.f32.mrb[5].mxu1  ;;  %v6790_v42 = vpop.f32.mrb[6].mxu0  ;;  %7090 = vmatpush3.bf16.msra.mxu0 %v7733_v54  ;;  %v7760_v32 = vld [vmem:[%s9705_s1 + $0x9e0] sm:$0xff]   ;;  %v7771_v54 = vld [vmem:[%s9705_s1 + $0x978] sm:$0xff]  }
 0x11f   : > { %v6811_v41 = vadd.f32 %v6810_v39, %v6809_v34  ;;  %v6812_v45 = vpop.f32.mrb[6].mxu1  ;;  %v6791_v47 = vpop.f32.mrb[7].mxu0  ;;  %7112 = vmatpush3.bf16.msra.mxu1 %v7734_v56  ;;  %7091 = vmatprep.subr.bf16.mxu0 %v7735_v58  ;;  %v7773_v56 = vld [vmem:[%s9705_s1 + $0x938] sm:$0xff]   ;;  %v249_v58 = vld [vmem:[%s8131_s6 + $0x90] sm:$0xff] }
 0x120   : > { %v4835_v44 = vadd.f32 %v6789_v38, %v8809_v61  ;;  %v6792_v50 = vadd.f32 %v6791_v47, %v6790_v42  ;;  %v6813_v51 = vpop.f32.mrb[7].mxu1  ;;  %7113 = vmatprep.subr.bf16.mxu1 %v7736_v59  ;;  %v7738_v61 = vld [vmem:[%s9705_s1 + $0x8b0] sm:$0xff]   ;;  %v7762_v38 = vld [vmem:[%s9705_s1 + $0x9a0] sm:$0xff]  }
 0x121   : > { %v6814_v53 = vadd.f32 %v6813_v51, %v6812_v45  ;;  %v7768_v51 = vld [vmem:[%s9705_s1 + $0x9f0] sm:$0xff]  }
 0x122   : > { %v8908_v48 = vadd.f32 %v6811_v41, %v4835_v44  ;;  %v4838_v55 = vadd.f32 %v6792_v50, %v8817_v1  ;;  %7092 = vmatpush3.bf16.msra.mxu0 %v7737_v60  ;;  %v7742_v1 = vld [vmem:[%s9705_s1 + $0x8b8] sm:$0xff]   ;;  %v7763_v41 = vld [vmem:[%s9705_s1 + $0x968] sm:$0xff]   ;;  %v7767_v50 = vld [vmem:[%s9705_s1 + $0x970] sm:$0xff]  }
 0x123   : > { %7114 = vmatpush3.bf16.msra.mxu1 %v7738_v61  ;;  %7093 = vmatprep.subr.bf16.mxu0 %v7739_v62  ;;  %v7764_v44 = vld [vmem:[%s9705_s1 + $0x9e8] sm:$0xff]   ;;  %v281_v59 = vld [vmem:[%s8131_s6 + $0x190] sm:$0xff]  ;;  %v250_v62 = vld [vmem:[%s8131_s6 + $0x98] sm:$0xff] }
 0x124   : > { %v8923_v57 = vadd.f32 %v6814_v53, %v4838_v55  ;;  %7115 = vmatprep.subr.bf16.mxu1 %v7740_v63  ;;  %v7770_v53 = vld [vmem:[%s9705_s1 + $0x9b0] sm:$0xff]   ;;  %v7772_v55 = vld [vmem:[%s9705_s1 + $0x9f8] sm:$0xff]   ;;  %v6184_v60 = vcombine.low %v249_v58, %v281_v59  ;;  %v6185_v61 = vcombine.high %v249_v58, %v281_v59  ;;  %v7807_v58 = vld [vmem:[%s9705_s1 + $0xb40] sm:$0xff]  }
 0x125   : > { %v282_v63 = vld [vmem:[%s8131_s6 + $0x198] sm:$0xff]  ;;  %v7808_v59 = vld [vmem:[%s9705_s1 + $0xbc0] sm:$0xff]  }
 0x126   : > { %7094 = vmatpush3.bf16.msra.mxu0 %v7741_v0  ;;  %v6186_v0 = vcombine.low %v250_v62, %v282_v63 }
 0x127   : > { %7116 = vmatpush3.bf16.msra.mxu1 %v7742_v1  ;;  %7123 = vmatprep.subr.bf16.mxu0 %v7743_v10  ;;  %v6187_v1 = vcombine.high %v250_v62, %v282_v63  ;;  %v7783_v10 = vld [vmem:[%s9705_s1 + $0xa50] sm:$0xff]   ;;  %v7811_v62 = vld [vmem:[%s9705_s1 + $0xb48] sm:$0xff]  }
 0x128   : > { %7145 = vmatprep.subr.bf16.mxu1 %v7744_v11  ;;  %v7784_v11 = vld [vmem:[%s9705_s1 + $0xad0] sm:$0xff]   ;;  %v7812_v63 = vld [vmem:[%s9705_s1 + $0xbc8] sm:$0xff]  }
 0x129   : > { %5407 = vmatmul.mubr.bf16.vlgmr.msra.gmra.mrb[32].mxu0 %v6180_v5  ;;  %v7778_v5 = vld [vmem:[%s9705_s1 + $0xa80] sm:$0xff]  }
 0x12a   : > { %5448 = vmatmul.mubr.bf16.vlgmr.msra.gmra.mrb[32].mxu1 %v6182_v8  ;;  %7124 = vmatpush3.bf16.msra.mxu0 %v7745_v12  ;;  %v7781_v8 = vld [vmem:[%s9705_s1 + $0xa08] sm:$0xff]   ;;  %v7785_v12 = vld [vmem:[%s9705_s1 + $0xa10] sm:$0xff]  }
 0x12b   : > { %7146 = vmatpush3.bf16.msra.mxu1 %v7746_v13  ;;  %7125 = vmatprep.subr.bf16.mxu0 %v7747_v14  ;;  %v7786_v13 = vld [vmem:[%s9705_s1 + $0xa90] sm:$0xff]   ;;  %v7787_v14 = vld [vmem:[%s9705_s1 + $0xa58] sm:$0xff]  }
 0x12c   : > { %7147 = vmatprep.subr.bf16.mxu1 %v7748_v15  ;;  %5488 = vmatprep.mubr.bf16.mxu0 %v6185_v61  ;;  %v7788_v15 = vld [vmem:[%s9705_s1 + $0xad8] sm:$0xff]   ;;  %v7810_v61 = vld [vmem:[%s9705_s1 + $0xb80] sm:$0xff]  }
 0x12d   : > { %5529 = vmatprep.mubr.bf16.mxu1 %v6187_v1  ;;  %v7814_v1 = vld [vmem:[%s9705_s1 + $0xb88] sm:$0xff]  }
 0x12e   : > { %7126 = vmatpush3.bf16.msra.mxu0 %v7749_v16 }
 0x12f   : > { %7148 = vmatpush3.bf16.msra.mxu1 %v7750_v17  ;;  %7127 = vmatprep.subr.bf16.mxu0 %v7751_v18  ;;  %v7789_v17 = vld [vmem:[%s9705_s1 + $0xa18] sm:$0xff]  }
 0x130   : > { %7149 = vmatprep.subr.bf16.mxu1 %v7752_v19  ;;  %v7790_v19 = vld [vmem:[%s9705_s1 + $0xa98] sm:$0xff]  }
 0x132   : > { %7128 = vmatpush3.bf16.msra.mxu0 %v7753_v20 }
 0x133   : > { %7150 = vmatpush3.bf16.msra.mxu1 %v7754_v21  ;;  %7129 = vmatprep.subr.bf16.mxu0 %v7755_v22  ;;  %v7791_v21 = vld [vmem:[%s9705_s1 + $0xa60] sm:$0xff]  }
 0x134   : > { %7151 = vmatprep.subr.bf16.mxu1 %v7756_v23 }
 0x136   : > { %7130 = vmatpush3.bf16.msra.mxu0 %v7757_v25 }
 0x137   : > { %7152 = vmatpush3.bf16.msra.mxu1 %v7758_v27  ;;  %7131 = vmatprep.subr.bf16.mxu0 %v7759_v29  ;;  %v7793_v27 = vld [vmem:[%s9705_s1 + $0xa20] sm:$0xff]  }
 0x138   : > { %7153 = vmatprep.subr.bf16.mxu1 %v7760_v32 }
 0x13a   : > { %7132 = vmatpush3.bf16.msra.mxu0 %v7761_v35 }
 0x13b   : > { %7154 = vmatpush3.bf16.msra.mxu1 %v7762_v38  ;;  %7133 = vmatprep.subr.bf16.mxu0 %v7763_v41  ;;  %v7797_v38 = vld [vmem:[%s9705_s1 + $0xa28] sm:$0xff]  }
 0x13c   : > { %v6831_v24 = vpop.f32.mrb[8].mxu0  ;;  %7155 = vmatprep.subr.bf16.mxu1 %v7764_v44  ;;  %v7801_v44 = vld [vmem:[%s9705_s1 + $0xa30] sm:$0xff]  }
 0x13d   : > { %v6853_v26 = vpop.f32.mrb[8].mxu1  ;;  %v6832_v28 = vpop.f32.mrb[9].mxu0 }
 0x13e   : > { %v6833_v30 = vadd.f32 %v6832_v28, %v6831_v24  ;;  %v6854_v31 = vpop.f32.mrb[9].mxu1  ;;  %v6834_v34 = vpop.f32.mrb[10].mxu0  ;;  %7134 = vmatpush3.bf16.msra.mxu0 %v7765_v46  ;;  %v7792_v24 = vld [vmem:[%s9705_s1 + $0xae0] sm:$0xff]   ;;  %v7803_v46 = vld [vmem:[%s9705_s1 + $0xa78] sm:$0xff]  }
 0x13f   : > { %v6855_v33 = vadd.f32 %v6854_v31, %v6853_v26  ;;  %v6856_v37 = vpop.f32.mrb[10].mxu1  ;;  %v6835_v39 = vpop.f32.mrb[11].mxu0  ;;  %7135 = vmatprep.subr.bf16.mxu0 %v7767_v50  ;;  %v251_v50 = vld [vmem:[%s8131_s6 + $0xa0] sm:$0xff] }
 0x140   : > { %v4917_v36 = vadd.f32 %v6833_v30, %v8908_v48  ;;  %v6836_v42 = vadd.f32 %v6835_v39, %v6834_v34  ;;  %v6857_v43 = vpop.f32.mrb[11].mxu1  ;;  %v7766_v48 = vld [vmem:[%s9705_s1 + $0x9a8] sm:$0xff]   ;;  %v7794_v30 = vld [vmem:[%s9705_s1 + $0xaa0] sm:$0xff]  }
 0x141   : > { %v6858_v45 = vadd.f32 %v6857_v43, %v6856_v37  ;;  %7156 = vmatpush3.bf16.msra.mxu1 %v7766_v48  ;;  %v7800_v43 = vld [vmem:[%s9705_s1 + $0xaf0] sm:$0xff]   ;;  %v7805_v48 = vld [vmem:[%s9705_s1 + $0xa38] sm:$0xff]  }
 0x142   : > { %v9014_v40 = vadd.f32 %v6855_v33, %v4917_v36  ;;  %v4920_v47 = vadd.f32 %v6836_v42, %v8923_v57  ;;  %7157 = vmatprep.subr.bf16.mxu1 %v7768_v51  ;;  %7136 = vmatpush3.bf16.msra.mxu0 %v7769_v52  ;;  %v7774_v57 = vld [vmem:[%s9705_s1 + $0x9b8] sm:$0xff]   ;;  %v7795_v33 = vld [vmem:[%s9705_s1 + $0xa68] sm:$0xff]   ;;  %v7799_v42 = vld [vmem:[%s9705_s1 + $0xa70] sm:$0xff]  }
 0x143   : > { %7137 = vmatprep.subr.bf16.mxu0 %v7771_v54  ;;  %v7796_v36 = vld [vmem:[%s9705_s1 + $0xae8] sm:$0xff]   ;;  %v283_v51 = vld [vmem:[%s8131_s6 + $0x1a0] sm:$0xff] }
 0x144   : > { %v9029_v49 = vadd.f32 %v6858_v45, %v4920_v47  ;;  %v7802_v45 = vld [vmem:[%s9705_s1 + $0xab0] sm:$0xff]   ;;  %v7804_v47 = vld [vmem:[%s9705_s1 + $0xaf8] sm:$0xff]   ;;  %v252_v52 = vld [vmem:[%s8131_s6 + $0xa8] sm:$0xff]  ;;  %v6188_v54 = vcombine.low %v251_v50, %v283_v51 }
 0x145   : > { %7158 = vmatpush3.bf16.msra.mxu1 %v7770_v53  ;;  %v284_v53 = vld [vmem:[%s8131_s6 + $0x1a8] sm:$0xff] }
 0x146   : > { %7159 = vmatprep.subr.bf16.mxu1 %v7772_v55  ;;  %7138 = vmatpush3.bf16.msra.mxu0 %v7773_v56  ;;  %v6189_v55 = vcombine.high %v251_v50, %v283_v51  ;;  %v6190_v56 = vcombine.low %v252_v52, %v284_v53  ;;  %v7839_v50 = vld [vmem:[%s9705_s1 + $0xc40] sm:$0xff]  }
 0x147   : > { %7167 = vmatprep.subr.bf16.mxu0 %v7775_v2  ;;  %v7815_v2 = vld [vmem:[%s9705_s1 + $0xb50] sm:$0xff]   ;;  %v7840_v51 = vld [vmem:[%s9705_s1 + $0xcc0] sm:$0xff]  }
 0x149   : > { %7160 = vmatpush3.bf16.msra.mxu1 %v7774_v57  ;;  %5489 = vmatmul.mubr.bf16.vlgmr.msra.gmra.mrb[36].mxu0 %v6184_v60  ;;  %v6191_v57 = vcombine.high %v252_v52, %v284_v53  ;;  %v7809_v60 = vld [vmem:[%s9705_s1 + $0xb00] sm:$0xff]  }
 0x14a   : > { %7189 = vmatprep.subr.bf16.mxu1 %v7776_v3  ;;  %7168 = vmatpush3.bf16.msra.mxu0 %v7777_v4  ;;  %v7816_v3 = vld [vmem:[%s9705_s1 + $0xbd0] sm:$0xff]   ;;  %v7841_v52 = vld [vmem:[%s9705_s1 + $0xc00] sm:$0xff]  }
 0x14b   : > { %7169 = vmatprep.subr.bf16.mxu0 %v7779_v6  ;;  %5570 = vmatprep.mubr.bf16.mxu0 %v6189_v55  ;;  %v7817_v4 = vld [vmem:[%s9705_s1 + $0xb10] sm:$0xff]   ;;  %v7819_v6 = vld [vmem:[%s9705_s1 + $0xb58] sm:$0xff]   ;;  %v7842_v53 = vld [vmem:[%s9705_s1 + $0xc80] sm:$0xff]  }
 0x14c   : > { %5530 = vmatmul.mubr.bf16.vlgmr.msra.gmra.mrb[36].mxu1 %v6186_v0  ;;  %v7813_v0 = vld [vmem:[%s9705_s1 + $0xb08] sm:$0xff]  }
 0x14d   : > { %7190 = vmatpush3.bf16.msra.mxu1 %v7778_v5  ;;  %5611 = vmatprep.mubr.bf16.mxu1 %v6191_v57  ;;  %v7818_v5 = vld [vmem:[%s9705_s1 + $0xb90] sm:$0xff]   ;;  %v7844_v55 = vld [vmem:[%s9705_s1 + $0xcc8] sm:$0xff]  }
 0x14e   : > { %7191 = vmatprep.subr.bf16.mxu1 %v7780_v7  ;;  %7170 = vmatpush3.bf16.msra.mxu0 %v7781_v8  ;;  %v7820_v7 = vld [vmem:[%s9705_s1 + $0xbd8] sm:$0xff]   ;;  %v7846_v57 = vld [vmem:[%s9705_s1 + $0xc88] sm:$0xff]  }
 0x14f   : > { %7171 = vmatprep.subr.bf16.mxu0 %v7783_v10 }
 0x151   : > { %7192 = vmatpush3.bf16.msra.mxu1 %v7782_v9  ;;  %v7821_v9 = vld [vmem:[%s9705_s1 + $0xb18] sm:$0xff]  }
 0x152   : > { %7193 = vmatprep.subr.bf16.mxu1 %v7784_v11  ;;  %7172 = vmatpush3.bf16.msra.mxu0 %v7785_v12  ;;  %v7822_v11 = vld [vmem:[%s9705_s1 + $0xb98] sm:$0xff]  }
 0x153   : > { %7173 = vmatprep.subr.bf16.mxu0 %v7787_v14 }
 0x155   : > { %7194 = vmatpush3.bf16.msra.mxu1 %v7786_v13  ;;  %v7823_v13 = vld [vmem:[%s9705_s1 + $0xb60] sm:$0xff]  }
 0x156   : > { %7195 = vmatprep.subr.bf16.mxu1 %v7788_v15  ;;  %7174 = vmatpush3.bf16.msra.mxu0 %v7789_v17 }
 0x157   : > { %7175 = vmatprep.subr.bf16.mxu0 %v7791_v21 }
 0x159   : > { %7196 = vmatpush3.bf16.msra.mxu1 %v7790_v19  ;;  %v7825_v19 = vld [vmem:[%s9705_s1 + $0xb20] sm:$0xff]  }
 0x15a   : > { %7197 = vmatprep.subr.bf16.mxu1 %v7792_v24  ;;  %7176 = vmatpush3.bf16.msra.mxu0 %v7793_v27 }
 0x15b   : > { %7177 = vmatprep.subr.bf16.mxu0 %v7795_v33 }
 0x15c   : > { %v6875_v16 = vpop.f32.mrb[12].mxu0 }
 0x15d   : > { %v6897_v18 = vpop.f32.mrb[12].mxu1  ;;  %v6876_v20 = vpop.f32.mrb[13].mxu0  ;;  %7198 = vmatpush3.bf16.msra.mxu1 %v7794_v30  ;;  %v7829_v30 = vld [vmem:[%s9705_s1 + $0xb28] sm:$0xff]  }
 0x15e   : > { %v6877_v22 = vadd.f32 %v6876_v20, %v6875_v16  ;;  %v6898_v23 = vpop.f32.mrb[13].mxu1  ;;  %v6878_v26 = vpop.f32.mrb[14].mxu0  ;;  %7199 = vmatprep.subr.bf16.mxu1 %v7796_v36  ;;  %7178 = vmatpush3.bf16.msra.mxu0 %v7797_v38  ;;  %v7824_v16 = vld [vmem:[%s9705_s1 + $0xbe0] sm:$0xff]   ;;  %v7833_v36 = vld [vmem:[%s9705_s1 + $0xb30] sm:$0xff]   ;;  %v7835_v38 = vld [vmem:[%s9705_s1 + $0xb78] sm:$0xff]  }
 0x15f   : > { %v6899_v25 = vadd.f32 %v6898_v23, %v6897_v18  ;;  %v6900_v29 = vpop.f32.mrb[14].mxu1  ;;  %v6879_v31 = vpop.f32.mrb[15].mxu0  ;;  %7179 = vmatprep.subr.bf16.mxu0 %v7799_v42  ;;  %v253_v42 = vld [vmem:[%s8131_s6 + $0xb0] sm:$0xff] }
 0x160   : > { %v4999_v28 = vadd.f32 %v6877_v22, %v9014_v40  ;;  %v6880_v34 = vadd.f32 %v6879_v31, %v6878_v26  ;;  %v6901_v35 = vpop.f32.mrb[15].mxu1  ;;  %v7798_v40 = vld [vmem:[%s9705_s1 + $0xaa8] sm:$0xff]   ;;  %v7826_v22 = vld [vmem:[%s9705_s1 + $0xba0] sm:$0xff]  }
 0x161   : > { %v6902_v37 = vadd.f32 %v6901_v35, %v6900_v29  ;;  %7200 = vmatpush3.bf16.msra.mxu1 %v7798_v40  ;;  %v7832_v35 = vld [vmem:[%s9705_s1 + $0xbf0] sm:$0xff]   ;;  %v7837_v40 = vld [vmem:[%s9705_s1 + $0xb38] sm:$0xff]  }
 0x162   : > { %v9120_v32 = vadd.f32 %v6899_v25, %v4999_v28  ;;  %v5002_v39 = vadd.f32 %v6880_v34, %v9029_v49  ;;  %7201 = vmatprep.subr.bf16.mxu1 %v7800_v43  ;;  %7180 = vmatpush3.bf16.msra.mxu0 %v7801_v44  ;;  %v7806_v49 = vld [vmem:[%s9705_s1 + $0xab8] sm:$0xff]   ;;  %v7827_v25 = vld [vmem:[%s9705_s1 + $0xb68] sm:$0xff]   ;;  %v7831_v34 = vld [vmem:[%s9705_s1 + $0xb70] sm:$0xff]  }
 0x163   : > { %7181 = vmatprep.subr.bf16.mxu0 %v7803_v46  ;;  %v7828_v28 = vld [vmem:[%s9705_s1 + $0xbe8] sm:$0xff]   ;;  %v285_v43 = vld [vmem:[%s8131_s6 + $0x1b0] sm:$0xff]  ;;  %v254_v44 = vld [vmem:[%s8131_s6 + $0xb8] sm:$0xff] }
 0x164   : > { %v9135_v41 = vadd.f32 %v6902_v37, %v5002_v39  ;;  %v7834_v37 = vld [vmem:[%s9705_s1 + $0xbb0] sm:$0xff]   ;;  %v7836_v39 = vld [vmem:[%s9705_s1 + $0xbf8] sm:$0xff]   ;;  %v6193_v46 = vcombine.high %v253_v42, %v285_v43 }
 0x165   : > { %7202 = vmatpush3.bf16.msra.mxu1 %v7802_v45  ;;  %v6192_v45 = vcombine.low %v253_v42, %v285_v43  ;;  %v7871_v42 = vld [vmem:[%s9705_s1 + $0xd40] sm:$0xff]  }
 0x166   : > { %7203 = vmatprep.subr.bf16.mxu1 %v7804_v47  ;;  %7182 = vmatpush3.bf16.msra.mxu0 %v7805_v48  ;;  %v286_v47 = vld [vmem:[%s8131_s6 + $0x1b8] sm:$0xff]  ;;  %v7872_v43 = vld [vmem:[%s9705_s1 + $0xdc0] sm:$0xff]  }
 0x167   : > { %7211 = vmatprep.subr.bf16.mxu0 %v7807_v58  ;;  %v6194_v48 = vcombine.low %v254_v44, %v286_v47  ;;  %v7847_v58 = vld [vmem:[%s9705_s1 + $0xc50] sm:$0xff]  }
 0x169   : > { %7204 = vmatpush3.bf16.msra.mxu1 %v7806_v49  ;;  %5571 = vmatmul.mubr.bf16.vlgmr.msra.gmra.mrb[40].mxu0 %v6188_v54  ;;  %v6195_v49 = vcombine.high %v254_v44, %v286_v47  ;;  %v7843_v54 = vld [vmem:[%s9705_s1 + $0xc48] sm:$0xff]   ;;  %v7873_v44 = vld [vmem:[%s9705_s1 + $0xd00] sm:$0xff]  }
 0x16a   : > { %7233 = vmatprep.subr.bf16.mxu1 %v7808_v59  ;;  %7212 = vmatpush3.bf16.msra.mxu0 %v7809_v60  ;;  %v7848_v59 = vld [vmem:[%s9705_s1 + $0xcd0] sm:$0xff]   ;;  %v7876_v47 = vld [vmem:[%s9705_s1 + $0xdc8] sm:$0xff]  }
 0x16b   : > { %7213 = vmatprep.subr.bf16.mxu0 %v7811_v62  ;;  %5652 = vmatprep.mubr.bf16.mxu0 %v6193_v46  ;;  %v7849_v60 = vld [vmem:[%s9705_s1 + $0xc10] sm:$0xff]   ;;  %v7851_v62 = vld [vmem:[%s9705_s1 + $0xc58] sm:$0xff]   ;;  %v7875_v46 = vld [vmem:[%s9705_s1 + $0xd48] sm:$0xff]  }
 0x16c   : > { %5612 = vmatmul.mubr.bf16.vlgmr.msra.gmra.mrb[40].mxu1 %v6190_v56  ;;  %v7845_v56 = vld [vmem:[%s9705_s1 + $0xc08] sm:$0xff]  }
 0x16d   : > { %7234 = vmatpush3.bf16.msra.mxu1 %v7810_v61  ;;  %5693 = vmatprep.mubr.bf16.mxu1 %v6195_v49  ;;  %v7850_v61 = vld [vmem:[%s9705_s1 + $0xc90] sm:$0xff]   ;;  %v7878_v49 = vld [vmem:[%s9705_s1 + $0xd88] sm:$0xff]  }
 0x16e   : > { %7235 = vmatprep.subr.bf16.mxu1 %v7812_v63  ;;  %7214 = vmatpush3.bf16.msra.mxu0 %v7813_v0  ;;  %v7852_v63 = vld [vmem:[%s9705_s1 + $0xcd8] sm:$0xff]  }
 0x16f   : > { %7215 = vmatprep.subr.bf16.mxu0 %v7815_v2 }
 0x171   : > { %7236 = vmatpush3.bf16.msra.mxu1 %v7814_v1  ;;  %v7853_v1 = vld [vmem:[%s9705_s1 + $0xc18] sm:$0xff]  }
 0x172   : > { %7237 = vmatprep.subr.bf16.mxu1 %v7816_v3  ;;  %7216 = vmatpush3.bf16.msra.mxu0 %v7817_v4  ;;  %v7854_v3 = vld [vmem:[%s9705_s1 + $0xc98] sm:$0xff]  }
 0x173   : > { %7217 = vmatprep.subr.bf16.mxu0 %v7819_v6 }
 0x175   : > { %7238 = vmatpush3.bf16.msra.mxu1 %v7818_v5  ;;  %v7855_v5 = vld [vmem:[%s9705_s1 + $0xc60] sm:$0xff]  }
 0x176   : > { %7239 = vmatprep.subr.bf16.mxu1 %v7820_v7  ;;  %7218 = vmatpush3.bf16.msra.mxu0 %v7821_v9 }
 0x177   : > { %7219 = vmatprep.subr.bf16.mxu0 %v7823_v13 }
 0x179   : > { %7240 = vmatpush3.bf16.msra.mxu1 %v7822_v11  ;;  %v7857_v11 = vld [vmem:[%s9705_s1 + $0xc20] sm:$0xff]  }
 0x17a   : > { %7241 = vmatprep.subr.bf16.mxu1 %v7824_v16  ;;  %7220 = vmatpush3.bf16.msra.mxu0 %v7825_v19 }
 0x17b   : > { %7221 = vmatprep.subr.bf16.mxu0 %v7827_v25 }
 0x17c   : > { %v6919_v8 = vpop.f32.mrb[16].mxu0 }
 0x17d   : > { %v6941_v10 = vpop.f32.mrb[16].mxu1  ;;  %v6920_v12 = vpop.f32.mrb[17].mxu0  ;;  %7242 = vmatpush3.bf16.msra.mxu1 %v7826_v22  ;;  %v7861_v22 = vld [vmem:[%s9705_s1 + $0xc28] sm:$0xff]  }
 0x17e   : > { %v6921_v14 = vadd.f32 %v6920_v12, %v6919_v8  ;;  %v6942_v15 = vpop.f32.mrb[17].mxu1  ;;  %v6922_v18 = vpop.f32.mrb[18].mxu0  ;;  %7243 = vmatprep.subr.bf16.mxu1 %v7828_v28  ;;  %7222 = vmatpush3.bf16.msra.mxu0 %v7829_v30  ;;  %v7856_v8 = vld [vmem:[%s9705_s1 + $0xce0] sm:$0xff]   ;;  %v7865_v28 = vld [vmem:[%s9705_s1 + $0xc30] sm:$0xff]   ;;  %v7867_v30 = vld [vmem:[%s9705_s1 + $0xc78] sm:$0xff]  }
 0x17f   : > { %v6943_v17 = vadd.f32 %v6942_v15, %v6941_v10  ;;  %v6944_v21 = vpop.f32.mrb[18].mxu1  ;;  %v6923_v23 = vpop.f32.mrb[19].mxu0  ;;  %7223 = vmatprep.subr.bf16.mxu0 %v7831_v34  ;;  %v255_v34 = vld [vmem:[%s8131_s6 + $0xc0] sm:$0xff] }
 0x180   : > { %v5081_v20 = vadd.f32 %v6921_v14, %v9120_v32  ;;  %v6924_v26 = vadd.f32 %v6923_v23, %v6922_v18  ;;  %v6945_v27 = vpop.f32.mrb[19].mxu1  ;;  %v7830_v32 = vld [vmem:[%s9705_s1 + $0xba8] sm:$0xff]   ;;  %v7858_v14 = vld [vmem:[%s9705_s1 + $0xca0] sm:$0xff]  }
 0x181   : > { %v6946_v29 = vadd.f32 %v6945_v27, %v6944_v21  ;;  %7244 = vmatpush3.bf16.msra.mxu1 %v7830_v32  ;;  %v7864_v27 = vld [vmem:[%s9705_s1 + $0xcf0] sm:$0xff]   ;;  %v7869_v32 = vld [vmem:[%s9705_s1 + $0xc38] sm:$0xff]  }
 0x182   : > { %v9226_v24 = vadd.f32 %v6943_v17, %v5081_v20  ;;  %v5084_v31 = vadd.f32 %v6924_v26, %v9135_v41  ;;  %7245 = vmatprep.subr.bf16.mxu1 %v7832_v35  ;;  %7224 = vmatpush3.bf16.msra.mxu0 %v7833_v36  ;;  %v7838_v41 = vld [vmem:[%s9705_s1 + $0xbb8] sm:$0xff]   ;;  %v7859_v17 = vld [vmem:[%s9705_s1 + $0xc68] sm:$0xff]   ;;  %v7863_v26 = vld [vmem:[%s9705_s1 + $0xc70] sm:$0xff]  }
 0x183   : > { %7225 = vmatprep.subr.bf16.mxu0 %v7835_v38  ;;  %v7860_v20 = vld [vmem:[%s9705_s1 + $0xce8] sm:$0xff]   ;;  %v287_v35 = vld [vmem:[%s8131_s6 + $0x1c0] sm:$0xff] }
 0x184   : > { %v9241_v33 = vadd.f32 %v6946_v29, %v5084_v31  ;;  %v7866_v29 = vld [vmem:[%s9705_s1 + $0xcb0] sm:$0xff]   ;;  %v7868_v31 = vld [vmem:[%s9705_s1 + $0xcf8] sm:$0xff]   ;;  %v6196_v36 = vcombine.low %v255_v34, %v287_v35  ;;  %v256_v38 = vld [vmem:[%s8131_s6 + $0xc8] sm:$0xff] }
 0x185   : > { %7246 = vmatpush3.bf16.msra.mxu1 %v7834_v37  ;;  %v6197_v37 = vcombine.high %v255_v34, %v287_v35  ;;  %v7903_v34 = vld [vmem:[%s9705_s1 + $0xe40] sm:$0xff]  }
 0x186   : > { %7247 = vmatprep.subr.bf16.mxu1 %v7836_v39  ;;  %7226 = vmatpush3.bf16.msra.mxu0 %v7837_v40  ;;  %v288_v39 = vld [vmem:[%s8131_s6 + $0x1c8] sm:$0xff]  ;;  %v7904_v35 = vld [vmem:[%s9705_s1 + $0xec0] sm:$0xff]  }
 0x187   : > { %7255 = vmatprep.subr.bf16.mxu0 %v7839_v50  ;;  %v6198_v40 = vcombine.low %v256_v38, %v288_v39  ;;  %v7879_v50 = vld [vmem:[%s9705_s1 + $0xd50] sm:$0xff]  }
 0x189   : > { %7248 = vmatpush3.bf16.msra.mxu1 %v7838_v41  ;;  %5653 = vmatmul.mubr.bf16.vlgmr.msra.gmra.mrb[44].mxu0 %v6192_v45  ;;  %v6199_v41 = vcombine.high %v256_v38, %v288_v39  ;;  %v7874_v45 = vld [vmem:[%s9705_s1 + $0xd80] sm:$0xff]   ;;  %v7907_v38 = vld [vmem:[%s9705_s1 + $0xe48] sm:$0xff]  }
 0x18a   : > { %7277 = vmatprep.subr.bf16.mxu1 %v7840_v51  ;;  %7256 = vmatpush3.bf16.msra.mxu0 %v7841_v52  ;;  %v7880_v51 = vld [vmem:[%s9705_s1 + $0xdd0] sm:$0xff]   ;;  %v7908_v39 = vld [vmem:[%s9705_s1 + $0xec8] sm:$0xff]  }
 0x18b   : > { %7257 = vmatprep.subr.bf16.mxu0 %v7843_v54  ;;  %5734 = vmatprep.mubr.bf16.mxu0 %v6197_v37  ;;  %v7881_v52 = vld [vmem:[%s9705_s1 + $0xd10] sm:$0xff]   ;;  %v7883_v54 = vld [vmem:[%s9705_s1 + $0xd58] sm:$0xff]   ;;  %v7906_v37 = vld [vmem:[%s9705_s1 + $0xe80] sm:$0xff]  }
 0x18c   : > { %5694 = vmatmul.mubr.bf16.vlgmr.msra.gmra.mrb[44].mxu1 %v6194_v48  ;;  %v7877_v48 = vld [vmem:[%s9705_s1 + $0xd08] sm:$0xff]  }
 0x18d   : > { %7278 = vmatpush3.bf16.msra.mxu1 %v7842_v53  ;;  %5775 = vmatprep.mubr.bf16.mxu1 %v6199_v41  ;;  %v7882_v53 = vld [vmem:[%s9705_s1 + $0xd90] sm:$0xff]   ;;  %v7910_v41 = vld [vmem:[%s9705_s1 + $0xe88] sm:$0xff]  }
 0x18e   : > { %7279 = vmatprep.subr.bf16.mxu1 %v7844_v55  ;;  %7258 = vmatpush3.bf16.msra.mxu0 %v7845_v56  ;;  %v7884_v55 = vld [vmem:[%s9705_s1 + $0xdd8] sm:$0xff]  }
 0x18f   : > { %7259 = vmatprep.subr.bf16.mxu0 %v7847_v58 }
 0x191   : > { %7280 = vmatpush3.bf16.msra.mxu1 %v7846_v57  ;;  %v7885_v57 = vld [vmem:[%s9705_s1 + $0xd18] sm:$0xff]  }
 0x192   : > { %7281 = vmatprep.subr.bf16.mxu1 %v7848_v59  ;;  %7260 = vmatpush3.bf16.msra.mxu0 %v7849_v60  ;;  %v7886_v59 = vld [vmem:[%s9705_s1 + $0xd98] sm:$0xff]  }
 0x193   : > { %7261 = vmatprep.subr.bf16.mxu0 %v7851_v62 }
 0x195   : > { %7282 = vmatpush3.bf16.msra.mxu1 %v7850_v61  ;;  %v7887_v61 = vld [vmem:[%s9705_s1 + $0xd60] sm:$0xff]  }
 0x196   : > { %7283 = vmatprep.subr.bf16.mxu1 %v7852_v63  ;;  %7262 = vmatpush3.bf16.msra.mxu0 %v7853_v1 }
 0x197   : > { %7263 = vmatprep.subr.bf16.mxu0 %v7855_v5 }
 0x199   : > { %7284 = vmatpush3.bf16.msra.mxu1 %v7854_v3  ;;  %v7889_v3 = vld [vmem:[%s9705_s1 + $0xd20] sm:$0xff]  }
 0x19a   : > { %7285 = vmatprep.subr.bf16.mxu1 %v7856_v8  ;;  %7264 = vmatpush3.bf16.msra.mxu0 %v7857_v11 }
 0x19b   : > { %7265 = vmatprep.subr.bf16.mxu0 %v7859_v17 }
 0x19c   : > { %v6963_v0 = vpop.f32.mrb[20].mxu0 }
 0x19d   : > { %v6985_v2 = vpop.f32.mrb[20].mxu1  ;;  %v6964_v4 = vpop.f32.mrb[21].mxu0  ;;  %7286 = vmatpush3.bf16.msra.mxu1 %v7858_v14  ;;  %v7893_v14 = vld [vmem:[%s9705_s1 + $0xd28] sm:$0xff]  }
 0x19e   : > { %v6965_v6 = vadd.f32 %v6964_v4, %v6963_v0  ;;  %v6986_v7 = vpop.f32.mrb[21].mxu1  ;;  %v6966_v10 = vpop.f32.mrb[22].mxu0  ;;  %7287 = vmatprep.subr.bf16.mxu1 %v7860_v20  ;;  %7266 = vmatpush3.bf16.msra.mxu0 %v7861_v22  ;;  %v7888_v0 = vld [vmem:[%s9705_s1 + $0xde0] sm:$0xff]   ;;  %v7897_v20 = vld [vmem:[%s9705_s1 + $0xd30] sm:$0xff]   ;;  %v7899_v22 = vld [vmem:[%s9705_s1 + $0xd78] sm:$0xff]  }
 0x19f   : > { %v6987_v9 = vadd.f32 %v6986_v7, %v6985_v2  ;;  %v6988_v13 = vpop.f32.mrb[22].mxu1  ;;  %v6967_v15 = vpop.f32.mrb[23].mxu0  ;;  %7267 = vmatprep.subr.bf16.mxu0 %v7863_v26  ;;  %v257_v26 = vld [vmem:[%s8131_s6 + $0xd0] sm:$0xff] }
 0x1a0   : > { %v5163_v12 = vadd.f32 %v6965_v6, %v9226_v24  ;;  %v6968_v18 = vadd.f32 %v6967_v15, %v6966_v10  ;;  %v6989_v19 = vpop.f32.mrb[23].mxu1  ;;  %v7862_v24 = vld [vmem:[%s9705_s1 + $0xca8] sm:$0xff]   ;;  %v7890_v6 = vld [vmem:[%s9705_s1 + $0xda0] sm:$0xff]  }
 0x1a1   : > { %v6990_v21 = vadd.f32 %v6989_v19, %v6988_v13  ;;  %7288 = vmatpush3.bf16.msra.mxu1 %v7862_v24  ;;  %v7896_v19 = vld [vmem:[%s9705_s1 + $0xdf0] sm:$0xff]   ;;  %v7901_v24 = vld [vmem:[%s9705_s1 + $0xd38] sm:$0xff]  }
 0x1a2   : > { %v9332_v16 = vadd.f32 %v6987_v9, %v5163_v12  ;;  %v5166_v23 = vadd.f32 %v6968_v18, %v9241_v33  ;;  %7289 = vmatprep.subr.bf16.mxu1 %v7864_v27  ;;  %7268 = vmatpush3.bf16.msra.mxu0 %v7865_v28  ;;  %v7870_v33 = vld [vmem:[%s9705_s1 + $0xcb8] sm:$0xff]   ;;  %v7891_v9 = vld [vmem:[%s9705_s1 + $0xd68] sm:$0xff]   ;;  %v7895_v18 = vld [vmem:[%s9705_s1 + $0xd70] sm:$0xff]  }
 0x1a3   : > { %7269 = vmatprep.subr.bf16.mxu0 %v7867_v30  ;;  %v7892_v12 = vld [vmem:[%s9705_s1 + $0xde8] sm:$0xff]   ;;  %v289_v27 = vld [vmem:[%s8131_s6 + $0x1d0] sm:$0xff]  ;;  %v258_v28 = vld [vmem:[%s8131_s6 + $0xd8] sm:$0xff] }
 0x1a4   : > { %v9347_v25 = vadd.f32 %v6990_v21, %v5166_v23  ;;  %v7898_v21 = vld [vmem:[%s9705_s1 + $0xdb0] sm:$0xff]   ;;  %v7900_v23 = vld [vmem:[%s9705_s1 + $0xdf8] sm:$0xff]   ;;  %v6200_v30 = vcombine.low %v257_v26, %v289_v27 }
 0x1a5   : > { %7290 = vmatpush3.bf16.msra.mxu1 %v7866_v29  ;;  %v290_v29 = vld [vmem:[%s8131_s6 + $0x1d8] sm:$0xff] }
 0x1a6   : > { %7291 = vmatprep.subr.bf16.mxu1 %v7868_v31  ;;  %7270 = vmatpush3.bf16.msra.mxu0 %v7869_v32  ;;  %v6201_v31 = vcombine.high %v257_v26, %v289_v27  ;;  %v6202_v32 = vcombine.low %v258_v28, %v290_v29  ;;  %v7935_v26 = vld [vmem:[%s9705_s1 + $0xf40] sm:$0xff]  }
 0x1a7   : > { %7299 = vmatprep.subr.bf16.mxu0 %v7871_v42  ;;  %v7911_v42 = vld [vmem:[%s9705_s1 + $0xe50] sm:$0xff]   ;;  %v7936_v27 = vld [vmem:[%s9705_s1 + $0xfc0] sm:$0xff]  }
 0x1a9   : > { %7292 = vmatpush3.bf16.msra.mxu1 %v7870_v33  ;;  %5735 = vmatmul.mubr.bf16.vlgmr.msra.gmra.mrb[48].mxu0 %v6196_v36  ;;  %v6203_v33 = vcombine.high %v258_v28, %v290_v29  ;;  %v7905_v36 = vld [vmem:[%s9705_s1 + $0xe00] sm:$0xff]  }
 0x1aa   : > { %7321 = vmatprep.subr.bf16.mxu1 %v7872_v43  ;;  %7300 = vmatpush3.bf16.msra.mxu0 %v7873_v44  ;;  %v7912_v43 = vld [vmem:[%s9705_s1 + $0xed0] sm:$0xff]   ;;  %v7937_v28 = vld [vmem:[%s9705_s1 + $0xf00] sm:$0xff]  }
 0x1ab   : > { %7301 = vmatprep.subr.bf16.mxu0 %v7875_v46  ;;  %5816 = vmatprep.mubr.bf16.mxu0 %v6201_v31  ;;  %v7913_v44 = vld [vmem:[%s9705_s1 + $0xe10] sm:$0xff]   ;;  %v7915_v46 = vld [vmem:[%s9705_s1 + $0xe58] sm:$0xff]   ;;  %v7938_v29 = vld [vmem:[%s9705_s1 + $0xf80] sm:$0xff]  }
 0x1ac   : > { %5776 = vmatmul.mubr.bf16.vlgmr.msra.gmra.mrb[48].mxu1 %v6198_v40  ;;  %v7909_v40 = vld [vmem:[%s9705_s1 + $0xe08] sm:$0xff]  }
 0x1ad   : > { %7322 = vmatpush3.bf16.msra.mxu1 %v7874_v45  ;;  %5857 = vmatprep.mubr.bf16.mxu1 %v6203_v33  ;;  %v7914_v45 = vld [vmem:[%s9705_s1 + $0xe90] sm:$0xff]   ;;  %v7940_v31 = vld [vmem:[%s9705_s1 + $0xfc8] sm:$0xff]  }
 0x1ae   : > { %7323 = vmatprep.subr.bf16.mxu1 %v7876_v47  ;;  %7302 = vmatpush3.bf16.msra.mxu0 %v7877_v48  ;;  %v7916_v47 = vld [vmem:[%s9705_s1 + $0xed8] sm:$0xff]   ;;  %v7942_v33 = vld [vmem:[%s9705_s1 + $0xf88] sm:$0xff]  }
 0x1af   : > { %7303 = vmatprep.subr.bf16.mxu0 %v7879_v50  ;;  %v7917_v48 = vld [vmem:[%s9705_s1 + $0xe18] sm:$0xff]  }
 0x1b0   : > { %v7918_v50 = vld [vmem:[%s9705_s1 + $0xe98] sm:$0xff]  }
 0x1b1   : > { %7324 = vmatpush3.bf16.msra.mxu1 %v7878_v49 }
 0x1b2   : > { %7325 = vmatprep.subr.bf16.mxu1 %v7880_v51  ;;  %7304 = vmatpush3.bf16.msra.mxu0 %v7881_v52  ;;  %v7919_v52 = vld [vmem:[%s9705_s1 + $0xe60] sm:$0xff]  }
 0x1b3   : > { %7305 = vmatprep.subr.bf16.mxu0 %v7883_v54  ;;  %v7920_v54 = vld [vmem:[%s9705_s1 + $0xee0] sm:$0xff]  }
 0x1b5   : > { %7326 = vmatpush3.bf16.msra.mxu1 %v7882_v53 }
 0x1b6   : > { %7327 = vmatprep.subr.bf16.mxu1 %v7884_v55  ;;  %7306 = vmatpush3.bf16.msra.mxu0 %v7885_v57  ;;  %v7921_v57 = vld [vmem:[%s9705_s1 + $0xe20] sm:$0xff]  }
 0x1b7   : > { %7307 = vmatprep.subr.bf16.mxu0 %v7887_v61 }
 0x1b9   : > { %7328 = vmatpush3.bf16.msra.mxu1 %v7886_v59 }
 0x1ba   : > { %7329 = vmatprep.subr.bf16.mxu1 %v7888_v0  ;;  %7308 = vmatpush3.bf16.msra.mxu0 %v7889_v3 }
 0x1bb   : > { %7309 = vmatprep.subr.bf16.mxu0 %v7891_v9  ;;  %v7927_v9 = vld [vmem:[%s9705_s1 + $0xe70] sm:$0xff]  }
 0x1bc   : > { %v7007_v56 = vpop.f32.mrb[24].mxu0 }
 0x1bd   : > { %v7029_v58 = vpop.f32.mrb[24].mxu1  ;;  %v7008_v60 = vpop.f32.mrb[25].mxu0  ;;  %7330 = vmatpush3.bf16.msra.mxu1 %v7890_v6 }
 0x1be   : > { %v7009_v62 = vadd.f32 %v7008_v60, %v7007_v56  ;;  %v7030_v63 = vpop.f32.mrb[25].mxu1  ;;  %v7010_v2 = vpop.f32.mrb[26].mxu0  ;;  %7331 = vmatprep.subr.bf16.mxu1 %v7892_v12  ;;  %7310 = vmatpush3.bf16.msra.mxu0 %v7893_v14  ;;  %v7922_v60 = vld [vmem:[%s9705_s1 + $0xea0] sm:$0xff]   ;;  %v7929_v12 = vld [vmem:[%s9705_s1 + $0xe30] sm:$0xff]   ;;  %v7931_v14 = vld [vmem:[%s9705_s1 + $0xe78] sm:$0xff]  }
 0x1bf   : > { %v7031_v1 = vadd.f32 %v7030_v63, %v7029_v58  ;;  %v7032_v5 = vpop.f32.mrb[26].mxu1  ;;  %v7011_v7 = vpop.f32.mrb[27].mxu0  ;;  %7311 = vmatprep.subr.bf16.mxu0 %v7895_v18  ;;  %v7923_v63 = vld [vmem:[%s9705_s1 + $0xe68] sm:$0xff]   ;;  %v259_v18 = vld [vmem:[%s8131_s6 + $0xe0] sm:$0xff] }
 0x1c0   : > { %v5245_v4 = vadd.f32 %v7009_v62, %v9332_v16  ;;  %v7012_v10 = vadd.f32 %v7011_v7, %v7010_v2  ;;  %v7033_v11 = vpop.f32.mrb[27].mxu1  ;;  %v7894_v16 = vld [vmem:[%s9705_s1 + $0xda8] sm:$0xff]  }
 0x1c1   : > { %v7034_v13 = vadd.f32 %v7033_v11, %v7032_v5  ;;  %7332 = vmatpush3.bf16.msra.mxu1 %v7894_v16  ;;  %v7924_v2 = vld [vmem:[%s9705_s1 + $0xee8] sm:$0xff]   ;;  %v7928_v11 = vld [vmem:[%s9705_s1 + $0xef0] sm:$0xff]   ;;  %v7933_v16 = vld [vmem:[%s9705_s1 + $0xe38] sm:$0xff]  }
 0x1c2   : > { %v9438_v8 = vadd.f32 %v7031_v1, %v5245_v4  ;;  %v5248_v15 = vadd.f32 %v7012_v10, %v9347_v25  ;;  %7333 = vmatprep.subr.bf16.mxu1 %v7896_v19  ;;  %7312 = vmatpush3.bf16.msra.mxu0 %v7897_v20  ;;  %v7902_v25 = vld [vmem:[%s9705_s1 + $0xdb8] sm:$0xff]   ;;  %v7925_v5 = vld [vmem:[%s9705_s1 + $0xe28] sm:$0xff]   ;;  %v291_v19 = vld [vmem:[%s8131_s6 + $0x1e0] sm:$0xff] }
 0x1c3   : > { %7313 = vmatprep.subr.bf16.mxu0 %v7899_v22  ;;  %v7926_v7 = vld [vmem:[%s9705_s1 + $0xea8] sm:$0xff]   ;;  %v6205_v22 = vcombine.high %v259_v18, %v291_v19 }
 0x1c4   : > { %v9453_v17 = vadd.f32 %v7034_v13, %v5248_v15  ;;  %v7930_v13 = vld [vmem:[%s9705_s1 + $0xeb0] sm:$0xff]   ;;  %v7932_v15 = vld [vmem:[%s9705_s1 + $0xef8] sm:$0xff]   ;;  %v260_v20 = vld [vmem:[%s8131_s6 + $0xe8] sm:$0xff] }
 0x1c5   : > { %7334 = vmatpush3.bf16.msra.mxu1 %v7898_v21  ;;  %v6204_v21 = vcombine.low %v259_v18, %v291_v19 }
 0x1c6   : > { %7335 = vmatprep.subr.bf16.mxu1 %v7900_v23  ;;  %7314 = vmatpush3.bf16.msra.mxu0 %v7901_v24  ;;  %v292_v23 = vld [vmem:[%s8131_s6 + $0x1e8] sm:$0xff] }
 0x1c7   : > { %7343 = vmatprep.subr.bf16.mxu0 %v7903_v34  ;;  %v6206_v24 = vcombine.low %v260_v20, %v292_v23  ;;  %v7943_v34 = vld [vmem:[%s9705_s1 + $0xf50] sm:$0xff]  }
 0x1c9   : > { %7336 = vmatpush3.bf16.msra.mxu1 %v7902_v25  ;;  %5817 = vmatmul.mubr.bf16.vlgmr.msra.gmra.mrb[52].mxu0 %v6200_v30  ;;  %v6207_v25 = vcombine.high %v260_v20, %v292_v23  ;;  %v7939_v30 = vld [vmem:[%s9705_s1 + $0xf48] sm:$0xff]  }
 0x1ca   : > { %7365 = vmatprep.subr.bf16.mxu1 %v7904_v35  ;;  %7344 = vmatpush3.bf16.msra.mxu0 %v7905_v36  ;;  %v7944_v35 = vld [vmem:[%s9705_s1 + $0xfd0] sm:$0xff]  }
 0x1cb   : > { %7345 = vmatprep.subr.bf16.mxu0 %v7907_v38  ;;  %5898 = vmatprep.mubr.bf16.mxu0 %v6205_v22  ;;  %v7945_v36 = vld [vmem:[%s9705_s1 + $0xf10] sm:$0xff]   ;;  %v7947_v38 = vld [vmem:[%s9705_s1 + $0xf58] sm:$0xff]  }
 0x1cc   : > { %5858 = vmatmul.mubr.bf16.vlgmr.msra.gmra.mrb[52].mxu1 %v6202_v32  ;;  %v7941_v32 = vld [vmem:[%s9705_s1 + $0xf08] sm:$0xff]  }
 0x1cd   : > { %7366 = vmatpush3.bf16.msra.mxu1 %v7906_v37  ;;  %5939 = vmatprep.mubr.bf16.mxu1 %v6207_v25  ;;  %v7946_v37 = vld [vmem:[%s9705_s1 + $0xf90] sm:$0xff]  }
 0x1ce   : > { %7367 = vmatprep.subr.bf16.mxu1 %v7908_v39  ;;  %7346 = vmatpush3.bf16.msra.mxu0 %v7909_v40  ;;  %v7948_v39 = vld [vmem:[%s9705_s1 + $0xfd8] sm:$0xff]  }
 0x1cf   : > { %7347 = vmatprep.subr.bf16.mxu0 %v7911_v42 }
 0x1d1   : > { %7368 = vmatpush3.bf16.msra.mxu1 %v7910_v41  ;;  %v7949_v41 = vld [vmem:[%s9705_s1 + $0xf18] sm:$0xff]  }
 0x1d2   : > { %7369 = vmatprep.subr.bf16.mxu1 %v7912_v43  ;;  %7348 = vmatpush3.bf16.msra.mxu0 %v7913_v44  ;;  %v7950_v43 = vld [vmem:[%s9705_s1 + $0xf98] sm:$0xff]  }
 0x1d3   : > { %7349 = vmatprep.subr.bf16.mxu0 %v7915_v46 }
 0x1d5   : > { %7370 = vmatpush3.bf16.msra.mxu1 %v7914_v45  ;;  %v7951_v45 = vld [vmem:[%s9705_s1 + $0xf60] sm:$0xff]  }
 0x1d6   : > { %7371 = vmatprep.subr.bf16.mxu1 %v7916_v47  ;;  %7350 = vmatpush3.bf16.msra.mxu0 %v7917_v48  ;;  %v7952_v48 = vld [vmem:[%s9705_s1 + $0xfe0] sm:$0xff]  }
 0x1d7   : > { %7351 = vmatprep.subr.bf16.mxu0 %v7919_v52 }
 0x1d9   : > { %7372 = vmatpush3.bf16.msra.mxu1 %v7918_v50 }
 0x1da   : > { %7373 = vmatprep.subr.bf16.mxu1 %v7920_v54  ;;  %7352 = vmatpush3.bf16.msra.mxu0 %v7921_v57  ;;  %v7954_v54 = vld [vmem:[%s9705_s1 + $0xfa0] sm:$0xff]   ;;  %v7955_v57 = vld [vmem:[%s9705_s1 + $0xf68] sm:$0xff]  }
 0x1db   : > { %7353 = vmatprep.subr.bf16.mxu0 %v7923_v63 }
 0x1dc   : > { %v7051_v49 = vpop.f32.mrb[28].mxu0 }
 0x1dd   : > { %v7073_v51 = vpop.f32.mrb[28].mxu1  ;;  %v7052_v53 = vpop.f32.mrb[29].mxu0  ;;  %7374 = vmatpush3.bf16.msra.mxu1 %v7922_v60  ;;  %v7956_v60 = vld [vmem:[%s9705_s1 + $0xfe8] sm:$0xff]  }
 0x1de   : > { %v7053_v55 = vadd.f32 %v7052_v53, %v7051_v49  ;;  %v7074_v56 = vpop.f32.mrb[29].mxu1  ;;  %v7054_v59 = vpop.f32.mrb[30].mxu0  ;;  %7375 = vmatprep.subr.bf16.mxu1 %v7924_v2  ;;  %7354 = vmatpush3.bf16.msra.mxu0 %v7925_v5  ;;  %v7959_v2 = vld [vmem:[%s9705_s1 + $0xf70] sm:$0xff]  }
 0x1df   : > { %v7075_v58 = vadd.f32 %v7074_v56, %v7073_v51  ;;  %v7076_v62 = vpop.f32.mrb[30].mxu1  ;;  %v7055_v0 = vpop.f32.mrb[31].mxu0  ;;  %7355 = vmatprep.subr.bf16.mxu0 %v7927_v9  ;;  %v7953_v51 = vld [vmem:[%s9705_s1 + $0xf20] sm:$0xff]   ;;  %v7962_v5 = vld [vmem:[%s9705_s1 + $0xfb0] sm:$0xff]   ;;  %v7966_v9 = vld [vmem:[%s9705_s1 + $0xfb8] sm:$0xff]  }
 0x1e0   : > { %v5327_v61 = vadd.f32 %v7053_v55, %v9438_v8  ;;  %v7056_v3 = vadd.f32 %v7055_v0, %v7054_v59  ;;  %v7077_v4 = vpop.f32.mrb[31].mxu1  ;;  %v7958_v0 = vld [vmem:[%s9705_s1 + $0xfa8] sm:$0xff]  }
 0x1e1   : > { %v7078_v6 = vadd.f32 %v7077_v4, %v7076_v62  ;;  %7376 = vmatpush3.bf16.msra.mxu1 %v7926_v7  ;;  %v7957_v62 = vld [vmem:[%s9705_s1 + $0xf28] sm:$0xff]   ;;  %v7961_v4 = vld [vmem:[%s9705_s1 + $0xf30] sm:$0xff]   ;;  %v7964_v7 = vld [vmem:[%s9705_s1 + $0xff8] sm:$0xff]  }
 0x1e2   : > { %v9547_v1 = vadd.f32 %v7075_v58, %v5327_v61  ;;  %v5330_v8 = vadd.f32 %v7056_v3, %v9453_v17  ;;  %7377 = vmatprep.subr.bf16.mxu1 %v7928_v11  ;;  %7356 = vmatpush3.bf16.msra.mxu0 %v7929_v12  ;;  %v7934_v17 = vld [vmem:[%s9705_s1 + $0xeb8] sm:$0xff]   ;;  %v7960_v3 = vld [vmem:[%s9705_s1 + $0xff0] sm:$0xff]  }
 0x1e3   : > { %7357 = vmatprep.subr.bf16.mxu0 %v7931_v14  ;;  %v293_v11 = vld [vmem:[%s8131_s6 + $0x1f0] sm:$0xff]  ;;  %v262_v14 = vld [vmem:[%s8131_s6 + $0xf8] sm:$0xff] }
 0x1e4   : > { %v9562_v10 = vadd.f32 %v7078_v6, %v5330_v8  ;;  %v7963_v6 = vld [vmem:[%s9705_s1 + $0xf78] sm:$0xff]  }
 0x1e5   : > { %7378 = vmatpush3.bf16.msra.mxu1 %v7930_v13  ;;  %v7965_v8 = vld [vmem:[%s9705_s1 + $0xf38] sm:$0xff]  }
 0x1e6   : > { %7379 = vmatprep.subr.bf16.mxu1 %v7932_v15  ;;  %7358 = vmatpush3.bf16.msra.mxu0 %v7933_v16  ;;  %v294_v15 = vld [vmem:[%s8131_s6 + $0x1f8] sm:$0xff] }
 0x1e7   : > { %7387 = vmatprep.subr.bf16.mxu0 %v7935_v26  ;;  %v6210_v16 = vcombine.low %v262_v14, %v294_v15 }
 0x1e9   : > { %7380 = vmatpush3.bf16.msra.mxu1 %v7934_v17  ;;  %5899 = vmatmul.mubr.bf16.vlgmr.msra.gmra.mrb[56].mxu0 %v6204_v21  ;;  %v6211_v17 = vcombine.high %v262_v14, %v294_v15 }
 0x1ea   : > { %7409 = vmatprep.subr.bf16.mxu1 %v7936_v27  ;;  %7388 = vmatpush3.bf16.msra.mxu0 %v7937_v28 }
 0x1eb   : > { %7389 = vmatprep.subr.bf16.mxu0 %v7939_v30 }
 0x1ec   : > { %5940 = vmatmul.mubr.bf16.vlgmr.msra.gmra.mrb[56].mxu1 %v6206_v24 }
 0x1ed   : > { %7410 = vmatpush3.bf16.msra.mxu1 %v7938_v29  ;;  %6021 = vmatprep.mubr.bf16.mxu1 %v6211_v17 }
 0x1ee   : > { %7411 = vmatprep.subr.bf16.mxu1 %v7940_v31  ;;  %7390 = vmatpush3.bf16.msra.mxu0 %v7941_v32 }
 0x1ef   : > { %7391 = vmatprep.subr.bf16.mxu0 %v7943_v34 }
 0x1f1   : > { %7412 = vmatpush3.bf16.msra.mxu1 %v7942_v33 }
 0x1f2   : > { %7413 = vmatprep.subr.bf16.mxu1 %v7944_v35  ;;  %7392 = vmatpush3.bf16.msra.mxu0 %v7945_v36 }
 0x1f3   : > { %7393 = vmatprep.subr.bf16.mxu0 %v7947_v38 }
 0x1f5   : > { %7414 = vmatpush3.bf16.msra.mxu1 %v7946_v37 }
 0x1f6   : > { %7415 = vmatprep.subr.bf16.mxu1 %v7948_v39  ;;  %7394 = vmatpush3.bf16.msra.mxu0 %v7949_v41 }
 0x1f7   : > { %7395 = vmatprep.subr.bf16.mxu0 %v7951_v45 }
 0x1f9   : > { %7416 = vmatpush3.bf16.msra.mxu1 %v7950_v43 }
 0x1fa   : > { %7417 = vmatprep.subr.bf16.mxu1 %v7952_v48  ;;  %7396 = vmatpush3.bf16.msra.mxu0 %v7953_v51 }
 0x1fb   : > { %7397 = vmatprep.subr.bf16.mxu0 %v7955_v57 }
 0x1fc   : > { %v7095_v40 = vpop.f32.mrb[32].mxu0 }
 0x1fd   : > { %v7117_v42 = vpop.f32.mrb[32].mxu1  ;;  %v7096_v44 = vpop.f32.mrb[33].mxu0  ;;  %7418 = vmatpush3.bf16.msra.mxu1 %v7954_v54 }
 0x1fe   : > { %v7097_v46 = vadd.f32 %v7096_v44, %v7095_v40  ;;  %v7118_v47 = vpop.f32.mrb[33].mxu1  ;;  %v7098_v50 = vpop.f32.mrb[34].mxu0  ;;  %7419 = vmatprep.subr.bf16.mxu1 %v7956_v60  ;;  %7398 = vmatpush3.bf16.msra.mxu0 %v7957_v62 }
 0x1ff   : > { %v7119_v49 = vadd.f32 %v7118_v47, %v7117_v42  ;;  %v7120_v53 = vpop.f32.mrb[34].mxu1  ;;  %v7099_v55 = vpop.f32.mrb[35].mxu0  ;;  %7399 = vmatprep.subr.bf16.mxu0 %v7959_v2 }
 0x200   : > { %v5409_v52 = vadd.f32 %v7097_v46, %v9547_v1  ;;  %v7100_v58 = vadd.f32 %v7099_v55, %v7098_v50  ;;  %v7121_v59 = vpop.f32.mrb[35].mxu1 }
 0x201   : > { %v7122_v61 = vadd.f32 %v7121_v59, %v7120_v53  ;;  %7420 = vmatpush3.bf16.msra.mxu1 %v7958_v0 }
 0x202   : > { %v5450_v56 = vadd.f32 %v7119_v49, %v5409_v52  ;;  %v5412_v63 = vadd.f32 %v7100_v58, %v9562_v10  ;;  %7421 = vmatprep.subr.bf16.mxu1 %v7960_v3  ;;  %7400 = vmatpush3.bf16.msra.mxu0 %v7961_v4  ;;  %v261_v10 = vld [vmem:[%s8131_s6 + $0xf0] sm:$0xff]  ;;  %s6146_s6 = sshll.u32 %s9713_s25, 3 }
 0x203   : > { %7401 = vmatprep.subr.bf16.mxu0 %v7963_v6  ;;  %v6208_v12 = vcombine.low %v261_v10, %v293_v11  ;;  %v6209_v13 = vcombine.high %v261_v10, %v293_v11  ;;  %s228_s14 = scalar_lea.vmem %s9707_s3, %s6146_s6 }
 0x204   : > { %v5453_v1 = vadd.f32 %v7122_v61, %v5412_v63 }
 0x205   : > { %7422 = vmatpush3.bf16.msra.mxu1 %v7962_v5  ;;  %5980 = vmatprep.mubr.bf16.mxu0 %v6209_v13 }
 0x206   : > { %7423 = vmatprep.subr.bf16.mxu1 %v7964_v7  ;;  %7402 = vmatpush3.bf16.msra.mxu0 %v7965_v8 }
 0x209   : > { %7424 = vmatpush3.bf16.msra.mxu1 %v7966_v9  ;;  %5981 = vmatmul.mubr.bf16.vlgmr.msra.gmra.mrb[60].mxu0 %v6208_v12 }
 0x20c   : > { %6022 = vmatmul.mubr.bf16.vlgmr.msra.gmra.mrb[60].mxu1 %v6210_v16 }
 0x21c   : > { %v7139_v18 = vpop.f32.mrb[36].mxu0 }
 0x21d   : > { %v7140_v20 = vpop.f32.mrb[37].mxu0 }
 0x21e   : > { %v7141_v21 = vadd.f32 %v7140_v20, %v7139_v18  ;;  %v7142_v23 = vpop.f32.mrb[38].mxu0 }
 0x21f   : > { %v7161_v19 = vpop.f32.mrb[36].mxu1  ;;  %v7143_v26 = vpop.f32.mrb[39].mxu0 }
 0x220   : > { %v7162_v22 = vpop.f32.mrb[37].mxu1  ;;  %v5491_v27 = vadd.f32 %v7141_v21, %v5450_v56  ;;  %v7144_v28 = vadd.f32 %v7143_v26, %v7142_v23 }
 0x221   : > { %v7163_v24 = vadd.f32 %v7162_v22, %v7161_v19  ;;  %v7164_v25 = vpop.f32.mrb[38].mxu1 }
 0x222   : > { %v7165_v29 = vpop.f32.mrb[39].mxu1  ;;  %v5494_v32 = vadd.f32 %v7144_v28, %v5453_v1 }
 0x223   : > { %v7166_v30 = vadd.f32 %v7165_v29, %v7164_v25  ;;  %v5532_v31 = vadd.f32 %v7163_v24, %v5491_v27 }
 0x225   : > { %v5535_v33 = vadd.f32 %v7166_v30, %v5494_v32 }
 0x23c   : > { %v7183_v34 = vpop.f32.mrb[40].mxu0 }
 0x23d   : > { %v7184_v36 = vpop.f32.mrb[41].mxu0 }
 0x23e   : > { %v7185_v38 = vadd.f32 %v7184_v36, %v7183_v34  ;;  %v7186_v40 = vpop.f32.mrb[42].mxu0 }
 0x23f   : > { %v7205_v35 = vpop.f32.mrb[40].mxu1  ;;  %v7187_v42 = vpop.f32.mrb[43].mxu0 }
 0x240   : > { %v7206_v37 = vpop.f32.mrb[41].mxu1  ;;  %v5573_v44 = vadd.f32 %v7185_v38, %v5532_v31  ;;  %v7188_v45 = vadd.f32 %v7187_v42, %v7186_v40 }
 0x241   : > { %v7207_v39 = vadd.f32 %v7206_v37, %v7205_v35  ;;  %v7208_v41 = vpop.f32.mrb[42].mxu1 }
 0x242   : > { %v7209_v43 = vpop.f32.mrb[43].mxu1  ;;  %v5576_v48 = vadd.f32 %v7188_v45, %v5535_v33 }
 0x243   : > { %v7210_v46 = vadd.f32 %v7209_v43, %v7208_v41  ;;  %v5614_v47 = vadd.f32 %v7207_v39, %v5573_v44 }
 0x245   : > { %v5617_v49 = vadd.f32 %v7210_v46, %v5576_v48 }
 0x25c   : > { %v7227_v50 = vpop.f32.mrb[44].mxu0 }
 0x25d   : > { %v7228_v52 = vpop.f32.mrb[45].mxu0 }
 0x25e   : > { %v7229_v53 = vadd.f32 %v7228_v52, %v7227_v50  ;;  %v7230_v55 = vpop.f32.mrb[46].mxu0 }
 0x25f   : > { %v7249_v51 = vpop.f32.mrb[44].mxu1  ;;  %v7231_v58 = vpop.f32.mrb[47].mxu0 }
 0x260   : > { %v7250_v54 = vpop.f32.mrb[45].mxu1  ;;  %v5655_v59 = vadd.f32 %v7229_v53, %v5614_v47  ;;  %v7232_v60 = vadd.f32 %v7231_v58, %v7230_v55 }
 0x261   : > { %v7251_v56 = vadd.f32 %v7250_v54, %v7249_v51  ;;  %v7252_v57 = vpop.f32.mrb[46].mxu1 }
 0x262   : > { %v7253_v61 = vpop.f32.mrb[47].mxu1  ;;  %v5658_v0 = vadd.f32 %v7232_v60, %v5617_v49 }
 0x263   : > { %v7254_v62 = vadd.f32 %v7253_v61, %v7252_v57  ;;  %v5696_v63 = vadd.f32 %v7251_v56, %v5655_v59 }
 0x265   : > { %v5699_v1 = vadd.f32 %v7254_v62, %v5658_v0 }
 0x27c   : > { %v7271_v2 = vpop.f32.mrb[48].mxu0 }
 0x27d   : > { %v7272_v4 = vpop.f32.mrb[49].mxu0 }
 0x27e   : > { %v7273_v5 = vadd.f32 %v7272_v4, %v7271_v2  ;;  %v7274_v7 = vpop.f32.mrb[50].mxu0 }
 0x27f   : > { %v7293_v3 = vpop.f32.mrb[48].mxu1  ;;  %v7275_v10 = vpop.f32.mrb[51].mxu0 }
 0x280   : > { %v7294_v6 = vpop.f32.mrb[49].mxu1  ;;  %v5737_v11 = vadd.f32 %v7273_v5, %v5696_v63  ;;  %v7276_v12 = vadd.f32 %v7275_v10, %v7274_v7 }
 0x281   : > { %v7295_v8 = vadd.f32 %v7294_v6, %v7293_v3  ;;  %v7296_v9 = vpop.f32.mrb[50].mxu1 }
 0x282   : > { %v7297_v13 = vpop.f32.mrb[51].mxu1  ;;  %v5740_v16 = vadd.f32 %v7276_v12, %v5699_v1 }
 0x283   : > { %v7298_v14 = vadd.f32 %v7297_v13, %v7296_v9  ;;  %v5778_v15 = vadd.f32 %v7295_v8, %v5737_v11 }
 0x285   : > { %v5781_v17 = vadd.f32 %v7298_v14, %v5740_v16 }
 0x29c   : > { %v7315_v18 = vpop.f32.mrb[52].mxu0 }
 0x29d   : > { %v7316_v20 = vpop.f32.mrb[53].mxu0 }
 0x29e   : > { %v7317_v22 = vadd.f32 %v7316_v20, %v7315_v18  ;;  %v7318_v24 = vpop.f32.mrb[54].mxu0 }
 0x29f   : > { %v7337_v19 = vpop.f32.mrb[52].mxu1  ;;  %v7319_v26 = vpop.f32.mrb[55].mxu0 }
 0x2a0   : > { %v7338_v21 = vpop.f32.mrb[53].mxu1  ;;  %v5819_v28 = vadd.f32 %v7317_v22, %v5778_v15  ;;  %v7320_v29 = vadd.f32 %v7319_v26, %v7318_v24 }
 0x2a1   : > { %v7339_v23 = vadd.f32 %v7338_v21, %v7337_v19  ;;  %v7340_v25 = vpop.f32.mrb[54].mxu1 }
 0x2a2   : > { %v7341_v27 = vpop.f32.mrb[55].mxu1  ;;  %v5822_v32 = vadd.f32 %v7320_v29, %v5781_v17 }
 0x2a3   : > { %v7342_v30 = vadd.f32 %v7341_v27, %v7340_v25  ;;  %v5860_v31 = vadd.f32 %v7339_v23, %v5819_v28 }
 0x2a5   : > { %v5863_v33 = vadd.f32 %v7342_v30, %v5822_v32 }
 0x2bc   : > { %v7359_v34 = vpop.f32.mrb[56].mxu0 }
 0x2bd   : > { %v7360_v36 = vpop.f32.mrb[57].mxu0 }
 0x2be   : > { %v7361_v37 = vadd.f32 %v7360_v36, %v7359_v34  ;;  %v7362_v39 = vpop.f32.mrb[58].mxu0 }
 0x2bf   : > { %v7381_v35 = vpop.f32.mrb[56].mxu1  ;;  %v7363_v42 = vpop.f32.mrb[59].mxu0 }
 0x2c0   : > { %v7382_v38 = vpop.f32.mrb[57].mxu1  ;;  %v5901_v43 = vadd.f32 %v7361_v37, %v5860_v31  ;;  %v7364_v44 = vadd.f32 %v7363_v42, %v7362_v39 }
 0x2c1   : > { %v7383_v40 = vadd.f32 %v7382_v38, %v7381_v35  ;;  %v7384_v41 = vpop.f32.mrb[58].mxu1 }
 0x2c2   : > { %v7385_v45 = vpop.f32.mrb[59].mxu1  ;;  %v5904_v48 = vadd.f32 %v7364_v44, %v5863_v33 }
 0x2c3   : > { %v7386_v46 = vadd.f32 %v7385_v45, %v7384_v41  ;;  %v5942_v47 = vadd.f32 %v7383_v40, %v5901_v43 }
 0x2c5   : > { %v5945_v49 = vadd.f32 %v7386_v46, %v5904_v48 }
 0x2dc   : > { %v7403_v50 = vpop.f32.mrb[60].mxu0 }
 0x2dd   : > { %v7404_v52 = vpop.f32.mrb[61].mxu0 }
 0x2de   : > { %v7405_v53 = vadd.f32 %v7404_v52, %v7403_v50  ;;  %v7406_v55 = vpop.f32.mrb[62].mxu0 }
 0x2df   : > { %v7425_v51 = vpop.f32.mrb[60].mxu1  ;;  %v7407_v58 = vpop.f32.mrb[63].mxu0 }
 0x2e0   : > { %v7426_v54 = vpop.f32.mrb[61].mxu1  ;;  %v5983_v59 = vadd.f32 %v7405_v53, %v5942_v47  ;;  %v7408_v60 = vadd.f32 %v7407_v58, %v7406_v55 }
 0x2e1   : > { %v7427_v56 = vadd.f32 %v7426_v54, %v7425_v51  ;;  %v7428_v57 = vpop.f32.mrb[62].mxu1 }
 0x2e2   : > { %v7429_v61 = vpop.f32.mrb[63].mxu1  ;;  %v5986_v0 = vadd.f32 %v7408_v60, %v5945_v49 }
 0x2e3   : > { %v7430_v62 = vadd.f32 %v7429_v61, %v7428_v57  ;;  %v6024_v63 = vadd.f32 %v7427_v56, %v5983_v59 }
 0x2e5   : > { %6031 = vst.msk [vmem:[%s228_s14] sm:$0xff] %vm6030_vm0, %v6024_v63  ;;  %v6027_v1 = vadd.f32 %v7430_v62, %v5986_v0 }
 0x2e7   : > { %6032 = vst.msk [vmem:[%s228_s14 + $0x8] sm:$0xff] %vm6030_vm0, %v6027_v1 }
 0x2e8 PF: > { %s15_s16 = sadd.s32 1, %s7989_s16   ;;  %s9708_s14 = smov %s7985_s15 }
 0x2e9   : > { %p12_p5 = scmp.ge.s32.totalorder %s15_s16, 4   ;;  %s9709_s15 = smov %s9711_s2 }
 0x2eb   :  { %14 = sbr.rel (!%p12_p5) target bundleno = 3 (0x3), region = 68 }

</bundles_post_ra>
